<compile_context>
chip_gen: v6e
topology: v6e:2x2x1
jax: 0.10.0
libtpu: 0.0.40
codegen_flags: <defaults>
</compile_context>

<pallas_src>
import jax
import jax.numpy as jnp
from jax.experimental import pallas as pl
from jax.experimental.pallas import tpu as pltpu

ODE_UNFOLDS = 6
EPSILON = 1e-8


# ---------------------------------------------------------------------------
# Pallas kernel: one batch element per grid step; time loop fully unrolled.
# ---------------------------------------------------------------------------
def _ltc_kernel(x_ref,                                    # (T, S)
                input_w_ref, input_b_ref,                 # (1, S)
                s_hs_ref, s_hsm_ref, s_weh_ref, s_wmh_ref,  # (S, U)
                hs_ref, hsm_ref, weh_ref, wmh_ref,        # (U, U)
                c_num0_ref, c_den0_ref, cm_t_ref,         # (1, U)
                output_w_ref, output_b_ref,               # (1, M)
                out_seq_ref,                              # (T, M)
                h_final_ref):                             # (1, U)
    T = x_ref.shape[0]
    U = hs_ref.shape[0]
    M = output_w_ref.shape[1]

    # Hoist every weight / constant load out of the loops.
    input_w, input_b = input_w_ref[...], input_b_ref[...]
    s_hs, s_hsm = s_hs_ref[...], s_hsm_ref[...]
    s_weh, s_wmh = s_weh_ref[...], s_wmh_ref[...]
    hs, hsm = hs_ref[...], hsm_ref[...]
    weh, wmh = weh_ref[...], wmh_ref[...]
    c_num0, c_den0 = c_num0_ref[...], c_den0_ref[...]
    cm_t = cm_t_ref[...]
    out_w, out_b = output_w_ref[...], output_b_ref[...]

    # ---- Sensory-synapse prologue: depends only on x, vectorized over all T ----
    # (kept OFF the serial v-dependence chain)
    x = x_ref[...] * input_w + input_b                       # (T, S)
    st = jnp.tanh(s_hs * x[:, :, None] - s_hsm)              # (T, S, U)  single EUP op
    c_num_all = jnp.sum(s_weh * st, axis=1) + c_num0         # (T, U)
    c_den_all = jnp.sum(s_wmh * st, axis=1) + c_den0         # (T, U)

    # ---- Serial time loop + fused ODE unfolds (fully unrolled; T, 6 are static) ----
    v = jnp.zeros((1, U), jnp.float32)
    for t in range(T):
        c_num = c_num_all[t:t + 1, :]                        # (1, U) static slice
        c_den = c_den_all[t:t + 1, :]
        for _ in range(ODE_UNFOLDS):
            act = jnp.tanh(hs * v[:, :, None] - hsm)         # (1, U, U)
            w_num = jnp.sum(weh * act, axis=1)               # (1, U)
            w_den = jnp.sum(wmh * act, axis=1)               # (1, U)
            num = cm_t * v + w_num + c_num
            den = w_den + c_den
            inv = pl.reciprocal(den, approx=True)
            inv = inv * (2.0 - den * inv)    # one Newton step -> ~exact f32 1/den
            v = num * inv
        # Motor readout (affine on the first M neurons); tiny, off the v chain.
        out_seq_ref[t] = (v[:, :M] * out_w + out_b)[0]
    h_final_ref[...] = v


# ---------------------------------------------------------------------------
# Parameter prefolding (done once, outside the hot path)
# ---------------------------------------------------------------------------
def prepare_ltc_params(p):
    wm = p["w"] * p["mask"]
    we = wm * p["erev"]
    s_wm = p["sensory_w"] * p["sensory_mask"]
    s_we = s_wm * p["sensory_erev"]
    weh, wmh = 0.5 * we, 0.5 * wm              # sigmoid -> 0.5*tanh+0.5 fold
    s_weh, s_wmh = 0.5 * s_we, 0.5 * s_wm
    cm_t = p["cm"] * float(ODE_UNFOLDS)        # elapsed_time == 1.0
    c_num0 = (jnp.sum(weh, axis=0, keepdims=True)
              + jnp.sum(s_weh, axis=0, keepdims=True)
              + p["gleak"] * p["vleak"])
    c_den0 = (jnp.sum(wmh, axis=0, keepdims=True)
              + jnp.sum(s_wmh, axis=0, keepdims=True)
              + cm_t + p["gleak"] + EPSILON)
    return {
        "input_w": p["input_w"], "input_b": p["input_b"],
        "s_hs": 0.5 * p["sensory_sigma"],
        "s_hsm": 0.5 * p["sensory_sigma"] * p["sensory_mu"],
        "s_weh": s_weh, "s_wmh": s_wmh,
        "hs": 0.5 * p["sigma"],
        "hsm": 0.5 * p["sigma"] * p["mu"],
        "weh": weh, "wmh": wmh,
        "c_num0": c_num0, "c_den0": c_den0, "cm_t": cm_t,
        "output_w": p["output_w"], "output_b": p["output_b"],
    }


# ---------------------------------------------------------------------------
# Forward wrapper
# ---------------------------------------------------------------------------
@jax.jit
def ltc_forward(input_sequence, fp):
    """input_sequence: (B, T, S). Returns (readout (B, T, M), hidden_state (B, U))."""
    B, T, S = input_sequence.shape
    U = fp["hs"].shape[0]
    M = fp["output_w"].shape[1]
    x = input_sequence.astype(jnp.float32)

    vmem_full = pl.BlockSpec(memory_space=pltpu.MemorySpace.VMEM)
    out_seq, h_final = pl.pallas_call(
        _ltc_kernel,
        grid=(B,),
        out_shape=(jax.ShapeDtypeStruct((B, T, M), jnp.float32),
                   jax.ShapeDtypeStruct((B, 1, U), jnp.float32)),
        in_specs=[pl.BlockSpec((None, T, S), lambda b: (b, 0, 0))] + [vmem_full] * 15,
        out_specs=(pl.BlockSpec((None, T, M), lambda b: (b, 0, 0)),
                   pl.BlockSpec((None, 1, U), lambda b: (b, 0, 0))),
        compiler_params=pltpu.CompilerParams(dimension_semantics=("parallel",)),
    )(
        x,
        fp["input_w"], fp["input_b"],
        fp["s_hs"], fp["s_hsm"], fp["s_weh"], fp["s_wmh"],
        fp["hs"], fp["hsm"], fp["weh"], fp["wmh"],
        fp["c_num0"], fp["c_den0"], fp["cm_t"],
        fp["output_w"], fp["output_b"],
    )
    return out_seq, h_final[:, 0, :]


# ---------------------------------------------------------------------------
# Deterministic parameter init (mirrors LTCCell._init_ranges; dense wiring)
# ---------------------------------------------------------------------------
def init_ltc_params(key, sensory_size, units, motor_size):
    S, U, M = sensory_size, units, motor_size
    ks = jax.random.split(key, 11)
    u = lambda k, lo, hi, shape: jax.random.uniform(k, shape, jnp.float32, lo, hi)
    pm1 = lambda k, shape: 2.0 * jax.random.bernoulli(k, 0.5, shape).astype(jnp.float32) - 1.0
    return {
        "gleak": u(ks[0], 0.001, 1.0, (1, U)),
        "vleak": u(ks[1], -0.2, 0.2, (1, U)),
        "cm": u(ks[2], 0.4, 0.6, (1, U)),
        "w": u(ks[3], 0.001, 1.0, (U, U)),
        "sigma": u(ks[4], 3.0, 8.0, (U, U)),
        "mu": u(ks[5], 0.3, 0.8, (U, U)),
        "erev": pm1(ks[6], (U, U)),
        "mask": jnp.ones((U, U), jnp.float32),          # fully-connected wiring
        "sensory_w": u(ks[7], 0.001, 1.0, (S, U)),
        "sensory_sigma": u(ks[8], 3.0, 8.0, (S, U)),
        "sensory_mu": u(ks[9], 0.3, 0.8, (S, U)),
        "sensory_erev": pm1(ks[10], (S, U)),
        "sensory_mask": jnp.ones((S, U), jnp.float32),
        "input_w": jnp.ones((1, S), jnp.float32),
        "input_b": jnp.zeros((1, S), jnp.float32),
        "output_w": jnp.ones((1, M), jnp.float32),
        "output_b": jnp.zeros((1, M), jnp.float32),
    }


# ---------------------------------------------------------------------------
# Pure-JAX reference (exact original math) for the correctness check
# ---------------------------------------------------------------------------
def ltc_reference(input_sequence, p, units, motor_size):
    B, T, S = input_sequence.shape
    h = jnp.zeros((B, units), jnp.float32)
    outs = []
    for t in range(T):
        x = input_sequence[:, t] * p["input_w"] + p["input_b"]
        s_act = jax.nn.sigmoid(p["sensory_sigma"] * (x[:, :, None] - p["sensory_mu"]))
        s_w_act = p["sensory_w"] * s_act * p["sensory_mask"]
        w_num_s = jnp.sum(s_w_act * p["sensory_erev"], axis=1)
        w_den_s = jnp.sum(s_w_act, axis=1)
        cm_t = p["cm"] * float(ODE_UNFOLDS)
        v = h
        for _ in range(ODE_UNFOLDS):
            act = jax.nn.sigmoid(p["sigma"] * (v[:, :, None] - p["mu"]))
            w_act = p["w"] * act * p["mask"]
            w_num = jnp.sum(w_act * p["erev"], axis=1) + w_num_s
            w_den = jnp.sum(w_act, axis=1) + w_den_s
            num = cm_t * v + p["gleak"] * p["vleak"] + w_num
            den = cm_t + p["gleak"] + w_den
            v = num / (den + EPSILON)
        h = v
        outs.append(v[:, :motor_size] * p["output_w"] + p["output_b"])
    return jnp.stack(outs, axis=1), h


if __name__ == "__main__":
    B, T = 2, 8          # batch, sequence length
    S, U, M = 8, 32, 4   # sensory (input) features, internal neurons, motor neurons

    key = jax.random.PRNGKey(0)
    k_params, k_x = jax.random.split(key)
    params = init_ltc_params(k_params, S, U, M)
    x = jax.random.normal(k_x, (B, T, S), jnp.float32)

    folded = prepare_ltc_params(params)
    out_seq, h_final = jax.block_until_ready(ltc_forward(x, folded))
    ref_seq, ref_h = ltc_reference(x, params, U, M)

    assert out_seq.shape == (B, T, M) and h_final.shape == (B, U)
    assert jnp.allclose(out_seq, ref_seq, rtol=1e-4, atol=1e-4)
    assert jnp.allclose(h_final, ref_h, rtol=1e-4, atol=1e-4)
    print("KERNEL_OK")
</pallas_src>

<mosaic_0001>
module attributes {stable_mosaic.version = 11 : i64} {
  func.func @_ltc_kernel(%arg0: i32, %arg1: memref<1x8x8xf32, #tpu.memory_space<vmem>>, %arg2: memref<1x8xf32, #tpu.memory_space<vmem>>, %arg3: memref<1x8xf32, #tpu.memory_space<vmem>>, %arg4: memref<8x32xf32, #tpu.memory_space<vmem>>, %arg5: memref<8x32xf32, #tpu.memory_space<vmem>>, %arg6: memref<8x32xf32, #tpu.memory_space<vmem>>, %arg7: memref<8x32xf32, #tpu.memory_space<vmem>>, %arg8: memref<32x32xf32, #tpu.memory_space<vmem>>, %arg9: memref<32x32xf32, #tpu.memory_space<vmem>>, %arg10: memref<32x32xf32, #tpu.memory_space<vmem>>, %arg11: memref<32x32xf32, #tpu.memory_space<vmem>>, %arg12: memref<1x32xf32, #tpu.memory_space<vmem>>, %arg13: memref<1x32xf32, #tpu.memory_space<vmem>>, %arg14: memref<1x32xf32, #tpu.memory_space<vmem>>, %arg15: memref<1x4xf32, #tpu.memory_space<vmem>>, %arg16: memref<1x4xf32, #tpu.memory_space<vmem>>, %arg17: memref<1x8x4xf32, #tpu.memory_space<vmem>>, %arg18: memref<1x1x32xf32, #tpu.memory_space<vmem>>) attributes {dimension_semantics = [#tpu.dimension_semantics<parallel>], iteration_bounds = array<i64: 2>, scalar_prefetch = 0 : i64, scratch_operands = 0 : i64, tpu.core_type = #tpu.core_type<tc>, window_params = [{transform_indices = @transform_0, window_bounds = array<i64: 1, 8, 8>}, {pipeline_mode = #tpu.pipeline_mode<synchronous>, transform_indices = @transform_1, window_bounds = array<i64: 1, 8>}, {pipeline_mode = #tpu.pipeline_mode<synchronous>, transform_indices = @transform_2, window_bounds = array<i64: 1, 8>}, {pipeline_mode = #tpu.pipeline_mode<synchronous>, transform_indices = @transform_3, window_bounds = array<i64: 8, 32>}, {pipeline_mode = #tpu.pipeline_mode<synchronous>, transform_indices = @transform_4, window_bounds = array<i64: 8, 32>}, {pipeline_mode = #tpu.pipeline_mode<synchronous>, transform_indices = @transform_5, window_bounds = array<i64: 8, 32>}, {pipeline_mode = #tpu.pipeline_mode<synchronous>, transform_indices = @transform_6, window_bounds = array<i64: 8, 32>}, {pipeline_mode = #tpu.pipeline_mode<synchronous>, transform_indices = @transform_7, window_bounds = array<i64: 32, 32>}, {pipeline_mode = #tpu.pipeline_mode<synchronous>, transform_indices = @transform_8, window_bounds = array<i64: 32, 32>}, {pipeline_mode = #tpu.pipeline_mode<synchronous>, transform_indices = @transform_9, window_bounds = array<i64: 32, 32>}, {pipeline_mode = #tpu.pipeline_mode<synchronous>, transform_indices = @transform_10, window_bounds = array<i64: 32, 32>}, {pipeline_mode = #tpu.pipeline_mode<synchronous>, transform_indices = @transform_11, window_bounds = array<i64: 1, 32>}, {pipeline_mode = #tpu.pipeline_mode<synchronous>, transform_indices = @transform_12, window_bounds = array<i64: 1, 32>}, {pipeline_mode = #tpu.pipeline_mode<synchronous>, transform_indices = @transform_13, window_bounds = array<i64: 1, 32>}, {pipeline_mode = #tpu.pipeline_mode<synchronous>, transform_indices = @transform_14, window_bounds = array<i64: 1, 4>}, {pipeline_mode = #tpu.pipeline_mode<synchronous>, transform_indices = @transform_15, window_bounds = array<i64: 1, 4>}, {transform_indices = @transform_16, window_bounds = array<i64: 1, 8, 4>}, {transform_indices = @transform_17, window_bounds = array<i64: 1, 1, 32>}]} {
    %c0 = arith.constant 0 : index
    %c0_0 = arith.constant 0 : index
    %0 = vector.load %arg2[%c0, %c0_0] : memref<1x8xf32, #tpu.memory_space<vmem>>, vector<1x8xf32>
    %c0_1 = arith.constant 0 : index
    %c0_2 = arith.constant 0 : index
    %1 = vector.load %arg3[%c0_1, %c0_2] : memref<1x8xf32, #tpu.memory_space<vmem>>, vector<1x8xf32>
    %c0_3 = arith.constant 0 : index
    %c0_4 = arith.constant 0 : index
    %2 = vector.load %arg4[%c0_3, %c0_4] : memref<8x32xf32, #tpu.memory_space<vmem>>, vector<8x32xf32>
    %c0_5 = arith.constant 0 : index
    %c0_6 = arith.constant 0 : index
    %3 = vector.load %arg5[%c0_5, %c0_6] : memref<8x32xf32, #tpu.memory_space<vmem>>, vector<8x32xf32>
    %c0_7 = arith.constant 0 : index
    %c0_8 = arith.constant 0 : index
    %4 = vector.load %arg6[%c0_7, %c0_8] : memref<8x32xf32, #tpu.memory_space<vmem>>, vector<8x32xf32>
    %c0_9 = arith.constant 0 : index
    %c0_10 = arith.constant 0 : index
    %5 = vector.load %arg7[%c0_9, %c0_10] : memref<8x32xf32, #tpu.memory_space<vmem>>, vector<8x32xf32>
    %c0_11 = arith.constant 0 : index
    %c0_12 = arith.constant 0 : index
    %6 = vector.load %arg8[%c0_11, %c0_12] : memref<32x32xf32, #tpu.memory_space<vmem>>, vector<32x32xf32>
    %c0_13 = arith.constant 0 : index
    %c0_14 = arith.constant 0 : index
    %7 = vector.load %arg9[%c0_13, %c0_14] : memref<32x32xf32, #tpu.memory_space<vmem>>, vector<32x32xf32>
    %c0_15 = arith.constant 0 : index
    %c0_16 = arith.constant 0 : index
    %8 = vector.load %arg10[%c0_15, %c0_16] : memref<32x32xf32, #tpu.memory_space<vmem>>, vector<32x32xf32>
    %c0_17 = arith.constant 0 : index
    %c0_18 = arith.constant 0 : index
    %9 = vector.load %arg11[%c0_17, %c0_18] : memref<32x32xf32, #tpu.memory_space<vmem>>, vector<32x32xf32>
    %c0_19 = arith.constant 0 : index
    %c0_20 = arith.constant 0 : index
    %10 = vector.load %arg12[%c0_19, %c0_20] : memref<1x32xf32, #tpu.memory_space<vmem>>, vector<1x32xf32>
    %c0_21 = arith.constant 0 : index
    %c0_22 = arith.constant 0 : index
    %11 = vector.load %arg13[%c0_21, %c0_22] : memref<1x32xf32, #tpu.memory_space<vmem>>, vector<1x32xf32>
    %c0_23 = arith.constant 0 : index
    %c0_24 = arith.constant 0 : index
    %12 = vector.load %arg14[%c0_23, %c0_24] : memref<1x32xf32, #tpu.memory_space<vmem>>, vector<1x32xf32>
    %c0_25 = arith.constant 0 : index
    %c0_26 = arith.constant 0 : index
    %13 = vector.load %arg15[%c0_25, %c0_26] : memref<1x4xf32, #tpu.memory_space<vmem>>, vector<1x4xf32>
    %c0_27 = arith.constant 0 : index
    %c0_28 = arith.constant 0 : index
    %14 = vector.load %arg16[%c0_27, %c0_28] : memref<1x4xf32, #tpu.memory_space<vmem>>, vector<1x4xf32>
    %c0_29 = arith.constant 0 : index
    %c0_30 = arith.constant 0 : index
    %c0_31 = arith.constant 0 : index
    %15 = vector.load %arg1[%c0_29, %c0_30, %c0_31] : memref<1x8x8xf32, #tpu.memory_space<vmem>>, vector<1x8x8xf32>
    %16 = vector.shape_cast %15 : vector<1x8x8xf32> to vector<8x8xf32>
    %17 = vector.broadcast %0 : vector<1x8xf32> to vector<8x8xf32>
    %18 = arith.mulf %16, %17 : vector<8x8xf32>
    %19 = vector.broadcast %1 : vector<1x8xf32> to vector<8x8xf32>
    %20 = arith.addf %18, %19 : vector<8x8xf32>
    %21 = vector.shape_cast %20 : vector<8x8xf32> to vector<8x8x1xf32>
    %22 = vector.shape_cast %2 : vector<8x32xf32> to vector<1x8x32xf32>
    %23 = vector.broadcast %22 : vector<1x8x32xf32> to vector<8x8x32xf32>
    %24 = vector.broadcast %21 : vector<8x8x1xf32> to vector<8x8x32xf32>
    %25 = arith.mulf %23, %24 : vector<8x8x32xf32>
    %26 = vector.shape_cast %3 : vector<8x32xf32> to vector<1x8x32xf32>
    %27 = vector.broadcast %26 : vector<1x8x32xf32> to vector<8x8x32xf32>
    %28 = arith.subf %25, %27 : vector<8x8x32xf32>
    %29 = math.tanh %28 : vector<8x8x32xf32>
    %30 = vector.shape_cast %4 : vector<8x32xf32> to vector<1x8x32xf32>
    %31 = vector.broadcast %30 : vector<1x8x32xf32> to vector<8x8x32xf32>
    %32 = arith.mulf %31, %29 : vector<8x8x32xf32>
    %cst = arith.constant dense<0.000000e+00> : vector<8x32xf32>
    %33 = vector.multi_reduction <add>, %32, %cst [1] : vector<8x8x32xf32> to vector<8x32xf32>
    %34 = vector.broadcast %10 : vector<1x32xf32> to vector<8x32xf32>
    %35 = arith.addf %33, %34 : vector<8x32xf32>
    %36 = vector.shape_cast %5 : vector<8x32xf32> to vector<1x8x32xf32>
    %37 = vector.broadcast %36 : vector<1x8x32xf32> to vector<8x8x32xf32>
    %38 = arith.mulf %37, %29 : vector<8x8x32xf32>
    %cst_32 = arith.constant dense<0.000000e+00> : vector<8x32xf32>
    %39 = vector.multi_reduction <add>, %38, %cst_32 [1] : vector<8x8x32xf32> to vector<8x32xf32>
    %40 = vector.broadcast %11 : vector<1x32xf32> to vector<8x32xf32>
    %41 = arith.addf %39, %40 : vector<8x32xf32>
    %cst_33 = arith.constant 0.000000e+00 : f32
    %42 = vector.broadcast %cst_33 : f32 to vector<1x32xf32>
    %43 = vector.extract_strided_slice %35 {offsets = [0, 0], sizes = [1, 32], strides = [1, 1]} : vector<8x32xf32> to vector<1x32xf32>
    %44 = vector.extract_strided_slice %41 {offsets = [0, 0], sizes = [1, 32], strides = [1, 1]} : vector<8x32xf32> to vector<1x32xf32>
    %45 = vector.shape_cast %42 : vector<1x32xf32> to vector<1x32x1xf32>
    %46 = vector.shape_cast %6 : vector<32x32xf32> to vector<1x32x32xf32>
    %47 = vector.broadcast %45 : vector<1x32x1xf32> to vector<1x32x32xf32>
    %48 = arith.mulf %46, %47 : vector<1x32x32xf32>
    %49 = vector.shape_cast %7 : vector<32x32xf32> to vector<1x32x32xf32>
    %50 = arith.subf %48, %49 : vector<1x32x32xf32>
    %51 = math.tanh %50 : vector<1x32x32xf32>
    %52 = vector.shape_cast %8 : vector<32x32xf32> to vector<1x32x32xf32>
    %53 = arith.mulf %52, %51 : vector<1x32x32xf32>
    %cst_34 = arith.constant dense<0.000000e+00> : vector<1x32xf32>
    %54 = vector.multi_reduction <add>, %53, %cst_34 [1] : vector<1x32x32xf32> to vector<1x32xf32>
    %55 = vector.shape_cast %9 : vector<32x32xf32> to vector<1x32x32xf32>
    %56 = arith.mulf %55, %51 : vector<1x32x32xf32>
    %cst_35 = arith.constant dense<0.000000e+00> : vector<1x32xf32>
    %57 = vector.multi_reduction <add>, %56, %cst_35 [1] : vector<1x32x32xf32> to vector<1x32xf32>
    %58 = arith.mulf %12, %42 : vector<1x32xf32>
    %59 = arith.addf %58, %54 : vector<1x32xf32>
    %60 = arith.addf %59, %43 : vector<1x32xf32>
    %61 = arith.addf %57, %44 : vector<1x32xf32>
    %62 = tpu.reciprocal %61 {approx = true} : vector<1x32xf32> -> vector<1x32xf32>
    %63 = arith.mulf %61, %62 : vector<1x32xf32>
    %cst_36 = arith.constant 2.000000e+00 : f32
    %64 = vector.broadcast %cst_36 : f32 to vector<1x32xf32>
    %65 = arith.subf %64, %63 : vector<1x32xf32>
    %66 = arith.mulf %62, %65 : vector<1x32xf32>
    %67 = arith.mulf %60, %66 : vector<1x32xf32>
    %68 = vector.shape_cast %67 : vector<1x32xf32> to vector<1x32x1xf32>
    %69 = vector.shape_cast %6 : vector<32x32xf32> to vector<1x32x32xf32>
    %70 = vector.broadcast %68 : vector<1x32x1xf32> to vector<1x32x32xf32>
    %71 = arith.mulf %69, %70 : vector<1x32x32xf32>
    %72 = vector.shape_cast %7 : vector<32x32xf32> to vector<1x32x32xf32>
    %73 = arith.subf %71, %72 : vector<1x32x32xf32>
    %74 = math.tanh %73 : vector<1x32x32xf32>
    %75 = vector.shape_cast %8 : vector<32x32xf32> to vector<1x32x32xf32>
    %76 = arith.mulf %75, %74 : vector<1x32x32xf32>
    %cst_37 = arith.constant dense<0.000000e+00> : vector<1x32xf32>
    %77 = vector.multi_reduction <add>, %76, %cst_37 [1] : vector<1x32x32xf32> to vector<1x32xf32>
    %78 = vector.shape_cast %9 : vector<32x32xf32> to vector<1x32x32xf32>
    %79 = arith.mulf %78, %74 : vector<1x32x32xf32>
    %cst_38 = arith.constant dense<0.000000e+00> : vector<1x32xf32>
    %80 = vector.multi_reduction <add>, %79, %cst_38 [1] : vector<1x32x32xf32> to vector<1x32xf32>
    %81 = arith.mulf %12, %67 : vector<1x32xf32>
    %82 = arith.addf %81, %77 : vector<1x32xf32>
    %83 = arith.addf %82, %43 : vector<1x32xf32>
    %84 = arith.addf %80, %44 : vector<1x32xf32>
    %85 = tpu.reciprocal %84 {approx = true} : vector<1x32xf32> -> vector<1x32xf32>
    %86 = arith.mulf %84, %85 : vector<1x32xf32>
    %cst_39 = arith.constant 2.000000e+00 : f32
    %87 = vector.broadcast %cst_39 : f32 to vector<1x32xf32>
    %88 = arith.subf %87, %86 : vector<1x32xf32>
    %89 = arith.mulf %85, %88 : vector<1x32xf32>
    %90 = arith.mulf %83, %89 : vector<1x32xf32>
    %91 = vector.shape_cast %90 : vector<1x32xf32> to vector<1x32x1xf32>
    %92 = vector.shape_cast %6 : vector<32x32xf32> to vector<1x32x32xf32>
    %93 = vector.broadcast %91 : vector<1x32x1xf32> to vector<1x32x32xf32>
    %94 = arith.mulf %92, %93 : vector<1x32x32xf32>
    %95 = vector.shape_cast %7 : vector<32x32xf32> to vector<1x32x32xf32>
    %96 = arith.subf %94, %95 : vector<1x32x32xf32>
    %97 = math.tanh %96 : vector<1x32x32xf32>
    %98 = vector.shape_cast %8 : vector<32x32xf32> to vector<1x32x32xf32>
    %99 = arith.mulf %98, %97 : vector<1x32x32xf32>
    %cst_40 = arith.constant dense<0.000000e+00> : vector<1x32xf32>
    %100 = vector.multi_reduction <add>, %99, %cst_40 [1] : vector<1x32x32xf32> to vector<1x32xf32>
    %101 = vector.shape_cast %9 : vector<32x32xf32> to vector<1x32x32xf32>
    %102 = arith.mulf %101, %97 : vector<1x32x32xf32>
    %cst_41 = arith.constant dense<0.000000e+00> : vector<1x32xf32>
    %103 = vector.multi_reduction <add>, %102, %cst_41 [1] : vector<1x32x32xf32> to vector<1x32xf32>
    %104 = arith.mulf %12, %90 : vector<1x32xf32>
    %105 = arith.addf %104, %100 : vector<1x32xf32>
    %106 = arith.addf %105, %43 : vector<1x32xf32>
    %107 = arith.addf %103, %44 : vector<1x32xf32>
    %108 = tpu.reciprocal %107 {approx = true} : vector<1x32xf32> -> vector<1x32xf32>
    %109 = arith.mulf %107, %108 : vector<1x32xf32>
    %cst_42 = arith.constant 2.000000e+00 : f32
    %110 = vector.broadcast %cst_42 : f32 to vector<1x32xf32>
    %111 = arith.subf %110, %109 : vector<1x32xf32>
    %112 = arith.mulf %108, %111 : vector<1x32xf32>
    %113 = arith.mulf %106, %112 : vector<1x32xf32>
    %114 = vector.shape_cast %113 : vector<1x32xf32> to vector<1x32x1xf32>
    %115 = vector.shape_cast %6 : vector<32x32xf32> to vector<1x32x32xf32>
    %116 = vector.broadcast %114 : vector<1x32x1xf32> to vector<1x32x32xf32>
    %117 = arith.mulf %115, %116 : vector<1x32x32xf32>
    %118 = vector.shape_cast %7 : vector<32x32xf32> to vector<1x32x32xf32>
    %119 = arith.subf %117, %118 : vector<1x32x32xf32>
    %120 = math.tanh %119 : vector<1x32x32xf32>
    %121 = vector.shape_cast %8 : vector<32x32xf32> to vector<1x32x32xf32>
    %122 = arith.mulf %121, %120 : vector<1x32x32xf32>
    %cst_43 = arith.constant dense<0.000000e+00> : vector<1x32xf32>
    %123 = vector.multi_reduction <add>, %122, %cst_43 [1] : vector<1x32x32xf32> to vector<1x32xf32>
    %124 = vector.shape_cast %9 : vector<32x32xf32> to vector<1x32x32xf32>
    %125 = arith.mulf %124, %120 : vector<1x32x32xf32>
    %cst_44 = arith.constant dense<0.000000e+00> : vector<1x32xf32>
    %126 = vector.multi_reduction <add>, %125, %cst_44 [1] : vector<1x32x32xf32> to vector<1x32xf32>
    %127 = arith.mulf %12, %113 : vector<1x32xf32>
    %128 = arith.addf %127, %123 : vector<1x32xf32>
    %129 = arith.addf %128, %43 : vector<1x32xf32>
    %130 = arith.addf %126, %44 : vector<1x32xf32>
    %131 = tpu.reciprocal %130 {approx = true} : vector<1x32xf32> -> vector<1x32xf32>
    %132 = arith.mulf %130, %131 : vector<1x32xf32>
    %cst_45 = arith.constant 2.000000e+00 : f32
    %133 = vector.broadcast %cst_45 : f32 to vector<1x32xf32>
    %134 = arith.subf %133, %132 : vector<1x32xf32>
    %135 = arith.mulf %131, %134 : vector<1x32xf32>
    %136 = arith.mulf %129, %135 : vector<1x32xf32>
    %137 = vector.shape_cast %136 : vector<1x32xf32> to vector<1x32x1xf32>
    %138 = vector.shape_cast %6 : vector<32x32xf32> to vector<1x32x32xf32>
    %139 = vector.broadcast %137 : vector<1x32x1xf32> to vector<1x32x32xf32>
    %140 = arith.mulf %138, %139 : vector<1x32x32xf32>
    %141 = vector.shape_cast %7 : vector<32x32xf32> to vector<1x32x32xf32>
    %142 = arith.subf %140, %141 : vector<1x32x32xf32>
    %143 = math.tanh %142 : vector<1x32x32xf32>
    %144 = vector.shape_cast %8 : vector<32x32xf32> to vector<1x32x32xf32>
    %145 = arith.mulf %144, %143 : vector<1x32x32xf32>
    %cst_46 = arith.constant dense<0.000000e+00> : vector<1x32xf32>
    %146 = vector.multi_reduction <add>, %145, %cst_46 [1] : vector<1x32x32xf32> to vector<1x32xf32>
    %147 = vector.shape_cast %9 : vector<32x32xf32> to vector<1x32x32xf32>
    %148 = arith.mulf %147, %143 : vector<1x32x32xf32>
    %cst_47 = arith.constant dense<0.000000e+00> : vector<1x32xf32>
    %149 = vector.multi_reduction <add>, %148, %cst_47 [1] : vector<1x32x32xf32> to vector<1x32xf32>
    %150 = arith.mulf %12, %136 : vector<1x32xf32>
    %151 = arith.addf %150, %146 : vector<1x32xf32>
    %152 = arith.addf %151, %43 : vector<1x32xf32>
    %153 = arith.addf %149, %44 : vector<1x32xf32>
    %154 = tpu.reciprocal %153 {approx = true} : vector<1x32xf32> -> vector<1x32xf32>
    %155 = arith.mulf %153, %154 : vector<1x32xf32>
    %cst_48 = arith.constant 2.000000e+00 : f32
    %156 = vector.broadcast %cst_48 : f32 to vector<1x32xf32>
    %157 = arith.subf %156, %155 : vector<1x32xf32>
    %158 = arith.mulf %154, %157 : vector<1x32xf32>
    %159 = arith.mulf %152, %158 : vector<1x32xf32>
    %160 = vector.shape_cast %159 : vector<1x32xf32> to vector<1x32x1xf32>
    %161 = vector.shape_cast %6 : vector<32x32xf32> to vector<1x32x32xf32>
    %162 = vector.broadcast %160 : vector<1x32x1xf32> to vector<1x32x32xf32>
    %163 = arith.mulf %161, %162 : vector<1x32x32xf32>
    %164 = vector.shape_cast %7 : vector<32x32xf32> to vector<1x32x32xf32>
    %165 = arith.subf %163, %164 : vector<1x32x32xf32>
    %166 = math.tanh %165 : vector<1x32x32xf32>
    %167 = vector.shape_cast %8 : vector<32x32xf32> to vector<1x32x32xf32>
    %168 = arith.mulf %167, %166 : vector<1x32x32xf32>
    %cst_49 = arith.constant dense<0.000000e+00> : vector<1x32xf32>
    %169 = vector.multi_reduction <add>, %168, %cst_49 [1] : vector<1x32x32xf32> to vector<1x32xf32>
    %170 = vector.shape_cast %9 : vector<32x32xf32> to vector<1x32x32xf32>
    %171 = arith.mulf %170, %166 : vector<1x32x32xf32>
    %cst_50 = arith.constant dense<0.000000e+00> : vector<1x32xf32>
    %172 = vector.multi_reduction <add>, %171, %cst_50 [1] : vector<1x32x32xf32> to vector<1x32xf32>
    %173 = arith.mulf %12, %159 : vector<1x32xf32>
    %174 = arith.addf %173, %169 : vector<1x32xf32>
    %175 = arith.addf %174, %43 : vector<1x32xf32>
    %176 = arith.addf %172, %44 : vector<1x32xf32>
    %177 = tpu.reciprocal %176 {approx = true} : vector<1x32xf32> -> vector<1x32xf32>
    %178 = arith.mulf %176, %177 : vector<1x32xf32>
    %cst_51 = arith.constant 2.000000e+00 : f32
    %179 = vector.broadcast %cst_51 : f32 to vector<1x32xf32>
    %180 = arith.subf %179, %178 : vector<1x32xf32>
    %181 = arith.mulf %177, %180 : vector<1x32xf32>
    %182 = arith.mulf %175, %181 : vector<1x32xf32>
    %183 = vector.extract_strided_slice %182 {offsets = [0, 0], sizes = [1, 4], strides = [1, 1]} : vector<1x32xf32> to vector<1x4xf32>
    %184 = arith.mulf %183, %13 : vector<1x4xf32>
    %185 = arith.addf %184, %14 : vector<1x4xf32>
    %186 = vector.shape_cast %185 : vector<1x4xf32> to vector<4xf32>
    %c0_52 = arith.constant 0 : index
    %c0_53 = arith.constant 0 : index
    %c0_54 = arith.constant 0 : index
    %187 = vector.load %arg17[%c0_52, %c0_53, %c0_54] : memref<1x8x4xf32, #tpu.memory_space<vmem>>, vector<1x1x4xf32>
    %188 = vector.shape_cast %187 : vector<1x1x4xf32> to vector<4xf32>
    %189 = vector.shape_cast %186 : vector<4xf32> to vector<1x1x4xf32>
    tpu.vector_store %arg17[%c0_52, %c0_53, %c0_54], %189 {strides = array<i32>} : memref<1x8x4xf32, #tpu.memory_space<vmem>>, vector<1x1x4xf32>,
    %190 = vector.extract_strided_slice %35 {offsets = [1, 0], sizes = [1, 32], strides = [1, 1]} : vector<8x32xf32> to vector<1x32xf32>
    %191 = vector.extract_strided_slice %41 {offsets = [1, 0], sizes = [1, 32], strides = [1, 1]} : vector<8x32xf32> to vector<1x32xf32>
    %192 = vector.shape_cast %182 : vector<1x32xf32> to vector<1x32x1xf32>
    %193 = vector.shape_cast %6 : vector<32x32xf32> to vector<1x32x32xf32>
    %194 = vector.broadcast %192 : vector<1x32x1xf32> to vector<1x32x32xf32>
    %195 = arith.mulf %193, %194 : vector<1x32x32xf32>
    %196 = vector.shape_cast %7 : vector<32x32xf32> to vector<1x32x32xf32>
    %197 = arith.subf %195, %196 : vector<1x32x32xf32>
    %198 = math.tanh %197 : vector<1x32x32xf32>
    %199 = vector.shape_cast %8 : vector<32x32xf32> to vector<1x32x32xf32>
    %200 = arith.mulf %199, %198 : vector<1x32x32xf32>
    %cst_55 = arith.constant dense<0.000000e+00> : vector<1x32xf32>
    %201 = vector.multi_reduction <add>, %200, %cst_55 [1] : vector<1x32x32xf32> to vector<1x32xf32>
    %202 = vector.shape_cast %9 : vector<32x32xf32> to vector<1x32x32xf32>
    %203 = arith.mulf %202, %198 : vector<1x32x32xf32>
    %cst_56 = arith.constant dense<0.000000e+00> : vector<1x32xf32>
    %204 = vector.multi_reduction <add>, %203, %cst_56 [1] : vector<1x32x32xf32> to vector<1x32xf32>
    %205 = arith.mulf %12, %182 : vector<1x32xf32>
    %206 = arith.addf %205, %201 : vector<1x32xf32>
    %207 = arith.addf %206, %190 : vector<1x32xf32>
    %208 = arith.addf %204, %191 : vector<1x32xf32>
    %209 = tpu.reciprocal %208 {approx = true} : vector<1x32xf32> -> vector<1x32xf32>
    %210 = arith.mulf %208, %209 : vector<1x32xf32>
    %cst_57 = arith.constant 2.000000e+00 : f32
    %211 = vector.broadcast %cst_57 : f32 to vector<1x32xf32>
    %212 = arith.subf %211, %210 : vector<1x32xf32>
    %213 = arith.mulf %209, %212 : vector<1x32xf32>
    %214 = arith.mulf %207, %213 : vector<1x32xf32>
    %215 = vector.shape_cast %214 : vector<1x32xf32> to vector<1x32x1xf32>
    %216 = vector.shape_cast %6 : vector<32x32xf32> to vector<1x32x32xf32>
    %217 = vector.broadcast %215 : vector<1x32x1xf32> to vector<1x32x32xf32>
    %218 = arith.mulf %216, %217 : vector<1x32x32xf32>
    %219 = vector.shape_cast %7 : vector<32x32xf32> to vector<1x32x32xf32>
    %220 = arith.subf %218, %219 : vector<1x32x32xf32>
    %221 = math.tanh %220 : vector<1x32x32xf32>
    %222 = vector.shape_cast %8 : vector<32x32xf32> to vector<1x32x32xf32>
    %223 = arith.mulf %222, %221 : vector<1x32x32xf32>
    %cst_58 = arith.constant dense<0.000000e+00> : vector<1x32xf32>
    %224 = vector.multi_reduction <add>, %223, %cst_58 [1] : vector<1x32x32xf32> to vector<1x32xf32>
    %225 = vector.shape_cast %9 : vector<32x32xf32> to vector<1x32x32xf32>
    %226 = arith.mulf %225, %221 : vector<1x32x32xf32>
    %cst_59 = arith.constant dense<0.000000e+00> : vector<1x32xf32>
    %227 = vector.multi_reduction <add>, %226, %cst_59 [1] : vector<1x32x32xf32> to vector<1x32xf32>
    %228 = arith.mulf %12, %214 : vector<1x32xf32>
    %229 = arith.addf %228, %224 : vector<1x32xf32>
    %230 = arith.addf %229, %190 : vector<1x32xf32>
    %231 = arith.addf %227, %191 : vector<1x32xf32>
    %232 = tpu.reciprocal %231 {approx = true} : vector<1x32xf32> -> vector<1x32xf32>
    %233 = arith.mulf %231, %232 : vector<1x32xf32>
    %cst_60 = arith.constant 2.000000e+00 : f32
    %234 = vector.broadcast %cst_60 : f32 to vector<1x32xf32>
    %235 = arith.subf %234, %233 : vector<1x32xf32>
    %236 = arith.mulf %232, %235 : vector<1x32xf32>
    %237 = arith.mulf %230, %236 : vector<1x32xf32>
    %238 = vector.shape_cast %237 : vector<1x32xf32> to vector<1x32x1xf32>
    %239 = vector.shape_cast %6 : vector<32x32xf32> to vector<1x32x32xf32>
    %240 = vector.broadcast %238 : vector<1x32x1xf32> to vector<1x32x32xf32>
    %241 = arith.mulf %239, %240 : vector<1x32x32xf32>
    %242 = vector.shape_cast %7 : vector<32x32xf32> to vector<1x32x32xf32>
    %243 = arith.subf %241, %242 : vector<1x32x32xf32>
    %244 = math.tanh %243 : vector<1x32x32xf32>
    %245 = vector.shape_cast %8 : vector<32x32xf32> to vector<1x32x32xf32>
    %246 = arith.mulf %245, %244 : vector<1x32x32xf32>
    %cst_61 = arith.constant dense<0.000000e+00> : vector<1x32xf32>
    %247 = vector.multi_reduction <add>, %246, %cst_61 [1] : vector<1x32x32xf32> to vector<1x32xf32>
    %248 = vector.shape_cast %9 : vector<32x32xf32> to vector<1x32x32xf32>
    %249 = arith.mulf %248, %244 : vector<1x32x32xf32>
    %cst_62 = arith.constant dense<0.000000e+00> : vector<1x32xf32>
    %250 = vector.multi_reduction <add>, %249, %cst_62 [1] : vector<1x32x32xf32> to vector<1x32xf32>
    %251 = arith.mulf %12, %237 : vector<1x32xf32>
    %252 = arith.addf %251, %247 : vector<1x32xf32>
    %253 = arith.addf %252, %190 : vector<1x32xf32>
    %254 = arith.addf %250, %191 : vector<1x32xf32>
    %255 = tpu.reciprocal %254 {approx = true} : vector<1x32xf32> -> vector<1x32xf32>
    %256 = arith.mulf %254, %255 : vector<1x32xf32>
    %cst_63 = arith.constant 2.000000e+00 : f32
    %257 = vector.broadcast %cst_63 : f32 to vector<1x32xf32>
    %258 = arith.subf %257, %256 : vector<1x32xf32>
    %259 = arith.mulf %255, %258 : vector<1x32xf32>
    %260 = arith.mulf %253, %259 : vector<1x32xf32>
    %261 = vector.shape_cast %260 : vector<1x32xf32> to vector<1x32x1xf32>
    %262 = vector.shape_cast %6 : vector<32x32xf32> to vector<1x32x32xf32>
    %263 = vector.broadcast %261 : vector<1x32x1xf32> to vector<1x32x32xf32>
    %264 = arith.mulf %262, %263 : vector<1x32x32xf32>
    %265 = vector.shape_cast %7 : vector<32x32xf32> to vector<1x32x32xf32>
    %266 = arith.subf %264, %265 : vector<1x32x32xf32>
    %267 = math.tanh %266 : vector<1x32x32xf32>
    %268 = vector.shape_cast %8 : vector<32x32xf32> to vector<1x32x32xf32>
    %269 = arith.mulf %268, %267 : vector<1x32x32xf32>
    %cst_64 = arith.constant dense<0.000000e+00> : vector<1x32xf32>
    %270 = vector.multi_reduction <add>, %269, %cst_64 [1] : vector<1x32x32xf32> to vector<1x32xf32>
    %271 = vector.shape_cast %9 : vector<32x32xf32> to vector<1x32x32xf32>
    %272 = arith.mulf %271, %267 : vector<1x32x32xf32>
    %cst_65 = arith.constant dense<0.000000e+00> : vector<1x32xf32>
    %273 = vector.multi_reduction <add>, %272, %cst_65 [1] : vector<1x32x32xf32> to vector<1x32xf32>
    %274 = arith.mulf %12, %260 : vector<1x32xf32>
    %275 = arith.addf %274, %270 : vector<1x32xf32>
    %276 = arith.addf %275, %190 : vector<1x32xf32>
    %277 = arith.addf %273, %191 : vector<1x32xf32>
    %278 = tpu.reciprocal %277 {approx = true} : vector<1x32xf32> -> vector<1x32xf32>
    %279 = arith.mulf %277, %278 : vector<1x32xf32>
    %cst_66 = arith.constant 2.000000e+00 : f32
    %280 = vector.broadcast %cst_66 : f32 to vector<1x32xf32>
    %281 = arith.subf %280, %279 : vector<1x32xf32>
    %282 = arith.mulf %278, %281 : vector<1x32xf32>
    %283 = arith.mulf %276, %282 : vector<1x32xf32>
    %284 = vector.shape_cast %283 : vector<1x32xf32> to vector<1x32x1xf32>
    %285 = vector.shape_cast %6 : vector<32x32xf32> to vector<1x32x32xf32>
    %286 = vector.broadcast %284 : vector<1x32x1xf32> to vector<1x32x32xf32>
    %287 = arith.mulf %285, %286 : vector<1x32x32xf32>
    %288 = vector.shape_cast %7 : vector<32x32xf32> to vector<1x32x32xf32>
    %289 = arith.subf %287, %288 : vector<1x32x32xf32>
    %290 = math.tanh %289 : vector<1x32x32xf32>
    %291 = vector.shape_cast %8 : vector<32x32xf32> to vector<1x32x32xf32>
    %292 = arith.mulf %291, %290 : vector<1x32x32xf32>
    %cst_67 = arith.constant dense<0.000000e+00> : vector<1x32xf32>
    %293 = vector.multi_reduction <add>, %292, %cst_67 [1] : vector<1x32x32xf32> to vector<1x32xf32>
    %294 = vector.shape_cast %9 : vector<32x32xf32> to vector<1x32x32xf32>
    %295 = arith.mulf %294, %290 : vector<1x32x32xf32>
    %cst_68 = arith.constant dense<0.000000e+00> : vector<1x32xf32>
    %296 = vector.multi_reduction <add>, %295, %cst_68 [1] : vector<1x32x32xf32> to vector<1x32xf32>
    %297 = arith.mulf %12, %283 : vector<1x32xf32>
    %298 = arith.addf %297, %293 : vector<1x32xf32>
    %299 = arith.addf %298, %190 : vector<1x32xf32>
    %300 = arith.addf %296, %191 : vector<1x32xf32>
    %301 = tpu.reciprocal %300 {approx = true} : vector<1x32xf32> -> vector<1x32xf32>
    %302 = arith.mulf %300, %301 : vector<1x32xf32>
    %cst_69 = arith.constant 2.000000e+00 : f32
    %303 = vector.broadcast %cst_69 : f32 to vector<1x32xf32>
    %304 = arith.subf %303, %302 : vector<1x32xf32>
    %305 = arith.mulf %301, %304 : vector<1x32xf32>
    %306 = arith.mulf %299, %305 : vector<1x32xf32>
    %307 = vector.shape_cast %306 : vector<1x32xf32> to vector<1x32x1xf32>
    %308 = vector.shape_cast %6 : vector<32x32xf32> to vector<1x32x32xf32>
    %309 = vector.broadcast %307 : vector<1x32x1xf32> to vector<1x32x32xf32>
    %310 = arith.mulf %308, %309 : vector<1x32x32xf32>
    %311 = vector.shape_cast %7 : vector<32x32xf32> to vector<1x32x32xf32>
    %312 = arith.subf %310, %311 : vector<1x32x32xf32>
    %313 = math.tanh %312 : vector<1x32x32xf32>
    %314 = vector.shape_cast %8 : vector<32x32xf32> to vector<1x32x32xf32>
    %315 = arith.mulf %314, %313 : vector<1x32x32xf32>
    %cst_70 = arith.constant dense<0.000000e+00> : vector<1x32xf32>
    %316 = vector.multi_reduction <add>, %315, %cst_70 [1] : vector<1x32x32xf32> to vector<1x32xf32>
    %317 = vector.shape_cast %9 : vector<32x32xf32> to vector<1x32x32xf32>
    %318 = arith.mulf %317, %313 : vector<1x32x32xf32>
    %cst_71 = arith.constant dense<0.000000e+00> : vector<1x32xf32>
    %319 = vector.multi_reduction <add>, %318, %cst_71 [1] : vector<1x32x32xf32> to vector<1x32xf32>
    %320 = arith.mulf %12, %306 : vector<1x32xf32>
    %321 = arith.addf %320, %316 : vector<1x32xf32>
    %322 = arith.addf %321, %190 : vector<1x32xf32>
    %323 = arith.addf %319, %191 : vector<1x32xf32>
    %324 = tpu.reciprocal %323 {approx = true} : vector<1x32xf32> -> vector<1x32xf32>
    %325 = arith.mulf %323, %324 : vector<1x32xf32>
    %cst_72 = arith.constant 2.000000e+00 : f32
    %326 = vector.broadcast %cst_72 : f32 to vector<1x32xf32>
    %327 = arith.subf %326, %325 : vector<1x32xf32>
    %328 = arith.mulf %324, %327 : vector<1x32xf32>
    %329 = arith.mulf %322, %328 : vector<1x32xf32>
    %330 = vector.extract_strided_slice %329 {offsets = [0, 0], sizes = [1, 4], strides = [1, 1]} : vector<1x32xf32> to vector<1x4xf32>
    %331 = arith.mulf %330, %13 : vector<1x4xf32>
    %332 = arith.addf %331, %14 : vector<1x4xf32>
    %333 = vector.shape_cast %332 : vector<1x4xf32> to vector<4xf32>
    %c0_73 = arith.constant 0 : index
    %c1 = arith.constant 1 : index
    %c0_74 = arith.constant 0 : index
    %334 = vector.load %arg17[%c0_73, %c1, %c0_74] : memref<1x8x4xf32, #tpu.memory_space<vmem>>, vector<1x1x4xf32>
    %335 = vector.shape_cast %334 : vector<1x1x4xf32> to vector<4xf32>
    %336 = vector.shape_cast %333 : vector<4xf32> to vector<1x1x4xf32>
    tpu.vector_store %arg17[%c0_73, %c1, %c0_74], %336 {strides = array<i32>} : memref<1x8x4xf32, #tpu.memory_space<vmem>>, vector<1x1x4xf32>,
    %337 = vector.extract_strided_slice %35 {offsets = [2, 0], sizes = [1, 32], strides = [1, 1]} : vector<8x32xf32> to vector<1x32xf32>
    %338 = vector.extract_strided_slice %41 {offsets = [2, 0], sizes = [1, 32], strides = [1, 1]} : vector<8x32xf32> to vector<1x32xf32>
    %339 = vector.shape_cast %329 : vector<1x32xf32> to vector<1x32x1xf32>
    %340 = vector.shape_cast %6 : vector<32x32xf32> to vector<1x32x32xf32>
    %341 = vector.broadcast %339 : vector<1x32x1xf32> to vector<1x32x32xf32>
    %342 = arith.mulf %340, %341 : vector<1x32x32xf32>
    %343 = vector.shape_cast %7 : vector<32x32xf32> to vector<1x32x32xf32>
    %344 = arith.subf %342, %343 : vector<1x32x32xf32>
    %345 = math.tanh %344 : vector<1x32x32xf32>
    %346 = vector.shape_cast %8 : vector<32x32xf32> to vector<1x32x32xf32>
    %347 = arith.mulf %346, %345 : vector<1x32x32xf32>
    %cst_75 = arith.constant dense<0.000000e+00> : vector<1x32xf32>
    %348 = vector.multi_reduction <add>, %347, %cst_75 [1] : vector<1x32x32xf32> to vector<1x32xf32>
    %349 = vector.shape_cast %9 : vector<32x32xf32> to vector<1x32x32xf32>
    %350 = arith.mulf %349, %345 : vector<1x32x32xf32>
    %cst_76 = arith.constant dense<0.000000e+00> : vector<1x32xf32>
    %351 = vector.multi_reduction <add>, %350, %cst_76 [1] : vector<1x32x32xf32> to vector<1x32xf32>
    %352 = arith.mulf %12, %329 : vector<1x32xf32>
    %353 = arith.addf %352, %348 : vector<1x32xf32>
    %354 = arith.addf %353, %337 : vector<1x32xf32>
    %355 = arith.addf %351, %338 : vector<1x32xf32>
    %356 = tpu.reciprocal %355 {approx = true} : vector<1x32xf32> -> vector<1x32xf32>
    %357 = arith.mulf %355, %356 : vector<1x32xf32>
    %cst_77 = arith.constant 2.000000e+00 : f32
    %358 = vector.broadcast %cst_77 : f32 to vector<1x32xf32>
    %359 = arith.subf %358, %357 : vector<1x32xf32>
    %360 = arith.mulf %356, %359 : vector<1x32xf32>
    %361 = arith.mulf %354, %360 : vector<1x32xf32>
    %362 = vector.shape_cast %361 : vector<1x32xf32> to vector<1x32x1xf32>
    %363 = vector.shape_cast %6 : vector<32x32xf32> to vector<1x32x32xf32>
    %364 = vector.broadcast %362 : vector<1x32x1xf32> to vector<1x32x32xf32>
    %365 = arith.mulf %363, %364 : vector<1x32x32xf32>
    %366 = vector.shape_cast %7 : vector<32x32xf32> to vector<1x32x32xf32>
    %367 = arith.subf %365, %366 : vector<1x32x32xf32>
    %368 = math.tanh %367 : vector<1x32x32xf32>
    %369 = vector.shape_cast %8 : vector<32x32xf32> to vector<1x32x32xf32>
    %370 = arith.mulf %369, %368 : vector<1x32x32xf32>
    %cst_78 = arith.constant dense<0.000000e+00> : vector<1x32xf32>
    %371 = vector.multi_reduction <add>, %370, %cst_78 [1] : vector<1x32x32xf32> to vector<1x32xf32>
    %372 = vector.shape_cast %9 : vector<32x32xf32> to vector<1x32x32xf32>
    %373 = arith.mulf %372, %368 : vector<1x32x32xf32>
    %cst_79 = arith.constant dense<0.000000e+00> : vector<1x32xf32>
    %374 = vector.multi_reduction <add>, %373, %cst_79 [1] : vector<1x32x32xf32> to vector<1x32xf32>
    %375 = arith.mulf %12, %361 : vector<1x32xf32>
    %376 = arith.addf %375, %371 : vector<1x32xf32>
    %377 = arith.addf %376, %337 : vector<1x32xf32>
    %378 = arith.addf %374, %338 : vector<1x32xf32>
    %379 = tpu.reciprocal %378 {approx = true} : vector<1x32xf32> -> vector<1x32xf32>
    %380 = arith.mulf %378, %379 : vector<1x32xf32>
    %cst_80 = arith.constant 2.000000e+00 : f32
    %381 = vector.broadcast %cst_80 : f32 to vector<1x32xf32>
    %382 = arith.subf %381, %380 : vector<1x32xf32>
    %383 = arith.mulf %379, %382 : vector<1x32xf32>
    %384 = arith.mulf %377, %383 : vector<1x32xf32>
    %385 = vector.shape_cast %384 : vector<1x32xf32> to vector<1x32x1xf32>
    %386 = vector.shape_cast %6 : vector<32x32xf32> to vector<1x32x32xf32>
    %387 = vector.broadcast %385 : vector<1x32x1xf32> to vector<1x32x32xf32>
    %388 = arith.mulf %386, %387 : vector<1x32x32xf32>
    %389 = vector.shape_cast %7 : vector<32x32xf32> to vector<1x32x32xf32>
    %390 = arith.subf %388, %389 : vector<1x32x32xf32>
    %391 = math.tanh %390 : vector<1x32x32xf32>
    %392 = vector.shape_cast %8 : vector<32x32xf32> to vector<1x32x32xf32>
    %393 = arith.mulf %392, %391 : vector<1x32x32xf32>
    %cst_81 = arith.constant dense<0.000000e+00> : vector<1x32xf32>
    %394 = vector.multi_reduction <add>, %393, %cst_81 [1] : vector<1x32x32xf32> to vector<1x32xf32>
    %395 = vector.shape_cast %9 : vector<32x32xf32> to vector<1x32x32xf32>
    %396 = arith.mulf %395, %391 : vector<1x32x32xf32>
    %cst_82 = arith.constant dense<0.000000e+00> : vector<1x32xf32>
    %397 = vector.multi_reduction <add>, %396, %cst_82 [1] : vector<1x32x32xf32> to vector<1x32xf32>
    %398 = arith.mulf %12, %384 : vector<1x32xf32>
    %399 = arith.addf %398, %394 : vector<1x32xf32>
    %400 = arith.addf %399, %337 : vector<1x32xf32>
    %401 = arith.addf %397, %338 : vector<1x32xf32>
    %402 = tpu.reciprocal %401 {approx = true} : vector<1x32xf32> -> vector<1x32xf32>
    %403 = arith.mulf %401, %402 : vector<1x32xf32>
    %cst_83 = arith.constant 2.000000e+00 : f32
    %404 = vector.broadcast %cst_83 : f32 to vector<1x32xf32>
    %405 = arith.subf %404, %403 : vector<1x32xf32>
    %406 = arith.mulf %402, %405 : vector<1x32xf32>
    %407 = arith.mulf %400, %406 : vector<1x32xf32>
    %408 = vector.shape_cast %407 : vector<1x32xf32> to vector<1x32x1xf32>
    %409 = vector.shape_cast %6 : vector<32x32xf32> to vector<1x32x32xf32>
    %410 = vector.broadcast %408 : vector<1x32x1xf32> to vector<1x32x32xf32>
    %411 = arith.mulf %409, %410 : vector<1x32x32xf32>
    %412 = vector.shape_cast %7 : vector<32x32xf32> to vector<1x32x32xf32>
    %413 = arith.subf %411, %412 : vector<1x32x32xf32>
    %414 = math.tanh %413 : vector<1x32x32xf32>
    %415 = vector.shape_cast %8 : vector<32x32xf32> to vector<1x32x32xf32>
    %416 = arith.mulf %415, %414 : vector<1x32x32xf32>
    %cst_84 = arith.constant dense<0.000000e+00> : vector<1x32xf32>
    %417 = vector.multi_reduction <add>, %416, %cst_84 [1] : vector<1x32x32xf32> to vector<1x32xf32>
    %418 = vector.shape_cast %9 : vector<32x32xf32> to vector<1x32x32xf32>
    %419 = arith.mulf %418, %414 : vector<1x32x32xf32>
    %cst_85 = arith.constant dense<0.000000e+00> : vector<1x32xf32>
    %420 = vector.multi_reduction <add>, %419, %cst_85 [1] : vector<1x32x32xf32> to vector<1x32xf32>
    %421 = arith.mulf %12, %407 : vector<1x32xf32>
    %422 = arith.addf %421, %417 : vector<1x32xf32>
    %423 = arith.addf %422, %337 : vector<1x32xf32>
    %424 = arith.addf %420, %338 : vector<1x32xf32>
    %425 = tpu.reciprocal %424 {approx = true} : vector<1x32xf32> -> vector<1x32xf32>
    %426 = arith.mulf %424, %425 : vector<1x32xf32>
    %cst_86 = arith.constant 2.000000e+00 : f32
    %427 = vector.broadcast %cst_86 : f32 to vector<1x32xf32>
    %428 = arith.subf %427, %426 : vector<1x32xf32>
    %429 = arith.mulf %425, %428 : vector<1x32xf32>
    %430 = arith.mulf %423, %429 : vector<1x32xf32>
    %431 = vector.shape_cast %430 : vector<1x32xf32> to vector<1x32x1xf32>
    %432 = vector.shape_cast %6 : vector<32x32xf32> to vector<1x32x32xf32>
    %433 = vector.broadcast %431 : vector<1x32x1xf32> to vector<1x32x32xf32>
    %434 = arith.mulf %432, %433 : vector<1x32x32xf32>
    %435 = vector.shape_cast %7 : vector<32x32xf32> to vector<1x32x32xf32>
    %436 = arith.subf %434, %435 : vector<1x32x32xf32>
    %437 = math.tanh %436 : vector<1x32x32xf32>
    %438 = vector.shape_cast %8 : vector<32x32xf32> to vector<1x32x32xf32>
    %439 = arith.mulf %438, %437 : vector<1x32x32xf32>
    %cst_87 = arith.constant dense<0.000000e+00> : vector<1x32xf32>
    %440 = vector.multi_reduction <add>, %439, %cst_87 [1] : vector<1x32x32xf32> to vector<1x32xf32>
    %441 = vector.shape_cast %9 : vector<32x32xf32> to vector<1x32x32xf32>
    %442 = arith.mulf %441, %437 : vector<1x32x32xf32>
    %cst_88 = arith.constant dense<0.000000e+00> : vector<1x32xf32>
    %443 = vector.multi_reduction <add>, %442, %cst_88 [1] : vector<1x32x32xf32> to vector<1x32xf32>
    %444 = arith.mulf %12, %430 : vector<1x32xf32>
    %445 = arith.addf %444, %440 : vector<1x32xf32>
    %446 = arith.addf %445, %337 : vector<1x32xf32>
    %447 = arith.addf %443, %338 : vector<1x32xf32>
    %448 = tpu.reciprocal %447 {approx = true} : vector<1x32xf32> -> vector<1x32xf32>
    %449 = arith.mulf %447, %448 : vector<1x32xf32>
    %cst_89 = arith.constant 2.000000e+00 : f32
    %450 = vector.broadcast %cst_89 : f32 to vector<1x32xf32>
    %451 = arith.subf %450, %449 : vector<1x32xf32>
    %452 = arith.mulf %448, %451 : vector<1x32xf32>
    %453 = arith.mulf %446, %452 : vector<1x32xf32>
    %454 = vector.shape_cast %453 : vector<1x32xf32> to vector<1x32x1xf32>
    %455 = vector.shape_cast %6 : vector<32x32xf32> to vector<1x32x32xf32>
    %456 = vector.broadcast %454 : vector<1x32x1xf32> to vector<1x32x32xf32>
    %457 = arith.mulf %455, %456 : vector<1x32x32xf32>
    %458 = vector.shape_cast %7 : vector<32x32xf32> to vector<1x32x32xf32>
    %459 = arith.subf %457, %458 : vector<1x32x32xf32>
    %460 = math.tanh %459 : vector<1x32x32xf32>
    %461 = vector.shape_cast %8 : vector<32x32xf32> to vector<1x32x32xf32>
    %462 = arith.mulf %461, %460 : vector<1x32x32xf32>
    %cst_90 = arith.constant dense<0.000000e+00> : vector<1x32xf32>
    %463 = vector.multi_reduction <add>, %462, %cst_90 [1] : vector<1x32x32xf32> to vector<1x32xf32>
    %464 = vector.shape_cast %9 : vector<32x32xf32> to vector<1x32x32xf32>
    %465 = arith.mulf %464, %460 : vector<1x32x32xf32>
    %cst_91 = arith.constant dense<0.000000e+00> : vector<1x32xf32>
    %466 = vector.multi_reduction <add>, %465, %cst_91 [1] : vector<1x32x32xf32> to vector<1x32xf32>
    %467 = arith.mulf %12, %453 : vector<1x32xf32>
    %468 = arith.addf %467, %463 : vector<1x32xf32>
    %469 = arith.addf %468, %337 : vector<1x32xf32>
    %470 = arith.addf %466, %338 : vector<1x32xf32>
    %471 = tpu.reciprocal %470 {approx = true} : vector<1x32xf32> -> vector<1x32xf32>
    %472 = arith.mulf %470, %471 : vector<1x32xf32>
    %cst_92 = arith.constant 2.000000e+00 : f32
    %473 = vector.broadcast %cst_92 : f32 to vector<1x32xf32>
    %474 = arith.subf %473, %472 : vector<1x32xf32>
    %475 = arith.mulf %471, %474 : vector<1x32xf32>
    %476 = arith.mulf %469, %475 : vector<1x32xf32>
    %477 = vector.extract_strided_slice %476 {offsets = [0, 0], sizes = [1, 4], strides = [1, 1]} : vector<1x32xf32> to vector<1x4xf32>
    %478 = arith.mulf %477, %13 : vector<1x4xf32>
    %479 = arith.addf %478, %14 : vector<1x4xf32>
    %480 = vector.shape_cast %479 : vector<1x4xf32> to vector<4xf32>
    %c0_93 = arith.constant 0 : index
    %c2 = arith.constant 2 : index
    %c0_94 = arith.constant 0 : index
    %481 = vector.load %arg17[%c0_93, %c2, %c0_94] : memref<1x8x4xf32, #tpu.memory_space<vmem>>, vector<1x1x4xf32>
    %482 = vector.shape_cast %481 : vector<1x1x4xf32> to vector<4xf32>
    %483 = vector.shape_cast %480 : vector<4xf32> to vector<1x1x4xf32>
    tpu.vector_store %arg17[%c0_93, %c2, %c0_94], %483 {strides = array<i32>} : memref<1x8x4xf32, #tpu.memory_space<vmem>>, vector<1x1x4xf32>,
    %484 = vector.extract_strided_slice %35 {offsets = [3, 0], sizes = [1, 32], strides = [1, 1]} : vector<8x32xf32> to vector<1x32xf32>
    %485 = vector.extract_strided_slice %41 {offsets = [3, 0], sizes = [1, 32], strides = [1, 1]} : vector<8x32xf32> to vector<1x32xf32>
    %486 = vector.shape_cast %476 : vector<1x32xf32> to vector<1x32x1xf32>
    %487 = vector.shape_cast %6 : vector<32x32xf32> to vector<1x32x32xf32>
    %488 = vector.broadcast %486 : vector<1x32x1xf32> to vector<1x32x32xf32>
    %489 = arith.mulf %487, %488 : vector<1x32x32xf32>
    %490 = vector.shape_cast %7 : vector<32x32xf32> to vector<1x32x32xf32>
    %491 = arith.subf %489, %490 : vector<1x32x32xf32>
    %492 = math.tanh %491 : vector<1x32x32xf32>
    %493 = vector.shape_cast %8 : vector<32x32xf32> to vector<1x32x32xf32>
    %494 = arith.mulf %493, %492 : vector<1x32x32xf32>
    %cst_95 = arith.constant dense<0.000000e+00> : vector<1x32xf32>
    %495 = vector.multi_reduction <add>, %494, %cst_95 [1] : vector<1x32x32xf32> to vector<1x32xf32>
    %496 = vector.shape_cast %9 : vector<32x32xf32> to vector<1x32x32xf32>
    %497 = arith.mulf %496, %492 : vector<1x32x32xf32>
    %cst_96 = arith.constant dense<0.000000e+00> : vector<1x32xf32>
    %498 = vector.multi_reduction <add>, %497, %cst_96 [1] : vector<1x32x32xf32> to vector<1x32xf32>
    %499 = arith.mulf %12, %476 : vector<1x32xf32>
    %500 = arith.addf %499, %495 : vector<1x32xf32>
    %501 = arith.addf %500, %484 : vector<1x32xf32>
    %502 = arith.addf %498, %485 : vector<1x32xf32>
    %503 = tpu.reciprocal %502 {approx = true} : vector<1x32xf32> -> vector<1x32xf32>
    %504 = arith.mulf %502, %503 : vector<1x32xf32>
    %cst_97 = arith.constant 2.000000e+00 : f32
    %505 = vector.broadcast %cst_97 : f32 to vector<1x32xf32>
    %506 = arith.subf %505, %504 : vector<1x32xf32>
    %507 = arith.mulf %503, %506 : vector<1x32xf32>
    %508 = arith.mulf %501, %507 : vector<1x32xf32>
    %509 = vector.shape_cast %508 : vector<1x32xf32> to vector<1x32x1xf32>
    %510 = vector.shape_cast %6 : vector<32x32xf32> to vector<1x32x32xf32>
    %511 = vector.broadcast %509 : vector<1x32x1xf32> to vector<1x32x32xf32>
    %512 = arith.mulf %510, %511 : vector<1x32x32xf32>
    %513 = vector.shape_cast %7 : vector<32x32xf32> to vector<1x32x32xf32>
    %514 = arith.subf %512, %513 : vector<1x32x32xf32>
    %515 = math.tanh %514 : vector<1x32x32xf32>
    %516 = vector.shape_cast %8 : vector<32x32xf32> to vector<1x32x32xf32>
    %517 = arith.mulf %516, %515 : vector<1x32x32xf32>
    %cst_98 = arith.constant dense<0.000000e+00> : vector<1x32xf32>
    %518 = vector.multi_reduction <add>, %517, %cst_98 [1] : vector<1x32x32xf32> to vector<1x32xf32>
    %519 = vector.shape_cast %9 : vector<32x32xf32> to vector<1x32x32xf32>
    %520 = arith.mulf %519, %515 : vector<1x32x32xf32>
    %cst_99 = arith.constant dense<0.000000e+00> : vector<1x32xf32>
    %521 = vector.multi_reduction <add>, %520, %cst_99 [1] : vector<1x32x32xf32> to vector<1x32xf32>
    %522 = arith.mulf %12, %508 : vector<1x32xf32>
    %523 = arith.addf %522, %518 : vector<1x32xf32>
    %524 = arith.addf %523, %484 : vector<1x32xf32>
    %525 = arith.addf %521, %485 : vector<1x32xf32>
    %526 = tpu.reciprocal %525 {approx = true} : vector<1x32xf32> -> vector<1x32xf32>
    %527 = arith.mulf %525, %526 : vector<1x32xf32>
    %cst_100 = arith.constant 2.000000e+00 : f32
    %528 = vector.broadcast %cst_100 : f32 to vector<1x32xf32>
    %529 = arith.subf %528, %527 : vector<1x32xf32>
    %530 = arith.mulf %526, %529 : vector<1x32xf32>
    %531 = arith.mulf %524, %530 : vector<1x32xf32>
    %532 = vector.shape_cast %531 : vector<1x32xf32> to vector<1x32x1xf32>
    %533 = vector.shape_cast %6 : vector<32x32xf32> to vector<1x32x32xf32>
    %534 = vector.broadcast %532 : vector<1x32x1xf32> to vector<1x32x32xf32>
    %535 = arith.mulf %533, %534 : vector<1x32x32xf32>
    %536 = vector.shape_cast %7 : vector<32x32xf32> to vector<1x32x32xf32>
    %537 = arith.subf %535, %536 : vector<1x32x32xf32>
    %538 = math.tanh %537 : vector<1x32x32xf32>
    %539 = vector.shape_cast %8 : vector<32x32xf32> to vector<1x32x32xf32>
    %540 = arith.mulf %539, %538 : vector<1x32x32xf32>
    %cst_101 = arith.constant dense<0.000000e+00> : vector<1x32xf32>
    %541 = vector.multi_reduction <add>, %540, %cst_101 [1] : vector<1x32x32xf32> to vector<1x32xf32>
    %542 = vector.shape_cast %9 : vector<32x32xf32> to vector<1x32x32xf32>
    %543 = arith.mulf %542, %538 : vector<1x32x32xf32>
    %cst_102 = arith.constant dense<0.000000e+00> : vector<1x32xf32>
    %544 = vector.multi_reduction <add>, %543, %cst_102 [1] : vector<1x32x32xf32> to vector<1x32xf32>
    %545 = arith.mulf %12, %531 : vector<1x32xf32>
    %546 = arith.addf %545, %541 : vector<1x32xf32>
    %547 = arith.addf %546, %484 : vector<1x32xf32>
    %548 = arith.addf %544, %485 : vector<1x32xf32>
    %549 = tpu.reciprocal %548 {approx = true} : vector<1x32xf32> -> vector<1x32xf32>
    %550 = arith.mulf %548, %549 : vector<1x32xf32>
    %cst_103 = arith.constant 2.000000e+00 : f32
    %551 = vector.broadcast %cst_103 : f32 to vector<1x32xf32>
    %552 = arith.subf %551, %550 : vector<1x32xf32>
    %553 = arith.mulf %549, %552 : vector<1x32xf32>
    %554 = arith.mulf %547, %553 : vector<1x32xf32>
    %555 = vector.shape_cast %554 : vector<1x32xf32> to vector<1x32x1xf32>
    %556 = vector.shape_cast %6 : vector<32x32xf32> to vector<1x32x32xf32>
    %557 = vector.broadcast %555 : vector<1x32x1xf32> to vector<1x32x32xf32>
    %558 = arith.mulf %556, %557 : vector<1x32x32xf32>
    %559 = vector.shape_cast %7 : vector<32x32xf32> to vector<1x32x32xf32>
    %560 = arith.subf %558, %559 : vector<1x32x32xf32>
    %561 = math.tanh %560 : vector<1x32x32xf32>
    %562 = vector.shape_cast %8 : vector<32x32xf32> to vector<1x32x32xf32>
    %563 = arith.mulf %562, %561 : vector<1x32x32xf32>
    %cst_104 = arith.constant dense<0.000000e+00> : vector<1x32xf32>
    %564 = vector.multi_reduction <add>, %563, %cst_104 [1] : vector<1x32x32xf32> to vector<1x32xf32>
    %565 = vector.shape_cast %9 : vector<32x32xf32> to vector<1x32x32xf32>
    %566 = arith.mulf %565, %561 : vector<1x32x32xf32>
    %cst_105 = arith.constant dense<0.000000e+00> : vector<1x32xf32>
    %567 = vector.multi_reduction <add>, %566, %cst_105 [1] : vector<1x32x32xf32> to vector<1x32xf32>
    %568 = arith.mulf %12, %554 : vector<1x32xf32>
    %569 = arith.addf %568, %564 : vector<1x32xf32>
    %570 = arith.addf %569, %484 : vector<1x32xf32>
    %571 = arith.addf %567, %485 : vector<1x32xf32>
    %572 = tpu.reciprocal %571 {approx = true} : vector<1x32xf32> -> vector<1x32xf32>
    %573 = arith.mulf %571, %572 : vector<1x32xf32>
    %cst_106 = arith.constant 2.000000e+00 : f32
    %574 = vector.broadcast %cst_106 : f32 to vector<1x32xf32>
    %575 = arith.subf %574, %573 : vector<1x32xf32>
    %576 = arith.mulf %572, %575 : vector<1x32xf32>
    %577 = arith.mulf %570, %576 : vector<1x32xf32>
    %578 = vector.shape_cast %577 : vector<1x32xf32> to vector<1x32x1xf32>
    %579 = vector.shape_cast %6 : vector<32x32xf32> to vector<1x32x32xf32>
    %580 = vector.broadcast %578 : vector<1x32x1xf32> to vector<1x32x32xf32>
    %581 = arith.mulf %579, %580 : vector<1x32x32xf32>
    %582 = vector.shape_cast %7 : vector<32x32xf32> to vector<1x32x32xf32>
    %583 = arith.subf %581, %582 : vector<1x32x32xf32>
    %584 = math.tanh %583 : vector<1x32x32xf32>
    %585 = vector.shape_cast %8 : vector<32x32xf32> to vector<1x32x32xf32>
    %586 = arith.mulf %585, %584 : vector<1x32x32xf32>
    %cst_107 = arith.constant dense<0.000000e+00> : vector<1x32xf32>
    %587 = vector.multi_reduction <add>, %586, %cst_107 [1] : vector<1x32x32xf32> to vector<1x32xf32>
    %588 = vector.shape_cast %9 : vector<32x32xf32> to vector<1x32x32xf32>
    %589 = arith.mulf %588, %584 : vector<1x32x32xf32>
    %cst_108 = arith.constant dense<0.000000e+00> : vector<1x32xf32>
    %590 = vector.multi_reduction <add>, %589, %cst_108 [1] : vector<1x32x32xf32> to vector<1x32xf32>
    %591 = arith.mulf %12, %577 : vector<1x32xf32>
    %592 = arith.addf %591, %587 : vector<1x32xf32>
    %593 = arith.addf %592, %484 : vector<1x32xf32>
    %594 = arith.addf %590, %485 : vector<1x32xf32>
    %595 = tpu.reciprocal %594 {approx = true} : vector<1x32xf32> -> vector<1x32xf32>
    %596 = arith.mulf %594, %595 : vector<1x32xf32>
    %cst_109 = arith.constant 2.000000e+00 : f32
    %597 = vector.broadcast %cst_109 : f32 to vector<1x32xf32>
    %598 = arith.subf %597, %596 : vector<1x32xf32>
    %599 = arith.mulf %595, %598 : vector<1x32xf32>
    %600 = arith.mulf %593, %599 : vector<1x32xf32>
    %601 = vector.shape_cast %600 : vector<1x32xf32> to vector<1x32x1xf32>
    %602 = vector.shape_cast %6 : vector<32x32xf32> to vector<1x32x32xf32>
    %603 = vector.broadcast %601 : vector<1x32x1xf32> to vector<1x32x32xf32>
    %604 = arith.mulf %602, %603 : vector<1x32x32xf32>
    %605 = vector.shape_cast %7 : vector<32x32xf32> to vector<1x32x32xf32>
    %606 = arith.subf %604, %605 : vector<1x32x32xf32>
    %607 = math.tanh %606 : vector<1x32x32xf32>
    %608 = vector.shape_cast %8 : vector<32x32xf32> to vector<1x32x32xf32>
    %609 = arith.mulf %608, %607 : vector<1x32x32xf32>
    %cst_110 = arith.constant dense<0.000000e+00> : vector<1x32xf32>
    %610 = vector.multi_reduction <add>, %609, %cst_110 [1] : vector<1x32x32xf32> to vector<1x32xf32>
    %611 = vector.shape_cast %9 : vector<32x32xf32> to vector<1x32x32xf32>
    %612 = arith.mulf %611, %607 : vector<1x32x32xf32>
    %cst_111 = arith.constant dense<0.000000e+00> : vector<1x32xf32>
    %613 = vector.multi_reduction <add>, %612, %cst_111 [1] : vector<1x32x32xf32> to vector<1x32xf32>
    %614 = arith.mulf %12, %600 : vector<1x32xf32>
    %615 = arith.addf %614, %610 : vector<1x32xf32>
    %616 = arith.addf %615, %484 : vector<1x32xf32>
    %617 = arith.addf %613, %485 : vector<1x32xf32>
    %618 = tpu.reciprocal %617 {approx = true} : vector<1x32xf32> -> vector<1x32xf32>
    %619 = arith.mulf %617, %618 : vector<1x32xf32>
    %cst_112 = arith.constant 2.000000e+00 : f32
    %620 = vector.broadcast %cst_112 : f32 to vector<1x32xf32>
    %621 = arith.subf %620, %619 : vector<1x32xf32>
    %622 = arith.mulf %618, %621 : vector<1x32xf32>
    %623 = arith.mulf %616, %622 : vector<1x32xf32>
    %624 = vector.extract_strided_slice %623 {offsets = [0, 0], sizes = [1, 4], strides = [1, 1]} : vector<1x32xf32> to vector<1x4xf32>
    %625 = arith.mulf %624, %13 : vector<1x4xf32>
    %626 = arith.addf %625, %14 : vector<1x4xf32>
    %627 = vector.shape_cast %626 : vector<1x4xf32> to vector<4xf32>
    %c0_113 = arith.constant 0 : index
    %c3 = arith.constant 3 : index
    %c0_114 = arith.constant 0 : index
    %628 = vector.load %arg17[%c0_113, %c3, %c0_114] : memref<1x8x4xf32, #tpu.memory_space<vmem>>, vector<1x1x4xf32>
    %629 = vector.shape_cast %628 : vector<1x1x4xf32> to vector<4xf32>
    %630 = vector.shape_cast %627 : vector<4xf32> to vector<1x1x4xf32>
    tpu.vector_store %arg17[%c0_113, %c3, %c0_114], %630 {strides = array<i32>} : memref<1x8x4xf32, #tpu.memory_space<vmem>>, vector<1x1x4xf32>,
    %631 = vector.extract_strided_slice %35 {offsets = [4, 0], sizes = [1, 32], strides = [1, 1]} : vector<8x32xf32> to vector<1x32xf32>
    %632 = vector.extract_strided_slice %41 {offsets = [4, 0], sizes = [1, 32], strides = [1, 1]} : vector<8x32xf32> to vector<1x32xf32>
    %633 = vector.shape_cast %623 : vector<1x32xf32> to vector<1x32x1xf32>
    %634 = vector.shape_cast %6 : vector<32x32xf32> to vector<1x32x32xf32>
    %635 = vector.broadcast %633 : vector<1x32x1xf32> to vector<1x32x32xf32>
    %636 = arith.mulf %634, %635 : vector<1x32x32xf32>
    %637 = vector.shape_cast %7 : vector<32x32xf32> to vector<1x32x32xf32>
    %638 = arith.subf %636, %637 : vector<1x32x32xf32>
    %639 = math.tanh %638 : vector<1x32x32xf32>
    %640 = vector.shape_cast %8 : vector<32x32xf32> to vector<1x32x32xf32>
    %641 = arith.mulf %640, %639 : vector<1x32x32xf32>
    %cst_115 = arith.constant dense<0.000000e+00> : vector<1x32xf32>
    %642 = vector.multi_reduction <add>, %641, %cst_115 [1] : vector<1x32x32xf32> to vector<1x32xf32>
    %643 = vector.shape_cast %9 : vector<32x32xf32> to vector<1x32x32xf32>
    %644 = arith.mulf %643, %639 : vector<1x32x32xf32>
    %cst_116 = arith.constant dense<0.000000e+00> : vector<1x32xf32>
    %645 = vector.multi_reduction <add>, %644, %cst_116 [1] : vector<1x32x32xf32> to vector<1x32xf32>
    %646 = arith.mulf %12, %623 : vector<1x32xf32>
    %647 = arith.addf %646, %642 : vector<1x32xf32>
    %648 = arith.addf %647, %631 : vector<1x32xf32>
    %649 = arith.addf %645, %632 : vector<1x32xf32>
    %650 = tpu.reciprocal %649 {approx = true} : vector<1x32xf32> -> vector<1x32xf32>
    %651 = arith.mulf %649, %650 : vector<1x32xf32>
    %cst_117 = arith.constant 2.000000e+00 : f32
    %652 = vector.broadcast %cst_117 : f32 to vector<1x32xf32>
    %653 = arith.subf %652, %651 : vector<1x32xf32>
    %654 = arith.mulf %650, %653 : vector<1x32xf32>
    %655 = arith.mulf %648, %654 : vector<1x32xf32>
    %656 = vector.shape_cast %655 : vector<1x32xf32> to vector<1x32x1xf32>
    %657 = vector.shape_cast %6 : vector<32x32xf32> to vector<1x32x32xf32>
    %658 = vector.broadcast %656 : vector<1x32x1xf32> to vector<1x32x32xf32>
    %659 = arith.mulf %657, %658 : vector<1x32x32xf32>
    %660 = vector.shape_cast %7 : vector<32x32xf32> to vector<1x32x32xf32>
    %661 = arith.subf %659, %660 : vector<1x32x32xf32>
    %662 = math.tanh %661 : vector<1x32x32xf32>
    %663 = vector.shape_cast %8 : vector<32x32xf32> to vector<1x32x32xf32>
    %664 = arith.mulf %663, %662 : vector<1x32x32xf32>
    %cst_118 = arith.constant dense<0.000000e+00> : vector<1x32xf32>
    %665 = vector.multi_reduction <add>, %664, %cst_118 [1] : vector<1x32x32xf32> to vector<1x32xf32>
    %666 = vector.shape_cast %9 : vector<32x32xf32> to vector<1x32x32xf32>
    %667 = arith.mulf %666, %662 : vector<1x32x32xf32>
    %cst_119 = arith.constant dense<0.000000e+00> : vector<1x32xf32>
    %668 = vector.multi_reduction <add>, %667, %cst_119 [1] : vector<1x32x32xf32> to vector<1x32xf32>
    %669 = arith.mulf %12, %655 : vector<1x32xf32>
    %670 = arith.addf %669, %665 : vector<1x32xf32>
    %671 = arith.addf %670, %631 : vector<1x32xf32>
    %672 = arith.addf %668, %632 : vector<1x32xf32>
    %673 = tpu.reciprocal %672 {approx = true} : vector<1x32xf32> -> vector<1x32xf32>
    %674 = arith.mulf %672, %673 : vector<1x32xf32>
    %cst_120 = arith.constant 2.000000e+00 : f32
    %675 = vector.broadcast %cst_120 : f32 to vector<1x32xf32>
    %676 = arith.subf %675, %674 : vector<1x32xf32>
    %677 = arith.mulf %673, %676 : vector<1x32xf32>
    %678 = arith.mulf %671, %677 : vector<1x32xf32>
    %679 = vector.shape_cast %678 : vector<1x32xf32> to vector<1x32x1xf32>
    %680 = vector.shape_cast %6 : vector<32x32xf32> to vector<1x32x32xf32>
    %681 = vector.broadcast %679 : vector<1x32x1xf32> to vector<1x32x32xf32>
    %682 = arith.mulf %680, %681 : vector<1x32x32xf32>
    %683 = vector.shape_cast %7 : vector<32x32xf32> to vector<1x32x32xf32>
    %684 = arith.subf %682, %683 : vector<1x32x32xf32>
    %685 = math.tanh %684 : vector<1x32x32xf32>
    %686 = vector.shape_cast %8 : vector<32x32xf32> to vector<1x32x32xf32>
    %687 = arith.mulf %686, %685 : vector<1x32x32xf32>
    %cst_121 = arith.constant dense<0.000000e+00> : vector<1x32xf32>
    %688 = vector.multi_reduction <add>, %687, %cst_121 [1] : vector<1x32x32xf32> to vector<1x32xf32>
    %689 = vector.shape_cast %9 : vector<32x32xf32> to vector<1x32x32xf32>
    %690 = arith.mulf %689, %685 : vector<1x32x32xf32>
    %cst_122 = arith.constant dense<0.000000e+00> : vector<1x32xf32>
    %691 = vector.multi_reduction <add>, %690, %cst_122 [1] : vector<1x32x32xf32> to vector<1x32xf32>
    %692 = arith.mulf %12, %678 : vector<1x32xf32>
    %693 = arith.addf %692, %688 : vector<1x32xf32>
    %694 = arith.addf %693, %631 : vector<1x32xf32>
    %695 = arith.addf %691, %632 : vector<1x32xf32>
    %696 = tpu.reciprocal %695 {approx = true} : vector<1x32xf32> -> vector<1x32xf32>
    %697 = arith.mulf %695, %696 : vector<1x32xf32>
    %cst_123 = arith.constant 2.000000e+00 : f32
    %698 = vector.broadcast %cst_123 : f32 to vector<1x32xf32>
    %699 = arith.subf %698, %697 : vector<1x32xf32>
    %700 = arith.mulf %696, %699 : vector<1x32xf32>
    %701 = arith.mulf %694, %700 : vector<1x32xf32>
    %702 = vector.shape_cast %701 : vector<1x32xf32> to vector<1x32x1xf32>
    %703 = vector.shape_cast %6 : vector<32x32xf32> to vector<1x32x32xf32>
    %704 = vector.broadcast %702 : vector<1x32x1xf32> to vector<1x32x32xf32>
    %705 = arith.mulf %703, %704 : vector<1x32x32xf32>
    %706 = vector.shape_cast %7 : vector<32x32xf32> to vector<1x32x32xf32>
    %707 = arith.subf %705, %706 : vector<1x32x32xf32>
    %708 = math.tanh %707 : vector<1x32x32xf32>
    %709 = vector.shape_cast %8 : vector<32x32xf32> to vector<1x32x32xf32>
    %710 = arith.mulf %709, %708 : vector<1x32x32xf32>
    %cst_124 = arith.constant dense<0.000000e+00> : vector<1x32xf32>
    %711 = vector.multi_reduction <add>, %710, %cst_124 [1] : vector<1x32x32xf32> to vector<1x32xf32>
    %712 = vector.shape_cast %9 : vector<32x32xf32> to vector<1x32x32xf32>
    %713 = arith.mulf %712, %708 : vector<1x32x32xf32>
    %cst_125 = arith.constant dense<0.000000e+00> : vector<1x32xf32>
    %714 = vector.multi_reduction <add>, %713, %cst_125 [1] : vector<1x32x32xf32> to vector<1x32xf32>
    %715 = arith.mulf %12, %701 : vector<1x32xf32>
    %716 = arith.addf %715, %711 : vector<1x32xf32>
    %717 = arith.addf %716, %631 : vector<1x32xf32>
    %718 = arith.addf %714, %632 : vector<1x32xf32>
    %719 = tpu.reciprocal %718 {approx = true} : vector<1x32xf32> -> vector<1x32xf32>
    %720 = arith.mulf %718, %719 : vector<1x32xf32>
    %cst_126 = arith.constant 2.000000e+00 : f32
    %721 = vector.broadcast %cst_126 : f32 to vector<1x32xf32>
    %722 = arith.subf %721, %720 : vector<1x32xf32>
    %723 = arith.mulf %719, %722 : vector<1x32xf32>
    %724 = arith.mulf %717, %723 : vector<1x32xf32>
    %725 = vector.shape_cast %724 : vector<1x32xf32> to vector<1x32x1xf32>
    %726 = vector.shape_cast %6 : vector<32x32xf32> to vector<1x32x32xf32>
    %727 = vector.broadcast %725 : vector<1x32x1xf32> to vector<1x32x32xf32>
    %728 = arith.mulf %726, %727 : vector<1x32x32xf32>
    %729 = vector.shape_cast %7 : vector<32x32xf32> to vector<1x32x32xf32>
    %730 = arith.subf %728, %729 : vector<1x32x32xf32>
    %731 = math.tanh %730 : vector<1x32x32xf32>
    %732 = vector.shape_cast %8 : vector<32x32xf32> to vector<1x32x32xf32>
    %733 = arith.mulf %732, %731 : vector<1x32x32xf32>
    %cst_127 = arith.constant dense<0.000000e+00> : vector<1x32xf32>
    %734 = vector.multi_reduction <add>, %733, %cst_127 [1] : vector<1x32x32xf32> to vector<1x32xf32>
    %735 = vector.shape_cast %9 : vector<32x32xf32> to vector<1x32x32xf32>
    %736 = arith.mulf %735, %731 : vector<1x32x32xf32>
    %cst_128 = arith.constant dense<0.000000e+00> : vector<1x32xf32>
    %737 = vector.multi_reduction <add>, %736, %cst_128 [1] : vector<1x32x32xf32> to vector<1x32xf32>
    %738 = arith.mulf %12, %724 : vector<1x32xf32>
    %739 = arith.addf %738, %734 : vector<1x32xf32>
    %740 = arith.addf %739, %631 : vector<1x32xf32>
    %741 = arith.addf %737, %632 : vector<1x32xf32>
    %742 = tpu.reciprocal %741 {approx = true} : vector<1x32xf32> -> vector<1x32xf32>
    %743 = arith.mulf %741, %742 : vector<1x32xf32>
    %cst_129 = arith.constant 2.000000e+00 : f32
    %744 = vector.broadcast %cst_129 : f32 to vector<1x32xf32>
    %745 = arith.subf %744, %743 : vector<1x32xf32>
    %746 = arith.mulf %742, %745 : vector<1x32xf32>
    %747 = arith.mulf %740, %746 : vector<1x32xf32>
    %748 = vector.shape_cast %747 : vector<1x32xf32> to vector<1x32x1xf32>
    %749 = vector.shape_cast %6 : vector<32x32xf32> to vector<1x32x32xf32>
    %750 = vector.broadcast %748 : vector<1x32x1xf32> to vector<1x32x32xf32>
    %751 = arith.mulf %749, %750 : vector<1x32x32xf32>
    %752 = vector.shape_cast %7 : vector<32x32xf32> to vector<1x32x32xf32>
    %753 = arith.subf %751, %752 : vector<1x32x32xf32>
    %754 = math.tanh %753 : vector<1x32x32xf32>
    %755 = vector.shape_cast %8 : vector<32x32xf32> to vector<1x32x32xf32>
    %756 = arith.mulf %755, %754 : vector<1x32x32xf32>
    %cst_130 = arith.constant dense<0.000000e+00> : vector<1x32xf32>
    %757 = vector.multi_reduction <add>, %756, %cst_130 [1] : vector<1x32x32xf32> to vector<1x32xf32>
    %758 = vector.shape_cast %9 : vector<32x32xf32> to vector<1x32x32xf32>
    %759 = arith.mulf %758, %754 : vector<1x32x32xf32>
    %cst_131 = arith.constant dense<0.000000e+00> : vector<1x32xf32>
    %760 = vector.multi_reduction <add>, %759, %cst_131 [1] : vector<1x32x32xf32> to vector<1x32xf32>
    %761 = arith.mulf %12, %747 : vector<1x32xf32>
    %762 = arith.addf %761, %757 : vector<1x32xf32>
    %763 = arith.addf %762, %631 : vector<1x32xf32>
    %764 = arith.addf %760, %632 : vector<1x32xf32>
    %765 = tpu.reciprocal %764 {approx = true} : vector<1x32xf32> -> vector<1x32xf32>
    %766 = arith.mulf %764, %765 : vector<1x32xf32>
    %cst_132 = arith.constant 2.000000e+00 : f32
    %767 = vector.broadcast %cst_132 : f32 to vector<1x32xf32>
    %768 = arith.subf %767, %766 : vector<1x32xf32>
    %769 = arith.mulf %765, %768 : vector<1x32xf32>
    %770 = arith.mulf %763, %769 : vector<1x32xf32>
    %771 = vector.extract_strided_slice %770 {offsets = [0, 0], sizes = [1, 4], strides = [1, 1]} : vector<1x32xf32> to vector<1x4xf32>
    %772 = arith.mulf %771, %13 : vector<1x4xf32>
    %773 = arith.addf %772, %14 : vector<1x4xf32>
    %774 = vector.shape_cast %773 : vector<1x4xf32> to vector<4xf32>
    %c0_133 = arith.constant 0 : index
    %c4 = arith.constant 4 : index
    %c0_134 = arith.constant 0 : index
    %775 = vector.load %arg17[%c0_133, %c4, %c0_134] : memref<1x8x4xf32, #tpu.memory_space<vmem>>, vector<1x1x4xf32>
    %776 = vector.shape_cast %775 : vector<1x1x4xf32> to vector<4xf32>
    %777 = vector.shape_cast %774 : vector<4xf32> to vector<1x1x4xf32>
    tpu.vector_store %arg17[%c0_133, %c4, %c0_134], %777 {strides = array<i32>} : memref<1x8x4xf32, #tpu.memory_space<vmem>>, vector<1x1x4xf32>,
    %778 = vector.extract_strided_slice %35 {offsets = [5, 0], sizes = [1, 32], strides = [1, 1]} : vector<8x32xf32> to vector<1x32xf32>
    %779 = vector.extract_strided_slice %41 {offsets = [5, 0], sizes = [1, 32], strides = [1, 1]} : vector<8x32xf32> to vector<1x32xf32>
    %780 = vector.shape_cast %770 : vector<1x32xf32> to vector<1x32x1xf32>
    %781 = vector.shape_cast %6 : vector<32x32xf32> to vector<1x32x32xf32>
    %782 = vector.broadcast %780 : vector<1x32x1xf32> to vector<1x32x32xf32>
    %783 = arith.mulf %781, %782 : vector<1x32x32xf32>
    %784 = vector.shape_cast %7 : vector<32x32xf32> to vector<1x32x32xf32>
    %785 = arith.subf %783, %784 : vector<1x32x32xf32>
    %786 = math.tanh %785 : vector<1x32x32xf32>
    %787 = vector.shape_cast %8 : vector<32x32xf32> to vector<1x32x32xf32>
    %788 = arith.mulf %787, %786 : vector<1x32x32xf32>
    %cst_135 = arith.constant dense<0.000000e+00> : vector<1x32xf32>
    %789 = vector.multi_reduction <add>, %788, %cst_135 [1] : vector<1x32x32xf32> to vector<1x32xf32>
    %790 = vector.shape_cast %9 : vector<32x32xf32> to vector<1x32x32xf32>
    %791 = arith.mulf %790, %786 : vector<1x32x32xf32>
    %cst_136 = arith.constant dense<0.000000e+00> : vector<1x32xf32>
    %792 = vector.multi_reduction <add>, %791, %cst_136 [1] : vector<1x32x32xf32> to vector<1x32xf32>
    %793 = arith.mulf %12, %770 : vector<1x32xf32>
    %794 = arith.addf %793, %789 : vector<1x32xf32>
    %795 = arith.addf %794, %778 : vector<1x32xf32>
    %796 = arith.addf %792, %779 : vector<1x32xf32>
    %797 = tpu.reciprocal %796 {approx = true} : vector<1x32xf32> -> vector<1x32xf32>
    %798 = arith.mulf %796, %797 : vector<1x32xf32>
    %cst_137 = arith.constant 2.000000e+00 : f32
    %799 = vector.broadcast %cst_137 : f32 to vector<1x32xf32>
    %800 = arith.subf %799, %798 : vector<1x32xf32>
    %801 = arith.mulf %797, %800 : vector<1x32xf32>
    %802 = arith.mulf %795, %801 : vector<1x32xf32>
    %803 = vector.shape_cast %802 : vector<1x32xf32> to vector<1x32x1xf32>
    %804 = vector.shape_cast %6 : vector<32x32xf32> to vector<1x32x32xf32>
    %805 = vector.broadcast %803 : vector<1x32x1xf32> to vector<1x32x32xf32>
    %806 = arith.mulf %804, %805 : vector<1x32x32xf32>
    %807 = vector.shape_cast %7 : vector<32x32xf32> to vector<1x32x32xf32>
    %808 = arith.subf %806, %807 : vector<1x32x32xf32>
    %809 = math.tanh %808 : vector<1x32x32xf32>
    %810 = vector.shape_cast %8 : vector<32x32xf32> to vector<1x32x32xf32>
    %811 = arith.mulf %810, %809 : vector<1x32x32xf32>
    %cst_138 = arith.constant dense<0.000000e+00> : vector<1x32xf32>
    %812 = vector.multi_reduction <add>, %811, %cst_138 [1] : vector<1x32x32xf32> to vector<1x32xf32>
    %813 = vector.shape_cast %9 : vector<32x32xf32> to vector<1x32x32xf32>
    %814 = arith.mulf %813, %809 : vector<1x32x32xf32>
    %cst_139 = arith.constant dense<0.000000e+00> : vector<1x32xf32>
    %815 = vector.multi_reduction <add>, %814, %cst_139 [1] : vector<1x32x32xf32> to vector<1x32xf32>
    %816 = arith.mulf %12, %802 : vector<1x32xf32>
    %817 = arith.addf %816, %812 : vector<1x32xf32>
    %818 = arith.addf %817, %778 : vector<1x32xf32>
    %819 = arith.addf %815, %779 : vector<1x32xf32>
    %820 = tpu.reciprocal %819 {approx = true} : vector<1x32xf32> -> vector<1x32xf32>
    %821 = arith.mulf %819, %820 : vector<1x32xf32>
    %cst_140 = arith.constant 2.000000e+00 : f32
    %822 = vector.broadcast %cst_140 : f32 to vector<1x32xf32>
    %823 = arith.subf %822, %821 : vector<1x32xf32>
    %824 = arith.mulf %820, %823 : vector<1x32xf32>
    %825 = arith.mulf %818, %824 : vector<1x32xf32>
    %826 = vector.shape_cast %825 : vector<1x32xf32> to vector<1x32x1xf32>
    %827 = vector.shape_cast %6 : vector<32x32xf32> to vector<1x32x32xf32>
    %828 = vector.broadcast %826 : vector<1x32x1xf32> to vector<1x32x32xf32>
    %829 = arith.mulf %827, %828 : vector<1x32x32xf32>
    %830 = vector.shape_cast %7 : vector<32x32xf32> to vector<1x32x32xf32>
    %831 = arith.subf %829, %830 : vector<1x32x32xf32>
    %832 = math.tanh %831 : vector<1x32x32xf32>
    %833 = vector.shape_cast %8 : vector<32x32xf32> to vector<1x32x32xf32>
    %834 = arith.mulf %833, %832 : vector<1x32x32xf32>
    %cst_141 = arith.constant dense<0.000000e+00> : vector<1x32xf32>
    %835 = vector.multi_reduction <add>, %834, %cst_141 [1] : vector<1x32x32xf32> to vector<1x32xf32>
    %836 = vector.shape_cast %9 : vector<32x32xf32> to vector<1x32x32xf32>
    %837 = arith.mulf %836, %832 : vector<1x32x32xf32>
    %cst_142 = arith.constant dense<0.000000e+00> : vector<1x32xf32>
    %838 = vector.multi_reduction <add>, %837, %cst_142 [1] : vector<1x32x32xf32> to vector<1x32xf32>
    %839 = arith.mulf %12, %825 : vector<1x32xf32>
    %840 = arith.addf %839, %835 : vector<1x32xf32>
    %841 = arith.addf %840, %778 : vector<1x32xf32>
    %842 = arith.addf %838, %779 : vector<1x32xf32>
    %843 = tpu.reciprocal %842 {approx = true} : vector<1x32xf32> -> vector<1x32xf32>
    %844 = arith.mulf %842, %843 : vector<1x32xf32>
    %cst_143 = arith.constant 2.000000e+00 : f32
    %845 = vector.broadcast %cst_143 : f32 to vector<1x32xf32>
    %846 = arith.subf %845, %844 : vector<1x32xf32>
    %847 = arith.mulf %843, %846 : vector<1x32xf32>
    %848 = arith.mulf %841, %847 : vector<1x32xf32>
    %849 = vector.shape_cast %848 : vector<1x32xf32> to vector<1x32x1xf32>
    %850 = vector.shape_cast %6 : vector<32x32xf32> to vector<1x32x32xf32>
    %851 = vector.broadcast %849 : vector<1x32x1xf32> to vector<1x32x32xf32>
    %852 = arith.mulf %850, %851 : vector<1x32x32xf32>
    %853 = vector.shape_cast %7 : vector<32x32xf32> to vector<1x32x32xf32>
    %854 = arith.subf %852, %853 : vector<1x32x32xf32>
    %855 = math.tanh %854 : vector<1x32x32xf32>
    %856 = vector.shape_cast %8 : vector<32x32xf32> to vector<1x32x32xf32>
    %857 = arith.mulf %856, %855 : vector<1x32x32xf32>
    %cst_144 = arith.constant dense<0.000000e+00> : vector<1x32xf32>
    %858 = vector.multi_reduction <add>, %857, %cst_144 [1] : vector<1x32x32xf32> to vector<1x32xf32>
    %859 = vector.shape_cast %9 : vector<32x32xf32> to vector<1x32x32xf32>
    %860 = arith.mulf %859, %855 : vector<1x32x32xf32>
    %cst_145 = arith.constant dense<0.000000e+00> : vector<1x32xf32>
    %861 = vector.multi_reduction <add>, %860, %cst_145 [1] : vector<1x32x32xf32> to vector<1x32xf32>
    %862 = arith.mulf %12, %848 : vector<1x32xf32>
    %863 = arith.addf %862, %858 : vector<1x32xf32>
    %864 = arith.addf %863, %778 : vector<1x32xf32>
    %865 = arith.addf %861, %779 : vector<1x32xf32>
    %866 = tpu.reciprocal %865 {approx = true} : vector<1x32xf32> -> vector<1x32xf32>
    %867 = arith.mulf %865, %866 : vector<1x32xf32>
    %cst_146 = arith.constant 2.000000e+00 : f32
    %868 = vector.broadcast %cst_146 : f32 to vector<1x32xf32>
    %869 = arith.subf %868, %867 : vector<1x32xf32>
    %870 = arith.mulf %866, %869 : vector<1x32xf32>
    %871 = arith.mulf %864, %870 : vector<1x32xf32>
    %872 = vector.shape_cast %871 : vector<1x32xf32> to vector<1x32x1xf32>
    %873 = vector.shape_cast %6 : vector<32x32xf32> to vector<1x32x32xf32>
    %874 = vector.broadcast %872 : vector<1x32x1xf32> to vector<1x32x32xf32>
    %875 = arith.mulf %873, %874 : vector<1x32x32xf32>
    %876 = vector.shape_cast %7 : vector<32x32xf32> to vector<1x32x32xf32>
    %877 = arith.subf %875, %876 : vector<1x32x32xf32>
    %878 = math.tanh %877 : vector<1x32x32xf32>
    %879 = vector.shape_cast %8 : vector<32x32xf32> to vector<1x32x32xf32>
    %880 = arith.mulf %879, %878 : vector<1x32x32xf32>
    %cst_147 = arith.constant dense<0.000000e+00> : vector<1x32xf32>
    %881 = vector.multi_reduction <add>, %880, %cst_147 [1] : vector<1x32x32xf32> to vector<1x32xf32>
    %882 = vector.shape_cast %9 : vector<32x32xf32> to vector<1x32x32xf32>
    %883 = arith.mulf %882, %878 : vector<1x32x32xf32>
    %cst_148 = arith.constant dense<0.000000e+00> : vector<1x32xf32>
    %884 = vector.multi_reduction <add>, %883, %cst_148 [1] : vector<1x32x32xf32> to vector<1x32xf32>
    %885 = arith.mulf %12, %871 : vector<1x32xf32>
    %886 = arith.addf %885, %881 : vector<1x32xf32>
    %887 = arith.addf %886, %778 : vector<1x32xf32>
    %888 = arith.addf %884, %779 : vector<1x32xf32>
    %889 = tpu.reciprocal %888 {approx = true} : vector<1x32xf32> -> vector<1x32xf32>
    %890 = arith.mulf %888, %889 : vector<1x32xf32>
    %cst_149 = arith.constant 2.000000e+00 : f32
    %891 = vector.broadcast %cst_149 : f32 to vector<1x32xf32>
    %892 = arith.subf %891, %890 : vector<1x32xf32>
    %893 = arith.mulf %889, %892 : vector<1x32xf32>
    %894 = arith.mulf %887, %893 : vector<1x32xf32>
    %895 = vector.shape_cast %894 : vector<1x32xf32> to vector<1x32x1xf32>
    %896 = vector.shape_cast %6 : vector<32x32xf32> to vector<1x32x32xf32>
    %897 = vector.broadcast %895 : vector<1x32x1xf32> to vector<1x32x32xf32>
    %898 = arith.mulf %896, %897 : vector<1x32x32xf32>
    %899 = vector.shape_cast %7 : vector<32x32xf32> to vector<1x32x32xf32>
    %900 = arith.subf %898, %899 : vector<1x32x32xf32>
    %901 = math.tanh %900 : vector<1x32x32xf32>
    %902 = vector.shape_cast %8 : vector<32x32xf32> to vector<1x32x32xf32>
    %903 = arith.mulf %902, %901 : vector<1x32x32xf32>
    %cst_150 = arith.constant dense<0.000000e+00> : vector<1x32xf32>
    %904 = vector.multi_reduction <add>, %903, %cst_150 [1] : vector<1x32x32xf32> to vector<1x32xf32>
    %905 = vector.shape_cast %9 : vector<32x32xf32> to vector<1x32x32xf32>
    %906 = arith.mulf %905, %901 : vector<1x32x32xf32>
    %cst_151 = arith.constant dense<0.000000e+00> : vector<1x32xf32>
    %907 = vector.multi_reduction <add>, %906, %cst_151 [1] : vector<1x32x32xf32> to vector<1x32xf32>
    %908 = arith.mulf %12, %894 : vector<1x32xf32>
    %909 = arith.addf %908, %904 : vector<1x32xf32>
    %910 = arith.addf %909, %778 : vector<1x32xf32>
    %911 = arith.addf %907, %779 : vector<1x32xf32>
    %912 = tpu.reciprocal %911 {approx = true} : vector<1x32xf32> -> vector<1x32xf32>
    %913 = arith.mulf %911, %912 : vector<1x32xf32>
    %cst_152 = arith.constant 2.000000e+00 : f32
    %914 = vector.broadcast %cst_152 : f32 to vector<1x32xf32>
    %915 = arith.subf %914, %913 : vector<1x32xf32>
    %916 = arith.mulf %912, %915 : vector<1x32xf32>
    %917 = arith.mulf %910, %916 : vector<1x32xf32>
    %918 = vector.extract_strided_slice %917 {offsets = [0, 0], sizes = [1, 4], strides = [1, 1]} : vector<1x32xf32> to vector<1x4xf32>
    %919 = arith.mulf %918, %13 : vector<1x4xf32>
    %920 = arith.addf %919, %14 : vector<1x4xf32>
    %921 = vector.shape_cast %920 : vector<1x4xf32> to vector<4xf32>
    %c0_153 = arith.constant 0 : index
    %c5 = arith.constant 5 : index
    %c0_154 = arith.constant 0 : index
    %922 = vector.load %arg17[%c0_153, %c5, %c0_154] : memref<1x8x4xf32, #tpu.memory_space<vmem>>, vector<1x1x4xf32>
    %923 = vector.shape_cast %922 : vector<1x1x4xf32> to vector<4xf32>
    %924 = vector.shape_cast %921 : vector<4xf32> to vector<1x1x4xf32>
    tpu.vector_store %arg17[%c0_153, %c5, %c0_154], %924 {strides = array<i32>} : memref<1x8x4xf32, #tpu.memory_space<vmem>>, vector<1x1x4xf32>,
    %925 = vector.extract_strided_slice %35 {offsets = [6, 0], sizes = [1, 32], strides = [1, 1]} : vector<8x32xf32> to vector<1x32xf32>
    %926 = vector.extract_strided_slice %41 {offsets = [6, 0], sizes = [1, 32], strides = [1, 1]} : vector<8x32xf32> to vector<1x32xf32>
    %927 = vector.shape_cast %917 : vector<1x32xf32> to vector<1x32x1xf32>
    %928 = vector.shape_cast %6 : vector<32x32xf32> to vector<1x32x32xf32>
    %929 = vector.broadcast %927 : vector<1x32x1xf32> to vector<1x32x32xf32>
    %930 = arith.mulf %928, %929 : vector<1x32x32xf32>
    %931 = vector.shape_cast %7 : vector<32x32xf32> to vector<1x32x32xf32>
    %932 = arith.subf %930, %931 : vector<1x32x32xf32>
    %933 = math.tanh %932 : vector<1x32x32xf32>
    %934 = vector.shape_cast %8 : vector<32x32xf32> to vector<1x32x32xf32>
    %935 = arith.mulf %934, %933 : vector<1x32x32xf32>
    %cst_155 = arith.constant dense<0.000000e+00> : vector<1x32xf32>
    %936 = vector.multi_reduction <add>, %935, %cst_155 [1] : vector<1x32x32xf32> to vector<1x32xf32>
    %937 = vector.shape_cast %9 : vector<32x32xf32> to vector<1x32x32xf32>
    %938 = arith.mulf %937, %933 : vector<1x32x32xf32>
    %cst_156 = arith.constant dense<0.000000e+00> : vector<1x32xf32>
    %939 = vector.multi_reduction <add>, %938, %cst_156 [1] : vector<1x32x32xf32> to vector<1x32xf32>
    %940 = arith.mulf %12, %917 : vector<1x32xf32>
    %941 = arith.addf %940, %936 : vector<1x32xf32>
    %942 = arith.addf %941, %925 : vector<1x32xf32>
    %943 = arith.addf %939, %926 : vector<1x32xf32>
    %944 = tpu.reciprocal %943 {approx = true} : vector<1x32xf32> -> vector<1x32xf32>
    %945 = arith.mulf %943, %944 : vector<1x32xf32>
    %cst_157 = arith.constant 2.000000e+00 : f32
    %946 = vector.broadcast %cst_157 : f32 to vector<1x32xf32>
    %947 = arith.subf %946, %945 : vector<1x32xf32>
    %948 = arith.mulf %944, %947 : vector<1x32xf32>
    %949 = arith.mulf %942, %948 : vector<1x32xf32>
    %950 = vector.shape_cast %949 : vector<1x32xf32> to vector<1x32x1xf32>
    %951 = vector.shape_cast %6 : vector<32x32xf32> to vector<1x32x32xf32>
    %952 = vector.broadcast %950 : vector<1x32x1xf32> to vector<1x32x32xf32>
    %953 = arith.mulf %951, %952 : vector<1x32x32xf32>
    %954 = vector.shape_cast %7 : vector<32x32xf32> to vector<1x32x32xf32>
    %955 = arith.subf %953, %954 : vector<1x32x32xf32>
    %956 = math.tanh %955 : vector<1x32x32xf32>
    %957 = vector.shape_cast %8 : vector<32x32xf32> to vector<1x32x32xf32>
    %958 = arith.mulf %957, %956 : vector<1x32x32xf32>
    %cst_158 = arith.constant dense<0.000000e+00> : vector<1x32xf32>
    %959 = vector.multi_reduction <add>, %958, %cst_158 [1] : vector<1x32x32xf32> to vector<1x32xf32>
    %960 = vector.shape_cast %9 : vector<32x32xf32> to vector<1x32x32xf32>
    %961 = arith.mulf %960, %956 : vector<1x32x32xf32>
    %cst_159 = arith.constant dense<0.000000e+00> : vector<1x32xf32>
    %962 = vector.multi_reduction <add>, %961, %cst_159 [1] : vector<1x32x32xf32> to vector<1x32xf32>
    %963 = arith.mulf %12, %949 : vector<1x32xf32>
    %964 = arith.addf %963, %959 : vector<1x32xf32>
    %965 = arith.addf %964, %925 : vector<1x32xf32>
    %966 = arith.addf %962, %926 : vector<1x32xf32>
    %967 = tpu.reciprocal %966 {approx = true} : vector<1x32xf32> -> vector<1x32xf32>
    %968 = arith.mulf %966, %967 : vector<1x32xf32>
    %cst_160 = arith.constant 2.000000e+00 : f32
    %969 = vector.broadcast %cst_160 : f32 to vector<1x32xf32>
    %970 = arith.subf %969, %968 : vector<1x32xf32>
    %971 = arith.mulf %967, %970 : vector<1x32xf32>
    %972 = arith.mulf %965, %971 : vector<1x32xf32>
    %973 = vector.shape_cast %972 : vector<1x32xf32> to vector<1x32x1xf32>
    %974 = vector.shape_cast %6 : vector<32x32xf32> to vector<1x32x32xf32>
    %975 = vector.broadcast %973 : vector<1x32x1xf32> to vector<1x32x32xf32>
    %976 = arith.mulf %974, %975 : vector<1x32x32xf32>
    %977 = vector.shape_cast %7 : vector<32x32xf32> to vector<1x32x32xf32>
    %978 = arith.subf %976, %977 : vector<1x32x32xf32>
    %979 = math.tanh %978 : vector<1x32x32xf32>
    %980 = vector.shape_cast %8 : vector<32x32xf32> to vector<1x32x32xf32>
    %981 = arith.mulf %980, %979 : vector<1x32x32xf32>
    %cst_161 = arith.constant dense<0.000000e+00> : vector<1x32xf32>
    %982 = vector.multi_reduction <add>, %981, %cst_161 [1] : vector<1x32x32xf32> to vector<1x32xf32>
    %983 = vector.shape_cast %9 : vector<32x32xf32> to vector<1x32x32xf32>
    %984 = arith.mulf %983, %979 : vector<1x32x32xf32>
    %cst_162 = arith.constant dense<0.000000e+00> : vector<1x32xf32>
    %985 = vector.multi_reduction <add>, %984, %cst_162 [1] : vector<1x32x32xf32> to vector<1x32xf32>
    %986 = arith.mulf %12, %972 : vector<1x32xf32>
    %987 = arith.addf %986, %982 : vector<1x32xf32>
    %988 = arith.addf %987, %925 : vector<1x32xf32>
    %989 = arith.addf %985, %926 : vector<1x32xf32>
    %990 = tpu.reciprocal %989 {approx = true} : vector<1x32xf32> -> vector<1x32xf32>
    %991 = arith.mulf %989, %990 : vector<1x32xf32>
    %cst_163 = arith.constant 2.000000e+00 : f32
    %992 = vector.broadcast %cst_163 : f32 to vector<1x32xf32>
    %993 = arith.subf %992, %991 : vector<1x32xf32>
    %994 = arith.mulf %990, %993 : vector<1x32xf32>
    %995 = arith.mulf %988, %994 : vector<1x32xf32>
    %996 = vector.shape_cast %995 : vector<1x32xf32> to vector<1x32x1xf32>
    %997 = vector.shape_cast %6 : vector<32x32xf32> to vector<1x32x32xf32>
    %998 = vector.broadcast %996 : vector<1x32x1xf32> to vector<1x32x32xf32>
    %999 = arith.mulf %997, %998 : vector<1x32x32xf32>
    %1000 = vector.shape_cast %7 : vector<32x32xf32> to vector<1x32x32xf32>
    %1001 = arith.subf %999, %1000 : vector<1x32x32xf32>
    %1002 = math.tanh %1001 : vector<1x32x32xf32>
    %1003 = vector.shape_cast %8 : vector<32x32xf32> to vector<1x32x32xf32>
    %1004 = arith.mulf %1003, %1002 : vector<1x32x32xf32>
    %cst_164 = arith.constant dense<0.000000e+00> : vector<1x32xf32>
    %1005 = vector.multi_reduction <add>, %1004, %cst_164 [1] : vector<1x32x32xf32> to vector<1x32xf32>
    %1006 = vector.shape_cast %9 : vector<32x32xf32> to vector<1x32x32xf32>
    %1007 = arith.mulf %1006, %1002 : vector<1x32x32xf32>
    %cst_165 = arith.constant dense<0.000000e+00> : vector<1x32xf32>
    %1008 = vector.multi_reduction <add>, %1007, %cst_165 [1] : vector<1x32x32xf32> to vector<1x32xf32>
    %1009 = arith.mulf %12, %995 : vector<1x32xf32>
    %1010 = arith.addf %1009, %1005 : vector<1x32xf32>
    %1011 = arith.addf %1010, %925 : vector<1x32xf32>
    %1012 = arith.addf %1008, %926 : vector<1x32xf32>
    %1013 = tpu.reciprocal %1012 {approx = true} : vector<1x32xf32> -> vector<1x32xf32>
    %1014 = arith.mulf %1012, %1013 : vector<1x32xf32>
    %cst_166 = arith.constant 2.000000e+00 : f32
    %1015 = vector.broadcast %cst_166 : f32 to vector<1x32xf32>
    %1016 = arith.subf %1015, %1014 : vector<1x32xf32>
    %1017 = arith.mulf %1013, %1016 : vector<1x32xf32>
    %1018 = arith.mulf %1011, %1017 : vector<1x32xf32>
    %1019 = vector.shape_cast %1018 : vector<1x32xf32> to vector<1x32x1xf32>
    %1020 = vector.shape_cast %6 : vector<32x32xf32> to vector<1x32x32xf32>
    %1021 = vector.broadcast %1019 : vector<1x32x1xf32> to vector<1x32x32xf32>
    %1022 = arith.mulf %1020, %1021 : vector<1x32x32xf32>
    %1023 = vector.shape_cast %7 : vector<32x32xf32> to vector<1x32x32xf32>
    %1024 = arith.subf %1022, %1023 : vector<1x32x32xf32>
    %1025 = math.tanh %1024 : vector<1x32x32xf32>
    %1026 = vector.shape_cast %8 : vector<32x32xf32> to vector<1x32x32xf32>
    %1027 = arith.mulf %1026, %1025 : vector<1x32x32xf32>
    %cst_167 = arith.constant dense<0.000000e+00> : vector<1x32xf32>
    %1028 = vector.multi_reduction <add>, %1027, %cst_167 [1] : vector<1x32x32xf32> to vector<1x32xf32>
    %1029 = vector.shape_cast %9 : vector<32x32xf32> to vector<1x32x32xf32>
    %1030 = arith.mulf %1029, %1025 : vector<1x32x32xf32>
    %cst_168 = arith.constant dense<0.000000e+00> : vector<1x32xf32>
    %1031 = vector.multi_reduction <add>, %1030, %cst_168 [1] : vector<1x32x32xf32> to vector<1x32xf32>
    %1032 = arith.mulf %12, %1018 : vector<1x32xf32>
    %1033 = arith.addf %1032, %1028 : vector<1x32xf32>
    %1034 = arith.addf %1033, %925 : vector<1x32xf32>
    %1035 = arith.addf %1031, %926 : vector<1x32xf32>
    %1036 = tpu.reciprocal %1035 {approx = true} : vector<1x32xf32> -> vector<1x32xf32>
    %1037 = arith.mulf %1035, %1036 : vector<1x32xf32>
    %cst_169 = arith.constant 2.000000e+00 : f32
    %1038 = vector.broadcast %cst_169 : f32 to vector<1x32xf32>
    %1039 = arith.subf %1038, %1037 : vector<1x32xf32>
    %1040 = arith.mulf %1036, %1039 : vector<1x32xf32>
    %1041 = arith.mulf %1034, %1040 : vector<1x32xf32>
    %1042 = vector.shape_cast %1041 : vector<1x32xf32> to vector<1x32x1xf32>
    %1043 = vector.shape_cast %6 : vector<32x32xf32> to vector<1x32x32xf32>
    %1044 = vector.broadcast %1042 : vector<1x32x1xf32> to vector<1x32x32xf32>
    %1045 = arith.mulf %1043, %1044 : vector<1x32x32xf32>
    %1046 = vector.shape_cast %7 : vector<32x32xf32> to vector<1x32x32xf32>
    %1047 = arith.subf %1045, %1046 : vector<1x32x32xf32>
    %1048 = math.tanh %1047 : vector<1x32x32xf32>
    %1049 = vector.shape_cast %8 : vector<32x32xf32> to vector<1x32x32xf32>
    %1050 = arith.mulf %1049, %1048 : vector<1x32x32xf32>
    %cst_170 = arith.constant dense<0.000000e+00> : vector<1x32xf32>
    %1051 = vector.multi_reduction <add>, %1050, %cst_170 [1] : vector<1x32x32xf32> to vector<1x32xf32>
    %1052 = vector.shape_cast %9 : vector<32x32xf32> to vector<1x32x32xf32>
    %1053 = arith.mulf %1052, %1048 : vector<1x32x32xf32>
    %cst_171 = arith.constant dense<0.000000e+00> : vector<1x32xf32>
    %1054 = vector.multi_reduction <add>, %1053, %cst_171 [1] : vector<1x32x32xf32> to vector<1x32xf32>
    %1055 = arith.mulf %12, %1041 : vector<1x32xf32>
    %1056 = arith.addf %1055, %1051 : vector<1x32xf32>
    %1057 = arith.addf %1056, %925 : vector<1x32xf32>
    %1058 = arith.addf %1054, %926 : vector<1x32xf32>
    %1059 = tpu.reciprocal %1058 {approx = true} : vector<1x32xf32> -> vector<1x32xf32>
    %1060 = arith.mulf %1058, %1059 : vector<1x32xf32>
    %cst_172 = arith.constant 2.000000e+00 : f32
    %1061 = vector.broadcast %cst_172 : f32 to vector<1x32xf32>
    %1062 = arith.subf %1061, %1060 : vector<1x32xf32>
    %1063 = arith.mulf %1059, %1062 : vector<1x32xf32>
    %1064 = arith.mulf %1057, %1063 : vector<1x32xf32>
    %1065 = vector.extract_strided_slice %1064 {offsets = [0, 0], sizes = [1, 4], strides = [1, 1]} : vector<1x32xf32> to vector<1x4xf32>
    %1066 = arith.mulf %1065, %13 : vector<1x4xf32>
    %1067 = arith.addf %1066, %14 : vector<1x4xf32>
    %1068 = vector.shape_cast %1067 : vector<1x4xf32> to vector<4xf32>
    %c0_173 = arith.constant 0 : index
    %c6 = arith.constant 6 : index
    %c0_174 = arith.constant 0 : index
    %1069 = vector.load %arg17[%c0_173, %c6, %c0_174] : memref<1x8x4xf32, #tpu.memory_space<vmem>>, vector<1x1x4xf32>
    %1070 = vector.shape_cast %1069 : vector<1x1x4xf32> to vector<4xf32>
    %1071 = vector.shape_cast %1068 : vector<4xf32> to vector<1x1x4xf32>
    tpu.vector_store %arg17[%c0_173, %c6, %c0_174], %1071 {strides = array<i32>} : memref<1x8x4xf32, #tpu.memory_space<vmem>>, vector<1x1x4xf32>,
    %1072 = vector.extract_strided_slice %35 {offsets = [7, 0], sizes = [1, 32], strides = [1, 1]} : vector<8x32xf32> to vector<1x32xf32>
    %1073 = vector.extract_strided_slice %41 {offsets = [7, 0], sizes = [1, 32], strides = [1, 1]} : vector<8x32xf32> to vector<1x32xf32>
    %1074 = vector.shape_cast %1064 : vector<1x32xf32> to vector<1x32x1xf32>
    %1075 = vector.shape_cast %6 : vector<32x32xf32> to vector<1x32x32xf32>
    %1076 = vector.broadcast %1074 : vector<1x32x1xf32> to vector<1x32x32xf32>
    %1077 = arith.mulf %1075, %1076 : vector<1x32x32xf32>
    %1078 = vector.shape_cast %7 : vector<32x32xf32> to vector<1x32x32xf32>
    %1079 = arith.subf %1077, %1078 : vector<1x32x32xf32>
    %1080 = math.tanh %1079 : vector<1x32x32xf32>
    %1081 = vector.shape_cast %8 : vector<32x32xf32> to vector<1x32x32xf32>
    %1082 = arith.mulf %1081, %1080 : vector<1x32x32xf32>
    %cst_175 = arith.constant dense<0.000000e+00> : vector<1x32xf32>
    %1083 = vector.multi_reduction <add>, %1082, %cst_175 [1] : vector<1x32x32xf32> to vector<1x32xf32>
    %1084 = vector.shape_cast %9 : vector<32x32xf32> to vector<1x32x32xf32>
    %1085 = arith.mulf %1084, %1080 : vector<1x32x32xf32>
    %cst_176 = arith.constant dense<0.000000e+00> : vector<1x32xf32>
    %1086 = vector.multi_reduction <add>, %1085, %cst_176 [1] : vector<1x32x32xf32> to vector<1x32xf32>
    %1087 = arith.mulf %12, %1064 : vector<1x32xf32>
    %1088 = arith.addf %1087, %1083 : vector<1x32xf32>
    %1089 = arith.addf %1088, %1072 : vector<1x32xf32>
    %1090 = arith.addf %1086, %1073 : vector<1x32xf32>
    %1091 = tpu.reciprocal %1090 {approx = true} : vector<1x32xf32> -> vector<1x32xf32>
    %1092 = arith.mulf %1090, %1091 : vector<1x32xf32>
    %cst_177 = arith.constant 2.000000e+00 : f32
    %1093 = vector.broadcast %cst_177 : f32 to vector<1x32xf32>
    %1094 = arith.subf %1093, %1092 : vector<1x32xf32>
    %1095 = arith.mulf %1091, %1094 : vector<1x32xf32>
    %1096 = arith.mulf %1089, %1095 : vector<1x32xf32>
    %1097 = vector.shape_cast %1096 : vector<1x32xf32> to vector<1x32x1xf32>
    %1098 = vector.shape_cast %6 : vector<32x32xf32> to vector<1x32x32xf32>
    %1099 = vector.broadcast %1097 : vector<1x32x1xf32> to vector<1x32x32xf32>
    %1100 = arith.mulf %1098, %1099 : vector<1x32x32xf32>
    %1101 = vector.shape_cast %7 : vector<32x32xf32> to vector<1x32x32xf32>
    %1102 = arith.subf %1100, %1101 : vector<1x32x32xf32>
    %1103 = math.tanh %1102 : vector<1x32x32xf32>
    %1104 = vector.shape_cast %8 : vector<32x32xf32> to vector<1x32x32xf32>
    %1105 = arith.mulf %1104, %1103 : vector<1x32x32xf32>
    %cst_178 = arith.constant dense<0.000000e+00> : vector<1x32xf32>
    %1106 = vector.multi_reduction <add>, %1105, %cst_178 [1] : vector<1x32x32xf32> to vector<1x32xf32>
    %1107 = vector.shape_cast %9 : vector<32x32xf32> to vector<1x32x32xf32>
    %1108 = arith.mulf %1107, %1103 : vector<1x32x32xf32>
    %cst_179 = arith.constant dense<0.000000e+00> : vector<1x32xf32>
    %1109 = vector.multi_reduction <add>, %1108, %cst_179 [1] : vector<1x32x32xf32> to vector<1x32xf32>
    %1110 = arith.mulf %12, %1096 : vector<1x32xf32>
    %1111 = arith.addf %1110, %1106 : vector<1x32xf32>
    %1112 = arith.addf %1111, %1072 : vector<1x32xf32>
    %1113 = arith.addf %1109, %1073 : vector<1x32xf32>
    %1114 = tpu.reciprocal %1113 {approx = true} : vector<1x32xf32> -> vector<1x32xf32>
    %1115 = arith.mulf %1113, %1114 : vector<1x32xf32>
    %cst_180 = arith.constant 2.000000e+00 : f32
    %1116 = vector.broadcast %cst_180 : f32 to vector<1x32xf32>
    %1117 = arith.subf %1116, %1115 : vector<1x32xf32>
    %1118 = arith.mulf %1114, %1117 : vector<1x32xf32>
    %1119 = arith.mulf %1112, %1118 : vector<1x32xf32>
    %1120 = vector.shape_cast %1119 : vector<1x32xf32> to vector<1x32x1xf32>
    %1121 = vector.shape_cast %6 : vector<32x32xf32> to vector<1x32x32xf32>
    %1122 = vector.broadcast %1120 : vector<1x32x1xf32> to vector<1x32x32xf32>
    %1123 = arith.mulf %1121, %1122 : vector<1x32x32xf32>
    %1124 = vector.shape_cast %7 : vector<32x32xf32> to vector<1x32x32xf32>
    %1125 = arith.subf %1123, %1124 : vector<1x32x32xf32>
    %1126 = math.tanh %1125 : vector<1x32x32xf32>
    %1127 = vector.shape_cast %8 : vector<32x32xf32> to vector<1x32x32xf32>
    %1128 = arith.mulf %1127, %1126 : vector<1x32x32xf32>
    %cst_181 = arith.constant dense<0.000000e+00> : vector<1x32xf32>
    %1129 = vector.multi_reduction <add>, %1128, %cst_181 [1] : vector<1x32x32xf32> to vector<1x32xf32>
    %1130 = vector.shape_cast %9 : vector<32x32xf32> to vector<1x32x32xf32>
    %1131 = arith.mulf %1130, %1126 : vector<1x32x32xf32>
    %cst_182 = arith.constant dense<0.000000e+00> : vector<1x32xf32>
    %1132 = vector.multi_reduction <add>, %1131, %cst_182 [1] : vector<1x32x32xf32> to vector<1x32xf32>
    %1133 = arith.mulf %12, %1119 : vector<1x32xf32>
    %1134 = arith.addf %1133, %1129 : vector<1x32xf32>
    %1135 = arith.addf %1134, %1072 : vector<1x32xf32>
    %1136 = arith.addf %1132, %1073 : vector<1x32xf32>
    %1137 = tpu.reciprocal %1136 {approx = true} : vector<1x32xf32> -> vector<1x32xf32>
    %1138 = arith.mulf %1136, %1137 : vector<1x32xf32>
    %cst_183 = arith.constant 2.000000e+00 : f32
    %1139 = vector.broadcast %cst_183 : f32 to vector<1x32xf32>
    %1140 = arith.subf %1139, %1138 : vector<1x32xf32>
    %1141 = arith.mulf %1137, %1140 : vector<1x32xf32>
    %1142 = arith.mulf %1135, %1141 : vector<1x32xf32>
    %1143 = vector.shape_cast %1142 : vector<1x32xf32> to vector<1x32x1xf32>
    %1144 = vector.shape_cast %6 : vector<32x32xf32> to vector<1x32x32xf32>
    %1145 = vector.broadcast %1143 : vector<1x32x1xf32> to vector<1x32x32xf32>
    %1146 = arith.mulf %1144, %1145 : vector<1x32x32xf32>
    %1147 = vector.shape_cast %7 : vector<32x32xf32> to vector<1x32x32xf32>
    %1148 = arith.subf %1146, %1147 : vector<1x32x32xf32>
    %1149 = math.tanh %1148 : vector<1x32x32xf32>
    %1150 = vector.shape_cast %8 : vector<32x32xf32> to vector<1x32x32xf32>
    %1151 = arith.mulf %1150, %1149 : vector<1x32x32xf32>
    %cst_184 = arith.constant dense<0.000000e+00> : vector<1x32xf32>
    %1152 = vector.multi_reduction <add>, %1151, %cst_184 [1] : vector<1x32x32xf32> to vector<1x32xf32>
    %1153 = vector.shape_cast %9 : vector<32x32xf32> to vector<1x32x32xf32>
    %1154 = arith.mulf %1153, %1149 : vector<1x32x32xf32>
    %cst_185 = arith.constant dense<0.000000e+00> : vector<1x32xf32>
    %1155 = vector.multi_reduction <add>, %1154, %cst_185 [1] : vector<1x32x32xf32> to vector<1x32xf32>
    %1156 = arith.mulf %12, %1142 : vector<1x32xf32>
    %1157 = arith.addf %1156, %1152 : vector<1x32xf32>
    %1158 = arith.addf %1157, %1072 : vector<1x32xf32>
    %1159 = arith.addf %1155, %1073 : vector<1x32xf32>
    %1160 = tpu.reciprocal %1159 {approx = true} : vector<1x32xf32> -> vector<1x32xf32>
    %1161 = arith.mulf %1159, %1160 : vector<1x32xf32>
    %cst_186 = arith.constant 2.000000e+00 : f32
    %1162 = vector.broadcast %cst_186 : f32 to vector<1x32xf32>
    %1163 = arith.subf %1162, %1161 : vector<1x32xf32>
    %1164 = arith.mulf %1160, %1163 : vector<1x32xf32>
    %1165 = arith.mulf %1158, %1164 : vector<1x32xf32>
    %1166 = vector.shape_cast %1165 : vector<1x32xf32> to vector<1x32x1xf32>
    %1167 = vector.shape_cast %6 : vector<32x32xf32> to vector<1x32x32xf32>
    %1168 = vector.broadcast %1166 : vector<1x32x1xf32> to vector<1x32x32xf32>
    %1169 = arith.mulf %1167, %1168 : vector<1x32x32xf32>
    %1170 = vector.shape_cast %7 : vector<32x32xf32> to vector<1x32x32xf32>
    %1171 = arith.subf %1169, %1170 : vector<1x32x32xf32>
    %1172 = math.tanh %1171 : vector<1x32x32xf32>
    %1173 = vector.shape_cast %8 : vector<32x32xf32> to vector<1x32x32xf32>
    %1174 = arith.mulf %1173, %1172 : vector<1x32x32xf32>
    %cst_187 = arith.constant dense<0.000000e+00> : vector<1x32xf32>
    %1175 = vector.multi_reduction <add>, %1174, %cst_187 [1] : vector<1x32x32xf32> to vector<1x32xf32>
    %1176 = vector.shape_cast %9 : vector<32x32xf32> to vector<1x32x32xf32>
    %1177 = arith.mulf %1176, %1172 : vector<1x32x32xf32>
    %cst_188 = arith.constant dense<0.000000e+00> : vector<1x32xf32>
    %1178 = vector.multi_reduction <add>, %1177, %cst_188 [1] : vector<1x32x32xf32> to vector<1x32xf32>
    %1179 = arith.mulf %12, %1165 : vector<1x32xf32>
    %1180 = arith.addf %1179, %1175 : vector<1x32xf32>
    %1181 = arith.addf %1180, %1072 : vector<1x32xf32>
    %1182 = arith.addf %1178, %1073 : vector<1x32xf32>
    %1183 = tpu.reciprocal %1182 {approx = true} : vector<1x32xf32> -> vector<1x32xf32>
    %1184 = arith.mulf %1182, %1183 : vector<1x32xf32>
    %cst_189 = arith.constant 2.000000e+00 : f32
    %1185 = vector.broadcast %cst_189 : f32 to vector<1x32xf32>
    %1186 = arith.subf %1185, %1184 : vector<1x32xf32>
    %1187 = arith.mulf %1183, %1186 : vector<1x32xf32>
    %1188 = arith.mulf %1181, %1187 : vector<1x32xf32>
    %1189 = vector.shape_cast %1188 : vector<1x32xf32> to vector<1x32x1xf32>
    %1190 = vector.shape_cast %6 : vector<32x32xf32> to vector<1x32x32xf32>
    %1191 = vector.broadcast %1189 : vector<1x32x1xf32> to vector<1x32x32xf32>
    %1192 = arith.mulf %1190, %1191 : vector<1x32x32xf32>
    %1193 = vector.shape_cast %7 : vector<32x32xf32> to vector<1x32x32xf32>
    %1194 = arith.subf %1192, %1193 : vector<1x32x32xf32>
    %1195 = math.tanh %1194 : vector<1x32x32xf32>
    %1196 = vector.shape_cast %8 : vector<32x32xf32> to vector<1x32x32xf32>
    %1197 = arith.mulf %1196, %1195 : vector<1x32x32xf32>
    %cst_190 = arith.constant dense<0.000000e+00> : vector<1x32xf32>
    %1198 = vector.multi_reduction <add>, %1197, %cst_190 [1] : vector<1x32x32xf32> to vector<1x32xf32>
    %1199 = vector.shape_cast %9 : vector<32x32xf32> to vector<1x32x32xf32>
    %1200 = arith.mulf %1199, %1195 : vector<1x32x32xf32>
    %cst_191 = arith.constant dense<0.000000e+00> : vector<1x32xf32>
    %1201 = vector.multi_reduction <add>, %1200, %cst_191 [1] : vector<1x32x32xf32> to vector<1x32xf32>
    %1202 = arith.mulf %12, %1188 : vector<1x32xf32>
    %1203 = arith.addf %1202, %1198 : vector<1x32xf32>
    %1204 = arith.addf %1203, %1072 : vector<1x32xf32>
    %1205 = arith.addf %1201, %1073 : vector<1x32xf32>
    %1206 = tpu.reciprocal %1205 {approx = true} : vector<1x32xf32> -> vector<1x32xf32>
    %1207 = arith.mulf %1205, %1206 : vector<1x32xf32>
    %cst_192 = arith.constant 2.000000e+00 : f32
    %1208 = vector.broadcast %cst_192 : f32 to vector<1x32xf32>
    %1209 = arith.subf %1208, %1207 : vector<1x32xf32>
    %1210 = arith.mulf %1206, %1209 : vector<1x32xf32>
    %1211 = arith.mulf %1204, %1210 : vector<1x32xf32>
    %1212 = vector.extract_strided_slice %1211 {offsets = [0, 0], sizes = [1, 4], strides = [1, 1]} : vector<1x32xf32> to vector<1x4xf32>
    %1213 = arith.mulf %1212, %13 : vector<1x4xf32>
    %1214 = arith.addf %1213, %14 : vector<1x4xf32>
    %1215 = vector.shape_cast %1214 : vector<1x4xf32> to vector<4xf32>
    %c0_193 = arith.constant 0 : index
    %c7 = arith.constant 7 : index
    %c0_194 = arith.constant 0 : index
    %1216 = vector.load %arg17[%c0_193, %c7, %c0_194] : memref<1x8x4xf32, #tpu.memory_space<vmem>>, vector<1x1x4xf32>
    %1217 = vector.shape_cast %1216 : vector<1x1x4xf32> to vector<4xf32>
    %1218 = vector.shape_cast %1215 : vector<4xf32> to vector<1x1x4xf32>
    tpu.vector_store %arg17[%c0_193, %c7, %c0_194], %1218 {strides = array<i32>} : memref<1x8x4xf32, #tpu.memory_space<vmem>>, vector<1x1x4xf32>,
    %c0_195 = arith.constant 0 : index
    %c0_196 = arith.constant 0 : index
    %c0_197 = arith.constant 0 : index
    %1219 = vector.load %arg18[%c0_195, %c0_196, %c0_197] : memref<1x1x32xf32, #tpu.memory_space<vmem>>, vector<1x1x32xf32>
    %1220 = vector.shape_cast %1219 : vector<1x1x32xf32> to vector<1x32xf32>
    %1221 = vector.shape_cast %1211 : vector<1x32xf32> to vector<1x1x32xf32>
    tpu.vector_store %arg18[%c0_195, %c0_196, %c0_197], %1221 {strides = array<i32>} : memref<1x1x32xf32, #tpu.memory_space<vmem>>, vector<1x1x32xf32>,
    return
  }
  func.func @transform_0(%arg0: i32) -> (i32, i32, i32) {
    %c0_i32 = arith.constant 0 : i32
    %c0_i32_0 = arith.constant 0 : i32
    %c0_i32_1 = arith.constant 0 : i32
    return %arg0, %c0_i32, %c0_i32_0 : i32, i32, i32
  }
  func.func @transform_1(%arg0: i32) -> (i32, i32) {
    %c0_i32 = arith.constant 0 : i32
    %c0_i32_0 = arith.constant 0 : i32
    %c0_i32_1 = arith.constant 0 : i32
    return %c0_i32, %c0_i32_0 : i32, i32
  }
  func.func @transform_2(%arg0: i32) -> (i32, i32) {
    %c0_i32 = arith.constant 0 : i32
    %c0_i32_0 = arith.constant 0 : i32
    %c0_i32_1 = arith.constant 0 : i32
    return %c0_i32, %c0_i32_0 : i32, i32
  }
  func.func @transform_3(%arg0: i32) -> (i32, i32) {
    %c0_i32 = arith.constant 0 : i32
    %c0_i32_0 = arith.constant 0 : i32
    %c0_i32_1 = arith.constant 0 : i32
    return %c0_i32, %c0_i32_0 : i32, i32
  }
  func.func @transform_4(%arg0: i32) -> (i32, i32) {
    %c0_i32 = arith.constant 0 : i32
    %c0_i32_0 = arith.constant 0 : i32
    %c0_i32_1 = arith.constant 0 : i32
    return %c0_i32, %c0_i32_0 : i32, i32
  }
  func.func @transform_5(%arg0: i32) -> (i32, i32) {
    %c0_i32 = arith.constant 0 : i32
    %c0_i32_0 = arith.constant 0 : i32
    %c0_i32_1 = arith.constant 0 : i32
    return %c0_i32, %c0_i32_0 : i32, i32
  }
  func.func @transform_6(%arg0: i32) -> (i32, i32) {
    %c0_i32 = arith.constant 0 : i32
    %c0_i32_0 = arith.constant 0 : i32
    %c0_i32_1 = arith.constant 0 : i32
    return %c0_i32, %c0_i32_0 : i32, i32
  }
  func.func @transform_7(%arg0: i32) -> (i32, i32) {
    %c0_i32 = arith.constant 0 : i32
    %c0_i32_0 = arith.constant 0 : i32
    %c0_i32_1 = arith.constant 0 : i32
    return %c0_i32, %c0_i32_0 : i32, i32
  }
  func.func @transform_8(%arg0: i32) -> (i32, i32) {
    %c0_i32 = arith.constant 0 : i32
    %c0_i32_0 = arith.constant 0 : i32
    %c0_i32_1 = arith.constant 0 : i32
    return %c0_i32, %c0_i32_0 : i32, i32
  }
  func.func @transform_9(%arg0: i32) -> (i32, i32) {
    %c0_i32 = arith.constant 0 : i32
    %c0_i32_0 = arith.constant 0 : i32
    %c0_i32_1 = arith.constant 0 : i32
    return %c0_i32, %c0_i32_0 : i32, i32
  }
  func.func @transform_10(%arg0: i32) -> (i32, i32) {
    %c0_i32 = arith.constant 0 : i32
    %c0_i32_0 = arith.constant 0 : i32
    %c0_i32_1 = arith.constant 0 : i32
    return %c0_i32, %c0_i32_0 : i32, i32
  }
  func.func @transform_11(%arg0: i32) -> (i32, i32) {
    %c0_i32 = arith.constant 0 : i32
    %c0_i32_0 = arith.constant 0 : i32
    %c0_i32_1 = arith.constant 0 : i32
    return %c0_i32, %c0_i32_0 : i32, i32
  }
  func.func @transform_12(%arg0: i32) -> (i32, i32) {
    %c0_i32 = arith.constant 0 : i32
    %c0_i32_0 = arith.constant 0 : i32
    %c0_i32_1 = arith.constant 0 : i32
    return %c0_i32, %c0_i32_0 : i32, i32
  }
  func.func @transform_13(%arg0: i32) -> (i32, i32) {
    %c0_i32 = arith.constant 0 : i32
    %c0_i32_0 = arith.constant 0 : i32
    %c0_i32_1 = arith.constant 0 : i32
    return %c0_i32, %c0_i32_0 : i32, i32
  }
  func.func @transform_14(%arg0: i32) -> (i32, i32) {
    %c0_i32 = arith.constant 0 : i32
    %c0_i32_0 = arith.constant 0 : i32
    %c0_i32_1 = arith.constant 0 : i32
    return %c0_i32, %c0_i32_0 : i32, i32
  }
  func.func @transform_15(%arg0: i32) -> (i32, i32) {
    %c0_i32 = arith.constant 0 : i32
    %c0_i32_0 = arith.constant 0 : i32
    %c0_i32_1 = arith.constant 0 : i32
    return %c0_i32, %c0_i32_0 : i32, i32
  }
  func.func @transform_16(%arg0: i32) -> (i32, i32, i32) {
    %c0_i32 = arith.constant 0 : i32
    %c0_i32_0 = arith.constant 0 : i32
    %c0_i32_1 = arith.constant 0 : i32
    return %arg0, %c0_i32, %c0_i32_0 : i32, i32, i32
  }
  func.func @transform_17(%arg0: i32) -> (i32, i32, i32) {
    %c0_i32 = arith.constant 0 : i32
    %c0_i32_0 = arith.constant 0 : i32
    %c0_i32_1 = arith.constant 0 : i32
    return %arg0, %c0_i32, %c0_i32_0 : i32, i32, i32
  }
}

</mosaic_0001>

<bundles_post_ra>
// kernel: ltc_forward.1
= control target key start
LH: loop header
LB: loop body
LE: loop exit
PB: predicated region body
PF: predicated region fallthrough
CT: control target
= control target key end

     0   :  { %s8401_s0 = inlined_call_operand.hbm [shape: f32[2,8,8], index: 0, kind: input, shape index: {}]   ;;  %s8402_s1 = inlined_call_operand.hbm [shape: f32[1,8], index: 1, kind: input, shape index: {}]   ;;  %s8403_s2 = inlined_call_operand.hbm [shape: f32[1,8], index: 2, kind: input, shape index: {}]   ;;  %s8404_s3 = inlined_call_operand.vmem [shape: f32[8,32], index: 3, kind: input, shape index: {}]   ;;  %s8405_s4 = inlined_call_operand.vmem [shape: f32[8,32], index: 4, kind: input, shape index: {}]   ;;  %s8406_s5 = inlined_call_operand.hbm [shape: f32[8,32], index: 5, kind: input, shape index: {}]   ;;  %s8407_s6 = inlined_call_operand.hbm [shape: f32[8,32], index: 6, kind: input, shape index: {}]   ;;  %s8408_s7 = inlined_call_operand.hbm [shape: f32[32,32], index: 7, kind: input, shape index: {}]   ;;  %s8409_s8 = inlined_call_operand.hbm [shape: f32[32,32], index: 8, kind: input, shape index: {}]   ;;  %s8410_s9 = inlined_call_operand.hbm [shape: f32[32,32], index: 9, kind: input, shape index: {}]   ;;  %s8411_s10 = inlined_call_operand.hbm [shape: f32[32,32], index: 10, kind: input, shape index: {}]   ;;  %s8412_s11 = inlined_call_operand.hbm [shape: f32[1,32], index: 11, kind: input, shape index: {}]   ;;  %s8413_s12 = inlined_call_operand.hbm [shape: f32[1,32], index: 12, kind: input, shape index: {}]   ;;  %s8414_s13 = inlined_call_operand.hbm [shape: f32[1,32], index: 13, kind: input, shape index: {}]   ;;  %s8415_s14 = inlined_call_operand.hbm [shape: f32[1,4], index: 14, kind: input, shape index: {}]   ;;  %s8416_s15 = inlined_call_operand.hbm [shape: f32[1,4], index: 15, kind: input, shape index: {}]   ;;  %s8417_s16 = inlined_call_operand.vmem [shape: f32[2,8,4], index: 16, kind: output, shape index: {0}]   ;;  %s8418_s17 = inlined_call_operand.hbm [shape: f32[2,1,32], index: 17, kind: output, shape index: {1}]  }
   0x1   :  { %8429 = sst [smem:[#allocation35_spill]] %s8401_s0 }
   0x2   :  { %8430 = sst [smem:[#allocation36_spill]] %s8402_s1 }
   0x3   :  { %8431 = sst [smem:[#allocation37_spill]] %s8403_s2 }
   0x4   :  { %8432 = sst [smem:[#allocation38_spill]] %s8406_s5 }
   0x5   :  { %8433 = sst [smem:[#allocation39_spill]] %s8407_s6 }
   0x6   :  { %8434 = sst [smem:[#allocation40_spill]] %s8408_s7 }
   0x7   :  { %8435 = sst [smem:[#allocation41_spill]] %s8409_s8 }
   0x8   :  { %8436 = sst [smem:[#allocation42_spill]] %s8410_s9 }
   0x9   :  { %8437 = sst [smem:[#allocation43_spill]] %s8411_s10 }
   0xa   :  { %8438 = sst [smem:[#allocation44_spill]] %s8412_s11 }
   0xb   :  { %8439 = sst [smem:[#allocation45_spill]] %s8413_s12 }
   0xc   :  { %8440 = sst [smem:[#allocation46_spill]] %s8417_s16 }
   0xd   :  { %8441 = sst [smem:[#allocation47_spill]] %s8418_s17 }
   0xe   :  { %23 = vsyncpa [#allocation3], 0 }
   0xf   :  { %25 = vsyncpa [#allocation3 + $0x1], 0 }
  0x10   :  { %26 = vsyncpa [#allocation6], 0 }
  0x11   :  { %27 = vsyncpa [#allocation9], 0 }
  0x12   :  { %28 = vsyncpa [#allocation12], 0 }
  0x13   :  { %29 = vsyncpa [#allocation15], 0 }
  0x14   :  { %30 = vsyncpa [#allocation18], 0 }
  0x15   :  { %31 = vsyncpa [#allocation21], 0 }
  0x16   :  { %32 = vsyncpa [#allocation24], 0 }
  0x17   :  { %33 = vsyncpa [#allocation4], 0 }
  0x18   :  { %35 = vsyncpa [#allocation4 + $0x1], 0  ;;  %s6227_s24 = smov 0   ;;  %s6229_s25 = smov 0  }
  0x19   :  { %s6231_s26 = smov 0   ;;  %s6233_s27 = smov 0  }
  0x1a LB: > { %s6120_s28 = smov [#allocation5]   ;;  %s6248_s0 = sadd.s32 4294967295, %s6118_s27   ;;  %s6118_s27 = sphi %s6233_s27, %s8487_s27   ;;  %s6114_s26 = sphi %s6231_s26, %s8486_s26   ;;  %s6110_s25 = sphi %s6229_s25, %s8485_s25   ;;  %s6106_s24 = sphi %s6227_s24, %s8484_s24  }
  0x1b   : > { %s452_s29 = sshll.u32 %s6120_s28, 4  ;;  %p4819_p0 = scmp.ge.s32.totalorder %s6118_s27, 1  ;;  %s453_s29 = int_to_ptr.vmem [resolvable:$true] %s452_s29 }
  0x1c   : > { %p8421_p1 = scmp.eq.s32.totalorder %s6248_s0, 0  ;;  %p439_p2 = scmp.lt.s32.totalorder %s6118_s27, 3 }
  0x1d   : > { %s6121_s18 = smov [#allocation8]   ;;  %s6122_s1 = smov [#allocation11]  }
  0x1e   : > { %p6253_p3 = pnand %p4819_p0, %p439_p2  ;;  %s480_s19 = sshll.u32 %s6121_s18, 4  ;;  %s481_s19 = int_to_ptr.vmem [resolvable:$true] %s480_s19 }
  0x1f   : > { %s501_s20 = sshll.u32 %s6122_s1, 4  ;;  %s5671_s23 = scalar_lea.vmem %s453_s29, 16  ;;  %s6266_s20 = int_to_ptr.vmem [resolvable:$true] %s501_s20 }
  0x20   : > { %s8442_s30 = scalar_select %p6253_p3, 1, 0 }
  0x21   : > { %p4915_p5 = pneg %p6253_p3  ;;  %p5672_p8 = scmp.ne.s32.totalorder %s453_s29, %s5671_s23 }
  0x22   : > { %s5678_s28 = scalar_lea.vmem %s453_s29, 32  ;;  %p5679_p11 = scmp.lt.s32.totalorder %s453_s29, %s453_s29 }
  0x23   : > { %p6262_p6 = pnand %p4915_p5, %p8421_p1  ;;  %p5680_p12 = scmp.lt.s32.totalorder %s5678_s28, %s5671_s23 }
  0x25   : > { %p6270_p7 = pneg %p6262_p6  ;;  %p5681_p13 = por %p5680_p12, %p5679_p11 }
  0x27   : > { %p5674_p9 = pnand %p5672_p8, %p6270_p7 }
  0x29   : > { %p5675_p10 = pneg %p5674_p9 }
  0x2b   : > { %p5682_p0 = pnand %p5681_p13, %p5675_p10 }
  0x2d   : > { %5685 = shalt.err (!%p5682_p0)
}
  0x2e   : > { %s8445_s17 = sld [smem:[#allocation36_spill]]  ;;  %s5697_s16 = scalar_lea.vmem %s481_s19, 128 }
  0x2f   : > { %p5698_p2 = scmp.ne.s32.totalorder %s481_s19, %s5697_s16  ;;  %p5705_p8 = scmp.lt.s32.totalorder %s481_s19, %s481_s19 }
  0x30   : > { %p5706_p9 = scmp.lt.s32.totalorder %s5697_s16, %s5697_s16 }
  0x31   : > { %p5700_p5 = pnand %p5698_p2, %p6270_p7 }
  0x32   : > { %p5707_p1 = por %p5706_p9, %p5705_p8 }
  0x33   : > { %p5701_p4 = pneg %p5700_p5 }
  0x34   : > { %4918 = dma.hbm_to_vmem [thread:$0]  (!%p6262_p6), %s8445_s17, 16, %s453_s29, [#allocation6]  }
  0x35   : > { %p5708_p3 = pnand %p5707_p1, %p5701_p4 }
  0x37   : > { %5711 = shalt.err (!%p5708_p3)
}
  0x38   : > { %s8446_s5 = sld [smem:[#allocation38_spill]]  ;;  %s5723_s17 = scalar_lea.vmem %s6266_s20, 512 }
  0x39   : > { %p5724_p10 = scmp.ne.s32.totalorder %s6266_s20, %s5723_s17  ;;  %p5731_p13 = scmp.lt.s32.totalorder %s6266_s20, %s6266_s20 }
  0x3a   : > { %p5732_p0 = scmp.lt.s32.totalorder %s5723_s17, %s5723_s17 }
  0x3b   : > { %p5726_p11 = pnand %p5724_p10, %p6270_p7 }
  0x3c   : > { %p5733_p1 = por %p5732_p0, %p5731_p13 }
  0x3d   : > { %p5727_p12 = pneg %p5726_p11 }
  0x3e   : > { %4924 = dma.hbm_to_vmem [thread:$0]  (!%p6262_p6), %s8446_s5, 128, %s481_s19, [#allocation9]  }
  0x3f   : > { %p5734_p3 = pnand %p5733_p1, %p5727_p12 }
  0x41   : > { %5737 = shalt.err (!%p5734_p3)
}
  0x42   : > { %s8423_s16 = smov 128   ;;  %s8425_s29 = smov 8  }
  0x43   : > { %s8447_s7 = sld [smem:[#allocation40_spill]]  ;;  %s6125_s1 = smov [#allocation14]  }
  0x44   : > { %s527_s23 = sshll.u32 %s6125_s1, 4  ;;  %s6126_s28 = smov [#allocation17]   ;;  %s528_s23 = int_to_ptr.vmem [resolvable:$true] %s527_s23 }
  0x45   : > { %s554_s17 = sshll.u32 %s6126_s28, 4  ;;  %s5749_s5 = scalar_lea.vmem %s528_s23, 512  ;;  %s555_s17 = int_to_ptr.vmem [resolvable:$true] %s554_s17 }
  0x46   : > { %p5750_p4 = scmp.ne.s32.totalorder %s528_s23, %s5749_s5  ;;  %p5757_p8 = scmp.lt.s32.totalorder %s528_s23, %s528_s23 }
  0x47   : > { %p5758_p9 = scmp.lt.s32.totalorder %s5749_s5, %s5749_s5 }
  0x48   : > { %p5752_p2 = pnand %p5750_p4, %p6270_p7 }
  0x49   : > { %4930 = dma.hbm_to_vmem [thread:$0]  (!%p6262_p6), %s8447_s7, 512, %s6266_s20, [#allocation12], %s8423_s16, %s8423_s16, %s8425_s29  }
  0x4a   : > { %p5753_p5 = pneg %p5752_p2  ;;  %p5759_p10 = por %p5758_p9, %p5757_p8 }
  0x4c   : > { %p5760_p11 = pnand %p5759_p10, %p5753_p5 }
  0x4e   : > { %5763 = shalt.err (!%p5760_p11)
}
  0x4f   : > { %s8448_s9 = sld [smem:[#allocation42_spill]]  ;;  %s5775_s18 = scalar_lea.vmem %s555_s17, 16 }
  0x50   : > { %p5776_p12 = scmp.ne.s32.totalorder %s555_s17, %s5775_s18  ;;  %s5782_s5 = scalar_lea.vmem %s555_s17, 32 }
  0x51   : > { %p5783_p1 = scmp.lt.s32.totalorder %s555_s17, %s555_s17  ;;  %p5784_p3 = scmp.lt.s32.totalorder %s5782_s5, %s5775_s18 }
  0x52   : > { %p5778_p13 = pnand %p5776_p12, %p6270_p7 }
  0x53   : > { %p5785_p4 = por %p5784_p3, %p5783_p1 }
  0x54   : > { %p5779_p0 = pneg %p5778_p13 }
  0x55   : > { %4936 = dma.hbm_to_vmem [thread:$0]  (!%p6262_p6), %s8448_s9, 512, %s528_s23, [#allocation15], %s8423_s16, %s8423_s16, %s8425_s29  }
  0x56   : > { %p5786_p2 = pnand %p5785_p4, %p5779_p0 }
  0x58   : > { %5789 = shalt.err (!%p5786_p2)
}
  0x59   : > { %s8449_s11 = sld [smem:[#allocation44_spill]]  ;;  %s6127_s23 = smov [#allocation20]  }
  0x5a   : > { %s576_s20 = sshll.u32 %s6127_s23, 4  ;;  %s6128_s19 = smov [#allocation7]   ;;  %s577_s20 = int_to_ptr.vmem [resolvable:$true] %s576_s20 }
  0x5b   : > { %s463_s16 = sshll.u32 %s6128_s19, 4  ;;  %s5801_s29 = scalar_lea.vmem %s577_s20, 16  ;;  %s464_s16 = int_to_ptr.vmem [resolvable:$true] %s463_s16 }
  0x5c   : > { %p5802_p5 = scmp.ne.s32.totalorder %s577_s20, %s5801_s29  ;;  %s5808_s18 = scalar_lea.vmem %s577_s20, 32 }
  0x5d   : > { %p5809_p10 = scmp.lt.s32.totalorder %s577_s20, %s577_s20  ;;  %p5810_p11 = scmp.lt.s32.totalorder %s5808_s18, %s5801_s29 }
  0x5e   : > { %p5804_p8 = pnand %p5802_p5, %p6270_p7 }
  0x5f   : > { %4942 = dma.hbm_to_vmem [thread:$0]  (!%p6262_p6), %s8449_s11, 16, %s555_s17, [#allocation18]  }
  0x60   : > { %p5805_p9 = pneg %p5804_p8  ;;  %p5811_p12 = por %p5810_p11, %p5809_p10 }
  0x62   : > { %p5812_p13 = pnand %p5811_p12, %p5805_p9 }
  0x64   : > { %5815 = shalt.err (!%p5812_p13)
}
  0x65   : > { %4948 = dma.hbm_to_vmem [thread:$0]  (!%p6262_p6), %s8414_s13, 16, %s577_s20, [#allocation21]  }
  0x66   : > { %s5827_s1 = scalar_lea.vmem %s464_s16, 16  ;;  %s5834_s28 = scalar_lea.vmem %s464_s16, 32 }
  0x67   : > { %p5828_p0 = scmp.ne.s32.totalorder %s464_s16, %s5827_s1  ;;  %p5835_p4 = scmp.lt.s32.totalorder %s464_s16, %s464_s16 }
  0x68   : > { %p5836_p2 = scmp.lt.s32.totalorder %s5834_s28, %s5827_s1 }
  0x69   : > { %p5830_p1 = pnand %p5828_p0, %p6270_p7 }
  0x6a   : > { %p5837_p5 = por %p5836_p2, %p5835_p4 }
  0x6b   : > { %p5831_p3 = pneg %p5830_p1 }
  0x6d   : > { %p5838_p8 = pnand %p5837_p5, %p5831_p3 }
  0x6f   : > { %5841 = shalt.err (!%p5838_p8)
}
  0x70   : > { %s8450_s2 = sld [smem:[#allocation37_spill]]  ;;  %s6129_s20 = smov [#allocation10]  }
  0x71   : > { %s491_s19 = sshll.u32 %s6129_s20, 4  ;;  %s6130_s18 = smov [#allocation13]   ;;  %s492_s19 = int_to_ptr.vmem [resolvable:$true] %s491_s19 }
  0x72   : > { %s514_s5 = sshll.u32 %s6130_s18, 4  ;;  %s5853_s17 = scalar_lea.vmem %s492_s19, 128  ;;  %s515_s5 = int_to_ptr.vmem [resolvable:$true] %s514_s5 }
  0x73   : > { %p5854_p9 = scmp.ne.s32.totalorder %s492_s19, %s5853_s17  ;;  %p5861_p12 = scmp.lt.s32.totalorder %s492_s19, %s492_s19 }
  0x74   : > { %p5862_p13 = scmp.lt.s32.totalorder %s5853_s17, %s5853_s17 }
  0x75   : > { %p5856_p10 = pnand %p5854_p9, %p6270_p7 }
  0x76   : > { %4921 = dma.hbm_to_vmem [thread:$0]  (!%p6262_p6), %s8450_s2, 16, %s464_s16, [#allocation6]  }
  0x77   : > { %p5857_p11 = pneg %p5856_p10  ;;  %p5863_p0 = por %p5862_p13, %p5861_p12 }
  0x79   : > { %p5864_p1 = pnand %p5863_p0, %p5857_p11 }
  0x7b   : > { %5867 = shalt.err (!%p5864_p1)
}
  0x7c   : > { %s8451_s6 = sld [smem:[#allocation39_spill]]  ;;  %s5879_s16 = scalar_lea.vmem %s515_s5, 512 }
  0x7d   : > { %p5880_p3 = scmp.ne.s32.totalorder %s515_s5, %s5879_s16  ;;  %p5887_p5 = scmp.lt.s32.totalorder %s515_s5, %s515_s5 }
  0x7e   : > { %p5888_p8 = scmp.lt.s32.totalorder %s5879_s16, %s5879_s16 }
  0x7f   : > { %p5882_p4 = pnand %p5880_p3, %p6270_p7 }
  0x80   : > { %p5889_p9 = por %p5888_p8, %p5887_p5 }
  0x81   : > { %p5883_p2 = pneg %p5882_p4 }
  0x82   : > { %4927 = dma.hbm_to_vmem [thread:$0]  (!%p6262_p6), %s8451_s6, 128, %s492_s19, [#allocation9]  }
  0x83   : > { %p5890_p10 = pnand %p5889_p9, %p5883_p2 }
  0x85   : > { %5893 = shalt.err (!%p5890_p10)
}
  0x86   : > { %s8452_s29 = smov 8   ;;  %s8453_s23 = smov 128  }
  0x87   : > { %s8454_s8 = sld [smem:[#allocation41_spill]]  ;;  %s6131_s19 = smov [#allocation16]  }
  0x88   : > { %s540_s17 = sshll.u32 %s6131_s19, 4  ;;  %s6132_s1 = smov [#allocation19]   ;;  %s541_s17 = int_to_ptr.vmem [resolvable:$true] %s540_s17 }
  0x89   : > { %s565_s28 = sshll.u32 %s6132_s1, 4  ;;  %s5905_s2 = scalar_lea.vmem %s541_s17, 512  ;;  %s566_s28 = int_to_ptr.vmem [resolvable:$true] %s565_s28 }
  0x8a   : > { %p5906_p11 = scmp.ne.s32.totalorder %s541_s17, %s5905_s2  ;;  %p5913_p0 = scmp.lt.s32.totalorder %s541_s17, %s541_s17 }
  0x8b   : > { %p5914_p1 = scmp.lt.s32.totalorder %s5905_s2, %s5905_s2 }
  0x8c   : > { %p5908_p12 = pnand %p5906_p11, %p6270_p7 }
  0x8d   : > { %4933 = dma.hbm_to_vmem [thread:$0]  (!%p6262_p6), %s8454_s8, 512, %s515_s5, [#allocation12], %s8453_s23, %s8453_s23, %s8452_s29  }
  0x8e   : > { %p5909_p13 = pneg %p5908_p12  ;;  %p5915_p3 = por %p5914_p1, %p5913_p0 }
  0x90   : > { %p5916_p4 = pnand %p5915_p3, %p5909_p13 }
  0x92   : > { %5919 = shalt.err (!%p5916_p4)
}
  0x93   : > { %s8455_s10 = sld [smem:[#allocation43_spill]]  ;;  %s5931_s20 = scalar_lea.vmem %s566_s28, 16 }
  0x94   : > { %p5932_p2 = scmp.ne.s32.totalorder %s566_s28, %s5931_s20  ;;  %s5938_s2 = scalar_lea.vmem %s566_s28, 32 }
  0x95   : > { %p5939_p9 = scmp.lt.s32.totalorder %s566_s28, %s566_s28  ;;  %p5940_p10 = scmp.lt.s32.totalorder %s5938_s2, %s5931_s20 }
  0x96   : > { %p5934_p5 = pnand %p5932_p2, %p6270_p7 }
  0x97   : > { %p5941_p11 = por %p5940_p10, %p5939_p9 }
  0x98   : > { %p5935_p8 = pneg %p5934_p5 }
  0x99   : > { %4939 = dma.hbm_to_vmem [thread:$0]  (!%p6262_p6), %s8455_s10, 512, %s541_s17, [#allocation15], %s8453_s23, %s8453_s23, %s8452_s29  }
  0x9a   : > { %p5942_p12 = pnand %p5941_p11, %p5935_p8 }
  0x9c   : > { %5945 = shalt.err (!%p5942_p12)
}
  0x9d   : > { %s8456_s12 = sld [smem:[#allocation45_spill]]  ;;  %s6133_s29 = smov [#allocation22]  }
  0x9e   : > { %s587_s23 = sshll.u32 %s6133_s29, 4  ;;  %s6134_s17 = smov [#allocation23]   ;;  %s588_s23 = int_to_ptr.vmem [resolvable:$true] %s587_s23 }
  0x9f   : > { %s598_s1 = sshll.u32 %s6134_s17, 4  ;;  %s5957_s5 = scalar_lea.vmem %s588_s23, 16  ;;  %s599_s1 = int_to_ptr.vmem [resolvable:$true] %s598_s1 }
  0xa0   : > { %p5958_p13 = scmp.ne.s32.totalorder %s588_s23, %s5957_s5  ;;  %s5964_s16 = scalar_lea.vmem %s588_s23, 32 }
  0xa1   : > { %p5965_p3 = scmp.lt.s32.totalorder %s588_s23, %s588_s23  ;;  %p5966_p4 = scmp.lt.s32.totalorder %s5964_s16, %s5957_s5 }
  0xa2   : > { %p5960_p0 = pnand %p5958_p13, %p6270_p7 }
  0xa3   : > { %4945 = dma.hbm_to_vmem [thread:$0]  (!%p6262_p6), %s8456_s12, 16, %s566_s28, [#allocation18]  }
  0xa4   : > { %p5961_p1 = pneg %p5960_p0  ;;  %p5967_p2 = por %p5966_p4, %p5965_p3 }
  0xa6   : > { %p5968_p5 = pnand %p5967_p2, %p5961_p1 }
  0xa8   : > { %5971 = shalt.err (!%p5968_p5)
}
  0xa9   : > { %4951 = dma.hbm_to_vmem [thread:$0]  (!%p6262_p6), %s8415_s14, 16, %s588_s23, [#allocation21]  }
  0xaa   : > { %s5983_s2 = scalar_lea.vmem %s599_s1, 16  ;;  %s5990_s18 = scalar_lea.vmem %s599_s1, 32 }
  0xab   : > { %p5984_p8 = scmp.ne.s32.totalorder %s599_s1, %s5983_s2  ;;  %p5991_p11 = scmp.lt.s32.totalorder %s599_s1, %s599_s1 }
  0xac   : > { %p5992_p12 = scmp.lt.s32.totalorder %s5990_s18, %s5983_s2 }
  0xad   : > { %p5986_p9 = pnand %p5984_p8, %p6270_p7 }
  0xae   : > { %p5993_p13 = por %p5992_p12, %p5991_p11 }
  0xaf   : > { %p5987_p10 = pneg %p5986_p9 }
  0xb1   : > { %p5994_p0 = pnand %p5993_p13, %p5987_p10 }
  0xb3   : > { %5997 = shalt.err (!%p5994_p0)
}
  0xb4   : > { %4954 = dma.hbm_to_vmem [thread:$0]  (!%p6262_p6), %s8416_s15, 16, %s599_s1, [#allocation24]  }
  0xb5   : > { %s4818_s22 = sadd.s32 4294967294, %s6118_s27   ;;  %s6384_s21 = sadd.s32 1, %s6118_s27  }
  0xb6   : > { %s48_s23 = sadd.s32 1, %s6114_s26  ;;  %s45_s17 = ssub.s32 %s6118_s27, %s6384_s21 }
  0xb7   : > { %p55_p7 = scmp.ne.s32.totalorder %s6114_s26, %s6110_s25  ;;  %p46_p1 = scmp.eq.s32.totalorder %s45_s17, 0 }
  0xb8   : > { %p56_p3 = scmp.eq.s32.totalorder %s6118_s27, 0  ;;  %p61_p4 = scmp.ne.s32.totalorder %s6110_s25, %s6106_s24 }
  0xb9   : > { %p426_p2 = scmp.eq.s32.totalorder %s6248_s0, 1  ;;  %p8457_p8 = scmp.eq.s32.totalorder %s6248_s0, 0 }
  0xba   : > { %s6396_s5 = scalar_select %p46_p1, %s6114_s26, %s48_s23  }
  0xbb   : > { %p57_p5 = por %p56_p3, %p55_p7  ;;  %p6400_p9 = por %p8457_p8, %p61_p4 }
  0xbc   : > { %p6404_p6 = por %p426_p2, %p55_p7  ;;  %p432_p10 = scmp.eq.s32.totalorder %s4818_s22, 1 }
  0xbd   : > { %s8458_s16 = scalar_select %p6400_p9, 1, 0 }
  0xbe   : > { %s8459_s1 = scalar_select %p6404_p6, 1, 0 }
  0xbf   : > { %p4976_p11 = scmp.lt.s32.totalorder %s6118_s27, 2  ;;  %s609_s20 = sand.u32 1, %s6114_s26  }
  0xc0   : > { %p6410_p12 = por %p432_p10, %p61_p4  ;;  %s4834_s2 = sshll.u32 %s609_s20, 3 }
  0xc1   : > { %s4835_s18 = sshll.u32 %s6118_s27, 7  ;;  %s8461_s23 = sld [smem:[#allocation35_spill]] }
  0xc2   : > { %s8460_s28 = scalar_select %p6410_p12, 1, 0 }
  0xc3   : > { %s613_s6 = scalar_lea.vmem [#allocation2], %s4834_s2  ;;  %p6420_p13 = pnand %p4976_p11, %p57_p5 }
  0xc4   : > { %s620_s7 = sshll.u32 %s613_s6, 4  ;;  %s610_s8 = scalar_lea.sflag [#allocation3], %s609_s20  ;;  %s621_s7 = int_to_ptr.vmem [resolvable:$true] %s620_s7 }
  0xc5   : > { %p6000_p7 = pneg %p6420_p13 }
  0xc7   : > { %s6418_s17 = scalar_lea.hbm %s8461_s23, %s4835_s18  ;;  %s6003_s29 = scalar_lea.hbm %s8461_s23, 256 }
  0xc8   : > { %s5998_s9 = scalar_lea.hbm %s6418_s17, 128  ;;  %p6004_p4 = scmp.lt.s32.totalorder %s6418_s17, %s8461_s23 }
  0xc9   : > { %p5999_p0 = scmp.ne.s32.totalorder %s6418_s17, %s5998_s9  ;;  %p6005_p2 = scmp.lt.s32.totalorder %s6003_s29, %s5998_s9 }
  0xcb   : > { %p6001_p1 = pnand %p6000_p7, %p5999_p0  ;;  %p6006_p5 = por %p6005_p2, %p6004_p4 }
  0xcd   : > { %p6002_p3 = pneg %p6001_p1 }
  0xcf   : > { %p6007_p8 = pnand %p6006_p5, %p6002_p3 }
  0xd1   : > { %6010 = shalt.err (!%p6007_p8)
}
  0xd2   : > { %s6011_s6 = scalar_lea.vmem %s621_s7, 128  ;;  %s6135_s20 = smov [#allocation2]  }
  0xd3   : > { %p6012_p10 = scmp.ne.s32.totalorder %s621_s7, %s6011_s6  ;;  %s6016_s11 = sshll.u32 %s6135_s20, 4  ;;  %s6017_s11 = int_to_ptr.vmem [resolvable:$false] %s6016_s11 }
  0xd4   : > { %s6018_s12 = scalar_lea.vmem %s6017_s11, 256  ;;  %p6019_p0 = scmp.lt.s32.totalorder %s621_s7, %s6017_s11 }
  0xd5   : > { %p6014_p11 = pnand %p6012_p10, %p6000_p7  ;;  %p6020_p1 = scmp.lt.s32.totalorder %s6018_s12, %s6011_s6 }
  0xd7   : > { %p6015_p12 = pneg %p6014_p11  ;;  %p6021_p6 = por %p6020_p1, %p6019_p0 }
  0xd9   : > { %p6022_p9 = pnand %p6021_p6, %p6015_p12 }
  0xdb   : > { %6025 = shalt.err (!%p6022_p9)
}
  0xdc   : > { %4958 = dma.hbm_to_vmem [thread:$0]  (!%p6420_p13), %s6418_s17, 128, %s621_s7, %s610_s8  }
  0xdd   : > { %p8463_p3 = scmp.ne.s32.totalorder %s8442_s30, 0 }
  0xde   : > { %s6441_s9 = sand.u32 (!%p8463_p3), 1, %s6110_s25   ;;  %p8464_p7 = scmp.ne.s32.totalorder (!%p8463_p3), %s8458_s16, 0 }
  0xdf   : > { %629 = sbr.rel (%p8463_p3) target bundleno = 9056 (0x2360), region = 84  ;;  %s4837_s10 = sshll.u32 (!%p8463_p3), %s6441_s9, 3 }
  0xe0   : > { %s632_s18 = scalar_lea.sflag (!%p8463_p3), [#allocation3], %s6441_s9  ;;  %s635_s11 = scalar_lea.vmem (!%p8463_p3), [#allocation2], %s4837_s10 }
  0xe4   : > { %6069 = dma.done.wait (%p8464_p7), %s632_s18, 128  }
  0xe5   : > { %6071 = vsyncadd (%p8464_p7), %s632_s18, 4294967168  ;;  %p8465_p9 = scmp.eq.s32.totalorder %s6248_s0, 0 }
  0xe7   : > { %6073 = dma.done.wait (%p8465_p9), [#allocation6], 32   ;;  %p8466_p6 = pmov %p8465_p9 }
  0xe9   : > { %6075 = vsyncadd (%p8466_p6), [#allocation6], 4294967264  ;;  %p8467_p12 = pmov %p8466_p6 }
  0xea   : > { %p8468_p13 = pmov %p8466_p6 }
  0xeb   : > { %6077 = dma.done.wait (%p8467_p12), [#allocation9], 256  }
  0xec   : > { %6079 = vsyncadd (%p8468_p13), [#allocation9], 4294967040  ;;  %p8469_p4 = pmov %p8466_p6 }
  0xee   : > { %6081 = dma.done.wait (%p8469_p4), [#allocation12], 1024   ;;  %p8470_p2 = pmov %p8469_p4 }
  0xf0   : > { %6083 = vsyncadd (%p8470_p2), [#allocation12], 4294966272  ;;  %p8471_p5 = pmov %p8470_p2 }
  0xf1   : > { %p8472_p8 = pmov %p8470_p2 }
  0xf2   : > { %6085 = dma.done.wait (%p8471_p5), [#allocation15], 1024  }
  0xf3   : > { %6087 = vsyncadd (%p8472_p8), [#allocation15], 4294966272  ;;  %p8473_p10 = pmov %p8470_p2 }
  0xf4   : > { %p8474_p11 = pmov %p8470_p2 }
  0xf5   : > { %6089 = dma.done.wait (%p8473_p10), [#allocation18], 32  }
  0xf6   : > { %6091 = vsyncadd (%p8474_p11), [#allocation18], 4294967264  ;;  %p8475_p0 = pmov %p8470_p2 }
  0xf8   : > { %6093 = dma.done.wait (%p8475_p0), [#allocation21], 32   ;;  %p8476_p1 = pmov %p8475_p0 }
  0xf9   : > { %p8477_p3 = pmov %p8475_p0 }
  0xfa   : > { %6095 = vsyncadd (%p8476_p1), [#allocation21], 4294967264 }
  0xfb   : > { %6097 = dma.done.wait (%p8477_p3), [#allocation24], 16   ;;  %p8478_p7 = pmov %p8475_p0 }
  0xfc   : > { %v787_v0 = vlaneseq  ;;  %v4852_v2 = vld [vmem:[#allocation5] ss:$0 sm:$0xff]  ;;  %v4853_v3 = vld [vmem:[#allocation7] ss:$0 sm:$0xff]  ;;  %v772_v4 = vld [vmem:[%s635_s11] sm:$0xff]  ;;  %vm875_vm0 = vcmask 261120  }
  0xfd   : > { %6099 = vsyncadd (%p8478_p7), [#allocation24], 4294967280  ;;  %v779_v5 = vmul.f32 %v4852_v2, %v772_v4  ;;  %v6486_v9 = vld [vmem:[#allocation11] sm:$0xff]  ;;  %v6488_v10 = vld [vmem:[#allocation11 + $0x8] sm:$0xff]  ;;  %p741_p9 = scmp.lt.s32.totalorder %s6248_s0, 1  ;;  %s8479_s29 = sld [smem:[#allocation46_spill]] }
  0xfe   : > { %v6477_v1 = vshrl.u32 %v787_v0, 7  ;;  %v1024_v11 = vmul.f32 0.0, %v6486_v9  ;;  %v6491_v12 = vld [vmem:[#allocation13] sm:$0xff]  ;;  %v1025_v13 = vmul.f32 0.0, %v6488_v10  ;;  %v6494_v14 = vld [vmem:[#allocation11 + $0x10] sm:$0xff]  ;;  %v6496_v15 = vld [vmem:[#allocation13 + $0x8] sm:$0xff] }
  0xff   : > { %v6482_v7 = vadd.f32 %v4853_v3, %v779_v5  ;;  %v1026_v17 = vmul.f32 0.0, %v6494_v14  ;;  %v6501_v19 = vld [vmem:[#allocation11 + $0x18] sm:$0xff]  ;;  %v6503_v20 = vld [vmem:[#allocation13 + $0x10] sm:$0xff]  ;;  %v6510_v25 = vld [vmem:[#allocation16] sm:$0xff]  ;;  %s742_s16 = scalar_select %p741_p9, %s6248_s0, 1  ;;  %vm1451_vm1 = vcmask 24576  }
 0x100   : > { %v6480_v6 = vsub.s32 0, %v6477_v1  ;;  %v1028_v16 = vsub.f32 %v1024_v11, %v6491_v12  ;;  %v1029_v18 = vsub.f32 %v1025_v13, %v6496_v15  ;;  %v1027_v21 = vmul.f32 0.0, %v6501_v19  ;;  %v6507_v23 = vld [vmem:[#allocation13 + $0x18] sm:$0xff]  ;;  %v6512_v26 = vld [vmem:[#allocation16 + $0x8] sm:$0xff]  ;;  %v6516_v31 = vld [vmem:[#allocation16 + $0x10] sm:$0xff]  ;;  %s4856_s19 = sshll.u32 %s6248_s0, 4 }
 0x101   : > { %v1030_v22 = vsub.f32 %v1026_v17, %v6503_v20  ;;  %v6524_v36 = vld [vmem:[%s8404_s3] sm:$0xff]  ;;  %v6540_v49 = vld [vmem:[#allocation14 + $0x8] sm:$0xff]  ;;  %v6544_v53 = vld [vmem:[#allocation14 + $0x10] sm:$0xff]  ;;  %s4851_s17 = sshll.u32 %s742_s16, 3  ;;  %vm4582_vm2 = vcmask 253952   ;;  %s8480_s18 = sld [smem:[#allocation47_spill]] }
 0x102   : > { %v790_v8 = vrot.slane %v6482_v7, %v6480_v6  ;;  %5038 = vtanh.f32 %v1028_v16  ;;  %v1031_v24 = vsub.f32 %v1027_v21, %v6507_v23  ;;  %v6526_v37 = vld [vmem:[#allocation16 + $0x18] sm:$0xff]  ;;  %v6538_v48 = vld [vmem:[#allocation14] sm:$0xff]  ;;  %v6555_v2 = vld [vmem:[#allocation8] sm:$0xff]  ;;  %s4589_s7 = scalar_lea.sflag [#allocation4], %s6441_s9  ;;  %p8481_p12 = scmp.ne.s32.totalorder %s8459_s1, 0 }
 0x103   : > { %5040 = vtanh.f32 %v1029_v18  ;;  %v6531_v39 = vld [vmem:[%s8405_s4] sm:$0xff]  ;;  %s6733_s2 = scalar_lea.vmem %s8479_s29, %s4851_s17  ;;  %s740_s29 = scalar_lea.vmem [#allocation25], %s6441_s9 }
 0x104   : > { %792 = vbcast.lane.b32.xlu0 %v790_v8, 256  ;;  %5042 = vtanh.f32 %v1030_v22  ;;  %v6549_v58 = vld [vmem:[#allocation14 + $0x18] sm:$0xff]  ;;  %s4604_s6 = sshll.u32 %s740_s29, 4  ;;  %s6136_s0 = smov [#allocation25]   ;;  %s4605_s6 = int_to_ptr.vmem [resolvable:$true] %s4604_s6 }
 0x105   : > { %5044 = vtanh.f32 %v1031_v24  ;;  %v6551_v59 = vld [vmem:[#allocation10] sm:$0xff]  ;;  %s6026_s8 = scalar_lea.vmem %s4605_s6, 16  ;;  %s6030_s12 = sshll.u32 %s6136_s0, 4  ;;  %s6031_s12 = int_to_ptr.vmem [resolvable:$false] %s6030_s12 }
 0x106   : > { %p6027_p6 = scmp.ne.s32.totalorder %s4605_s6, %s6026_s8  ;;  %s6032_s30 = scalar_lea.vmem %s6031_s12, 32 }
 0x107   : > { %s8360_s11 = scalar_lea.hbm %s8480_s18, %s4856_s19  ;;  %p6033_p2 = scmp.lt.s32.totalorder %s4605_s6, %s6031_s12 }
 0x108   : > { %p6028_p13 = pnand %p6027_p6, %p8481_p12  ;;  %p6034_p5 = scmp.lt.s32.totalorder %s6032_s30, %s6026_s8 }
 0x10a   : > { %p6029_p4 = pneg %p6028_p13  ;;  %p6035_p8 = por %p6034_p5, %p6033_p2 }
 0x10c   : > { %p6036_p10 = pnand %p6035_p8, %p6029_p4 }
 0x10f   : > { %v5039_v27 = vpop.eup %5038 }
 0x110   : > { %v5041_v28 = vpop.eup %5040  ;;  %v1053_v29 = vmul.f32 %v5039_v27, %v6510_v25  ;;  %v1036_v51 = vmul.f32 %v5039_v27, %v6538_v48 }
 0x111   : > { %v1054_v30 = vmul.f32 %v5041_v28, %v6512_v26  ;;  %v5043_v32 = vpop.eup %5042  ;;  %v1037_v52 = vmul.f32 %v5041_v28, %v6540_v49 }
 0x112   : > { %v1055_v33 = vmul.f32 %v5043_v32, %v6516_v31  ;;  %v1057_v34 = vsel %vm875_vm0, %v1053_v29, 0.0  ;;  %v5045_v38 = vpop.eup %5044  ;;  %v1038_v55 = vmul.f32 %v5043_v32, %v6544_v53  ;;  %v1040_v56 = vsel %vm875_vm0, %v1036_v51, 0.0  ;;  %v6568_v51 = vld [vmem:[#allocation20] sm:$0x1] }
 0x113   : > { %v1058_v35 = vsel %vm875_vm0, %v1054_v30, 0.0  ;;  %v1056_v43 = vmul.f32 %v5045_v38, %v6526_v37  ;;  %v1041_v57 = vsel %vm875_vm0, %v1037_v52, 0.0  ;;  %v1039_v62 = vmul.f32 %v5045_v38, %v6549_v58 }
 0x114   : > { %v1059_v41 = vadd.f32 %v1058_v35, %v1057_v34  ;;  %v1060_v44 = vsel %vm875_vm0, %v1055_v33, 0.0  ;;  %v1042_v60 = vadd.f32 %v1041_v57, %v1040_v56  ;;  %v1043_v63 = vsel %vm875_vm0, %v1038_v55, 0.0  ;;  %v6562_v33 = vld [vmem:[#allocation19] ss:$0 sm:$0xff]  ;;  %v6571_v56 = vld [vmem:[#allocation17] ss:$0 sm:$0xff] }
 0x115   : > { %v1062_v47 = vsel %vm875_vm0, %v1056_v43, 0.0  ;;  %v1045_v13 = vsel %vm875_vm0, %v1039_v62, 0.0  ;;  %v1070_v55 = vmul.f32 0.0, %v6568_v51 }
 0x116   : > { %v1061_v46 = vadd.f32 %v1060_v44, %v1059_v41  ;;  %v1044_v4 = vadd.f32 %v1043_v63, %v1042_v60 }
 0x118   : > { %v1063_v50 = vadd.f32 %v1062_v47, %v1061_v46  ;;  %v1046_v18 = vadd.f32 %v1045_v13, %v1044_v4 }
 0x11a   : > { %v1064_v54 = vrot.slane %v1063_v50, 4  ;;  %v1047_v29 = vrot.slane %v1046_v18, 4 }
 0x11c   : > { %v1065_v61 = vadd.f32 %v1064_v54, %v1063_v50  ;;  %v1048_v38 = vadd.f32 %v1047_v29, %v1046_v18 }
 0x11e   : > { %v1066_v5 = vrot.slane %v1065_v61, 2  ;;  %v1049_v43 = vrot.slane %v1048_v38, 2 }
 0x120   : > { %v1067_v21 = vadd.f32 %v1066_v5, %v1065_v61  ;;  %v1050_v46 = vadd.f32 %v1049_v43, %v1048_v38 }
 0x122   : > { %v1068_v30 = vrot.slane %v1067_v21, 1  ;;  %v1051_v50 = vrot.slane %v1050_v46, 1 }
 0x124   : > { %v1052_v54 = vadd.f32 %v1051_v50, %v1050_v46 }
 0x126   : > { %v1071_v61 = vadd.f32 %v1070_v55, %v1052_v54 }
 0x176   : > { %v793_v40 = vpop.permute.xlu0 %792 }
 0x177   : > { %v843_v42 = vmul.f32 %v793_v40, %v6524_v36  ;;  %v1069_v40 = vadd.f32 %v1068_v30, %v1067_v21 }
 0x179   : > { %v851_v45 = vsub.f32 %v843_v42, %v6531_v39 }
 0x17b   : > { %5046 = vtanh.f32 %v851_v45 }
 0x188   : > { %v5047_v0 = vpop.eup %5046 }
 0x189   : > { %v946_v3 = vmul.f32 %v5047_v0, %v6551_v59  ;;  %v867_v8 = vmul.f32 %v5047_v0, %v6555_v2 }
 0x18b   : > { %v954_v11 = vsel %vm875_vm0, %v946_v3, 0.0  ;;  %v876_v22 = vsel %vm875_vm0, %v867_v8, 0.0 }
 0x18c   : > { %v955_v16 = vrot.slane %v954_v11, 4  ;;  %v877_v27 = vrot.slane %v876_v22, 4 }
 0x18e   : > { %v956_v17 = vadd.f32 %v955_v16, %v954_v11  ;;  %v878_v34 = vadd.f32 %v877_v27, %v876_v22 }
 0x190   : > { %v957_v24 = vrot.slane %v956_v17, 2  ;;  %v879_v42 = vrot.slane %v878_v34, 2 }
 0x192   : > { %v958_v28 = vadd.f32 %v957_v24, %v956_v17  ;;  %v880_v45 = vadd.f32 %v879_v42, %v878_v34 }
 0x194   : > { %v959_v32 = vrot.slane %v958_v28, 1  ;;  %v881_v47 = vrot.slane %v880_v45, 1 }
 0x196   : > { %v960_v35 = vadd.f32 %v959_v32, %v958_v28  ;;  %v882_v52 = vadd.f32 %v881_v47, %v880_v45 }
 0x198   : > { %v6565_v41 = vadd.f32 %v6562_v33, %v960_v35  ;;  %v6574_v60 = vadd.f32 %v6571_v56, %v882_v52 }
 0x19a   : > { %v1073_v44 = vadd.f32 %v1069_v40, %v6565_v41  ;;  %v1072_v0 = vadd.f32 %v1071_v61, %v6574_v60 }
 0x19c   : > { %5048 = vrcp.f32 %v1073_v44 }
 0x1a9   : > { %v5049_v57 = vpop.eup %5048 }
 0x1aa   : > { %v1075_v62 = vmul.f32 %v5049_v57, %v1073_v44 }
 0x1ac   : > { %v1076_v63 = vsub.f32 2.0, %v1075_v62 }
 0x1ae   : > { %v1077_v3 = vmul.f32 %v5049_v57, %v1076_v63 }
 0x1b0   : > { %v1078_v4 = vmul.f32 %v1077_v3, %v1072_v0 }
 0x1b2   : > { %v1082_v5 = vrot.slane %v1078_v4, %v6480_v6 }
 0x1b4   : > { %1088 = vbcast.lane.b32.xlu1 %v1082_v5, 264  ;;  %1084 = vbcast.lane.b32.xlu0 %v1082_v5, 256 }
 0x1b8   : > { %1092 = vbcast.lane.b32.xlu1 %v1082_v5, 272  ;;  %1096 = vbcast.lane.b32.xlu0 %v1082_v5, 280 }
 0x226   : > { %v1089_v8 = vpop.permute.xlu1 %1088  ;;  %v1085_v11 = vpop.permute.xlu0 %1084 }
 0x227   : > { %v1099_v13 = vmul.f32 %v1089_v8, %v6488_v10  ;;  %v1098_v16 = vmul.f32 %v1085_v11, %v6486_v9 }
 0x229   : > { %v1103_v17 = vsub.f32 %v1099_v13, %v6496_v15  ;;  %v1102_v18 = vsub.f32 %v1098_v16, %v6491_v12 }
 0x22a   : > { %v1093_v21 = vpop.permute.xlu1 %1092  ;;  %v1097_v22 = vpop.permute.xlu0 %1096 }
 0x22b   : > { %5050 = vtanh.f32 %v1103_v17  ;;  %v1100_v24 = vmul.f32 %v1093_v21, %v6494_v14  ;;  %v1101_v27 = vmul.f32 %v1097_v22, %v6501_v19 }
 0x22c   : > { %5052 = vtanh.f32 %v1102_v18 }
 0x22d   : > { %v1104_v28 = vsub.f32 %v1100_v24, %v6503_v20  ;;  %v1105_v29 = vsub.f32 %v1101_v27, %v6507_v23 }
 0x22f   : > { %5054 = vtanh.f32 %v1104_v28 }
 0x230   : > { %5056 = vtanh.f32 %v1105_v29 }
 0x238   : > { %v5051_v30 = vpop.eup %5050 }
 0x239   : > { %v5053_v32 = vpop.eup %5052  ;;  %v1111_v34 = vmul.f32 %v5051_v30, %v6540_v49  ;;  %v1128_v35 = vmul.f32 %v5051_v30, %v6512_v26 }
 0x23a   : > { %v1110_v38 = vmul.f32 %v5053_v32, %v6538_v48  ;;  %v1127_v40 = vmul.f32 %v5053_v32, %v6510_v25 }
 0x23b   : > { %v1115_v42 = vsel %vm875_vm0, %v1111_v34, 0.0  ;;  %v1132_v43 = vsel %vm875_vm0, %v1128_v35, 0.0 }
 0x23c   : > { %v5055_v44 = vpop.eup %5054  ;;  %v1114_v45 = vsel %vm875_vm0, %v1110_v38, 0.0  ;;  %v1131_v46 = vsel %vm875_vm0, %v1127_v40, 0.0  ;;  %v1144_v38 = vmul.f32 %v1078_v4, %v6568_v51 }
 0x23d   : > { %v5057_v47 = vpop.eup %5056  ;;  %v1112_v50 = vmul.f32 %v5055_v44, %v6544_v53  ;;  %v1129_v52 = vmul.f32 %v5055_v44, %v6516_v31  ;;  %v1116_v54 = vadd.f32 %v1115_v42, %v1114_v45  ;;  %v1133_v55 = vadd.f32 %v1132_v43, %v1131_v46 }
 0x23e   : > { %v1130_v57 = vmul.f32 %v5057_v47, %v6526_v37  ;;  %v1113_v63 = vmul.f32 %v5057_v47, %v6549_v58 }
 0x23f   : > { %v1117_v61 = vsel %vm875_vm0, %v1112_v50, 0.0  ;;  %v1134_v62 = vsel %vm875_vm0, %v1129_v52, 0.0 }
 0x240   : > { %v1118_v0 = vadd.f32 %v1117_v61, %v1116_v54  ;;  %v1135_v3 = vadd.f32 %v1134_v62, %v1133_v55  ;;  %v1136_v5 = vsel %vm875_vm0, %v1130_v57, 0.0  ;;  %v1119_v11 = vsel %vm875_vm0, %v1113_v63, 0.0 }
 0x242   : > { %v1137_v8 = vadd.f32 %v1136_v5, %v1135_v3  ;;  %v1120_v13 = vadd.f32 %v1119_v11, %v1118_v0 }
 0x244   : > { %v1138_v16 = vrot.slane %v1137_v8, 4  ;;  %v1121_v18 = vrot.slane %v1120_v13, 4 }
 0x246   : > { %v1139_v17 = vadd.f32 %v1138_v16, %v1137_v8  ;;  %v1122_v24 = vadd.f32 %v1121_v18, %v1120_v13 }
 0x248   : > { %v1140_v21 = vrot.slane %v1139_v17, 2  ;;  %v1123_v29 = vrot.slane %v1122_v24, 2 }
 0x24a   : > { %v1141_v22 = vadd.f32 %v1140_v21, %v1139_v17  ;;  %v1124_v32 = vadd.f32 %v1123_v29, %v1122_v24 }
 0x24c   : > { %v1142_v27 = vrot.slane %v1141_v22, 1  ;;  %v1125_v34 = vrot.slane %v1124_v32, 1 }
 0x24e   : > { %v1143_v28 = vadd.f32 %v1142_v27, %v1141_v22  ;;  %v1126_v35 = vadd.f32 %v1125_v34, %v1124_v32 }
 0x250   : > { %v1147_v30 = vadd.f32 %v1143_v28, %v6565_v41  ;;  %v1145_v42 = vadd.f32 %v1144_v38, %v1126_v35 }
 0x252   : > { %5058 = vrcp.f32 %v1147_v30  ;;  %v1146_v45 = vadd.f32 %v1145_v42, %v6574_v60 }
 0x25f   : > { %v5059_v40 = vpop.eup %5058 }
 0x260   : > { %v1149_v43 = vmul.f32 %v5059_v40, %v1147_v30 }
 0x262   : > { %v1150_v44 = vsub.f32 2.0, %v1149_v43 }
 0x264   : > { %v1151_v46 = vmul.f32 %v5059_v40, %v1150_v44 }
 0x266   : > { %v1152_v47 = vmul.f32 %v1151_v46, %v1146_v45 }
 0x268   : > { %v1156_v50 = vrot.slane %v1152_v47, %v6480_v6 }
 0x26a   : > { %1162 = vbcast.lane.b32.xlu0 %v1156_v50, 264  ;;  %1158 = vbcast.lane.b32.xlu1 %v1156_v50, 256 }
 0x26e   : > { %1170 = vbcast.lane.b32.xlu0 %v1156_v50, 280  ;;  %1166 = vbcast.lane.b32.xlu1 %v1156_v50, 272 }
 0x2dc   : > { %v1163_v52 = vpop.permute.xlu0 %1162  ;;  %v1159_v54 = vpop.permute.xlu1 %1158 }
 0x2dd   : > { %v1173_v55 = vmul.f32 %v1163_v52, %v6488_v10  ;;  %v1172_v4 = vmul.f32 %v1159_v54, %v6486_v9 }
 0x2df   : > { %v1177_v57 = vsub.f32 %v1173_v55, %v6496_v15  ;;  %v1176_v61 = vsub.f32 %v1172_v4, %v6491_v12 }
 0x2e0   : > { %v1171_v62 = vpop.permute.xlu0 %1170  ;;  %v1167_v63 = vpop.permute.xlu1 %1166 }
 0x2e1   : > { %5060 = vtanh.f32 %v1177_v57  ;;  %v1175_v0 = vmul.f32 %v1171_v62, %v6501_v19  ;;  %v1174_v3 = vmul.f32 %v1167_v63, %v6494_v14 }
 0x2e2   : > { %5062 = vtanh.f32 %v1176_v61 }
 0x2e3   : > { %v1179_v5 = vsub.f32 %v1175_v0, %v6507_v23  ;;  %v1178_v8 = vsub.f32 %v1174_v3, %v6503_v20 }
 0x2e5   : > { %5064 = vtanh.f32 %v1179_v5 }
 0x2e6   : > { %5066 = vtanh.f32 %v1178_v8 }
 0x2ee   : > { %v5061_v11 = vpop.eup %5060 }
 0x2ef   : > { %v5063_v13 = vpop.eup %5062  ;;  %v1185_v16 = vmul.f32 %v5061_v11, %v6540_v49  ;;  %v1202_v17 = vmul.f32 %v5061_v11, %v6512_v26 }
 0x2f0   : > { %v1184_v18 = vmul.f32 %v5063_v13, %v6538_v48  ;;  %v1201_v21 = vmul.f32 %v5063_v13, %v6510_v25 }
 0x2f1   : > { %v1189_v24 = vsel %vm875_vm0, %v1185_v16, 0.0  ;;  %v1206_v27 = vsel %vm875_vm0, %v1202_v17, 0.0 }
 0x2f2   : > { %v5065_v22 = vpop.eup %5064  ;;  %v1188_v28 = vsel %vm875_vm0, %v1184_v18, 0.0  ;;  %v1205_v29 = vsel %vm875_vm0, %v1201_v21, 0.0  ;;  %v1218_v18 = vmul.f32 %v1152_v47, %v6568_v51 }
 0x2f3   : > { %v5067_v30 = vpop.eup %5066  ;;  %v1204_v32 = vmul.f32 %v5065_v22, %v6526_v37  ;;  %v1190_v38 = vadd.f32 %v1189_v24, %v1188_v28  ;;  %v1207_v40 = vadd.f32 %v1206_v27, %v1205_v29  ;;  %v1187_v42 = vmul.f32 %v5065_v22, %v6549_v58 }
 0x2f4   : > { %v1186_v34 = vmul.f32 %v5067_v30, %v6544_v53  ;;  %v1203_v35 = vmul.f32 %v5067_v30, %v6516_v31 }
 0x2f5   : > { %v1210_v50 = vsel %vm875_vm0, %v1204_v32, 0.0  ;;  %v1193_v54 = vsel %vm875_vm0, %v1187_v42, 0.0 }
 0x2f6   : > { %v1191_v43 = vsel %vm875_vm0, %v1186_v34, 0.0  ;;  %v1208_v44 = vsel %vm875_vm0, %v1203_v35, 0.0 }
 0x2f7   : > { %v1192_v45 = vadd.f32 %v1191_v43, %v1190_v38  ;;  %v1209_v46 = vadd.f32 %v1208_v44, %v1207_v40 }
 0x2f9   : > { %v1211_v52 = vadd.f32 %v1210_v50, %v1209_v46  ;;  %v1194_v55 = vadd.f32 %v1193_v54, %v1192_v45 }
 0x2fb   : > { %v1212_v4 = vrot.slane %v1211_v52, 4  ;;  %v1195_v61 = vrot.slane %v1194_v55, 4 }
 0x2fd   : > { %v1213_v57 = vadd.f32 %v1212_v4, %v1211_v52  ;;  %v1196_v0 = vadd.f32 %v1195_v61, %v1194_v55 }
 0x2ff   : > { %v1214_v62 = vrot.slane %v1213_v57, 2  ;;  %v1197_v8 = vrot.slane %v1196_v0, 2 }
 0x301   : > { %v1215_v63 = vadd.f32 %v1214_v62, %v1213_v57  ;;  %v1198_v13 = vadd.f32 %v1197_v8, %v1196_v0 }
 0x303   : > { %v1216_v3 = vrot.slane %v1215_v63, 1  ;;  %v1199_v16 = vrot.slane %v1198_v13, 1 }
 0x305   : > { %v1217_v5 = vadd.f32 %v1216_v3, %v1215_v63  ;;  %v1200_v17 = vadd.f32 %v1199_v16, %v1198_v13 }
 0x307   : > { %v1221_v11 = vadd.f32 %v1217_v5, %v6565_v41  ;;  %v1219_v22 = vadd.f32 %v1218_v18, %v1200_v17 }
 0x309   : > { %5068 = vrcp.f32 %v1221_v11  ;;  %v1220_v28 = vadd.f32 %v1219_v22, %v6574_v60 }
 0x316   : > { %v5069_v21 = vpop.eup %5068 }
 0x317   : > { %v1223_v24 = vmul.f32 %v5069_v21, %v1221_v11 }
 0x319   : > { %v1224_v27 = vsub.f32 2.0, %v1223_v24 }
 0x31b   : > { %v1225_v29 = vmul.f32 %v5069_v21, %v1224_v27 }
 0x31d   : > { %v1226_v30 = vmul.f32 %v1225_v29, %v1220_v28 }
 0x31f   : > { %v1230_v32 = vrot.slane %v1226_v30, %v6480_v6 }
 0x321   : > { %1236 = vbcast.lane.b32.xlu0 %v1230_v32, 264  ;;  %1232 = vbcast.lane.b32.xlu1 %v1230_v32, 256 }
 0x325   : > { %1244 = vbcast.lane.b32.xlu0 %v1230_v32, 280  ;;  %1240 = vbcast.lane.b32.xlu1 %v1230_v32, 272 }
 0x393   : > { %v1237_v34 = vpop.permute.xlu0 %1236  ;;  %v1233_v35 = vpop.permute.xlu1 %1232 }
 0x394   : > { %v1247_v38 = vmul.f32 %v1237_v34, %v6488_v10  ;;  %v1246_v47 = vmul.f32 %v1233_v35, %v6486_v9 }
 0x396   : > { %v1251_v40 = vsub.f32 %v1247_v38, %v6496_v15  ;;  %v1250_v42 = vsub.f32 %v1246_v47, %v6491_v12 }
 0x397   : > { %v1245_v43 = vpop.permute.xlu0 %1244  ;;  %v1241_v44 = vpop.permute.xlu1 %1240 }
 0x398   : > { %5070 = vtanh.f32 %v1251_v40  ;;  %v1249_v45 = vmul.f32 %v1245_v43, %v6501_v19  ;;  %v1248_v46 = vmul.f32 %v1241_v44, %v6494_v14 }
 0x399   : > { %5072 = vtanh.f32 %v1250_v42 }
 0x39a   : > { %v1253_v50 = vsub.f32 %v1249_v45, %v6507_v23  ;;  %v1252_v52 = vsub.f32 %v1248_v46, %v6503_v20 }
 0x39c   : > { %5074 = vtanh.f32 %v1253_v50 }
 0x39d   : > { %5076 = vtanh.f32 %v1252_v52 }
 0x3a5   : > { %v5071_v54 = vpop.eup %5070 }
 0x3a6   : > { %v5073_v55 = vpop.eup %5072  ;;  %v1259_v4 = vmul.f32 %v5071_v54, %v6540_v49  ;;  %v1276_v57 = vmul.f32 %v5071_v54, %v6512_v26 }
 0x3a7   : > { %v1258_v61 = vmul.f32 %v5073_v55, %v6538_v48  ;;  %v1275_v62 = vmul.f32 %v5073_v55, %v6510_v25 }
 0x3a8   : > { %v1263_v0 = vsel %vm875_vm0, %v1259_v4, 0.0  ;;  %v1280_v3 = vsel %vm875_vm0, %v1276_v57, 0.0 }
 0x3a9   : > { %v5075_v63 = vpop.eup %5074  ;;  %v1262_v5 = vsel %vm875_vm0, %v1258_v61, 0.0  ;;  %v1279_v8 = vsel %vm875_vm0, %v1275_v62, 0.0  ;;  %v1292_v61 = vmul.f32 %v1226_v30, %v6568_v51 }
 0x3aa   : > { %v5077_v11 = vpop.eup %5076  ;;  %v1278_v13 = vmul.f32 %v5075_v63, %v6526_v37  ;;  %v1264_v18 = vadd.f32 %v1263_v0, %v1262_v5  ;;  %v1281_v21 = vadd.f32 %v1280_v3, %v1279_v8  ;;  %v1261_v22 = vmul.f32 %v5075_v63, %v6549_v58 }
 0x3ab   : > { %v1260_v16 = vmul.f32 %v5077_v11, %v6544_v53  ;;  %v1277_v17 = vmul.f32 %v5077_v11, %v6516_v31 }
 0x3ac   : > { %v1284_v32 = vsel %vm875_vm0, %v1278_v13, 0.0  ;;  %v1267_v35 = vsel %vm875_vm0, %v1261_v22, 0.0 }
 0x3ad   : > { %v1265_v24 = vsel %vm875_vm0, %v1260_v16, 0.0  ;;  %v1282_v27 = vsel %vm875_vm0, %v1277_v17, 0.0 }
 0x3ae   : > { %v1266_v28 = vadd.f32 %v1265_v24, %v1264_v18  ;;  %v1283_v29 = vadd.f32 %v1282_v27, %v1281_v21 }
 0x3b0   : > { %v1285_v34 = vadd.f32 %v1284_v32, %v1283_v29  ;;  %v1268_v38 = vadd.f32 %v1267_v35, %v1266_v28 }
 0x3b2   : > { %v1286_v47 = vrot.slane %v1285_v34, 4  ;;  %v1269_v42 = vrot.slane %v1268_v38, 4 }
 0x3b4   : > { %v1287_v40 = vadd.f32 %v1286_v47, %v1285_v34  ;;  %v1270_v45 = vadd.f32 %v1269_v42, %v1268_v38 }
 0x3b6   : > { %v1288_v43 = vrot.slane %v1287_v40, 2  ;;  %v1271_v52 = vrot.slane %v1270_v45, 2 }
 0x3b8   : > { %v1289_v44 = vadd.f32 %v1288_v43, %v1287_v40  ;;  %v1272_v55 = vadd.f32 %v1271_v52, %v1270_v45 }
 0x3ba   : > { %v1290_v46 = vrot.slane %v1289_v44, 1  ;;  %v1273_v4 = vrot.slane %v1272_v55, 1 }
 0x3bc   : > { %v1291_v50 = vadd.f32 %v1290_v46, %v1289_v44  ;;  %v1274_v57 = vadd.f32 %v1273_v4, %v1272_v55 }
 0x3be   : > { %v1295_v54 = vadd.f32 %v1291_v50, %v6565_v41  ;;  %v1293_v63 = vadd.f32 %v1292_v61, %v1274_v57 }
 0x3c0   : > { %5078 = vrcp.f32 %v1295_v54  ;;  %v1294_v5 = vadd.f32 %v1293_v63, %v6574_v60 }
 0x3cd   : > { %v5079_v62 = vpop.eup %5078 }
 0x3ce   : > { %v1297_v0 = vmul.f32 %v5079_v62, %v1295_v54 }
 0x3d0   : > { %v1298_v3 = vsub.f32 2.0, %v1297_v0 }
 0x3d2   : > { %v1299_v8 = vmul.f32 %v5079_v62, %v1298_v3 }
 0x3d4   : > { %v1300_v11 = vmul.f32 %v1299_v8, %v1294_v5 }
 0x3d6   : > { %v1304_v13 = vrot.slane %v1300_v11, %v6480_v6 }
 0x3d8   : > { %1310 = vbcast.lane.b32.xlu0 %v1304_v13, 264  ;;  %1306 = vbcast.lane.b32.xlu1 %v1304_v13, 256 }
 0x3dc   : > { %1318 = vbcast.lane.b32.xlu0 %v1304_v13, 280  ;;  %1314 = vbcast.lane.b32.xlu1 %v1304_v13, 272 }
 0x44a   : > { %v1311_v16 = vpop.permute.xlu0 %1310  ;;  %v1307_v17 = vpop.permute.xlu1 %1306 }
 0x44b   : > { %v1321_v18 = vmul.f32 %v1311_v16, %v6488_v10  ;;  %v1320_v30 = vmul.f32 %v1307_v17, %v6486_v9 }
 0x44d   : > { %v1325_v21 = vsub.f32 %v1321_v18, %v6496_v15  ;;  %v1324_v22 = vsub.f32 %v1320_v30, %v6491_v12 }
 0x44e   : > { %v1319_v24 = vpop.permute.xlu0 %1318  ;;  %v1315_v27 = vpop.permute.xlu1 %1314 }
 0x44f   : > { %5080 = vtanh.f32 %v1325_v21  ;;  %v1323_v28 = vmul.f32 %v1319_v24, %v6501_v19  ;;  %v1322_v29 = vmul.f32 %v1315_v27, %v6494_v14 }
 0x450   : > { %5082 = vtanh.f32 %v1324_v22 }
 0x451   : > { %v1327_v32 = vsub.f32 %v1323_v28, %v6507_v23  ;;  %v1326_v34 = vsub.f32 %v1322_v29, %v6503_v20 }
 0x453   : > { %5084 = vtanh.f32 %v1327_v32 }
 0x454   : > { %5086 = vtanh.f32 %v1326_v34 }
 0x45c   : > { %v5081_v35 = vpop.eup %5080 }
 0x45d   : > { %v5083_v38 = vpop.eup %5082  ;;  %v1333_v47 = vmul.f32 %v5081_v35, %v6540_v49  ;;  %v1350_v40 = vmul.f32 %v5081_v35, %v6512_v26 }
 0x45e   : > { %v1332_v42 = vmul.f32 %v5083_v38, %v6538_v48  ;;  %v1349_v43 = vmul.f32 %v5083_v38, %v6510_v25 }
 0x45f   : > { %v1337_v45 = vsel %vm875_vm0, %v1333_v47, 0.0  ;;  %v1354_v46 = vsel %vm875_vm0, %v1350_v40, 0.0 }
 0x460   : > { %v5085_v44 = vpop.eup %5084  ;;  %v1336_v50 = vsel %vm875_vm0, %v1332_v42, 0.0  ;;  %v1353_v52 = vsel %vm875_vm0, %v1349_v43, 0.0  ;;  %v1366_v42 = vmul.f32 %v1300_v11, %v6568_v51 }
 0x461   : > { %v5087_v54 = vpop.eup %5086  ;;  %v1352_v55 = vmul.f32 %v5085_v44, %v6526_v37  ;;  %v1338_v61 = vadd.f32 %v1337_v45, %v1336_v50  ;;  %v1355_v62 = vadd.f32 %v1354_v46, %v1353_v52  ;;  %v1335_v63 = vmul.f32 %v5085_v44, %v6549_v58 }
 0x462   : > { %v1334_v4 = vmul.f32 %v5087_v54, %v6544_v53  ;;  %v1351_v57 = vmul.f32 %v5087_v54, %v6516_v31 }
 0x463   : > { %v1358_v13 = vsel %vm875_vm0, %v1352_v55, 0.0  ;;  %v1341_v17 = vsel %vm875_vm0, %v1335_v63, 0.0 }
 0x464   : > { %v1339_v0 = vsel %vm875_vm0, %v1334_v4, 0.0  ;;  %v1356_v3 = vsel %vm875_vm0, %v1351_v57, 0.0 }
 0x465   : > { %v1340_v5 = vadd.f32 %v1339_v0, %v1338_v61  ;;  %v1357_v8 = vadd.f32 %v1356_v3, %v1355_v62 }
 0x467   : > { %v1359_v16 = vadd.f32 %v1358_v13, %v1357_v8  ;;  %v1342_v18 = vadd.f32 %v1341_v17, %v1340_v5 }
 0x469   : > { %v1360_v30 = vrot.slane %v1359_v16, 4  ;;  %v1343_v22 = vrot.slane %v1342_v18, 4 }
 0x46b   : > { %v1361_v21 = vadd.f32 %v1360_v30, %v1359_v16  ;;  %v1344_v28 = vadd.f32 %v1343_v22, %v1342_v18 }
 0x46d   : > { %v1362_v24 = vrot.slane %v1361_v21, 2  ;;  %v1345_v34 = vrot.slane %v1344_v28, 2 }
 0x46f   : > { %v1363_v27 = vadd.f32 %v1362_v24, %v1361_v21  ;;  %v1346_v38 = vadd.f32 %v1345_v34, %v1344_v28 }
 0x471   : > { %v1364_v29 = vrot.slane %v1363_v27, 1  ;;  %v1347_v47 = vrot.slane %v1346_v38, 1 }
 0x473   : > { %v1365_v32 = vadd.f32 %v1364_v29, %v1363_v27  ;;  %v1348_v40 = vadd.f32 %v1347_v47, %v1346_v38 }
 0x475   : > { %v1369_v35 = vadd.f32 %v1365_v32, %v6565_v41  ;;  %v1367_v44 = vadd.f32 %v1366_v42, %v1348_v40 }
 0x477   : > { %5088 = vrcp.f32 %v1369_v35  ;;  %v1368_v50 = vadd.f32 %v1367_v44, %v6574_v60 }
 0x484   : > { %v5089_v43 = vpop.eup %5088 }
 0x485   : > { %v1371_v45 = vmul.f32 %v5089_v43, %v1369_v35 }
 0x487   : > { %v1372_v46 = vsub.f32 2.0, %v1371_v45 }
 0x489   : > { %v1373_v52 = vmul.f32 %v5089_v43, %v1372_v46 }
 0x48b   : > { %v1374_v54 = vmul.f32 %v1373_v52, %v1368_v50 }
 0x48d   : > { %v1378_v55 = vrot.slane %v1374_v54, %v6480_v6 }
 0x48f   : > { %1384 = vbcast.lane.b32.xlu0 %v1378_v55, 264  ;;  %1380 = vbcast.lane.b32.xlu1 %v1378_v55, 256 }
 0x493   : > { %1392 = vbcast.lane.b32.xlu0 %v1378_v55, 280  ;;  %1388 = vbcast.lane.b32.xlu1 %v1378_v55, 272 }
 0x501   : > { %v1385_v4 = vpop.permute.xlu0 %1384  ;;  %v1381_v57 = vpop.permute.xlu1 %1380 }
 0x502   : > { %v1395_v61 = vmul.f32 %v1385_v4, %v6488_v10  ;;  %v1394_v11 = vmul.f32 %v1381_v57, %v6486_v9 }
 0x504   : > { %v1399_v62 = vsub.f32 %v1395_v61, %v6496_v15  ;;  %v1398_v63 = vsub.f32 %v1394_v11, %v6491_v12 }
 0x505   : > { %v1393_v0 = vpop.permute.xlu0 %1392  ;;  %v1389_v3 = vpop.permute.xlu1 %1388 }
 0x506   : > { %5090 = vtanh.f32 %v1399_v62  ;;  %v1397_v5 = vmul.f32 %v1393_v0, %v6501_v19  ;;  %v1396_v8 = vmul.f32 %v1389_v3, %v6494_v14 }
 0x507   : > { %5092 = vtanh.f32 %v1398_v63 }
 0x508   : > { %v1401_v13 = vsub.f32 %v1397_v5, %v6507_v23  ;;  %v1400_v16 = vsub.f32 %v1396_v8, %v6503_v20 }
 0x50a   : > { %5094 = vtanh.f32 %v1401_v13 }
 0x50b   : > { %5096 = vtanh.f32 %v1400_v16 }
 0x513   : > { %v5091_v17 = vpop.eup %5090 }
 0x514   : > { %v5093_v18 = vpop.eup %5092  ;;  %v1407_v30 = vmul.f32 %v5091_v17, %v6540_v49  ;;  %v1424_v21 = vmul.f32 %v5091_v17, %v6512_v26 }
 0x515   : > { %v1406_v22 = vmul.f32 %v5093_v18, %v6538_v48  ;;  %v1423_v24 = vmul.f32 %v5093_v18, %v6510_v25 }
 0x516   : > { %v1411_v28 = vsel %vm875_vm0, %v1407_v30, 0.0  ;;  %v1428_v29 = vsel %vm875_vm0, %v1424_v21, 0.0 }
 0x517   : > { %v5095_v27 = vpop.eup %5094  ;;  %v1410_v32 = vsel %vm875_vm0, %v1406_v22, 0.0  ;;  %v1427_v34 = vsel %vm875_vm0, %v1423_v24, 0.0  ;;  %v1440_v22 = vmul.f32 %v1374_v54, %v6568_v51 }
 0x518   : > { %v5097_v35 = vpop.eup %5096  ;;  %v1426_v38 = vmul.f32 %v5095_v27, %v6526_v37  ;;  %v1412_v42 = vadd.f32 %v1411_v28, %v1410_v32  ;;  %v1429_v43 = vadd.f32 %v1428_v29, %v1427_v34  ;;  %v1409_v44 = vmul.f32 %v5095_v27, %v6549_v58 }
 0x519   : > { %v1408_v47 = vmul.f32 %v5097_v35, %v6544_v53  ;;  %v1425_v40 = vmul.f32 %v5097_v35, %v6516_v31  ;;  %v6719_v35 = vld [vmem:[#allocation22] sm:$0x1] }
 0x51a   : > { %v1432_v55 = vsel %vm875_vm0, %v1426_v38, 0.0  ;;  %v1415_v57 = vsel %vm875_vm0, %v1409_v44, 0.0 }
 0x51b   : > { %v1413_v45 = vsel %vm875_vm0, %v1408_v47, 0.0  ;;  %v1430_v46 = vsel %vm875_vm0, %v1425_v40, 0.0  ;;  %v6724_v47 = vld [vmem:[#allocation23] sm:$0x1] }
 0x51c   : > { %v1414_v50 = vadd.f32 %v1413_v45, %v1412_v42  ;;  %v1431_v52 = vadd.f32 %v1430_v46, %v1429_v43 }
 0x51e   : > { %v1433_v4 = vadd.f32 %v1432_v55, %v1431_v52  ;;  %v1416_v61 = vadd.f32 %v1415_v57, %v1414_v50 }
 0x520   : > { %v1434_v11 = vrot.slane %v1433_v4, 4  ;;  %v1417_v63 = vrot.slane %v1416_v61, 4 }
 0x522   : > { %v1435_v62 = vadd.f32 %v1434_v11, %v1433_v4  ;;  %v1418_v5 = vadd.f32 %v1417_v63, %v1416_v61 }
 0x524   : > { %v1436_v0 = vrot.slane %v1435_v62, 2  ;;  %v1419_v16 = vrot.slane %v1418_v5, 2 }
 0x526   : > { %v1437_v3 = vadd.f32 %v1436_v0, %v1435_v62  ;;  %v1420_v18 = vadd.f32 %v1419_v16, %v1418_v5 }
 0x528   : > { %v1438_v8 = vrot.slane %v1437_v3, 1  ;;  %v1421_v30 = vrot.slane %v1420_v18, 1 }
 0x52a   : > { %v1439_v13 = vadd.f32 %v1438_v8, %v1437_v3  ;;  %v1422_v21 = vadd.f32 %v1421_v30, %v1420_v18 }
 0x52c   : > { %v1443_v17 = vadd.f32 %v1439_v13, %v6565_v41  ;;  %v1441_v27 = vadd.f32 %v1440_v22, %v1422_v21  ;;  %v796_v41 = vsub.s32 1, %v6477_v1 }
 0x52e   : > { %5098 = vrcp.f32 %v1443_v17  ;;  %v1442_v32 = vadd.f32 %v1441_v27, %v6574_v60  ;;  %v797_v42 = vrot.slane %v6482_v7, %v796_v41 }
 0x53b   : > { %v5099_v24 = vpop.eup %5098 }
 0x53c   : > { %v1445_v28 = vmul.f32 %v5099_v24, %v1443_v17 }
 0x53e   : > { %v1446_v29 = vsub.f32 2.0, %v1445_v28 }
 0x540   : > { %v1447_v34 = vmul.f32 %v5099_v24, %v1446_v29 }
 0x542   : > { %v6721_v38 = vmul.f32 %v1447_v34, %v1442_v32 }
 0x544   : > { %v1456_v54 = vrot.slane %v6721_v38, %v6480_v6  ;;  %v1449_v40 = vmul.f32 %v6721_v38, %v6719_v35 }
 0x546   : > { %1462 = vbcast.lane.b32.xlu0 %v1456_v54, 264  ;;  %v1450_v60 = vadd.f32 %v1449_v40, %v6724_v47  ;;  %1458 = vbcast.lane.b32.xlu1 %v1456_v54, 256 }
 0x548   : > { %1452 = vst.msk [vmem:[%s6733_s2] sm:$0x1] %vm1451_vm1, %v1450_v60 }
 0x54a   : > { %799 = vbcast.lane.b32.xlu0 %v797_v42, 256  ;;  %1466 = vbcast.lane.b32.xlu1 %v1456_v54, 272 }
 0x54e   : > { %1470 = vbcast.lane.b32.xlu1 %v1456_v54, 280 }
 0x5b8   : > { %v1463_v43 = vpop.permute.xlu0 %1462  ;;  %v1459_v44 = vpop.permute.xlu1 %1458 }
 0x5b9   : > { %v1473_v45 = vmul.f32 %v1463_v43, %v6488_v10  ;;  %v1472_v46 = vmul.f32 %v1459_v44, %v6486_v9 }
 0x5bb   : > { %v1477_v50 = vsub.f32 %v1473_v45, %v6496_v15  ;;  %v1476_v52 = vsub.f32 %v1472_v46, %v6491_v12 }
 0x5bc   : > { %v800_v55 = vpop.permute.xlu0 %799  ;;  %v1467_v4 = vpop.permute.xlu1 %1466 }
 0x5bd   : > { %5100 = vtanh.f32 %v1477_v50  ;;  %v844_v57 = vmul.f32 %v800_v55, %v6524_v36  ;;  %v1474_v61 = vmul.f32 %v1467_v4, %v6494_v14 }
 0x5be   : > { %5102 = vtanh.f32 %v1476_v52 }
 0x5bf   : > { %v852_v11 = vsub.f32 %v844_v57, %v6531_v39  ;;  %v1478_v62 = vsub.f32 %v1474_v61, %v6503_v20 }
 0x5c0   : > { %v1471_v63 = vpop.permute.xlu1 %1470 }
 0x5c1   : > { %5104 = vtanh.f32 %v852_v11  ;;  %v1475_v9 = vmul.f32 %v1471_v63, %v6501_v19 }
 0x5c2   : > { %5106 = vtanh.f32 %v1478_v62 }
 0x5c3   : > { %v1479_v10 = vsub.f32 %v1475_v9, %v6507_v23 }
 0x5c5   : > { %5108 = vtanh.f32 %v1479_v10 }
 0x5ca   : > { %v5101_v12 = vpop.eup %5100 }
 0x5cb   : > { %v5103_v15 = vpop.eup %5102  ;;  %v1502_v0 = vmul.f32 %v5101_v12, %v6512_v26  ;;  %v1485_v14 = vmul.f32 %v5101_v12, %v6540_v49 }
 0x5cc   : > { %v1501_v36 = vmul.f32 %v5103_v15, %v6510_v25  ;;  %v1484_v39 = vmul.f32 %v5103_v15, %v6538_v48 }
 0x5cd   : > { %v1506_v5 = vsel %vm875_vm0, %v1502_v0, 0.0  ;;  %v1489_v26 = vsel %vm875_vm0, %v1485_v14, 0.0  ;;  %v1518_v0 = vmul.f32 %v6721_v38, %v6568_v51 }
 0x5ce   : > { %v5105_v3 = vpop.eup %5104  ;;  %v1505_v19 = vsel %vm875_vm0, %v1501_v36, 0.0  ;;  %v1488_v25 = vsel %vm875_vm0, %v1484_v39, 0.0 }
 0x5cf   : > { %v5107_v20 = vpop.eup %5106  ;;  %v947_v8 = vmul.f32 %v5105_v3, %v6551_v59  ;;  %v1507_v48 = vadd.f32 %v1506_v5, %v1505_v19  ;;  %v868_v34 = vmul.f32 %v5105_v3, %v6555_v2 }
 0x5d0   : > { %v1486_v23 = vmul.f32 %v5107_v20, %v6544_v53  ;;  %v1503_v13 = vmul.f32 %v5107_v20, %v6516_v31  ;;  %v1490_v53 = vadd.f32 %v1489_v26, %v1488_v25  ;;  %v6789_v25 = vld [vmem:[#allocation13 + $0x8] sm:$0xff] }
 0x5d1   : > { %v961_v49 = vsel %vm875_vm0, %v947_v8, 0.0 }
 0x5d2   : > { %v5109_v16 = vpop.eup %5108  ;;  %v962_v17 = vrot.slane %v961_v49, 4  ;;  %v1508_v18 = vsel %vm875_vm0, %v1503_v13, 0.0  ;;  %v1491_v30 = vsel %vm875_vm0, %v1486_v23, 0.0  ;;  %v6783_v23 = vld [vmem:[#allocation11 + $0x8] sm:$0xff]  ;;  %v6786_v13 = vld [vmem:[#allocation11] sm:$0xff] }
 0x5d3   : > { %v1487_v21 = vmul.f32 %v5109_v16, %v6549_v58  ;;  %v1504_v59 = vmul.f32 %v5109_v16, %v6526_v37  ;;  %v1509_v31 = vadd.f32 %v1508_v18, %v1507_v48  ;;  %v1492_v29 = vadd.f32 %v1491_v30, %v1490_v53  ;;  %v6792_v16 = vld [vmem:[#allocation13] sm:$0xff]  ;;  %v6795_v30 = vld [vmem:[#allocation11 + $0x18] sm:$0xff] }
 0x5d4   : > { %v963_v22 = vadd.f32 %v962_v17, %v961_v49  ;;  %v883_v58 = vsel %vm875_vm0, %v868_v34, 0.0 }
 0x5d5   : > { %v1493_v24 = vsel %vm875_vm0, %v1487_v21, 0.0  ;;  %v1510_v27 = vsel %vm875_vm0, %v1504_v59, 0.0  ;;  %v884_v44 = vrot.slane %v883_v58, 4  ;;  %v6798_v59 = vld [vmem:[#allocation11 + $0x10] sm:$0xff] }
 0x5d6   : > { %v964_v28 = vrot.slane %v963_v22, 2  ;;  %v1511_v32 = vadd.f32 %v1510_v27, %v1509_v31  ;;  %v1494_v54 = vadd.f32 %v1493_v24, %v1492_v29  ;;  %v6804_v24 = vld [vmem:[#allocation13 + $0x10] sm:$0xff] }
 0x5d7   : > { %v885_v55 = vadd.f32 %v884_v44, %v883_v58 }
 0x5d8   : > { %v965_v41 = vadd.f32 %v964_v28, %v963_v22  ;;  %v1512_v40 = vrot.slane %v1511_v32, 4  ;;  %v1495_v37 = vrot.slane %v1494_v54, 4  ;;  %v6801_v22 = vld [vmem:[#allocation13 + $0x18] sm:$0xff] }
 0x5d9   : > { %v886_v11 = vrot.slane %v885_v55, 2 }
 0x5da   : > { %v966_v60 = vrot.slane %v965_v41, 1  ;;  %v1513_v42 = vadd.f32 %v1512_v40, %v1511_v32  ;;  %v1496_v50 = vadd.f32 %v1495_v37, %v1494_v54  ;;  %v6807_v32 = vld [vmem:[#allocation14 + $0x8] sm:$0xff]  ;;  %v6813_v40 = vld [vmem:[#allocation14] sm:$0xff] }
 0x5db   : > { %v887_v63 = vadd.f32 %v886_v11, %v885_v55 }
 0x5dc   : > { %v1514_v43 = vrot.slane %v1513_v42, 2  ;;  %v967_v45 = vadd.f32 %v966_v60, %v965_v41  ;;  %v1497_v2 = vrot.slane %v1496_v50, 2  ;;  %v6810_v41 = vld [vmem:[#allocation16 + $0x8] sm:$0xff] }
 0x5dd   : > { %v888_v10 = vrot.slane %v887_v63, 1 }
 0x5de   : > { %v1515_v46 = vadd.f32 %v1514_v43, %v1513_v42  ;;  %v6770_v4 = vadd.f32 %v6562_v33, %v967_v45  ;;  %v1498_v62 = vadd.f32 %v1497_v2, %v1496_v50  ;;  %v6816_v42 = vld [vmem:[#allocation16] sm:$0xff] }
 0x5df   : > { %v889_v15 = vadd.f32 %v888_v10, %v887_v63 }
 0x5e0   : > { %v1516_v52 = vrot.slane %v1515_v46, 1  ;;  %v1499_v9 = vrot.slane %v1498_v62, 1 }
 0x5e1   : > { %v6776_v33 = vadd.f32 %v6571_v56, %v889_v15 }
 0x5e2   : > { %v1517_v57 = vadd.f32 %v1516_v52, %v1515_v46  ;;  %v1500_v12 = vadd.f32 %v1499_v9, %v1498_v62  ;;  %v6823_v52 = vld [vmem:[#allocation16 + $0x18] sm:$0xff] }
 0x5e3   : > { %v6832_v9 = vld [vmem:[#allocation14 + $0x18] sm:$0xff] }
 0x5e4   : > { %v1521_v61 = vadd.f32 %v1517_v57, %v6770_v4  ;;  %v1519_v14 = vadd.f32 %v1518_v0, %v1500_v12  ;;  %v6826_v57 = vld [vmem:[#allocation14 + $0x10] sm:$0xff] }
 0x5e6   : > { %5110 = vrcp.f32 %v1521_v61  ;;  %v1520_v20 = vadd.f32 %v1519_v14, %v6776_v33 }
 0x5f3   : > { %v5111_v36 = vpop.eup %5110 }
 0x5f4   : > { %v1523_v39 = vmul.f32 %v5111_v36, %v1521_v61  ;;  %v6829_v61 = vld [vmem:[#allocation16 + $0x10] sm:$0xff] }
 0x5f6   : > { %v1524_v3 = vsub.f32 2.0, %v1523_v39 }
 0x5f8   : > { %v1525_v5 = vmul.f32 %v5111_v36, %v1524_v3 }
 0x5fa   : > { %v6779_v19 = vmul.f32 %v1525_v5, %v1520_v20 }
 0x5fc   : > { %v1530_v8 = vrot.slane %v6779_v19, %v6480_v6 }
 0x5fe   : > { %1536 = vbcast.lane.b32.xlu1 %v1530_v8, 264  ;;  %1532 = vbcast.lane.b32.xlu0 %v1530_v8, 256 }
 0x602   : > { %1544 = vbcast.lane.b32.xlu1 %v1530_v8, 280  ;;  %1540 = vbcast.lane.b32.xlu0 %v1530_v8, 272 }
 0x670   : > { %v1537_v51 = vpop.permute.xlu1 %1536  ;;  %v1533_v38 = vpop.permute.xlu0 %1532 }
 0x671   : > { %v1547_v56 = vmul.f32 %v6783_v23, %v1537_v51  ;;  %v1546_v26 = vmul.f32 %v6786_v13, %v1533_v38 }
 0x673   : > { %v1551_v49 = vsub.f32 %v1547_v56, %v6789_v25  ;;  %v1550_v48 = vsub.f32 %v1546_v26, %v6792_v16 }
 0x674   : > { %v1545_v17 = vpop.permute.xlu1 %1544  ;;  %v1541_v18 = vpop.permute.xlu0 %1540 }
 0x675   : > { %5112 = vtanh.f32 %v1551_v49  ;;  %v1549_v21 = vmul.f32 %v6795_v30, %v1545_v17  ;;  %v1548_v53 = vmul.f32 %v6798_v59, %v1541_v18 }
 0x676   : > { %5114 = vtanh.f32 %v1550_v48 }
 0x677   : > { %v1553_v31 = vsub.f32 %v1549_v21, %v6801_v22  ;;  %v1552_v27 = vsub.f32 %v1548_v53, %v6804_v24 }
 0x679   : > { %5116 = vtanh.f32 %v1553_v31 }
 0x67a   : > { %5118 = vtanh.f32 %v1552_v27  ;;  %v6840_v27 = vld [vmem:[#allocation20] sm:$0x1] }
 0x682   : > { %v5113_v28 = vpop.eup %5112 }
 0x683   : > { %v5115_v29 = vpop.eup %5114  ;;  %v1559_v34 = vmul.f32 %v6807_v32, %v5113_v28  ;;  %v1576_v54 = vmul.f32 %v6810_v41, %v5113_v28  ;;  %v1592_v28 = vmul.f32 %v6840_v27, %v6779_v19 }
 0x684   : > { %v1558_v60 = vmul.f32 %v6813_v40, %v5115_v29  ;;  %v1575_v58 = vmul.f32 %v6816_v42, %v5115_v29 }
 0x685   : > { %v1563_v43 = vsel %vm875_vm0, %v1559_v34, 0.0  ;;  %v1580_v44 = vsel %vm875_vm0, %v1576_v54, 0.0 }
 0x686   : > { %v5117_v37 = vpop.eup %5116  ;;  %v1562_v45 = vsel %vm875_vm0, %v1558_v60, 0.0  ;;  %v1579_v46 = vsel %vm875_vm0, %v1575_v58, 0.0 }
 0x687   : > { %v5119_v50 = vpop.eup %5118  ;;  %v1578_v55 = vmul.f32 %v6823_v52, %v5117_v37  ;;  %v1564_v62 = vadd.f32 %v1563_v43, %v1562_v45  ;;  %v1581_v63 = vadd.f32 %v1580_v44, %v1579_v46  ;;  %v1561_v10 = vmul.f32 %v6832_v9, %v5117_v37 }
 0x688   : > { %v1560_v2 = vmul.f32 %v6826_v57, %v5119_v50  ;;  %v1577_v11 = vmul.f32 %v6829_v61, %v5119_v50 }
 0x689   : > { %v1584_v14 = vsel %vm875_vm0, %v1578_v55, 0.0  ;;  %v1567_v3 = vsel %vm875_vm0, %v1561_v10, 0.0 }
 0x68a   : > { %v1565_v12 = vsel %vm875_vm0, %v1560_v2, 0.0  ;;  %v1582_v15 = vsel %vm875_vm0, %v1577_v11, 0.0 }
 0x68b   : > { %v1566_v0 = vadd.f32 %v1565_v12, %v1564_v62  ;;  %v1583_v36 = vadd.f32 %v1582_v15, %v1581_v63 }
 0x68d   : > { %v1585_v39 = vadd.f32 %v1584_v14, %v1583_v36  ;;  %v1568_v20 = vadd.f32 %v1567_v3, %v1566_v0 }
 0x68f   : > { %v1586_v5 = vrot.slane %v1585_v39, 4  ;;  %v1569_v51 = vrot.slane %v1568_v20, 4 }
 0x691   : > { %v1587_v8 = vadd.f32 %v1586_v5, %v1585_v39  ;;  %v1570_v26 = vadd.f32 %v1569_v51, %v1568_v20 }
 0x693   : > { %v1588_v38 = vrot.slane %v1587_v8, 2  ;;  %v1571_v17 = vrot.slane %v1570_v26, 2 }
 0x695   : > { %v1589_v56 = vadd.f32 %v1588_v38, %v1587_v8  ;;  %v1572_v21 = vadd.f32 %v1571_v17, %v1570_v26 }
 0x697   : > { %v1590_v49 = vrot.slane %v1589_v56, 1  ;;  %v1573_v53 = vrot.slane %v1572_v21, 1 }
 0x699   : > { %v1591_v48 = vadd.f32 %v1590_v49, %v1589_v56  ;;  %v1574_v31 = vadd.f32 %v1573_v53, %v1572_v21 }
 0x69b   : > { %v1595_v18 = vadd.f32 %v1591_v48, %v6770_v4  ;;  %v1593_v34 = vadd.f32 %v1592_v28, %v1574_v31 }
 0x69d   : > { %5120 = vrcp.f32 %v1595_v18  ;;  %v1594_v58 = vadd.f32 %v1593_v34, %v6776_v33 }
 0x6aa   : > { %v5121_v29 = vpop.eup %5120 }
 0x6ab   : > { %v1597_v54 = vmul.f32 %v5121_v29, %v1595_v18 }
 0x6ad   : > { %v1598_v60 = vsub.f32 2.0, %v1597_v54 }
 0x6af   : > { %v1599_v37 = vmul.f32 %v5121_v29, %v1598_v60 }
 0x6b1   : > { %v1600_v43 = vmul.f32 %v1599_v37, %v1594_v58 }
 0x6b3   : > { %v1604_v44 = vrot.slane %v1600_v43, %v6480_v6 }
 0x6b5   : > { %1610 = vbcast.lane.b32.xlu1 %v1604_v44, 264  ;;  %1606 = vbcast.lane.b32.xlu0 %v1604_v44, 256 }
 0x6b9   : > { %1618 = vbcast.lane.b32.xlu1 %v1604_v44, 280  ;;  %1614 = vbcast.lane.b32.xlu0 %v1604_v44, 272 }
 0x727   : > { %v1611_v45 = vpop.permute.xlu1 %1610  ;;  %v1607_v46 = vpop.permute.xlu0 %1606 }
 0x728   : > { %v1621_v50 = vmul.f32 %v6783_v23, %v1611_v45  ;;  %v1620_v19 = vmul.f32 %v6786_v13, %v1607_v46 }
 0x72a   : > { %v1625_v55 = vsub.f32 %v1621_v50, %v6789_v25  ;;  %v1624_v2 = vsub.f32 %v1620_v19, %v6792_v16 }
 0x72b   : > { %v1619_v11 = vpop.permute.xlu1 %1618  ;;  %v1615_v62 = vpop.permute.xlu0 %1614 }
 0x72c   : > { %5122 = vtanh.f32 %v1625_v55  ;;  %v1623_v63 = vmul.f32 %v6795_v30, %v1619_v11  ;;  %v1622_v10 = vmul.f32 %v6798_v59, %v1615_v62 }
 0x72d   : > { %5124 = vtanh.f32 %v1624_v2 }
 0x72e   : > { %v1627_v12 = vsub.f32 %v1623_v63, %v6801_v22  ;;  %v1626_v15 = vsub.f32 %v1622_v10, %v6804_v24 }
 0x730   : > { %5126 = vtanh.f32 %v1627_v12 }
 0x731   : > { %5128 = vtanh.f32 %v1626_v15 }
 0x739   : > { %v5123_v0 = vpop.eup %5122 }
 0x73a   : > { %v5125_v36 = vpop.eup %5124  ;;  %v1633_v14 = vmul.f32 %v6807_v32, %v5123_v0  ;;  %v1650_v39 = vmul.f32 %v6810_v41, %v5123_v0  ;;  %v1666_v0 = vmul.f32 %v6840_v27, %v1600_v43 }
 0x73b   : > { %v1632_v3 = vmul.f32 %v6813_v40, %v5125_v36  ;;  %v1649_v20 = vmul.f32 %v6816_v42, %v5125_v36 }
 0x73c   : > { %v1637_v8 = vsel %vm875_vm0, %v1633_v14, 0.0  ;;  %v1654_v51 = vsel %vm875_vm0, %v1650_v39, 0.0 }
 0x73d   : > { %v5127_v5 = vpop.eup %5126  ;;  %v1636_v38 = vsel %vm875_vm0, %v1632_v3, 0.0  ;;  %v1653_v56 = vsel %vm875_vm0, %v1649_v20, 0.0 }
 0x73e   : > { %v5129_v26 = vpop.eup %5128  ;;  %v1652_v49 = vmul.f32 %v6823_v52, %v5127_v5  ;;  %v1638_v18 = vadd.f32 %v1637_v8, %v1636_v38  ;;  %v1655_v21 = vadd.f32 %v1654_v51, %v1653_v56  ;;  %v1635_v53 = vmul.f32 %v6832_v9, %v5127_v5 }
 0x73f   : > { %v1634_v48 = vmul.f32 %v6826_v57, %v5129_v26  ;;  %v1651_v17 = vmul.f32 %v6829_v61, %v5129_v26 }
 0x740   : > { %v1658_v54 = vsel %vm875_vm0, %v1652_v49, 0.0  ;;  %v1641_v58 = vsel %vm875_vm0, %v1635_v53, 0.0 }
 0x741   : > { %v1639_v31 = vsel %vm875_vm0, %v1634_v48, 0.0  ;;  %v1656_v28 = vsel %vm875_vm0, %v1651_v17, 0.0 }
 0x742   : > { %v1640_v29 = vadd.f32 %v1639_v31, %v1638_v18  ;;  %v1657_v34 = vadd.f32 %v1656_v28, %v1655_v21 }
 0x744   : > { %v1659_v60 = vadd.f32 %v1658_v54, %v1657_v34  ;;  %v1642_v37 = vadd.f32 %v1641_v58, %v1640_v29 }
 0x746   : > { %v1660_v44 = vrot.slane %v1659_v60, 4  ;;  %v1643_v46 = vrot.slane %v1642_v37, 4 }
 0x748   : > { %v1661_v45 = vadd.f32 %v1660_v44, %v1659_v60  ;;  %v1644_v55 = vadd.f32 %v1643_v46, %v1642_v37 }
 0x74a   : > { %v1662_v50 = vrot.slane %v1661_v45, 2  ;;  %v1645_v62 = vrot.slane %v1644_v55, 2 }
 0x74c   : > { %v1663_v19 = vadd.f32 %v1662_v50, %v1661_v45  ;;  %v1646_v10 = vadd.f32 %v1645_v62, %v1644_v55 }
 0x74e   : > { %v1664_v2 = vrot.slane %v1663_v19, 1  ;;  %v1647_v12 = vrot.slane %v1646_v10, 1 }
 0x750   : > { %v1665_v11 = vadd.f32 %v1664_v2, %v1663_v19  ;;  %v1648_v15 = vadd.f32 %v1647_v12, %v1646_v10 }
 0x752   : > { %v1669_v63 = vadd.f32 %v1665_v11, %v6770_v4  ;;  %v1667_v14 = vadd.f32 %v1666_v0, %v1648_v15 }
 0x754   : > { %5130 = vrcp.f32 %v1669_v63  ;;  %v1668_v20 = vadd.f32 %v1667_v14, %v6776_v33 }
 0x761   : > { %v5131_v36 = vpop.eup %5130 }
 0x762   : > { %v1671_v39 = vmul.f32 %v5131_v36, %v1669_v63 }
 0x764   : > { %v1672_v3 = vsub.f32 2.0, %v1671_v39 }
 0x766   : > { %v1673_v5 = vmul.f32 %v5131_v36, %v1672_v3 }
 0x768   : > { %v1674_v8 = vmul.f32 %v1673_v5, %v1668_v20 }
 0x76a   : > { %v1678_v51 = vrot.slane %v1674_v8, %v6480_v6 }
 0x76c   : > { %1684 = vbcast.lane.b32.xlu1 %v1678_v51, 264  ;;  %1680 = vbcast.lane.b32.xlu0 %v1678_v51, 256 }
 0x770   : > { %1692 = vbcast.lane.b32.xlu1 %v1678_v51, 280  ;;  %1688 = vbcast.lane.b32.xlu0 %v1678_v51, 272 }
 0x7de   : > { %v1685_v38 = vpop.permute.xlu1 %1684  ;;  %v1681_v56 = vpop.permute.xlu0 %1680 }
 0x7df   : > { %v1695_v26 = vmul.f32 %v6783_v23, %v1685_v38  ;;  %v1694_v43 = vmul.f32 %v6786_v13, %v1681_v56 }
 0x7e1   : > { %v1699_v49 = vsub.f32 %v1695_v26, %v6789_v25  ;;  %v1698_v48 = vsub.f32 %v1694_v43, %v6792_v16 }
 0x7e2   : > { %v1693_v17 = vpop.permute.xlu1 %1692  ;;  %v1689_v18 = vpop.permute.xlu0 %1688 }
 0x7e3   : > { %5132 = vtanh.f32 %v1699_v49  ;;  %v1697_v21 = vmul.f32 %v6795_v30, %v1693_v17  ;;  %v1696_v53 = vmul.f32 %v6798_v59, %v1689_v18 }
 0x7e4   : > { %5134 = vtanh.f32 %v1698_v48 }
 0x7e5   : > { %v1701_v31 = vsub.f32 %v1697_v21, %v6801_v22  ;;  %v1700_v28 = vsub.f32 %v1696_v53, %v6804_v24 }
 0x7e7   : > { %5136 = vtanh.f32 %v1701_v31 }
 0x7e8   : > { %5138 = vtanh.f32 %v1700_v28 }
 0x7f0   : > { %v5133_v29 = vpop.eup %5132 }
 0x7f1   : > { %v5135_v34 = vpop.eup %5134  ;;  %v1707_v54 = vmul.f32 %v6807_v32, %v5133_v29  ;;  %v1724_v60 = vmul.f32 %v6810_v41, %v5133_v29  ;;  %v1740_v29 = vmul.f32 %v6840_v27, %v1674_v8 }
 0x7f2   : > { %v1706_v58 = vmul.f32 %v6813_v40, %v5135_v34  ;;  %v1723_v37 = vmul.f32 %v6816_v42, %v5135_v34 }
 0x7f3   : > { %v1711_v45 = vsel %vm875_vm0, %v1707_v54, 0.0  ;;  %v1728_v46 = vsel %vm875_vm0, %v1724_v60, 0.0 }
 0x7f4   : > { %v5137_v44 = vpop.eup %5136  ;;  %v1710_v50 = vsel %vm875_vm0, %v1706_v58, 0.0  ;;  %v1727_v19 = vsel %vm875_vm0, %v1723_v37, 0.0 }
 0x7f5   : > { %v5139_v55 = vpop.eup %5138  ;;  %v1726_v2 = vmul.f32 %v6823_v52, %v5137_v44  ;;  %v1712_v63 = vadd.f32 %v1711_v45, %v1710_v50  ;;  %v1729_v10 = vadd.f32 %v1728_v46, %v1727_v19  ;;  %v1709_v12 = vmul.f32 %v6832_v9, %v5137_v44 }
 0x7f6   : > { %v1708_v11 = vmul.f32 %v6826_v57, %v5139_v55  ;;  %v1725_v62 = vmul.f32 %v6829_v61, %v5139_v55 }
 0x7f7   : > { %v1732_v39 = vsel %vm875_vm0, %v1726_v2, 0.0  ;;  %v1715_v20 = vsel %vm875_vm0, %v1709_v12, 0.0 }
 0x7f8   : > { %v1713_v15 = vsel %vm875_vm0, %v1708_v11, 0.0  ;;  %v1730_v0 = vsel %vm875_vm0, %v1725_v62, 0.0 }
 0x7f9   : > { %v1714_v36 = vadd.f32 %v1713_v15, %v1712_v63  ;;  %v1731_v14 = vadd.f32 %v1730_v0, %v1729_v10 }
 0x7fb   : > { %v1733_v3 = vadd.f32 %v1732_v39, %v1731_v14  ;;  %v1716_v5 = vadd.f32 %v1715_v20, %v1714_v36 }
 0x7fd   : > { %v1734_v51 = vrot.slane %v1733_v3, 4  ;;  %v1717_v56 = vrot.slane %v1716_v5, 4 }
 0x7ff   : > { %v1735_v38 = vadd.f32 %v1734_v51, %v1733_v3  ;;  %v1718_v49 = vadd.f32 %v1717_v56, %v1716_v5 }
 0x801   : > { %v1736_v26 = vrot.slane %v1735_v38, 2  ;;  %v1719_v18 = vrot.slane %v1718_v49, 2 }
 0x803   : > { %v1737_v43 = vadd.f32 %v1736_v26, %v1735_v38  ;;  %v1720_v53 = vadd.f32 %v1719_v18, %v1718_v49 }
 0x805   : > { %v1738_v48 = vrot.slane %v1737_v43, 1  ;;  %v1721_v31 = vrot.slane %v1720_v53, 1 }
 0x807   : > { %v1739_v17 = vadd.f32 %v1738_v48, %v1737_v43  ;;  %v1722_v28 = vadd.f32 %v1721_v31, %v1720_v53 }
 0x809   : > { %v1743_v21 = vadd.f32 %v1739_v17, %v6770_v4  ;;  %v1741_v54 = vadd.f32 %v1740_v29, %v1722_v28 }
 0x80b   : > { %5140 = vrcp.f32 %v1743_v21  ;;  %v1742_v37 = vadd.f32 %v1741_v54, %v6776_v33 }
 0x818   : > { %v5141_v34 = vpop.eup %5140 }
 0x819   : > { %v1745_v60 = vmul.f32 %v5141_v34, %v1743_v21 }
 0x81b   : > { %v1746_v58 = vsub.f32 2.0, %v1745_v60 }
 0x81d   : > { %v1747_v44 = vmul.f32 %v5141_v34, %v1746_v58 }
 0x81f   : > { %v1748_v45 = vmul.f32 %v1747_v44, %v1742_v37 }
 0x821   : > { %v1752_v46 = vrot.slane %v1748_v45, %v6480_v6 }
 0x823   : > { %1758 = vbcast.lane.b32.xlu1 %v1752_v46, 264  ;;  %1754 = vbcast.lane.b32.xlu0 %v1752_v46, 256 }
 0x827   : > { %1766 = vbcast.lane.b32.xlu1 %v1752_v46, 280  ;;  %1762 = vbcast.lane.b32.xlu0 %v1752_v46, 272 }
 0x895   : > { %v1759_v50 = vpop.permute.xlu1 %1758  ;;  %v1755_v19 = vpop.permute.xlu0 %1754 }
 0x896   : > { %v1769_v55 = vmul.f32 %v6783_v23, %v1759_v50  ;;  %v1768_v8 = vmul.f32 %v6786_v13, %v1755_v19 }
 0x898   : > { %v1773_v2 = vsub.f32 %v1769_v55, %v6789_v25  ;;  %v1772_v11 = vsub.f32 %v1768_v8, %v6792_v16 }
 0x899   : > { %v1767_v62 = vpop.permute.xlu1 %1766  ;;  %v1763_v63 = vpop.permute.xlu0 %1762 }
 0x89a   : > { %5142 = vtanh.f32 %v1773_v2  ;;  %v1771_v10 = vmul.f32 %v6795_v30, %v1767_v62  ;;  %v1770_v12 = vmul.f32 %v6798_v59, %v1763_v63 }
 0x89b   : > { %5144 = vtanh.f32 %v1772_v11 }
 0x89c   : > { %v1775_v15 = vsub.f32 %v1771_v10, %v6801_v22  ;;  %v1774_v0 = vsub.f32 %v1770_v12, %v6804_v24 }
 0x89e   : > { %5146 = vtanh.f32 %v1775_v15 }
 0x89f   : > { %5148 = vtanh.f32 %v1774_v0 }
 0x8a7   : > { %v5143_v36 = vpop.eup %5142 }
 0x8a8   : > { %v5145_v14 = vpop.eup %5144  ;;  %v1781_v39 = vmul.f32 %v6807_v32, %v5143_v36  ;;  %v1798_v3 = vmul.f32 %v6810_v41, %v5143_v36  ;;  %v1814_v36 = vmul.f32 %v6840_v27, %v1748_v45 }
 0x8a9   : > { %v1780_v20 = vmul.f32 %v6813_v40, %v5145_v14  ;;  %v1797_v5 = vmul.f32 %v6816_v42, %v5145_v14 }
 0x8aa   : > { %v1785_v38 = vsel %vm875_vm0, %v1781_v39, 0.0  ;;  %v1802_v56 = vsel %vm875_vm0, %v1798_v3, 0.0 }
 0x8ab   : > { %v5147_v51 = vpop.eup %5146  ;;  %v1784_v26 = vsel %vm875_vm0, %v1780_v20, 0.0  ;;  %v1801_v43 = vsel %vm875_vm0, %v1797_v5, 0.0 }
 0x8ac   : > { %v5149_v49 = vpop.eup %5148  ;;  %v1800_v48 = vmul.f32 %v6823_v52, %v5147_v51  ;;  %v1786_v21 = vadd.f32 %v1785_v38, %v1784_v26  ;;  %v1803_v53 = vadd.f32 %v1802_v56, %v1801_v43  ;;  %v1783_v31 = vmul.f32 %v6832_v9, %v5147_v51 }
 0x8ad   : > { %v1782_v17 = vmul.f32 %v6826_v57, %v5149_v49  ;;  %v1799_v18 = vmul.f32 %v6829_v61, %v5149_v49 }
 0x8ae   : > { %v1806_v60 = vsel %vm875_vm0, %v1800_v48, 0.0  ;;  %v1789_v37 = vsel %vm875_vm0, %v1783_v31, 0.0 }
 0x8af   : > { %v1787_v28 = vsel %vm875_vm0, %v1782_v17, 0.0  ;;  %v1804_v29 = vsel %vm875_vm0, %v1799_v18, 0.0 }
 0x8b0   : > { %v1788_v34 = vadd.f32 %v1787_v28, %v1786_v21  ;;  %v1805_v54 = vadd.f32 %v1804_v29, %v1803_v53 }
 0x8b2   : > { %v1807_v58 = vadd.f32 %v1806_v60, %v1805_v54  ;;  %v1790_v44 = vadd.f32 %v1789_v37, %v1788_v34 }
 0x8b4   : > { %v1808_v46 = vrot.slane %v1807_v58, 4  ;;  %v1791_v19 = vrot.slane %v1790_v44, 4 }
 0x8b6   : > { %v1809_v50 = vadd.f32 %v1808_v46, %v1807_v58  ;;  %v1792_v2 = vadd.f32 %v1791_v19, %v1790_v44 }
 0x8b8   : > { %v1810_v55 = vrot.slane %v1809_v50, 2  ;;  %v1793_v63 = vrot.slane %v1792_v2, 2 }
 0x8ba   : > { %v1811_v8 = vadd.f32 %v1810_v55, %v1809_v50  ;;  %v1794_v12 = vadd.f32 %v1793_v63, %v1792_v2 }
 0x8bc   : > { %v1812_v11 = vrot.slane %v1811_v8, 1  ;;  %v1795_v15 = vrot.slane %v1794_v12, 1 }
 0x8be   : > { %v1813_v62 = vadd.f32 %v1812_v11, %v1811_v8  ;;  %v1796_v0 = vadd.f32 %v1795_v15, %v1794_v12 }
 0x8c0   : > { %v1817_v10 = vadd.f32 %v1813_v62, %v6770_v4  ;;  %v1815_v39 = vadd.f32 %v1814_v36, %v1796_v0 }
 0x8c2   : > { %5150 = vrcp.f32 %v1817_v10  ;;  %v1816_v5 = vadd.f32 %v1815_v39, %v6776_v33 }
 0x8cf   : > { %v5151_v14 = vpop.eup %5150 }
 0x8d0   : > { %v1819_v3 = vmul.f32 %v5151_v14, %v1817_v10 }
 0x8d2   : > { %v1820_v20 = vsub.f32 2.0, %v1819_v3 }
 0x8d4   : > { %v1821_v51 = vmul.f32 %v5151_v14, %v1820_v20 }
 0x8d6   : > { %v1822_v38 = vmul.f32 %v1821_v51, %v1816_v5 }
 0x8d8   : > { %v1826_v56 = vrot.slane %v1822_v38, %v6480_v6 }
 0x8da   : > { %1832 = vbcast.lane.b32.xlu1 %v1826_v56, 264  ;;  %1828 = vbcast.lane.b32.xlu0 %v1826_v56, 256 }
 0x8de   : > { %1840 = vbcast.lane.b32.xlu1 %v1826_v56, 280  ;;  %1836 = vbcast.lane.b32.xlu0 %v1826_v56, 272 }
 0x94c   : > { %v1833_v26 = vpop.permute.xlu1 %1832  ;;  %v1829_v43 = vpop.permute.xlu0 %1828 }
 0x94d   : > { %v1843_v49 = vmul.f32 %v6783_v23, %v1833_v26  ;;  %v1842_v45 = vmul.f32 %v6786_v13, %v1829_v43 }
 0x94f   : > { %v1847_v48 = vsub.f32 %v1843_v49, %v6789_v25  ;;  %v1846_v17 = vsub.f32 %v1842_v45, %v6792_v16 }
 0x950   : > { %v1841_v18 = vpop.permute.xlu1 %1840  ;;  %v1837_v21 = vpop.permute.xlu0 %1836 }
 0x951   : > { %5152 = vtanh.f32 %v1847_v48  ;;  %v1845_v53 = vmul.f32 %v6795_v30, %v1841_v18  ;;  %v1844_v31 = vmul.f32 %v6798_v59, %v1837_v21 }
 0x952   : > { %5154 = vtanh.f32 %v1846_v17 }
 0x953   : > { %v1849_v28 = vsub.f32 %v1845_v53, %v6801_v22  ;;  %v1848_v29 = vsub.f32 %v1844_v31, %v6804_v24 }
 0x955   : > { %5156 = vtanh.f32 %v1849_v28 }
 0x956   : > { %5158 = vtanh.f32 %v1848_v29 }
 0x95e   : > { %v5153_v34 = vpop.eup %5152 }
 0x95f   : > { %v5155_v54 = vpop.eup %5154  ;;  %v1855_v60 = vmul.f32 %v6807_v32, %v5153_v34  ;;  %v1872_v58 = vmul.f32 %v6810_v41, %v5153_v34  ;;  %v1888_v34 = vmul.f32 %v6840_v27, %v1822_v38 }
 0x960   : > { %v1854_v37 = vmul.f32 %v6813_v40, %v5155_v54  ;;  %v1871_v44 = vmul.f32 %v6816_v42, %v5155_v54 }
 0x961   : > { %v1859_v50 = vsel %vm875_vm0, %v1855_v60, 0.0  ;;  %v1876_v19 = vsel %vm875_vm0, %v1872_v58, 0.0 }
 0x962   : > { %v5157_v46 = vpop.eup %5156  ;;  %v1858_v55 = vsel %vm875_vm0, %v1854_v37, 0.0  ;;  %v1875_v8 = vsel %vm875_vm0, %v1871_v44, 0.0 }
 0x963   : > { %v5159_v2 = vpop.eup %5158  ;;  %v1874_v11 = vmul.f32 %v6823_v52, %v5157_v46  ;;  %v1860_v10 = vadd.f32 %v1859_v50, %v1858_v55  ;;  %v1877_v12 = vadd.f32 %v1876_v19, %v1875_v8  ;;  %v1857_v15 = vmul.f32 %v6832_v9, %v5157_v46 }
 0x964   : > { %v1856_v62 = vmul.f32 %v6826_v57, %v5159_v2  ;;  %v1873_v63 = vmul.f32 %v6829_v61, %v5159_v2  ;;  %v803_v19 = vsub.s32 2, %v6477_v1 }
 0x965   : > { %v1880_v3 = vsel %vm875_vm0, %v1874_v11, 0.0  ;;  %v1863_v5 = vsel %vm875_vm0, %v1857_v15, 0.0 }
 0x966   : > { %v1861_v0 = vsel %vm875_vm0, %v1856_v62, 0.0  ;;  %v1878_v36 = vsel %vm875_vm0, %v1873_v63, 0.0  ;;  %v804_v8 = vrot.slane %v6482_v7, %v803_v19 }
 0x967   : > { %v1862_v14 = vadd.f32 %v1861_v0, %v1860_v10  ;;  %v1879_v39 = vadd.f32 %v1878_v36, %v1877_v12  ;;  %v6975_v12 = vld [vmem:[%s8404_s3] sm:$0xff] }
 0x968   : > { %v6982_v36 = vld [vmem:[%s8405_s4] sm:$0xff] }
 0x969   : > { %v1881_v20 = vadd.f32 %v1880_v3, %v1879_v39  ;;  %v1864_v51 = vadd.f32 %v1863_v5, %v1862_v14 }
 0x96b   : > { %v1882_v56 = vrot.slane %v1881_v20, 4  ;;  %v1865_v43 = vrot.slane %v1864_v51, 4 }
 0x96d   : > { %v1883_v26 = vadd.f32 %v1882_v56, %v1881_v20  ;;  %v1866_v48 = vadd.f32 %v1865_v43, %v1864_v51 }
 0x96f   : > { %v1884_v49 = vrot.slane %v1883_v26, 2  ;;  %v1867_v21 = vrot.slane %v1866_v48, 2 }
 0x971   : > { %v1885_v45 = vadd.f32 %v1884_v49, %v1883_v26  ;;  %v1868_v31 = vadd.f32 %v1867_v21, %v1866_v48 }
 0x973   : > { %v1886_v17 = vrot.slane %v1885_v45, 1  ;;  %v1869_v28 = vrot.slane %v1868_v31, 1 }
 0x975   : > { %v1887_v18 = vadd.f32 %v1886_v17, %v1885_v45  ;;  %v1870_v29 = vadd.f32 %v1869_v28, %v1868_v31 }
 0x977   : > { %v1891_v53 = vadd.f32 %v1887_v18, %v6770_v4  ;;  %v1889_v60 = vadd.f32 %v1888_v34, %v1870_v29 }
 0x979   : > { %5160 = vrcp.f32 %v1891_v53  ;;  %v1890_v44 = vadd.f32 %v1889_v60, %v6776_v33 }
 0x986   : > { %v5161_v54 = vpop.eup %5160 }
 0x987   : > { %v1893_v58 = vmul.f32 %v5161_v54, %v1891_v53  ;;  %v6994_v53 = vld [vmem:[#allocation10] sm:$0xff] }
 0x989   : > { %v1894_v37 = vsub.f32 2.0, %v1893_v58 }
 0x98b   : > { %v1895_v46 = vmul.f32 %v5161_v54, %v1894_v37 }
 0x98d   : > { %v6957_v50 = vmul.f32 %v1895_v46, %v1890_v44 }
 0x98f   : > { %v1903_v4 = vrot.slane %v6957_v50, %v6480_v6  ;;  %v1897_v55 = vmul.f32 %v6957_v50, %v6719_v35 }
 0x991   : > { %1909 = vbcast.lane.b32.xlu1 %v1903_v4, 264  ;;  %v1898_v38 = vadd.f32 %v1897_v55, %v6724_v47  ;;  %1905 = vbcast.lane.b32.xlu0 %v1903_v4, 256 }
 0x993   : > { %1899 = vst.msk [vmem:[%s6733_s2 + $0x1] sm:$0x1] %vm1451_vm1, %v1898_v38 }
 0x995   : > { %806 = vbcast.lane.b32.xlu1 %v804_v8, 256  ;;  %1913 = vbcast.lane.b32.xlu0 %v1903_v4, 272 }
 0x999   : > { %1917 = vbcast.lane.b32.xlu0 %v1903_v4, 280 }
 0xa03   : > { %v1910_v33 = vpop.permute.xlu1 %1909  ;;  %v1906_v2 = vpop.permute.xlu0 %1905 }
 0xa04   : > { %v1920_v11 = vmul.f32 %v6783_v23, %v1910_v33  ;;  %v1919_v62 = vmul.f32 %v6786_v13, %v1906_v2 }
 0xa06   : > { %v1924_v63 = vsub.f32 %v1920_v11, %v6789_v25  ;;  %v1923_v35 = vsub.f32 %v1919_v62, %v6792_v16 }
 0xa07   : > { %v807_v10 = vpop.permute.xlu1 %806  ;;  %v1914_v47 = vpop.permute.xlu0 %1913 }
 0xa08   : > { %5162 = vtanh.f32 %v1924_v63  ;;  %v845_v15 = vmul.f32 %v6975_v12, %v807_v10  ;;  %v1921_v0 = vmul.f32 %v6798_v59, %v1914_v47  ;;  %v7008_v10 = vld [vmem:[#allocation8] sm:$0xff] }
 0xa09   : > { %5164 = vtanh.f32 %v1923_v35 }
 0xa0a   : > { %v853_v14 = vsub.f32 %v845_v15, %v6982_v36  ;;  %v1925_v39 = vsub.f32 %v1921_v0, %v6804_v24 }
 0xa0b   : > { %v1918_v3 = vpop.permute.xlu0 %1917 }
 0xa0c   : > { %5166 = vtanh.f32 %v853_v14  ;;  %v1922_v20 = vmul.f32 %v6795_v30, %v1918_v3 }
 0xa0d   : > { %5168 = vtanh.f32 %v1925_v39 }
 0xa0e   : > { %v1926_v5 = vsub.f32 %v1922_v20, %v6801_v22 }
 0xa10   : > { %5170 = vtanh.f32 %v1926_v5 }
 0xa15   : > { %v5163_v51 = vpop.eup %5162 }
 0xa16   : > { %v5165_v56 = vpop.eup %5164  ;;  %v1949_v26 = vmul.f32 %v6810_v41, %v5163_v51  ;;  %v1932_v49 = vmul.f32 %v6807_v32, %v5163_v51 }
 0xa17   : > { %v1948_v43 = vmul.f32 %v6816_v42, %v5165_v56  ;;  %v1931_v45 = vmul.f32 %v6813_v40, %v5165_v56 }
 0xa18   : > { %v1953_v18 = vsel %vm875_vm0, %v1949_v26, 0.0  ;;  %v1936_v34 = vsel %vm875_vm0, %v1932_v49, 0.0 }
 0xa19   : > { %v5167_v48 = vpop.eup %5166  ;;  %v1952_v21 = vsel %vm875_vm0, %v1948_v43, 0.0  ;;  %v1935_v54 = vsel %vm875_vm0, %v1931_v45, 0.0 }
 0xa1a   : > { %v5169_v17 = vpop.eup %5168  ;;  %v948_v31 = vmul.f32 %v6994_v53, %v5167_v48  ;;  %v1954_v37 = vadd.f32 %v1953_v18, %v1952_v21  ;;  %v1937_v38 = vadd.f32 %v1936_v34, %v1935_v54  ;;  %v869_v47 = vmul.f32 %v7008_v10, %v5167_v48  ;;  %v7012_v18 = vld [vmem:[#allocation19] ss:$0 sm:$0xff] }
 0xa1b   : > { %v1933_v28 = vmul.f32 %v6826_v57, %v5169_v17  ;;  %v1950_v29 = vmul.f32 %v6829_v61, %v5169_v17 }
 0xa1c   : > { %v968_v60 = vsel %vm875_vm0, %v948_v31, 0.0  ;;  %v890_v20 = vsel %vm875_vm0, %v869_v47, 0.0 }
 0xa1d   : > { %v5171_v58 = vpop.eup %5170  ;;  %v969_v44 = vrot.slane %v968_v60, 4  ;;  %v1955_v46 = vsel %vm875_vm0, %v1950_v29, 0.0  ;;  %v1938_v19 = vsel %vm875_vm0, %v1933_v28, 0.0  ;;  %v891_v56 = vrot.slane %v890_v20, 4 }
 0xa1e   : > { %v1934_v4 = vmul.f32 %v6832_v9, %v5171_v58  ;;  %v1951_v55 = vmul.f32 %v6823_v52, %v5171_v58  ;;  %v1956_v33 = vadd.f32 %v1955_v46, %v1954_v37  ;;  %v1939_v63 = vadd.f32 %v1938_v19, %v1937_v38  ;;  %v7020_v38 = vld [vmem:[#allocation17] ss:$0 sm:$0xff] }
 0xa1f   : > { %v970_v8 = vadd.f32 %v969_v44, %v968_v60  ;;  %v892_v17 = vadd.f32 %v891_v56, %v890_v20  ;;  %v1965_v46 = vmul.f32 %v6840_v27, %v6957_v50 }
 0xa20   : > { %v1940_v2 = vsel %vm875_vm0, %v1934_v4, 0.0  ;;  %v1957_v11 = vsel %vm875_vm0, %v1951_v55, 0.0 }
 0xa21   : > { %v971_v62 = vrot.slane %v970_v8, 2  ;;  %v1958_v35 = vadd.f32 %v1957_v11, %v1956_v33  ;;  %v1941_v0 = vadd.f32 %v1940_v2, %v1939_v63  ;;  %v893_v29 = vrot.slane %v892_v17, 2 }
 0xa23   : > { %v972_v15 = vadd.f32 %v971_v62, %v970_v8  ;;  %v1959_v14 = vrot.slane %v1958_v35, 4  ;;  %v1942_v5 = vrot.slane %v1941_v0, 4  ;;  %v894_v54 = vadd.f32 %v893_v29, %v892_v17 }
 0xa25   : > { %v973_v39 = vrot.slane %v972_v15, 1  ;;  %v1960_v3 = vadd.f32 %v1959_v14, %v1958_v35  ;;  %v1943_v49 = vadd.f32 %v1942_v5, %v1941_v0  ;;  %v895_v58 = vrot.slane %v894_v54, 1 }
 0xa27   : > { %v1961_v51 = vrot.slane %v1960_v3, 2  ;;  %v974_v26 = vadd.f32 %v973_v39, %v972_v15  ;;  %v1944_v31 = vrot.slane %v1943_v49, 2  ;;  %v896_v44 = vadd.f32 %v895_v58, %v894_v54 }
 0xa29   : > { %v1962_v43 = vadd.f32 %v1961_v51, %v1960_v3  ;;  %v7015_v21 = vadd.f32 %v7012_v18, %v974_v26  ;;  %v1945_v34 = vadd.f32 %v1944_v31, %v1943_v49  ;;  %v7023_v8 = vadd.f32 %v7020_v38, %v896_v44 }
 0xa2b   : > { %v1963_v45 = vrot.slane %v1962_v43, 1  ;;  %v1946_v60 = vrot.slane %v1945_v34, 1 }
 0xa2d   : > { %v1964_v48 = vadd.f32 %v1963_v45, %v1962_v43  ;;  %v1947_v37 = vadd.f32 %v1946_v60, %v1945_v34 }
 0xa2f   : > { %v1968_v28 = vadd.f32 %v1964_v48, %v7015_v21  ;;  %v1966_v4 = vadd.f32 %v1965_v46, %v1947_v37 }
 0xa31   : > { %5172 = vrcp.f32 %v1968_v28  ;;  %v1967_v2 = vadd.f32 %v1966_v4, %v7023_v8 }
 0xa3e   : > { %v5173_v19 = vpop.eup %5172 }
 0xa3f   : > { %v1970_v55 = vmul.f32 %v5173_v19, %v1968_v28 }
 0xa41   : > { %v1971_v33 = vsub.f32 2.0, %v1970_v55 }
 0xa43   : > { %v1972_v11 = vmul.f32 %v5173_v19, %v1971_v33 }
 0xa45   : > { %v1973_v62 = vmul.f32 %v1972_v11, %v1967_v2 }
 0xa47   : > { %v1977_v63 = vrot.slane %v1973_v62, %v6480_v6 }
 0xa49   : > { %1983 = vbcast.lane.b32.xlu0 %v1977_v63, 264  ;;  %1979 = vbcast.lane.b32.xlu1 %v1977_v63, 256 }
 0xa4d   : > { %1991 = vbcast.lane.b32.xlu0 %v1977_v63, 280  ;;  %1987 = vbcast.lane.b32.xlu1 %v1977_v63, 272 }
 0xabb   : > { %v1984_v50 = vpop.permute.xlu0 %1983  ;;  %v1980_v35 = vpop.permute.xlu1 %1979 }
 0xabc   : > { %v1994_v47 = vmul.f32 %v6783_v23, %v1984_v50  ;;  %v1993_v15 = vmul.f32 %v6786_v13, %v1980_v35  ;;  %v2039_v50 = vmul.f32 %v6840_v27, %v1973_v62  ;;  %v7061_v62 = vld [vmem:[#allocation11] sm:$0xff] }
 0xabe   : > { %v1998_v0 = vsub.f32 %v1994_v47, %v6789_v25  ;;  %v1997_v14 = vsub.f32 %v1993_v15, %v6792_v16 }
 0xabf   : > { %v1992_v39 = vpop.permute.xlu0 %1991  ;;  %v1988_v3 = vpop.permute.xlu1 %1987 }
 0xac0   : > { %5174 = vtanh.f32 %v1998_v0  ;;  %v1996_v20 = vmul.f32 %v6795_v30, %v1992_v39  ;;  %v1995_v5 = vmul.f32 %v6798_v59, %v1988_v3 }
 0xac1   : > { %5176 = vtanh.f32 %v1997_v14 }
 0xac2   : > { %v2000_v51 = vsub.f32 %v1996_v20, %v6801_v22  ;;  %v1999_v56 = vsub.f32 %v1995_v5, %v6804_v24 }
 0xac4   : > { %5178 = vtanh.f32 %v2000_v51 }
 0xac5   : > { %5180 = vtanh.f32 %v1999_v56  ;;  %v7058_v56 = vld [vmem:[#allocation11 + $0x8] sm:$0xff] }
 0xacd   : > { %v5175_v23 = vpop.eup %5174 }
 0xace   : > { %v5177_v13 = vpop.eup %5176  ;;  %v2006_v25 = vmul.f32 %v6807_v32, %v5175_v23  ;;  %v2023_v16 = vmul.f32 %v6810_v41, %v5175_v23 }
 0xacf   : > { %v2005_v26 = vmul.f32 %v6813_v40, %v5177_v13  ;;  %v2022_v43 = vmul.f32 %v6816_v42, %v5177_v13  ;;  %v7064_v13 = vld [vmem:[#allocation13 + $0x8] sm:$0xff] }
 0xad0   : > { %v2010_v59 = vsel %vm875_vm0, %v2006_v25, 0.0  ;;  %v2027_v49 = vsel %vm875_vm0, %v2023_v16, 0.0  ;;  %v7067_v16 = vld [vmem:[#allocation13] sm:$0xff] }
 0xad1   : > { %v5179_v30 = vpop.eup %5178  ;;  %v2009_v22 = vsel %vm875_vm0, %v2005_v26, 0.0  ;;  %v2026_v24 = vsel %vm875_vm0, %v2022_v43, 0.0 }
 0xad2   : > { %v5181_v45 = vpop.eup %5180  ;;  %v2025_v17 = vmul.f32 %v6823_v52, %v5179_v30  ;;  %v2011_v48 = vadd.f32 %v2010_v59, %v2009_v22  ;;  %v2028_v40 = vadd.f32 %v2027_v49, %v2026_v24  ;;  %v2008_v42 = vmul.f32 %v6832_v9, %v5179_v30  ;;  %v7070_v59 = vld [vmem:[#allocation11 + $0x18] sm:$0xff]  ;;  %v7073_v22 = vld [vmem:[#allocation11 + $0x10] sm:$0xff] }
 0xad3   : > { %v2007_v32 = vmul.f32 %v6826_v57, %v5181_v45  ;;  %v2024_v41 = vmul.f32 %v6829_v61, %v5181_v45  ;;  %v7076_v45 = vld [vmem:[#allocation13 + $0x18] sm:$0xff] }
 0xad4   : > { %v2031_v54 = vsel %vm875_vm0, %v2025_v17, 0.0  ;;  %v2014_v58 = vsel %vm875_vm0, %v2008_v42, 0.0  ;;  %v7082_v42 = vld [vmem:[#allocation14 + $0x8] sm:$0xff] }
 0xad5   : > { %v2012_v31 = vsel %vm875_vm0, %v2007_v32, 0.0  ;;  %v2029_v28 = vsel %vm875_vm0, %v2024_v41, 0.0  ;;  %v7079_v32 = vld [vmem:[#allocation13 + $0x10] sm:$0xff] }
 0xad6   : > { %v2013_v29 = vadd.f32 %v2012_v31, %v2011_v48  ;;  %v2030_v34 = vadd.f32 %v2029_v28, %v2028_v40  ;;  %v7085_v28 = vld [vmem:[#allocation16 + $0x8] sm:$0xff] }
 0xad8   : > { %v2032_v60 = vadd.f32 %v2031_v54, %v2030_v34  ;;  %v2015_v52 = vadd.f32 %v2014_v58, %v2013_v29  ;;  %v7088_v34 = vld [vmem:[#allocation14] sm:$0xff] }
 0xada   : > { %v2033_v37 = vrot.slane %v2032_v60, 4  ;;  %v2016_v44 = vrot.slane %v2015_v52, 4 }
 0xadc   : > { %v2034_v57 = vadd.f32 %v2033_v37, %v2032_v60  ;;  %v2017_v19 = vadd.f32 %v2016_v44, %v2015_v52  ;;  %v7091_v60 = vld [vmem:[#allocation16] sm:$0xff] }
 0xade   : > { %v2035_v61 = vrot.slane %v2034_v57, 2  ;;  %v2018_v55 = vrot.slane %v2017_v19, 2 }
 0xae0   : > { %v2036_v46 = vadd.f32 %v2035_v61, %v2034_v57  ;;  %v2019_v2 = vadd.f32 %v2018_v55, %v2017_v19  ;;  %v7098_v19 = vld [vmem:[#allocation16 + $0x18] sm:$0xff] }
 0xae2   : > { %v2037_v4 = vrot.slane %v2036_v46, 1  ;;  %v2020_v11 = vrot.slane %v2019_v2, 1 }
 0xae4   : > { %v2038_v9 = vadd.f32 %v2037_v4, %v2036_v46  ;;  %v2021_v63 = vadd.f32 %v2020_v11, %v2019_v2 }
 0xae6   : > { %v2042_v33 = vadd.f32 %v2038_v9, %v7015_v21  ;;  %v2040_v47 = vadd.f32 %v2039_v50, %v2021_v63  ;;  %v7101_v9 = vld [vmem:[#allocation14 + $0x10] sm:$0xff]  ;;  %v7107_v50 = vld [vmem:[#allocation14 + $0x18] sm:$0xff] }
 0xae8   : > { %5182 = vrcp.f32 %v2042_v33  ;;  %v2041_v14 = vadd.f32 %v2040_v47, %v7023_v8 }
 0xaf5   : > { %v5183_v35 = vpop.eup %5182 }
 0xaf6   : > { %v2044_v15 = vmul.f32 %v5183_v35, %v2042_v33  ;;  %v7104_v33 = vld [vmem:[#allocation16 + $0x10] sm:$0xff] }
 0xaf8   : > { %v2045_v0 = vsub.f32 2.0, %v2044_v15 }
 0xafa   : > { %v2046_v39 = vmul.f32 %v5183_v35, %v2045_v0 }
 0xafc   : > { %v7054_v3 = vmul.f32 %v2046_v39, %v2041_v14 }
 0xafe   : > { %v2051_v20 = vrot.slane %v7054_v3, %v6480_v6 }
 0xb00   : > { %2057 = vbcast.lane.b32.xlu0 %v2051_v20, 264  ;;  %2053 = vbcast.lane.b32.xlu1 %v2051_v20, 256 }
 0xb04   : > { %2065 = vbcast.lane.b32.xlu0 %v2051_v20, 280  ;;  %2061 = vbcast.lane.b32.xlu1 %v2051_v20, 272 }
 0xb72   : > { %v2058_v5 = vpop.permute.xlu0 %2057  ;;  %v2054_v51 = vpop.permute.xlu1 %2053 }
 0xb73   : > { %v2068_v27 = vmul.f32 %v7058_v56, %v2058_v5  ;;  %v2067_v23 = vmul.f32 %v7061_v62, %v2054_v51 }
 0xb75   : > { %v2072_v25 = vsub.f32 %v2068_v27, %v7064_v13  ;;  %v2071_v26 = vsub.f32 %v2067_v23, %v7067_v16 }
 0xb76   : > { %v2066_v43 = vpop.permute.xlu0 %2065  ;;  %v2062_v30 = vpop.permute.xlu1 %2061 }
 0xb77   : > { %5184 = vtanh.f32 %v2072_v25  ;;  %v2070_v49 = vmul.f32 %v7070_v59, %v2066_v43  ;;  %v2069_v24 = vmul.f32 %v7073_v22, %v2062_v30 }
 0xb78   : > { %5186 = vtanh.f32 %v2071_v26 }
 0xb79   : > { %v2074_v17 = vsub.f32 %v2070_v49, %v7076_v45  ;;  %v2073_v41 = vsub.f32 %v2069_v24, %v7079_v32 }
 0xb7b   : > { %5188 = vtanh.f32 %v2074_v17 }
 0xb7c   : > { %5190 = vtanh.f32 %v2073_v41 }
 0xb84   : > { %v5185_v48 = vpop.eup %5184 }
 0xb85   : > { %v5187_v40 = vpop.eup %5186  ;;  %v2080_v31 = vmul.f32 %v7082_v42, %v5185_v48  ;;  %v2097_v29 = vmul.f32 %v7085_v28, %v5185_v48 }
 0xb86   : > { %v2079_v54 = vmul.f32 %v7088_v34, %v5187_v40  ;;  %v2096_v58 = vmul.f32 %v7091_v60, %v5187_v40 }
 0xb87   : > { %v2084_v37 = vsel %vm875_vm0, %v2080_v31, 0.0  ;;  %v2101_v57 = vsel %vm875_vm0, %v2097_v29, 0.0  ;;  %v7115_v29 = vld [vmem:[#allocation20] sm:$0x1] }
 0xb88   : > { %v5189_v52 = vpop.eup %5188  ;;  %v2083_v44 = vsel %vm875_vm0, %v2079_v54, 0.0  ;;  %v2100_v61 = vsel %vm875_vm0, %v2096_v58, 0.0  ;;  %v2113_v54 = vmul.f32 %v7115_v29, %v7054_v3 }
 0xb89   : > { %v5191_v46 = vpop.eup %5190  ;;  %v2099_v4 = vmul.f32 %v7098_v19, %v5189_v52  ;;  %v2085_v11 = vadd.f32 %v2084_v37, %v2083_v44  ;;  %v2102_v63 = vadd.f32 %v2101_v57, %v2100_v61  ;;  %v2082_v35 = vmul.f32 %v7107_v50, %v5189_v52 }
 0xb8a   : > { %v2081_v55 = vmul.f32 %v7101_v9, %v5191_v46  ;;  %v2098_v2 = vmul.f32 %v7104_v33, %v5191_v46 }
 0xb8b   : > { %v2105_v39 = vsel %vm875_vm0, %v2099_v4, 0.0  ;;  %v2088_v5 = vsel %vm875_vm0, %v2082_v35, 0.0 }
 0xb8c   : > { %v2086_v47 = vsel %vm875_vm0, %v2081_v55, 0.0  ;;  %v2103_v15 = vsel %vm875_vm0, %v2098_v2, 0.0 }
 0xb8d   : > { %v2087_v0 = vadd.f32 %v2086_v47, %v2085_v11  ;;  %v2104_v14 = vadd.f32 %v2103_v15, %v2102_v63 }
 0xb8f   : > { %v2106_v20 = vadd.f32 %v2105_v39, %v2104_v14  ;;  %v2089_v51 = vadd.f32 %v2088_v5, %v2087_v0 }
 0xb91   : > { %v2107_v27 = vrot.slane %v2106_v20, 4  ;;  %v2090_v25 = vrot.slane %v2089_v51, 4 }
 0xb93   : > { %v2108_v23 = vadd.f32 %v2107_v27, %v2106_v20  ;;  %v2091_v30 = vadd.f32 %v2090_v25, %v2089_v51 }
 0xb95   : > { %v2109_v26 = vrot.slane %v2108_v23, 2  ;;  %v2092_v17 = vrot.slane %v2091_v30, 2 }
 0xb97   : > { %v2110_v43 = vadd.f32 %v2109_v26, %v2108_v23  ;;  %v2093_v48 = vadd.f32 %v2092_v17, %v2091_v30 }
 0xb99   : > { %v2111_v49 = vrot.slane %v2110_v43, 1  ;;  %v2094_v40 = vrot.slane %v2093_v48, 1 }
 0xb9b   : > { %v2112_v24 = vadd.f32 %v2111_v49, %v2110_v43  ;;  %v2095_v31 = vadd.f32 %v2094_v40, %v2093_v48 }
 0xb9d   : > { %v2116_v41 = vadd.f32 %v2112_v24, %v7015_v21  ;;  %v2114_v52 = vadd.f32 %v2113_v54, %v2095_v31 }
 0xb9f   : > { %5192 = vrcp.f32 %v2116_v41  ;;  %v2115_v44 = vadd.f32 %v2114_v52, %v7023_v8 }
 0xbac   : > { %v5193_v58 = vpop.eup %5192 }
 0xbad   : > { %v2118_v37 = vmul.f32 %v5193_v58, %v2116_v41 }
 0xbaf   : > { %v2119_v57 = vsub.f32 2.0, %v2118_v37 }
 0xbb1   : > { %v2120_v61 = vmul.f32 %v5193_v58, %v2119_v57 }
 0xbb3   : > { %v2121_v46 = vmul.f32 %v2120_v61, %v2115_v44 }
 0xbb5   : > { %v2125_v4 = vrot.slane %v2121_v46, %v6480_v6 }
 0xbb7   : > { %2131 = vbcast.lane.b32.xlu0 %v2125_v4, 264  ;;  %2127 = vbcast.lane.b32.xlu1 %v2125_v4, 256 }
 0xbbb   : > { %2139 = vbcast.lane.b32.xlu0 %v2125_v4, 280  ;;  %2135 = vbcast.lane.b32.xlu1 %v2125_v4, 272 }
 0xc29   : > { %v2132_v55 = vpop.permute.xlu0 %2131  ;;  %v2128_v2 = vpop.permute.xlu1 %2127 }
 0xc2a   : > { %v2142_v11 = vmul.f32 %v7058_v56, %v2132_v55  ;;  %v2141_v3 = vmul.f32 %v7061_v62, %v2128_v2 }
 0xc2c   : > { %v2146_v63 = vsub.f32 %v2142_v11, %v7064_v13  ;;  %v2145_v35 = vsub.f32 %v2141_v3, %v7067_v16 }
 0xc2d   : > { %v2140_v47 = vpop.permute.xlu0 %2139  ;;  %v2136_v15 = vpop.permute.xlu1 %2135 }
 0xc2e   : > { %5194 = vtanh.f32 %v2146_v63  ;;  %v2144_v0 = vmul.f32 %v7070_v59, %v2140_v47  ;;  %v2143_v14 = vmul.f32 %v7073_v22, %v2136_v15 }
 0xc2f   : > { %5196 = vtanh.f32 %v2145_v35 }
 0xc30   : > { %v2148_v39 = vsub.f32 %v2144_v0, %v7076_v45  ;;  %v2147_v20 = vsub.f32 %v2143_v14, %v7079_v32 }
 0xc32   : > { %5198 = vtanh.f32 %v2148_v39 }
 0xc33   : > { %5200 = vtanh.f32 %v2147_v20 }
 0xc3b   : > { %v5195_v5 = vpop.eup %5194 }
 0xc3c   : > { %v5197_v51 = vpop.eup %5196  ;;  %v2154_v27 = vmul.f32 %v7082_v42, %v5195_v5  ;;  %v2171_v23 = vmul.f32 %v7085_v28, %v5195_v5 }
 0xc3d   : > { %v2153_v25 = vmul.f32 %v7088_v34, %v5197_v51  ;;  %v2170_v26 = vmul.f32 %v7091_v60, %v5197_v51 }
 0xc3e   : > { %v2158_v30 = vsel %vm875_vm0, %v2154_v27, 0.0  ;;  %v2175_v49 = vsel %vm875_vm0, %v2171_v23, 0.0 }
 0xc3f   : > { %v5199_v43 = vpop.eup %5198  ;;  %v2157_v24 = vsel %vm875_vm0, %v2153_v25, 0.0  ;;  %v2174_v17 = vsel %vm875_vm0, %v2170_v26, 0.0  ;;  %v2187_v25 = vmul.f32 %v7115_v29, %v2121_v46 }
 0xc40   : > { %v5201_v41 = vpop.eup %5200  ;;  %v2173_v48 = vmul.f32 %v7098_v19, %v5199_v43  ;;  %v2159_v54 = vadd.f32 %v2158_v30, %v2157_v24  ;;  %v2176_v58 = vadd.f32 %v2175_v49, %v2174_v17  ;;  %v2156_v52 = vmul.f32 %v7107_v50, %v5199_v43 }
 0xc41   : > { %v2155_v40 = vmul.f32 %v7101_v9, %v5201_v41  ;;  %v2172_v31 = vmul.f32 %v7104_v33, %v5201_v41 }
 0xc42   : > { %v2179_v4 = vsel %vm875_vm0, %v2173_v48, 0.0  ;;  %v2162_v2 = vsel %vm875_vm0, %v2156_v52, 0.0 }
 0xc43   : > { %v2160_v37 = vsel %vm875_vm0, %v2155_v40, 0.0  ;;  %v2177_v57 = vsel %vm875_vm0, %v2172_v31, 0.0 }
 0xc44   : > { %v2161_v44 = vadd.f32 %v2160_v37, %v2159_v54  ;;  %v2178_v61 = vadd.f32 %v2177_v57, %v2176_v58 }
 0xc46   : > { %v2180_v55 = vadd.f32 %v2179_v4, %v2178_v61  ;;  %v2163_v11 = vadd.f32 %v2162_v2, %v2161_v44 }
 0xc48   : > { %v2181_v3 = vrot.slane %v2180_v55, 4  ;;  %v2164_v35 = vrot.slane %v2163_v11, 4 }
 0xc4a   : > { %v2182_v63 = vadd.f32 %v2181_v3, %v2180_v55  ;;  %v2165_v0 = vadd.f32 %v2164_v35, %v2163_v11 }
 0xc4c   : > { %v2183_v47 = vrot.slane %v2182_v63, 2  ;;  %v2166_v20 = vrot.slane %v2165_v0, 2 }
 0xc4e   : > { %v2184_v15 = vadd.f32 %v2183_v47, %v2182_v63  ;;  %v2167_v51 = vadd.f32 %v2166_v20, %v2165_v0 }
 0xc50   : > { %v2185_v14 = vrot.slane %v2184_v15, 1  ;;  %v2168_v27 = vrot.slane %v2167_v51, 1 }
 0xc52   : > { %v2186_v39 = vadd.f32 %v2185_v14, %v2184_v15  ;;  %v2169_v23 = vadd.f32 %v2168_v27, %v2167_v51 }
 0xc54   : > { %v2190_v5 = vadd.f32 %v2186_v39, %v7015_v21  ;;  %v2188_v43 = vadd.f32 %v2187_v25, %v2169_v23 }
 0xc56   : > { %5202 = vrcp.f32 %v2190_v5  ;;  %v2189_v24 = vadd.f32 %v2188_v43, %v7023_v8 }
 0xc63   : > { %v5203_v26 = vpop.eup %5202 }
 0xc64   : > { %v2192_v30 = vmul.f32 %v5203_v26, %v2190_v5 }
 0xc66   : > { %v2193_v49 = vsub.f32 2.0, %v2192_v30 }
 0xc68   : > { %v2194_v17 = vmul.f32 %v5203_v26, %v2193_v49 }
 0xc6a   : > { %v2195_v41 = vmul.f32 %v2194_v17, %v2189_v24 }
 0xc6c   : > { %v2199_v48 = vrot.slane %v2195_v41, %v6480_v6 }
 0xc6e   : > { %2205 = vbcast.lane.b32.xlu0 %v2199_v48, 264  ;;  %2201 = vbcast.lane.b32.xlu1 %v2199_v48, 256 }
 0xc72   : > { %2213 = vbcast.lane.b32.xlu0 %v2199_v48, 280  ;;  %2209 = vbcast.lane.b32.xlu1 %v2199_v48, 272 }
 0xce0   : > { %v2206_v40 = vpop.permute.xlu0 %2205  ;;  %v2202_v31 = vpop.permute.xlu1 %2201 }
 0xce1   : > { %v2216_v54 = vmul.f32 %v7058_v56, %v2206_v40  ;;  %v2215_v46 = vmul.f32 %v7061_v62, %v2202_v31 }
 0xce3   : > { %v2220_v58 = vsub.f32 %v2216_v54, %v7064_v13  ;;  %v2219_v52 = vsub.f32 %v2215_v46, %v7067_v16 }
 0xce4   : > { %v2214_v37 = vpop.permute.xlu0 %2213  ;;  %v2210_v57 = vpop.permute.xlu1 %2209 }
 0xce5   : > { %5204 = vtanh.f32 %v2220_v58  ;;  %v2218_v44 = vmul.f32 %v7070_v59, %v2214_v37  ;;  %v2217_v61 = vmul.f32 %v7073_v22, %v2210_v57 }
 0xce6   : > { %5206 = vtanh.f32 %v2219_v52 }
 0xce7   : > { %v2222_v4 = vsub.f32 %v2218_v44, %v7076_v45  ;;  %v2221_v55 = vsub.f32 %v2217_v61, %v7079_v32 }
 0xce9   : > { %5208 = vtanh.f32 %v2222_v4 }
 0xcea   : > { %5210 = vtanh.f32 %v2221_v55 }
 0xcf2   : > { %v5205_v2 = vpop.eup %5204 }
 0xcf3   : > { %v5207_v11 = vpop.eup %5206  ;;  %v2228_v3 = vmul.f32 %v7082_v42, %v5205_v2  ;;  %v2245_v63 = vmul.f32 %v7085_v28, %v5205_v2 }
 0xcf4   : > { %v2227_v35 = vmul.f32 %v7088_v34, %v5207_v11  ;;  %v2244_v47 = vmul.f32 %v7091_v60, %v5207_v11 }
 0xcf5   : > { %v2232_v0 = vsel %vm875_vm0, %v2228_v3, 0.0  ;;  %v2249_v14 = vsel %vm875_vm0, %v2245_v63, 0.0 }
 0xcf6   : > { %v5209_v15 = vpop.eup %5208  ;;  %v2231_v39 = vsel %vm875_vm0, %v2227_v35, 0.0  ;;  %v2248_v20 = vsel %vm875_vm0, %v2244_v47, 0.0  ;;  %v2261_v35 = vmul.f32 %v7115_v29, %v2195_v41 }
 0xcf7   : > { %v5211_v5 = vpop.eup %5210  ;;  %v2247_v51 = vmul.f32 %v7098_v19, %v5209_v15  ;;  %v2233_v25 = vadd.f32 %v2232_v0, %v2231_v39  ;;  %v2250_v26 = vadd.f32 %v2249_v14, %v2248_v20  ;;  %v2230_v43 = vmul.f32 %v7107_v50, %v5209_v15 }
 0xcf8   : > { %v2229_v27 = vmul.f32 %v7101_v9, %v5211_v5  ;;  %v2246_v23 = vmul.f32 %v7104_v33, %v5211_v5 }
 0xcf9   : > { %v2253_v48 = vsel %vm875_vm0, %v2247_v51, 0.0  ;;  %v2236_v31 = vsel %vm875_vm0, %v2230_v43, 0.0 }
 0xcfa   : > { %v2234_v30 = vsel %vm875_vm0, %v2229_v27, 0.0  ;;  %v2251_v49 = vsel %vm875_vm0, %v2246_v23, 0.0 }
 0xcfb   : > { %v2235_v24 = vadd.f32 %v2234_v30, %v2233_v25  ;;  %v2252_v17 = vadd.f32 %v2251_v49, %v2250_v26 }
 0xcfd   : > { %v2254_v40 = vadd.f32 %v2253_v48, %v2252_v17  ;;  %v2237_v54 = vadd.f32 %v2236_v31, %v2235_v24 }
 0xcff   : > { %v2255_v46 = vrot.slane %v2254_v40, 4  ;;  %v2238_v52 = vrot.slane %v2237_v54, 4 }
 0xd01   : > { %v2256_v58 = vadd.f32 %v2255_v46, %v2254_v40  ;;  %v2239_v44 = vadd.f32 %v2238_v52, %v2237_v54 }
 0xd03   : > { %v2257_v37 = vrot.slane %v2256_v58, 2  ;;  %v2240_v55 = vrot.slane %v2239_v44, 2 }
 0xd05   : > { %v2258_v57 = vadd.f32 %v2257_v37, %v2256_v58  ;;  %v2241_v11 = vadd.f32 %v2240_v55, %v2239_v44 }
 0xd07   : > { %v2259_v61 = vrot.slane %v2258_v57, 1  ;;  %v2242_v3 = vrot.slane %v2241_v11, 1 }
 0xd09   : > { %v2260_v4 = vadd.f32 %v2259_v61, %v2258_v57  ;;  %v2243_v63 = vadd.f32 %v2242_v3, %v2241_v11 }
 0xd0b   : > { %v2264_v2 = vadd.f32 %v2260_v4, %v7015_v21  ;;  %v2262_v15 = vadd.f32 %v2261_v35, %v2243_v63 }
 0xd0d   : > { %5212 = vrcp.f32 %v2264_v2  ;;  %v2263_v39 = vadd.f32 %v2262_v15, %v7023_v8 }
 0xd1a   : > { %v5213_v47 = vpop.eup %5212 }
 0xd1b   : > { %v2266_v0 = vmul.f32 %v5213_v47, %v2264_v2 }
 0xd1d   : > { %v2267_v14 = vsub.f32 2.0, %v2266_v0 }
 0xd1f   : > { %v2268_v20 = vmul.f32 %v5213_v47, %v2267_v14 }
 0xd21   : > { %v2269_v5 = vmul.f32 %v2268_v20, %v2263_v39 }
 0xd23   : > { %v2273_v51 = vrot.slane %v2269_v5, %v6480_v6 }
 0xd25   : > { %2279 = vbcast.lane.b32.xlu0 %v2273_v51, 264  ;;  %2275 = vbcast.lane.b32.xlu1 %v2273_v51, 256 }
 0xd29   : > { %2287 = vbcast.lane.b32.xlu0 %v2273_v51, 280  ;;  %2283 = vbcast.lane.b32.xlu1 %v2273_v51, 272 }
 0xd97   : > { %v2280_v27 = vpop.permute.xlu0 %2279  ;;  %v2276_v23 = vpop.permute.xlu1 %2275 }
 0xd98   : > { %v2290_v25 = vmul.f32 %v7058_v56, %v2280_v27  ;;  %v2289_v41 = vmul.f32 %v7061_v62, %v2276_v23 }
 0xd9a   : > { %v2294_v26 = vsub.f32 %v2290_v25, %v7064_v13  ;;  %v2293_v43 = vsub.f32 %v2289_v41, %v7067_v16 }
 0xd9b   : > { %v2288_v30 = vpop.permute.xlu0 %2287  ;;  %v2284_v49 = vpop.permute.xlu1 %2283 }
 0xd9c   : > { %5214 = vtanh.f32 %v2294_v26  ;;  %v2292_v24 = vmul.f32 %v7070_v59, %v2288_v30  ;;  %v2291_v17 = vmul.f32 %v7073_v22, %v2284_v49 }
 0xd9d   : > { %5216 = vtanh.f32 %v2293_v43 }
 0xd9e   : > { %v2296_v48 = vsub.f32 %v2292_v24, %v7076_v45  ;;  %v2295_v40 = vsub.f32 %v2291_v17, %v7079_v32 }
 0xda0   : > { %5218 = vtanh.f32 %v2296_v48 }
 0xda1   : > { %5220 = vtanh.f32 %v2295_v40 }
 0xda9   : > { %v5215_v31 = vpop.eup %5214 }
 0xdaa   : > { %v5217_v54 = vpop.eup %5216  ;;  %v2302_v46 = vmul.f32 %v7082_v42, %v5215_v31  ;;  %v2319_v58 = vmul.f32 %v7085_v28, %v5215_v31 }
 0xdab   : > { %v2301_v52 = vmul.f32 %v7088_v34, %v5217_v54  ;;  %v2318_v37 = vmul.f32 %v7091_v60, %v5217_v54 }
 0xdac   : > { %v2306_v44 = vsel %vm875_vm0, %v2302_v46, 0.0  ;;  %v2323_v61 = vsel %vm875_vm0, %v2319_v58, 0.0 }
 0xdad   : > { %v5219_v57 = vpop.eup %5218  ;;  %v2305_v4 = vsel %vm875_vm0, %v2301_v52, 0.0  ;;  %v2322_v55 = vsel %vm875_vm0, %v2318_v37, 0.0  ;;  %v2335_v52 = vmul.f32 %v7115_v29, %v2269_v5 }
 0xdae   : > { %v5221_v2 = vpop.eup %5220  ;;  %v2321_v11 = vmul.f32 %v7098_v19, %v5219_v57  ;;  %v2307_v35 = vadd.f32 %v2306_v44, %v2305_v4  ;;  %v2324_v47 = vadd.f32 %v2323_v61, %v2322_v55  ;;  %v2304_v15 = vmul.f32 %v7107_v50, %v5219_v57 }
 0xdaf   : > { %v2303_v3 = vmul.f32 %v7101_v9, %v5221_v2  ;;  %v2320_v63 = vmul.f32 %v7104_v33, %v5221_v2 }
 0xdb0   : > { %v2327_v51 = vsel %vm875_vm0, %v2321_v11, 0.0  ;;  %v2310_v23 = vsel %vm875_vm0, %v2304_v15, 0.0  ;;  %v810_v11 = vsub.s32 3, %v6477_v1 }
 0xdb1   : > { %v2308_v0 = vsel %vm875_vm0, %v2303_v3, 0.0  ;;  %v2325_v14 = vsel %vm875_vm0, %v2320_v63, 0.0  ;;  %v7209_v3 = vld [vmem:[#allocation22] sm:$0x1]  ;;  %v7213_v63 = vld [vmem:[#allocation23] sm:$0x1] }
 0xdb2   : > { %v2309_v39 = vadd.f32 %v2308_v0, %v2307_v35  ;;  %v2326_v20 = vadd.f32 %v2325_v14, %v2324_v47 }
 0xdb4   : > { %v2328_v27 = vadd.f32 %v2327_v51, %v2326_v20  ;;  %v2311_v25 = vadd.f32 %v2310_v23, %v2309_v39 }
 0xdb6   : > { %v2329_v41 = vrot.slane %v2328_v27, 4  ;;  %v2312_v43 = vrot.slane %v2311_v25, 4 }
 0xdb8   : > { %v2330_v26 = vadd.f32 %v2329_v41, %v2328_v27  ;;  %v2313_v24 = vadd.f32 %v2312_v43, %v2311_v25 }
 0xdba   : > { %v2331_v30 = vrot.slane %v2330_v26, 2  ;;  %v2314_v40 = vrot.slane %v2313_v24, 2 }
 0xdbc   : > { %v2332_v49 = vadd.f32 %v2331_v30, %v2330_v26  ;;  %v2315_v54 = vadd.f32 %v2314_v40, %v2313_v24 }
 0xdbe   : > { %v2333_v17 = vrot.slane %v2332_v49, 1  ;;  %v2316_v46 = vrot.slane %v2315_v54, 1 }
 0xdc0   : > { %v2334_v48 = vadd.f32 %v2333_v17, %v2332_v49  ;;  %v2317_v58 = vadd.f32 %v2316_v46, %v2315_v54 }
 0xdc2   : > { %v2338_v31 = vadd.f32 %v2334_v48, %v7015_v21  ;;  %v2336_v57 = vadd.f32 %v2335_v52, %v2317_v58 }
 0xdc4   : > { %5222 = vrcp.f32 %v2338_v31  ;;  %v2337_v4 = vadd.f32 %v2336_v57, %v7023_v8  ;;  %v811_v8 = vrot.slane %v6482_v7, %v810_v11 }
 0xdd1   : > { %v5223_v37 = vpop.eup %5222 }
 0xdd2   : > { %v2340_v44 = vmul.f32 %v5223_v37, %v2338_v31 }
 0xdd4   : > { %v2341_v61 = vsub.f32 2.0, %v2340_v44 }
 0xdd6   : > { %v2342_v55 = vmul.f32 %v5223_v37, %v2341_v61 }
 0xdd8   : > { %v7204_v2 = vmul.f32 %v2342_v55, %v2337_v4 }
 0xdda   : > { %v2350_v21 = vrot.slane %v7204_v2, %v6480_v6  ;;  %v2344_v5 = vmul.f32 %v7209_v3, %v7204_v2 }
 0xddc   : > { %2356 = vbcast.lane.b32.xlu0 %v2350_v21, 264  ;;  %v2345_v35 = vadd.f32 %v7213_v63, %v2344_v5  ;;  %2352 = vbcast.lane.b32.xlu1 %v2350_v21, 256 }
 0xdde   : > { %2346 = vst.msk [vmem:[%s6733_s2 + $0x2] sm:$0x1] %vm1451_vm1, %v2345_v35 }
 0xde0   : > { %813 = vbcast.lane.b32.xlu0 %v811_v8, 256  ;;  %2360 = vbcast.lane.b32.xlu1 %v2350_v21, 272 }
 0xde4   : > { %2364 = vbcast.lane.b32.xlu1 %v2350_v21, 280 }
 0xe4e   : > { %v2357_v47 = vpop.permute.xlu0 %2356  ;;  %v2353_v15 = vpop.permute.xlu1 %2352 }
 0xe4f   : > { %v2367_v0 = vmul.f32 %v7058_v56, %v2357_v47  ;;  %v2366_v14 = vmul.f32 %v7061_v62, %v2353_v15 }
 0xe51   : > { %v2371_v39 = vsub.f32 %v2367_v0, %v7064_v13  ;;  %v2370_v20 = vsub.f32 %v2366_v14, %v7067_v16 }
 0xe52   : > { %v814_v51 = vpop.permute.xlu0 %813  ;;  %v2361_v27 = vpop.permute.xlu1 %2360 }
 0xe53   : > { %5224 = vtanh.f32 %v2371_v39  ;;  %v846_v23 = vmul.f32 %v6975_v12, %v814_v51  ;;  %v2368_v25 = vmul.f32 %v7073_v22, %v2361_v27 }
 0xe54   : > { %5226 = vtanh.f32 %v2370_v20 }
 0xe55   : > { %v854_v41 = vsub.f32 %v846_v23, %v6982_v36  ;;  %v2372_v26 = vsub.f32 %v2368_v25, %v7079_v32 }
 0xe56   : > { %v2365_v43 = vpop.permute.xlu1 %2364 }
 0xe57   : > { %5228 = vtanh.f32 %v854_v41  ;;  %v2369_v30 = vmul.f32 %v7070_v59, %v2365_v43 }
 0xe58   : > { %5230 = vtanh.f32 %v2372_v26 }
 0xe59   : > { %v2373_v49 = vsub.f32 %v2369_v30, %v7076_v45 }
 0xe5b   : > { %5232 = vtanh.f32 %v2373_v49 }
 0xe60   : > { %v5225_v24 = vpop.eup %5224 }
 0xe61   : > { %v5227_v17 = vpop.eup %5226  ;;  %v2396_v48 = vmul.f32 %v7085_v28, %v5225_v24  ;;  %v2379_v40 = vmul.f32 %v7082_v42, %v5225_v24 }
 0xe62   : > { %v2395_v12 = vmul.f32 %v7091_v60, %v5227_v17  ;;  %v2378_v36 = vmul.f32 %v7088_v34, %v5227_v17 }
 0xe63   : > { %v2400_v46 = vsel %vm875_vm0, %v2396_v48, 0.0  ;;  %v2383_v44 = vsel %vm875_vm0, %v2379_v40, 0.0 }
 0xe64   : > { %v5229_v31 = vpop.eup %5228  ;;  %v2399_v58 = vsel %vm875_vm0, %v2395_v12, 0.0  ;;  %v2382_v61 = vsel %vm875_vm0, %v2378_v36, 0.0 }
 0xe65   : > { %v5231_v54 = vpop.eup %5230  ;;  %v949_v52 = vmul.f32 %v6994_v53, %v5229_v31  ;;  %v2401_v11 = vadd.f32 %v2400_v46, %v2399_v58  ;;  %v2384_v47 = vadd.f32 %v2383_v44, %v2382_v61  ;;  %v870_v23 = vmul.f32 %v7008_v10, %v5229_v31 }
 0xe66   : > { %v2380_v37 = vmul.f32 %v7101_v9, %v5231_v54  ;;  %v2397_v57 = vmul.f32 %v7104_v33, %v5231_v54 }
 0xe67   : > { %v975_v4 = vsel %vm875_vm0, %v949_v52, 0.0  ;;  %v897_v49 = vsel %vm875_vm0, %v870_v23, 0.0 }
 0xe68   : > { %v5233_v55 = vpop.eup %5232  ;;  %v976_v21 = vrot.slane %v975_v4, 4  ;;  %v2402_v5 = vsel %vm875_vm0, %v2397_v57, 0.0  ;;  %v2385_v35 = vsel %vm875_vm0, %v2380_v37, 0.0  ;;  %v898_v48 = vrot.slane %v897_v49, 4 }
 0xe69   : > { %v2381_v8 = vmul.f32 %v7107_v50, %v5233_v55  ;;  %v2398_v53 = vmul.f32 %v7098_v19, %v5233_v55  ;;  %v2403_v0 = vadd.f32 %v2402_v5, %v2401_v11  ;;  %v2386_v51 = vadd.f32 %v2385_v35, %v2384_v47 }
 0xe6a   : > { %v977_v15 = vadd.f32 %v976_v21, %v975_v4  ;;  %v899_v46 = vadd.f32 %v898_v48, %v897_v49  ;;  %v2412_v21 = vmul.f32 %v7115_v29, %v7204_v2 }
 0xe6b   : > { %v2387_v14 = vsel %vm875_vm0, %v2381_v8, 0.0  ;;  %v2404_v39 = vsel %vm875_vm0, %v2398_v53, 0.0 }
 0xe6c   : > { %v978_v20 = vrot.slane %v977_v15, 2  ;;  %v2405_v27 = vadd.f32 %v2404_v39, %v2403_v0  ;;  %v2388_v41 = vadd.f32 %v2387_v14, %v2386_v51  ;;  %v900_v37 = vrot.slane %v899_v46, 2 }
 0xe6e   : > { %v979_v25 = vadd.f32 %v978_v20, %v977_v15  ;;  %v2406_v26 = vrot.slane %v2405_v27, 4  ;;  %v2389_v24 = vrot.slane %v2388_v41, 4  ;;  %v901_v44 = vadd.f32 %v900_v37, %v899_v46 }
 0xe70   : > { %v980_v43 = vrot.slane %v979_v25, 1  ;;  %v2407_v30 = vadd.f32 %v2406_v26, %v2405_v27  ;;  %v2390_v36 = vadd.f32 %v2389_v24, %v2388_v41  ;;  %v902_v4 = vrot.slane %v901_v44, 1 }
 0xe72   : > { %v2408_v17 = vrot.slane %v2407_v30, 2  ;;  %v981_v12 = vadd.f32 %v980_v43, %v979_v25  ;;  %v2391_v10 = vrot.slane %v2390_v36, 2  ;;  %v903_v11 = vadd.f32 %v902_v4, %v901_v44 }
 0xe74   : > { %v2409_v40 = vadd.f32 %v2408_v17, %v2407_v30  ;;  %v7250_v58 = vadd.f32 %v7012_v18, %v981_v12  ;;  %v2392_v57 = vadd.f32 %v2391_v10, %v2390_v36  ;;  %v7256_v18 = vadd.f32 %v7020_v38, %v903_v11 }
 0xe76   : > { %v2410_v54 = vrot.slane %v2409_v40, 1  ;;  %v2393_v61 = vrot.slane %v2392_v57, 1 }
 0xe78   : > { %v2411_v52 = vadd.f32 %v2410_v54, %v2409_v40  ;;  %v2394_v55 = vadd.f32 %v2393_v61, %v2392_v57 }
 0xe7a   : > { %v2415_v31 = vadd.f32 %v2411_v52, %v7250_v58  ;;  %v2413_v35 = vadd.f32 %v2412_v21, %v2394_v55 }
 0xe7c   : > { %5234 = vrcp.f32 %v2415_v31  ;;  %v2414_v47 = vadd.f32 %v2413_v35, %v7256_v18 }
 0xe89   : > { %v5235_v5 = vpop.eup %5234 }
 0xe8a   : > { %v2417_v8 = vmul.f32 %v5235_v5, %v2415_v31 }
 0xe8c   : > { %v2418_v53 = vsub.f32 2.0, %v2417_v8 }
 0xe8e   : > { %v2419_v15 = vmul.f32 %v5235_v5, %v2418_v53 }
 0xe90   : > { %v2420_v0 = vmul.f32 %v2419_v15, %v2414_v47 }
 0xe92   : > { %v2424_v14 = vrot.slane %v2420_v0, %v6480_v6 }
 0xe94   : > { %2430 = vbcast.lane.b32.xlu1 %v2424_v14, 264  ;;  %2426 = vbcast.lane.b32.xlu0 %v2424_v14, 256 }
 0xe98   : > { %2438 = vbcast.lane.b32.xlu1 %v2424_v14, 280  ;;  %2434 = vbcast.lane.b32.xlu0 %v2424_v14, 272 }
 0xf06   : > { %v2431_v39 = vpop.permute.xlu1 %2430  ;;  %v2427_v20 = vpop.permute.xlu0 %2426 }
 0xf07   : > { %v2441_v2 = vmul.f32 %v7058_v56, %v2431_v39  ;;  %v2440_v51 = vmul.f32 %v7061_v62, %v2427_v20 }
 0xf09   : > { %v2445_v38 = vsub.f32 %v2441_v2, %v7064_v13  ;;  %v2444_v27 = vsub.f32 %v2440_v51, %v7067_v16 }
 0xf0a   : > { %v2439_v23 = vpop.permute.xlu1 %2438  ;;  %v2435_v25 = vpop.permute.xlu0 %2434 }
 0xf0b   : > { %5236 = vtanh.f32 %v2445_v38  ;;  %v2443_v41 = vmul.f32 %v7070_v59, %v2439_v23  ;;  %v2442_v26 = vmul.f32 %v7073_v22, %v2435_v25 }
 0xf0c   : > { %5238 = vtanh.f32 %v2444_v27 }
 0xf0d   : > { %v2447_v43 = vsub.f32 %v2443_v41, %v7076_v45  ;;  %v2446_v30 = vsub.f32 %v2442_v26, %v7079_v32 }
 0xf0f   : > { %5240 = vtanh.f32 %v2447_v43 }
 0xf10   : > { %5242 = vtanh.f32 %v2446_v30 }
 0xf18   : > { %v5237_v49 = vpop.eup %5236 }
 0xf19   : > { %v5239_v24 = vpop.eup %5238  ;;  %v2453_v17 = vmul.f32 %v7082_v42, %v5237_v49  ;;  %v2470_v48 = vmul.f32 %v7085_v28, %v5237_v49  ;;  %v2486_v49 = vmul.f32 %v7115_v29, %v2420_v0 }
 0xf1a   : > { %v2452_v12 = vmul.f32 %v7088_v34, %v5239_v24  ;;  %v2469_v40 = vmul.f32 %v7091_v60, %v5239_v24 }
 0xf1b   : > { %v2457_v54 = vsel %vm875_vm0, %v2453_v17, 0.0  ;;  %v2474_v46 = vsel %vm875_vm0, %v2470_v48, 0.0 }
 0xf1c   : > { %v5241_v36 = vpop.eup %5240  ;;  %v2456_v52 = vsel %vm875_vm0, %v2452_v12, 0.0  ;;  %v2473_v10 = vsel %vm875_vm0, %v2469_v40, 0.0 }
 0xf1d   : > { %v5243_v31 = vpop.eup %5242  ;;  %v2472_v37 = vmul.f32 %v7098_v19, %v5241_v36  ;;  %v2458_v61 = vadd.f32 %v2457_v54, %v2456_v52  ;;  %v2475_v4 = vadd.f32 %v2474_v46, %v2473_v10  ;;  %v2455_v55 = vmul.f32 %v7107_v50, %v5241_v36 }
 0xf1e   : > { %v2454_v57 = vmul.f32 %v7101_v9, %v5243_v31  ;;  %v2471_v44 = vmul.f32 %v7104_v33, %v5243_v31 }
 0xf1f   : > { %v2478_v8 = vsel %vm875_vm0, %v2472_v37, 0.0  ;;  %v2461_v47 = vsel %vm875_vm0, %v2455_v55, 0.0 }
 0xf20   : > { %v2459_v11 = vsel %vm875_vm0, %v2454_v57, 0.0  ;;  %v2476_v21 = vsel %vm875_vm0, %v2471_v44, 0.0 }
 0xf21   : > { %v2460_v5 = vadd.f32 %v2459_v11, %v2458_v61  ;;  %v2477_v35 = vadd.f32 %v2476_v21, %v2475_v4 }
 0xf23   : > { %v2479_v53 = vadd.f32 %v2478_v8, %v2477_v35  ;;  %v2462_v15 = vadd.f32 %v2461_v47, %v2460_v5 }
 0xf25   : > { %v2480_v14 = vrot.slane %v2479_v53, 4  ;;  %v2463_v20 = vrot.slane %v2462_v15, 4 }
 0xf27   : > { %v2481_v39 = vadd.f32 %v2480_v14, %v2479_v53  ;;  %v2464_v38 = vadd.f32 %v2463_v20, %v2462_v15 }
 0xf29   : > { %v2482_v2 = vrot.slane %v2481_v39, 2  ;;  %v2465_v25 = vrot.slane %v2464_v38, 2 }
 0xf2b   : > { %v2483_v51 = vadd.f32 %v2482_v2, %v2481_v39  ;;  %v2466_v26 = vadd.f32 %v2465_v25, %v2464_v38 }
 0xf2d   : > { %v2484_v27 = vrot.slane %v2483_v51, 1  ;;  %v2467_v43 = vrot.slane %v2466_v26, 1 }
 0xf2f   : > { %v2485_v23 = vadd.f32 %v2484_v27, %v2483_v51  ;;  %v2468_v30 = vadd.f32 %v2467_v43, %v2466_v26 }
 0xf31   : > { %v2489_v41 = vadd.f32 %v2485_v23, %v7250_v58  ;;  %v2487_v17 = vadd.f32 %v2486_v49, %v2468_v30 }
 0xf33   : > { %5244 = vrcp.f32 %v2489_v41  ;;  %v2488_v40 = vadd.f32 %v2487_v17, %v7256_v18 }
 0xf40   : > { %v5245_v24 = vpop.eup %5244 }
 0xf41   : > { %v2491_v48 = vmul.f32 %v5245_v24, %v2489_v41 }
 0xf43   : > { %v2492_v12 = vsub.f32 2.0, %v2491_v48 }
 0xf45   : > { %v2493_v36 = vmul.f32 %v5245_v24, %v2492_v12 }
 0xf47   : > { %v2494_v54 = vmul.f32 %v2493_v36, %v2488_v40 }
 0xf49   : > { %v2498_v46 = vrot.slane %v2494_v54, %v6480_v6  ;;  %v2560_v12 = vmul.f32 %v7115_v29, %v2494_v54  ;;  %v7322_v54 = vld [vmem:[#allocation11] sm:$0xff] }
 0xf4b   : > { %2504 = vbcast.lane.b32.xlu1 %v2498_v46, 264  ;;  %2500 = vbcast.lane.b32.xlu0 %v2498_v46, 256 }
 0xf4f   : > { %2512 = vbcast.lane.b32.xlu1 %v2498_v46, 280  ;;  %2508 = vbcast.lane.b32.xlu0 %v2498_v46, 272 }
 0xfbd   : > { %v2505_v52 = vpop.permute.xlu1 %2504  ;;  %v2501_v10 = vpop.permute.xlu0 %2500 }
 0xfbe   : > { %v2515_v31 = vmul.f32 %v7058_v56, %v2505_v52  ;;  %v2514_v0 = vmul.f32 %v7061_v62, %v2501_v10 }
 0xfc0   : > { %v2519_v37 = vsub.f32 %v2515_v31, %v7064_v13  ;;  %v2518_v57 = vsub.f32 %v2514_v0, %v7067_v16 }
 0xfc1   : > { %v2513_v44 = vpop.permute.xlu1 %2512  ;;  %v2509_v61 = vpop.permute.xlu0 %2508 }
 0xfc2   : > { %5246 = vtanh.f32 %v2519_v37  ;;  %v2517_v4 = vmul.f32 %v7070_v59, %v2513_v44  ;;  %v2516_v55 = vmul.f32 %v7073_v22, %v2509_v61  ;;  %v7319_v61 = vld [vmem:[#allocation11 + $0x8] sm:$0xff] }
 0xfc3   : > { %5248 = vtanh.f32 %v2518_v57 }
 0xfc4   : > { %v2521_v11 = vsub.f32 %v2517_v4, %v7076_v45  ;;  %v2520_v21 = vsub.f32 %v2516_v55, %v7079_v32  ;;  %v7325_v55 = vld [vmem:[#allocation13 + $0x8] sm:$0xff] }
 0xfc6   : > { %5250 = vtanh.f32 %v2521_v11 }
 0xfc7   : > { %5252 = vtanh.f32 %v2520_v21  ;;  %v7328_v21 = vld [vmem:[#allocation13] sm:$0xff] }
 0xfcf   : > { %v5247_v56 = vpop.eup %5246 }
 0xfd0   : > { %v5249_v62 = vpop.eup %5248  ;;  %v2527_v13 = vmul.f32 %v7082_v42, %v5247_v56  ;;  %v2544_v16 = vmul.f32 %v7085_v28, %v5247_v56 }
 0xfd1   : > { %v2526_v5 = vmul.f32 %v7088_v34, %v5249_v62  ;;  %v2543_v35 = vmul.f32 %v7091_v60, %v5249_v62 }
 0xfd2   : > { %v2531_v22 = vsel %vm875_vm0, %v2527_v13, 0.0  ;;  %v2548_v8 = vsel %vm875_vm0, %v2544_v16, 0.0  ;;  %v7331_v16 = vld [vmem:[#allocation11 + $0x18] sm:$0xff] }
 0xfd3   : > { %v5251_v59 = vpop.eup %5250  ;;  %v2530_v45 = vsel %vm875_vm0, %v2526_v5, 0.0  ;;  %v2547_v32 = vsel %vm875_vm0, %v2543_v35, 0.0  ;;  %v7334_v35 = vld [vmem:[#allocation11 + $0x10] sm:$0xff] }
 0xfd4   : > { %v5253_v53 = vpop.eup %5252  ;;  %v2546_v47 = vmul.f32 %v7098_v19, %v5251_v59  ;;  %v2532_v15 = vadd.f32 %v2531_v22, %v2530_v45  ;;  %v2549_v34 = vadd.f32 %v2548_v8, %v2547_v32  ;;  %v2529_v60 = vmul.f32 %v7107_v50, %v5251_v59  ;;  %v7337_v22 = vld [vmem:[#allocation13 + $0x18] sm:$0xff]  ;;  %v7340_v45 = vld [vmem:[#allocation13 + $0x10] sm:$0xff] }
 0xfd5   : > { %v2528_v42 = vmul.f32 %v7101_v9, %v5253_v53  ;;  %v2545_v28 = vmul.f32 %v7104_v33, %v5253_v53 }
 0xfd6   : > { %v2552_v51 = vsel %vm875_vm0, %v2546_v47, 0.0  ;;  %v2535_v27 = vsel %vm875_vm0, %v2529_v60, 0.0  ;;  %v7349_v60 = vld [vmem:[#allocation14] sm:$0xff] }
 0xfd7   : > { %v2533_v14 = vsel %vm875_vm0, %v2528_v42, 0.0  ;;  %v2550_v39 = vsel %vm875_vm0, %v2545_v28, 0.0  ;;  %v7343_v42 = vld [vmem:[#allocation14 + $0x8] sm:$0xff] }
 0xfd8   : > { %v2534_v20 = vadd.f32 %v2533_v14, %v2532_v15  ;;  %v2551_v2 = vadd.f32 %v2550_v39, %v2549_v34  ;;  %v7346_v15 = vld [vmem:[#allocation16 + $0x8] sm:$0xff]  ;;  %v7352_v39 = vld [vmem:[#allocation16] sm:$0xff] }
 0xfda   : > { %v2553_v38 = vadd.f32 %v2552_v51, %v2551_v2  ;;  %v2536_v19 = vadd.f32 %v2535_v27, %v2534_v20 }
 0xfdc   : > { %v2554_v23 = vrot.slane %v2553_v38, 4  ;;  %v2537_v25 = vrot.slane %v2536_v19, 4 }
 0xfde   : > { %v2555_v9 = vadd.f32 %v2554_v23, %v2553_v38  ;;  %v2538_v26 = vadd.f32 %v2537_v25, %v2536_v19 }
 0xfe0   : > { %v2556_v33 = vrot.slane %v2555_v9, 2  ;;  %v2539_v30 = vrot.slane %v2538_v26, 2 }
 0xfe2   : > { %v2557_v41 = vadd.f32 %v2556_v33, %v2555_v9  ;;  %v2540_v24 = vadd.f32 %v2539_v30, %v2538_v26  ;;  %v7359_v9 = vld [vmem:[#allocation16 + $0x18] sm:$0xff]  ;;  %v7362_v33 = vld [vmem:[#allocation14 + $0x10] sm:$0xff] }
 0xfe3   : > { %v7365_v26 = vld [vmem:[#allocation16 + $0x10] sm:$0xff] }
 0xfe4   : > { %v2558_v43 = vrot.slane %v2557_v41, 1  ;;  %v2541_v17 = vrot.slane %v2540_v24, 1 }
 0xfe6   : > { %v2559_v50 = vadd.f32 %v2558_v43, %v2557_v41  ;;  %v2542_v48 = vadd.f32 %v2541_v17, %v2540_v24 }
 0xfe8   : > { %v2563_v49 = vadd.f32 %v2559_v50, %v7250_v58  ;;  %v2561_v36 = vadd.f32 %v2560_v12, %v2542_v48 }
 0xfea   : > { %5254 = vrcp.f32 %v2563_v49  ;;  %v2562_v10 = vadd.f32 %v2561_v36, %v7256_v18 }
 0xff7   : > { %v5255_v40 = vpop.eup %5254 }
 0xff8   : > { %v2565_v46 = vmul.f32 %v5255_v40, %v2563_v49  ;;  %v7368_v49 = vld [vmem:[#allocation14 + $0x18] sm:$0xff] }
 0xffa   : > { %v2566_v52 = vsub.f32 2.0, %v2565_v46 }
 0xffc   : > { %v2567_v31 = vmul.f32 %v5255_v40, %v2566_v52 }
 0xffe   : > { %v7315_v0 = vmul.f32 %v2567_v31, %v2562_v10 }
0x1000   : > { %v2572_v37 = vrot.slane %v7315_v0, %v6480_v6 }
0x1002   : > { %2578 = vbcast.lane.b32.xlu1 %v2572_v37, 264  ;;  %2574 = vbcast.lane.b32.xlu0 %v2572_v37, 256 }
0x1006   : > { %2586 = vbcast.lane.b32.xlu1 %v2572_v37, 280  ;;  %2582 = vbcast.lane.b32.xlu0 %v2572_v37, 272 }
0x1074   : > { %v2579_v57 = vpop.permute.xlu1 %2578  ;;  %v2575_v44 = vpop.permute.xlu0 %2574 }
0x1075   : > { %v2589_v29 = vmul.f32 %v7319_v61, %v2579_v57  ;;  %v2588_v4 = vmul.f32 %v7322_v54, %v2575_v44 }
0x1077   : > { %v2593_v11 = vsub.f32 %v2589_v29, %v7325_v55  ;;  %v2592_v56 = vsub.f32 %v2588_v4, %v7328_v21 }
0x1078   : > { %v2587_v62 = vpop.permute.xlu1 %2586  ;;  %v2583_v13 = vpop.permute.xlu0 %2582 }
0x1079   : > { %5256 = vtanh.f32 %v2593_v11  ;;  %v2591_v5 = vmul.f32 %v7331_v16, %v2587_v62  ;;  %v2590_v59 = vmul.f32 %v7334_v35, %v2583_v13 }
0x107a   : > { %5258 = vtanh.f32 %v2592_v56 }
0x107b   : > { %v2595_v8 = vsub.f32 %v2591_v5, %v7337_v22  ;;  %v2594_v32 = vsub.f32 %v2590_v59, %v7340_v45 }
0x107d   : > { %5260 = vtanh.f32 %v2595_v8 }
0x107e   : > { %5262 = vtanh.f32 %v2594_v32  ;;  %v7376_v32 = vld [vmem:[#allocation20] sm:$0x1] }
0x1086   : > { %v5257_v53 = vpop.eup %5256 }
0x1087   : > { %v5259_v47 = vpop.eup %5258  ;;  %v2601_v28 = vmul.f32 %v7343_v42, %v5257_v53  ;;  %v2618_v34 = vmul.f32 %v7346_v15, %v5257_v53  ;;  %v2634_v53 = vmul.f32 %v7376_v32, %v7315_v0 }
0x1088   : > { %v2600_v14 = vmul.f32 %v7349_v60, %v5259_v47  ;;  %v2617_v20 = vmul.f32 %v7352_v39, %v5259_v47 }
0x1089   : > { %v2605_v51 = vsel %vm875_vm0, %v2601_v28, 0.0  ;;  %v2622_v38 = vsel %vm875_vm0, %v2618_v34, 0.0 }
0x108a   : > { %v5261_v2 = vpop.eup %5260  ;;  %v2604_v27 = vsel %vm875_vm0, %v2600_v14, 0.0  ;;  %v2621_v19 = vsel %vm875_vm0, %v2617_v20, 0.0 }
0x108b   : > { %v5263_v23 = vpop.eup %5262  ;;  %v2620_v25 = vmul.f32 %v7359_v9, %v5261_v2  ;;  %v2606_v50 = vadd.f32 %v2605_v51, %v2604_v27  ;;  %v2623_v30 = vadd.f32 %v2622_v38, %v2621_v19  ;;  %v2603_v24 = vmul.f32 %v7368_v49, %v5261_v2 }
0x108c   : > { %v2602_v41 = vmul.f32 %v7362_v33, %v5263_v23  ;;  %v2619_v43 = vmul.f32 %v7365_v26, %v5263_v23 }
0x108d   : > { %v2626_v36 = vsel %vm875_vm0, %v2620_v25, 0.0  ;;  %v2609_v52 = vsel %vm875_vm0, %v2603_v24, 0.0 }
0x108e   : > { %v2607_v17 = vsel %vm875_vm0, %v2602_v41, 0.0  ;;  %v2624_v48 = vsel %vm875_vm0, %v2619_v43, 0.0 }
0x108f   : > { %v2608_v12 = vadd.f32 %v2607_v17, %v2606_v50  ;;  %v2625_v40 = vadd.f32 %v2624_v48, %v2623_v30 }
0x1091   : > { %v2627_v46 = vadd.f32 %v2626_v36, %v2625_v40  ;;  %v2610_v10 = vadd.f32 %v2609_v52, %v2608_v12 }
0x1093   : > { %v2628_v31 = vrot.slane %v2627_v46, 4  ;;  %v2611_v57 = vrot.slane %v2610_v10, 4 }
0x1095   : > { %v2629_v37 = vadd.f32 %v2628_v31, %v2627_v46  ;;  %v2612_v4 = vadd.f32 %v2611_v57, %v2610_v10 }
0x1097   : > { %v2630_v44 = vrot.slane %v2629_v37, 2  ;;  %v2613_v62 = vrot.slane %v2612_v4, 2 }
0x1099   : > { %v2631_v29 = vadd.f32 %v2630_v44, %v2629_v37  ;;  %v2614_v5 = vadd.f32 %v2613_v62, %v2612_v4 }
0x109b   : > { %v2632_v11 = vrot.slane %v2631_v29, 1  ;;  %v2615_v59 = vrot.slane %v2614_v5, 1 }
0x109d   : > { %v2633_v56 = vadd.f32 %v2632_v11, %v2631_v29  ;;  %v2616_v8 = vadd.f32 %v2615_v59, %v2614_v5 }
0x109f   : > { %v2637_v13 = vadd.f32 %v2633_v56, %v7250_v58  ;;  %v2635_v28 = vadd.f32 %v2634_v53, %v2616_v8 }
0x10a1   : > { %5264 = vrcp.f32 %v2637_v13  ;;  %v2636_v20 = vadd.f32 %v2635_v28, %v7256_v18 }
0x10ae   : > { %v5265_v47 = vpop.eup %5264 }
0x10af   : > { %v2639_v34 = vmul.f32 %v5265_v47, %v2637_v13 }
0x10b1   : > { %v2640_v14 = vsub.f32 2.0, %v2639_v34 }
0x10b3   : > { %v2641_v2 = vmul.f32 %v5265_v47, %v2640_v14 }
0x10b5   : > { %v2642_v51 = vmul.f32 %v2641_v2, %v2636_v20 }
0x10b7   : > { %v2646_v38 = vrot.slane %v2642_v51, %v6480_v6 }
0x10b9   : > { %2652 = vbcast.lane.b32.xlu1 %v2646_v38, 264  ;;  %2648 = vbcast.lane.b32.xlu0 %v2646_v38, 256 }
0x10bd   : > { %2660 = vbcast.lane.b32.xlu1 %v2646_v38, 280  ;;  %2656 = vbcast.lane.b32.xlu0 %v2646_v38, 272 }
0x112b   : > { %v2653_v27 = vpop.permute.xlu1 %2652  ;;  %v2649_v19 = vpop.permute.xlu0 %2648 }
0x112c   : > { %v2663_v23 = vmul.f32 %v7319_v61, %v2653_v27  ;;  %v2662_v0 = vmul.f32 %v7322_v54, %v2649_v19 }
0x112e   : > { %v2667_v25 = vsub.f32 %v2663_v23, %v7325_v55  ;;  %v2666_v41 = vsub.f32 %v2662_v0, %v7328_v21 }
0x112f   : > { %v2661_v43 = vpop.permute.xlu1 %2660  ;;  %v2657_v50 = vpop.permute.xlu0 %2656 }
0x1130   : > { %5266 = vtanh.f32 %v2667_v25  ;;  %v2665_v30 = vmul.f32 %v7331_v16, %v2661_v43  ;;  %v2664_v24 = vmul.f32 %v7334_v35, %v2657_v50 }
0x1131   : > { %5268 = vtanh.f32 %v2666_v41 }
0x1132   : > { %v2669_v17 = vsub.f32 %v2665_v30, %v7337_v22  ;;  %v2668_v48 = vsub.f32 %v2664_v24, %v7340_v45 }
0x1134   : > { %5270 = vtanh.f32 %v2669_v17 }
0x1135   : > { %5272 = vtanh.f32 %v2668_v48 }
0x113d   : > { %v5267_v12 = vpop.eup %5266 }
0x113e   : > { %v5269_v40 = vpop.eup %5268  ;;  %v2675_v36 = vmul.f32 %v7343_v42, %v5267_v12  ;;  %v2692_v46 = vmul.f32 %v7346_v15, %v5267_v12  ;;  %v2708_v12 = vmul.f32 %v7376_v32, %v2642_v51 }
0x113f   : > { %v2674_v52 = vmul.f32 %v7349_v60, %v5269_v40  ;;  %v2691_v10 = vmul.f32 %v7352_v39, %v5269_v40 }
0x1140   : > { %v2679_v37 = vsel %vm875_vm0, %v2675_v36, 0.0  ;;  %v2696_v57 = vsel %vm875_vm0, %v2692_v46, 0.0 }
0x1141   : > { %v5271_v31 = vpop.eup %5270  ;;  %v2678_v44 = vsel %vm875_vm0, %v2674_v52, 0.0  ;;  %v2695_v29 = vsel %vm875_vm0, %v2691_v10, 0.0 }
0x1142   : > { %v5273_v4 = vpop.eup %5272  ;;  %v2694_v11 = vmul.f32 %v7359_v9, %v5271_v31  ;;  %v2680_v13 = vadd.f32 %v2679_v37, %v2678_v44  ;;  %v2697_v5 = vadd.f32 %v2696_v57, %v2695_v29  ;;  %v2677_v59 = vmul.f32 %v7368_v49, %v5271_v31 }
0x1143   : > { %v2676_v56 = vmul.f32 %v7362_v33, %v5273_v4  ;;  %v2693_v62 = vmul.f32 %v7365_v26, %v5273_v4 }
0x1144   : > { %v2700_v34 = vsel %vm875_vm0, %v2694_v11, 0.0  ;;  %v2683_v20 = vsel %vm875_vm0, %v2677_v59, 0.0 }
0x1145   : > { %v2681_v8 = vsel %vm875_vm0, %v2676_v56, 0.0  ;;  %v2698_v53 = vsel %vm875_vm0, %v2693_v62, 0.0 }
0x1146   : > { %v2682_v47 = vadd.f32 %v2681_v8, %v2680_v13  ;;  %v2699_v28 = vadd.f32 %v2698_v53, %v2697_v5 }
0x1148   : > { %v2701_v14 = vadd.f32 %v2700_v34, %v2699_v28  ;;  %v2684_v2 = vadd.f32 %v2683_v20, %v2682_v47 }
0x114a   : > { %v2702_v38 = vrot.slane %v2701_v14, 4  ;;  %v2685_v19 = vrot.slane %v2684_v2, 4 }
0x114c   : > { %v2703_v27 = vadd.f32 %v2702_v38, %v2701_v14  ;;  %v2686_v25 = vadd.f32 %v2685_v19, %v2684_v2 }
0x114e   : > { %v2704_v23 = vrot.slane %v2703_v27, 2  ;;  %v2687_v50 = vrot.slane %v2686_v25, 2 }
0x1150   : > { %v2705_v0 = vadd.f32 %v2704_v23, %v2703_v27  ;;  %v2688_v24 = vadd.f32 %v2687_v50, %v2686_v25 }
0x1152   : > { %v2706_v41 = vrot.slane %v2705_v0, 1  ;;  %v2689_v17 = vrot.slane %v2688_v24, 1 }
0x1154   : > { %v2707_v43 = vadd.f32 %v2706_v41, %v2705_v0  ;;  %v2690_v48 = vadd.f32 %v2689_v17, %v2688_v24 }
0x1156   : > { %v2711_v30 = vadd.f32 %v2707_v43, %v7250_v58  ;;  %v2709_v36 = vadd.f32 %v2708_v12, %v2690_v48 }
0x1158   : > { %5274 = vrcp.f32 %v2711_v30  ;;  %v2710_v10 = vadd.f32 %v2709_v36, %v7256_v18 }
0x1165   : > { %v5275_v40 = vpop.eup %5274 }
0x1166   : > { %v2713_v46 = vmul.f32 %v5275_v40, %v2711_v30 }
0x1168   : > { %v2714_v52 = vsub.f32 2.0, %v2713_v46 }
0x116a   : > { %v2715_v31 = vmul.f32 %v5275_v40, %v2714_v52 }
0x116c   : > { %v2716_v37 = vmul.f32 %v2715_v31, %v2710_v10 }
0x116e   : > { %v2720_v57 = vrot.slane %v2716_v37, %v6480_v6 }
0x1170   : > { %2726 = vbcast.lane.b32.xlu1 %v2720_v57, 264  ;;  %2722 = vbcast.lane.b32.xlu0 %v2720_v57, 256 }
0x1174   : > { %2734 = vbcast.lane.b32.xlu1 %v2720_v57, 280  ;;  %2730 = vbcast.lane.b32.xlu0 %v2720_v57, 272 }
0x11e2   : > { %v2727_v44 = vpop.permute.xlu1 %2726  ;;  %v2723_v29 = vpop.permute.xlu0 %2722 }
0x11e3   : > { %v2737_v4 = vmul.f32 %v7319_v61, %v2727_v44  ;;  %v2736_v51 = vmul.f32 %v7322_v54, %v2723_v29 }
0x11e5   : > { %v2741_v11 = vsub.f32 %v2737_v4, %v7325_v55  ;;  %v2740_v56 = vsub.f32 %v2736_v51, %v7328_v21 }
0x11e6   : > { %v2735_v62 = vpop.permute.xlu1 %2734  ;;  %v2731_v13 = vpop.permute.xlu0 %2730 }
0x11e7   : > { %5276 = vtanh.f32 %v2741_v11  ;;  %v2739_v5 = vmul.f32 %v7331_v16, %v2735_v62  ;;  %v2738_v59 = vmul.f32 %v7334_v35, %v2731_v13 }
0x11e8   : > { %5278 = vtanh.f32 %v2740_v56 }
0x11e9   : > { %v2743_v8 = vsub.f32 %v2739_v5, %v7337_v22  ;;  %v2742_v53 = vsub.f32 %v2738_v59, %v7340_v45 }
0x11eb   : > { %5280 = vtanh.f32 %v2743_v8 }
0x11ec   : > { %5282 = vtanh.f32 %v2742_v53 }
0x11f4   : > { %v5277_v47 = vpop.eup %5276 }
0x11f5   : > { %v5279_v28 = vpop.eup %5278  ;;  %v2749_v34 = vmul.f32 %v7343_v42, %v5277_v47  ;;  %v2766_v14 = vmul.f32 %v7346_v15, %v5277_v47  ;;  %v2782_v47 = vmul.f32 %v7376_v32, %v2716_v37 }
0x11f6   : > { %v2748_v20 = vmul.f32 %v7349_v60, %v5279_v28  ;;  %v2765_v2 = vmul.f32 %v7352_v39, %v5279_v28 }
0x11f7   : > { %v2753_v27 = vsel %vm875_vm0, %v2749_v34, 0.0  ;;  %v2770_v19 = vsel %vm875_vm0, %v2766_v14, 0.0 }
0x11f8   : > { %v5281_v38 = vpop.eup %5280  ;;  %v2752_v23 = vsel %vm875_vm0, %v2748_v20, 0.0  ;;  %v2769_v0 = vsel %vm875_vm0, %v2765_v2, 0.0 }
0x11f9   : > { %v5283_v25 = vpop.eup %5282  ;;  %v2768_v41 = vmul.f32 %v7359_v9, %v5281_v38  ;;  %v2754_v30 = vadd.f32 %v2753_v27, %v2752_v23  ;;  %v2771_v24 = vadd.f32 %v2770_v19, %v2769_v0  ;;  %v2751_v17 = vmul.f32 %v7368_v49, %v5281_v38 }
0x11fa   : > { %v2750_v43 = vmul.f32 %v7362_v33, %v5283_v25  ;;  %v2767_v50 = vmul.f32 %v7365_v26, %v5283_v25  ;;  %v817_v19 = vsub.s32 4, %v6477_v1 }
0x11fb   : > { %v2774_v46 = vsel %vm875_vm0, %v2768_v41, 0.0  ;;  %v2757_v10 = vsel %vm875_vm0, %v2751_v17, 0.0 }
0x11fc   : > { %v2755_v48 = vsel %vm875_vm0, %v2750_v43, 0.0  ;;  %v2772_v12 = vsel %vm875_vm0, %v2767_v50, 0.0  ;;  %v818_v0 = vrot.slane %v6482_v7, %v817_v19 }
0x11fd   : > { %v2756_v40 = vadd.f32 %v2755_v48, %v2754_v30  ;;  %v2773_v36 = vadd.f32 %v2772_v12, %v2771_v24  ;;  %v7455_v24 = vld [vmem:[%s8404_s3] sm:$0xff] }
0x11fe   : > { %v7462_v12 = vld [vmem:[%s8405_s4] sm:$0xff] }
0x11ff   : > { %v2775_v52 = vadd.f32 %v2774_v46, %v2773_v36  ;;  %v2758_v31 = vadd.f32 %v2757_v10, %v2756_v40 }
0x1201   : > { %v2776_v57 = vrot.slane %v2775_v52, 4  ;;  %v2759_v29 = vrot.slane %v2758_v31, 4 }
0x1203   : > { %v2777_v44 = vadd.f32 %v2776_v57, %v2775_v52  ;;  %v2760_v11 = vadd.f32 %v2759_v29, %v2758_v31 }
0x1205   : > { %v2778_v4 = vrot.slane %v2777_v44, 2  ;;  %v2761_v13 = vrot.slane %v2760_v11, 2 }
0x1207   : > { %v2779_v51 = vadd.f32 %v2778_v4, %v2777_v44  ;;  %v2762_v59 = vadd.f32 %v2761_v13, %v2760_v11 }
0x1209   : > { %v2780_v56 = vrot.slane %v2779_v51, 1  ;;  %v2763_v8 = vrot.slane %v2762_v59, 1 }
0x120b   : > { %v2781_v62 = vadd.f32 %v2780_v56, %v2779_v51  ;;  %v2764_v53 = vadd.f32 %v2763_v8, %v2762_v59 }
0x120d   : > { %v2785_v5 = vadd.f32 %v2781_v62, %v7250_v58  ;;  %v2783_v34 = vadd.f32 %v2782_v47, %v2764_v53 }
0x120f   : > { %5284 = vrcp.f32 %v2785_v5  ;;  %v2784_v2 = vadd.f32 %v2783_v34, %v7256_v18 }
0x121c   : > { %v5285_v28 = vpop.eup %5284 }
0x121d   : > { %v2787_v14 = vmul.f32 %v5285_v28, %v2785_v5  ;;  %v7474_v5 = vld [vmem:[#allocation10] sm:$0xff] }
0x121f   : > { %v2788_v20 = vsub.f32 2.0, %v2787_v14 }
0x1221   : > { %v2789_v38 = vmul.f32 %v5285_v28, %v2788_v20 }
0x1223   : > { %v7437_v27 = vmul.f32 %v2789_v38, %v2784_v2 }
0x1225   : > { %v2797_v58 = vrot.slane %v7437_v27, %v6480_v6  ;;  %v2791_v23 = vmul.f32 %v7209_v3, %v7437_v27 }
0x1227   : > { %2803 = vbcast.lane.b32.xlu1 %v2797_v58, 264  ;;  %v2792_v37 = vadd.f32 %v7213_v63, %v2791_v23  ;;  %2799 = vbcast.lane.b32.xlu0 %v2797_v58, 256 }
0x1229   : > { %2793 = vst.msk [vmem:[%s6733_s2 + $0x3] sm:$0x1] %vm1451_vm1, %v2792_v37 }
0x122b   : > { %820 = vbcast.lane.b32.xlu1 %v818_v0, 256  ;;  %2807 = vbcast.lane.b32.xlu0 %v2797_v58, 272 }
0x122f   : > { %2811 = vbcast.lane.b32.xlu0 %v2797_v58, 280 }
0x1299   : > { %v2804_v18 = vpop.permute.xlu1 %2803  ;;  %v2800_v25 = vpop.permute.xlu0 %2799 }
0x129a   : > { %v2814_v41 = vmul.f32 %v7319_v61, %v2804_v18  ;;  %v2813_v43 = vmul.f32 %v7322_v54, %v2800_v25 }
0x129c   : > { %v2818_v50 = vsub.f32 %v2814_v41, %v7325_v55  ;;  %v2817_v3 = vsub.f32 %v2813_v43, %v7328_v21 }
0x129d   : > { %v821_v30 = vpop.permute.xlu1 %820  ;;  %v2808_v63 = vpop.permute.xlu0 %2807 }
0x129e   : > { %5286 = vtanh.f32 %v2818_v50  ;;  %v847_v17 = vmul.f32 %v7455_v24, %v821_v30  ;;  %v2815_v48 = vmul.f32 %v7334_v35, %v2808_v63  ;;  %v7488_v30 = vld [vmem:[#allocation8] sm:$0xff] }
0x129f   : > { %5288 = vtanh.f32 %v2817_v3 }
0x12a0   : > { %v855_v40 = vsub.f32 %v847_v17, %v7462_v12  ;;  %v2819_v36 = vsub.f32 %v2815_v48, %v7340_v45 }
0x12a1   : > { %v2812_v46 = vpop.permute.xlu0 %2811 }
0x12a2   : > { %5290 = vtanh.f32 %v855_v40  ;;  %v2816_v52 = vmul.f32 %v7331_v16, %v2812_v46 }
0x12a3   : > { %5292 = vtanh.f32 %v2819_v36 }
0x12a4   : > { %v2820_v10 = vsub.f32 %v2816_v52, %v7337_v22 }
0x12a6   : > { %5294 = vtanh.f32 %v2820_v10 }
0x12ab   : > { %v5287_v31 = vpop.eup %5286 }
0x12ac   : > { %v5289_v57 = vpop.eup %5288  ;;  %v2843_v44 = vmul.f32 %v7346_v15, %v5287_v31  ;;  %v2826_v4 = vmul.f32 %v7343_v42, %v5287_v31 }
0x12ad   : > { %v2842_v29 = vmul.f32 %v7352_v39, %v5289_v57  ;;  %v2825_v51 = vmul.f32 %v7349_v60, %v5289_v57 }
0x12ae   : > { %v2847_v62 = vsel %vm875_vm0, %v2843_v44, 0.0  ;;  %v2830_v47 = vsel %vm875_vm0, %v2826_v4, 0.0 }
0x12af   : > { %v5291_v11 = vpop.eup %5290  ;;  %v2846_v13 = vsel %vm875_vm0, %v2842_v29, 0.0  ;;  %v2829_v28 = vsel %vm875_vm0, %v2825_v51, 0.0 }
0x12b0   : > { %v5293_v56 = vpop.eup %5292  ;;  %v950_v59 = vmul.f32 %v7474_v5, %v5291_v11  ;;  %v2848_v20 = vadd.f32 %v2847_v62, %v2846_v13  ;;  %v2831_v37 = vadd.f32 %v2830_v47, %v2829_v28  ;;  %v871_v63 = vmul.f32 %v7488_v30, %v5291_v11  ;;  %v7492_v62 = vld [vmem:[#allocation19] ss:$0 sm:$0xff] }
0x12b1   : > { %v2827_v8 = vmul.f32 %v7362_v33, %v5293_v56  ;;  %v2844_v53 = vmul.f32 %v7365_v26, %v5293_v56 }
0x12b2   : > { %v982_v34 = vsel %vm875_vm0, %v950_v59, 0.0  ;;  %v904_v52 = vsel %vm875_vm0, %v871_v63, 0.0 }
0x12b3   : > { %v5295_v14 = vpop.eup %5294  ;;  %v983_v2 = vrot.slane %v982_v34, 4  ;;  %v2849_v38 = vsel %vm875_vm0, %v2844_v53, 0.0  ;;  %v2832_v19 = vsel %vm875_vm0, %v2827_v8, 0.0  ;;  %v905_v57 = vrot.slane %v904_v52, 4 }
0x12b4   : > { %v2828_v58 = vmul.f32 %v7368_v49, %v5295_v14  ;;  %v2845_v23 = vmul.f32 %v7359_v9, %v5295_v14  ;;  %v2850_v18 = vadd.f32 %v2849_v38, %v2848_v20  ;;  %v2833_v50 = vadd.f32 %v2832_v19, %v2831_v37  ;;  %v7500_v37 = vld [vmem:[#allocation17] ss:$0 sm:$0xff] }
0x12b5   : > { %v984_v0 = vadd.f32 %v983_v2, %v982_v34  ;;  %v906_v56 = vadd.f32 %v905_v57, %v904_v52  ;;  %v2859_v38 = vmul.f32 %v7376_v32, %v7437_v27 }
0x12b6   : > { %v2834_v25 = vsel %vm875_vm0, %v2828_v58, 0.0  ;;  %v2851_v41 = vsel %vm875_vm0, %v2845_v23, 0.0 }
0x12b7   : > { %v985_v43 = vrot.slane %v984_v0, 2  ;;  %v2852_v3 = vadd.f32 %v2851_v41, %v2850_v18  ;;  %v2835_v48 = vadd.f32 %v2834_v25, %v2833_v50  ;;  %v907_v53 = vrot.slane %v906_v56, 2 }
0x12b9   : > { %v986_v17 = vadd.f32 %v985_v43, %v984_v0  ;;  %v2853_v40 = vrot.slane %v2852_v3, 4  ;;  %v2836_v10 = vrot.slane %v2835_v48, 4  ;;  %v908_v28 = vadd.f32 %v907_v53, %v906_v56 }
0x12bb   : > { %v987_v36 = vrot.slane %v986_v17, 1  ;;  %v2854_v46 = vadd.f32 %v2853_v40, %v2852_v3  ;;  %v2837_v4 = vadd.f32 %v2836_v10, %v2835_v48  ;;  %v909_v14 = vrot.slane %v908_v28, 1 }
0x12bd   : > { %v2855_v31 = vrot.slane %v2854_v46, 2  ;;  %v988_v44 = vadd.f32 %v987_v36, %v986_v17  ;;  %v2838_v59 = vrot.slane %v2837_v4, 2  ;;  %v910_v2 = vadd.f32 %v909_v14, %v908_v28 }
0x12bf   : > { %v2856_v29 = vadd.f32 %v2855_v31, %v2854_v46  ;;  %v7495_v13 = vadd.f32 %v7492_v62, %v988_v44  ;;  %v2839_v47 = vadd.f32 %v2838_v59, %v2837_v4  ;;  %v7503_v0 = vadd.f32 %v7500_v37, %v910_v2 }
0x12c1   : > { %v2857_v51 = vrot.slane %v2856_v29, 1  ;;  %v2840_v34 = vrot.slane %v2839_v47, 1 }
0x12c3   : > { %v2858_v11 = vadd.f32 %v2857_v51, %v2856_v29  ;;  %v2841_v20 = vadd.f32 %v2840_v34, %v2839_v47 }
0x12c5   : > { %v2862_v8 = vadd.f32 %v2858_v11, %v7495_v13  ;;  %v2860_v58 = vadd.f32 %v2859_v38, %v2841_v20 }
0x12c7   : > { %5296 = vrcp.f32 %v2862_v8  ;;  %v2861_v25 = vadd.f32 %v2860_v58, %v7503_v0 }
0x12d4   : > { %v5297_v19 = vpop.eup %5296 }
0x12d5   : > { %v2864_v23 = vmul.f32 %v5297_v19, %v2862_v8 }
0x12d7   : > { %v2865_v18 = vsub.f32 2.0, %v2864_v23 }
0x12d9   : > { %v2866_v41 = vmul.f32 %v5297_v19, %v2865_v18 }
0x12db   : > { %v2867_v43 = vmul.f32 %v2866_v41, %v2861_v25 }
0x12dd   : > { %v2871_v50 = vrot.slane %v2867_v43, %v6480_v6 }
0x12df   : > { %2877 = vbcast.lane.b32.xlu0 %v2871_v50, 264  ;;  %2873 = vbcast.lane.b32.xlu1 %v2871_v50, 256 }
0x12e3   : > { %2885 = vbcast.lane.b32.xlu0 %v2871_v50, 280  ;;  %2881 = vbcast.lane.b32.xlu1 %v2871_v50, 272 }
0x1351   : > { %v2878_v27 = vpop.permute.xlu0 %2877  ;;  %v2874_v3 = vpop.permute.xlu1 %2873 }
0x1352   : > { %v2888_v63 = vmul.f32 %v7319_v61, %v2878_v27  ;;  %v2887_v17 = vmul.f32 %v7322_v54, %v2874_v3 }
0x1354   : > { %v2892_v48 = vsub.f32 %v2888_v63, %v7325_v55  ;;  %v2891_v40 = vsub.f32 %v2887_v17, %v7328_v21 }
0x1355   : > { %v2886_v36 = vpop.permute.xlu0 %2885  ;;  %v2882_v46 = vpop.permute.xlu1 %2881 }
0x1356   : > { %5298 = vtanh.f32 %v2892_v48  ;;  %v2890_v52 = vmul.f32 %v7331_v16, %v2886_v36  ;;  %v2889_v10 = vmul.f32 %v7334_v35, %v2882_v46 }
0x1357   : > { %5300 = vtanh.f32 %v2891_v40 }
0x1358   : > { %v2894_v31 = vsub.f32 %v2890_v52, %v7337_v22  ;;  %v2893_v57 = vsub.f32 %v2889_v10, %v7340_v45 }
0x135a   : > { %5302 = vtanh.f32 %v2894_v31 }
0x135b   : > { %5304 = vtanh.f32 %v2893_v57 }
0x1363   : > { %v5299_v44 = vpop.eup %5298 }
0x1364   : > { %v5301_v29 = vpop.eup %5300  ;;  %v2900_v4 = vmul.f32 %v7343_v42, %v5299_v44  ;;  %v2917_v51 = vmul.f32 %v7346_v15, %v5299_v44 }
0x1365   : > { %v2899_v56 = vmul.f32 %v7349_v60, %v5301_v29  ;;  %v2916_v11 = vmul.f32 %v7352_v39, %v5301_v29 }
0x1366   : > { %v2904_v8 = vsel %vm875_vm0, %v2900_v4, 0.0  ;;  %v2921_v53 = vsel %vm875_vm0, %v2917_v51, 0.0 }
0x1367   : > { %v5303_v59 = vpop.eup %5302  ;;  %v2903_v47 = vsel %vm875_vm0, %v2899_v56, 0.0  ;;  %v2920_v28 = vsel %vm875_vm0, %v2916_v11, 0.0  ;;  %v2933_v56 = vmul.f32 %v7376_v32, %v2867_v43 }
0x1368   : > { %v5305_v34 = vpop.eup %5304  ;;  %v2919_v14 = vmul.f32 %v7359_v9, %v5303_v59  ;;  %v2905_v38 = vadd.f32 %v2904_v8, %v2903_v47  ;;  %v2922_v19 = vadd.f32 %v2921_v53, %v2920_v28  ;;  %v2902_v58 = vmul.f32 %v7368_v49, %v5303_v59 }
0x1369   : > { %v2901_v20 = vmul.f32 %v7362_v33, %v5305_v34  ;;  %v2918_v2 = vmul.f32 %v7365_v26, %v5305_v34 }
0x136a   : > { %v2925_v50 = vsel %vm875_vm0, %v2919_v14, 0.0  ;;  %v2908_v3 = vsel %vm875_vm0, %v2902_v58, 0.0 }
0x136b   : > { %v2906_v23 = vsel %vm875_vm0, %v2901_v20, 0.0  ;;  %v2923_v18 = vsel %vm875_vm0, %v2918_v2, 0.0 }
0x136c   : > { %v2907_v25 = vadd.f32 %v2906_v23, %v2905_v38  ;;  %v2924_v41 = vadd.f32 %v2923_v18, %v2922_v19 }
0x136e   : > { %v2926_v27 = vadd.f32 %v2925_v50, %v2924_v41  ;;  %v2909_v63 = vadd.f32 %v2908_v3, %v2907_v25 }
0x1370   : > { %v2927_v17 = vrot.slane %v2926_v27, 4  ;;  %v2910_v40 = vrot.slane %v2909_v63, 4 }
0x1372   : > { %v2928_v48 = vadd.f32 %v2927_v17, %v2926_v27  ;;  %v2911_v52 = vadd.f32 %v2910_v40, %v2909_v63 }
0x1374   : > { %v2929_v36 = vrot.slane %v2928_v48, 2  ;;  %v2912_v57 = vrot.slane %v2911_v52, 2 }
0x1376   : > { %v2930_v46 = vadd.f32 %v2929_v36, %v2928_v48  ;;  %v2913_v29 = vadd.f32 %v2912_v57, %v2911_v52 }
0x1378   : > { %v2931_v10 = vrot.slane %v2930_v46, 1  ;;  %v2914_v4 = vrot.slane %v2913_v29, 1 }
0x137a   : > { %v2932_v31 = vadd.f32 %v2931_v10, %v2930_v46  ;;  %v2915_v51 = vadd.f32 %v2914_v4, %v2913_v29 }
0x137c   : > { %v2936_v44 = vadd.f32 %v2932_v31, %v7495_v13  ;;  %v2934_v59 = vadd.f32 %v2933_v56, %v2915_v51 }
0x137e   : > { %5306 = vrcp.f32 %v2936_v44  ;;  %v2935_v47 = vadd.f32 %v2934_v59, %v7503_v0 }
0x138b   : > { %v5307_v11 = vpop.eup %5306 }
0x138c   : > { %v2938_v8 = vmul.f32 %v5307_v11, %v2936_v44 }
0x138e   : > { %v2939_v53 = vsub.f32 2.0, %v2938_v8 }
0x1390   : > { %v2940_v28 = vmul.f32 %v5307_v11, %v2939_v53 }
0x1392   : > { %v2941_v34 = vmul.f32 %v2940_v28, %v2935_v47 }
0x1394   : > { %v2945_v14 = vrot.slane %v2941_v34, %v6480_v6 }
0x1396   : > { %2951 = vbcast.lane.b32.xlu0 %v2945_v14, 264  ;;  %2947 = vbcast.lane.b32.xlu1 %v2945_v14, 256 }
0x139a   : > { %2959 = vbcast.lane.b32.xlu0 %v2945_v14, 280  ;;  %2955 = vbcast.lane.b32.xlu1 %v2945_v14, 272 }
0x1408   : > { %v2952_v20 = vpop.permute.xlu0 %2951  ;;  %v2948_v2 = vpop.permute.xlu1 %2947 }
0x1409   : > { %v2962_v38 = vmul.f32 %v7319_v61, %v2952_v20  ;;  %v2961_v43 = vmul.f32 %v7322_v54, %v2948_v2 }
0x140b   : > { %v2966_v19 = vsub.f32 %v2962_v38, %v7325_v55  ;;  %v2965_v58 = vsub.f32 %v2961_v43, %v7328_v21 }
0x140c   : > { %v2960_v23 = vpop.permute.xlu0 %2959  ;;  %v2956_v18 = vpop.permute.xlu1 %2955 }
0x140d   : > { %5308 = vtanh.f32 %v2966_v19  ;;  %v2964_v25 = vmul.f32 %v7331_v16, %v2960_v23  ;;  %v2963_v41 = vmul.f32 %v7334_v35, %v2956_v18 }
0x140e   : > { %5310 = vtanh.f32 %v2965_v58 }
0x140f   : > { %v2968_v50 = vsub.f32 %v2964_v25, %v7337_v22  ;;  %v2967_v27 = vsub.f32 %v2963_v41, %v7340_v45 }
0x1411   : > { %5312 = vtanh.f32 %v2968_v50 }
0x1412   : > { %5314 = vtanh.f32 %v2967_v27 }
0x141a   : > { %v5309_v3 = vpop.eup %5308 }
0x141b   : > { %v5311_v63 = vpop.eup %5310  ;;  %v2974_v17 = vmul.f32 %v7343_v42, %v5309_v3  ;;  %v2991_v48 = vmul.f32 %v7346_v15, %v5309_v3 }
0x141c   : > { %v2973_v40 = vmul.f32 %v7349_v60, %v5311_v63  ;;  %v2990_v36 = vmul.f32 %v7352_v39, %v5311_v63 }
0x141d   : > { %v2978_v52 = vsel %vm875_vm0, %v2974_v17, 0.0  ;;  %v2995_v10 = vsel %vm875_vm0, %v2991_v48, 0.0 }
0x141e   : > { %v5313_v46 = vpop.eup %5312  ;;  %v2977_v31 = vsel %vm875_vm0, %v2973_v40, 0.0  ;;  %v2994_v57 = vsel %vm875_vm0, %v2990_v36, 0.0  ;;  %v3007_v40 = vmul.f32 %v7376_v32, %v2941_v34 }
0x141f   : > { %v5315_v44 = vpop.eup %5314  ;;  %v2993_v29 = vmul.f32 %v7359_v9, %v5313_v46  ;;  %v2979_v56 = vadd.f32 %v2978_v52, %v2977_v31  ;;  %v2996_v11 = vadd.f32 %v2995_v10, %v2994_v57  ;;  %v2976_v59 = vmul.f32 %v7368_v49, %v5313_v46 }
0x1420   : > { %v2975_v4 = vmul.f32 %v7362_v33, %v5315_v44  ;;  %v2992_v51 = vmul.f32 %v7365_v26, %v5315_v44 }
0x1421   : > { %v2999_v14 = vsel %vm875_vm0, %v2993_v29, 0.0  ;;  %v2982_v2 = vsel %vm875_vm0, %v2976_v59, 0.0 }
0x1422   : > { %v2980_v8 = vsel %vm875_vm0, %v2975_v4, 0.0  ;;  %v2997_v53 = vsel %vm875_vm0, %v2992_v51, 0.0 }
0x1423   : > { %v2981_v47 = vadd.f32 %v2980_v8, %v2979_v56  ;;  %v2998_v28 = vadd.f32 %v2997_v53, %v2996_v11 }
0x1425   : > { %v3000_v20 = vadd.f32 %v2999_v14, %v2998_v28  ;;  %v2983_v38 = vadd.f32 %v2982_v2, %v2981_v47 }
0x1427   : > { %v3001_v43 = vrot.slane %v3000_v20, 4  ;;  %v2984_v58 = vrot.slane %v2983_v38, 4 }
0x1429   : > { %v3002_v19 = vadd.f32 %v3001_v43, %v3000_v20  ;;  %v2985_v25 = vadd.f32 %v2984_v58, %v2983_v38 }
0x142b   : > { %v3003_v23 = vrot.slane %v3002_v19, 2  ;;  %v2986_v27 = vrot.slane %v2985_v25, 2 }
0x142d   : > { %v3004_v18 = vadd.f32 %v3003_v23, %v3002_v19  ;;  %v2987_v63 = vadd.f32 %v2986_v27, %v2985_v25 }
0x142f   : > { %v3005_v41 = vrot.slane %v3004_v18, 1  ;;  %v2988_v17 = vrot.slane %v2987_v63, 1 }
0x1431   : > { %v3006_v50 = vadd.f32 %v3005_v41, %v3004_v18  ;;  %v2989_v48 = vadd.f32 %v2988_v17, %v2987_v63 }
0x1433   : > { %v3010_v3 = vadd.f32 %v3006_v50, %v7495_v13  ;;  %v3008_v46 = vadd.f32 %v3007_v40, %v2989_v48 }
0x1435   : > { %5316 = vrcp.f32 %v3010_v3  ;;  %v3009_v31 = vadd.f32 %v3008_v46, %v7503_v0 }
0x1442   : > { %v5317_v36 = vpop.eup %5316 }
0x1443   : > { %v3012_v52 = vmul.f32 %v5317_v36, %v3010_v3 }
0x1445   : > { %v3013_v10 = vsub.f32 2.0, %v3012_v52 }
0x1447   : > { %v3014_v57 = vmul.f32 %v5317_v36, %v3013_v10 }
0x1449   : > { %v3015_v44 = vmul.f32 %v3014_v57, %v3009_v31 }
0x144b   : > { %v3019_v29 = vrot.slane %v3015_v44, %v6480_v6 }
0x144d   : > { %3025 = vbcast.lane.b32.xlu0 %v3019_v29, 264  ;;  %3021 = vbcast.lane.b32.xlu1 %v3019_v29, 256 }
0x1451   : > { %3033 = vbcast.lane.b32.xlu0 %v3019_v29, 280  ;;  %3029 = vbcast.lane.b32.xlu1 %v3019_v29, 272 }
0x14bf   : > { %v3026_v4 = vpop.permute.xlu0 %3025  ;;  %v3022_v51 = vpop.permute.xlu1 %3021 }
0x14c0   : > { %v3036_v56 = vmul.f32 %v7319_v61, %v3026_v4  ;;  %v3035_v34 = vmul.f32 %v7322_v54, %v3022_v51  ;;  %v3081_v4 = vmul.f32 %v7376_v32, %v3015_v44  ;;  %v7597_v44 = vld [vmem:[#allocation11] sm:$0xff] }
0x14c2   : > { %v3040_v11 = vsub.f32 %v3036_v56, %v7325_v55  ;;  %v3039_v59 = vsub.f32 %v3035_v34, %v7328_v21 }
0x14c3   : > { %v3034_v8 = vpop.permute.xlu0 %3033  ;;  %v3030_v53 = vpop.permute.xlu1 %3029 }
0x14c4   : > { %5318 = vtanh.f32 %v3040_v11  ;;  %v3038_v47 = vmul.f32 %v7331_v16, %v3034_v8  ;;  %v3037_v28 = vmul.f32 %v7334_v35, %v3030_v53 }
0x14c5   : > { %5320 = vtanh.f32 %v3039_v59 }
0x14c6   : > { %v3042_v14 = vsub.f32 %v3038_v47, %v7337_v22  ;;  %v3041_v20 = vsub.f32 %v3037_v28, %v7340_v45 }
0x14c8   : > { %5322 = vtanh.f32 %v3042_v14 }
0x14c9   : > { %5324 = vtanh.f32 %v3041_v20  ;;  %v7594_v20 = vld [vmem:[#allocation11 + $0x8] sm:$0xff] }
0x14d1   : > { %v5319_v61 = vpop.eup %5318 }
0x14d2   : > { %v5321_v54 = vpop.eup %5320  ;;  %v3048_v55 = vmul.f32 %v7343_v42, %v5319_v61  ;;  %v3065_v21 = vmul.f32 %v7346_v15, %v5319_v61 }
0x14d3   : > { %v3047_v2 = vmul.f32 %v7349_v60, %v5321_v54  ;;  %v3064_v38 = vmul.f32 %v7352_v39, %v5321_v54  ;;  %v7600_v54 = vld [vmem:[#allocation13 + $0x8] sm:$0xff] }
0x14d4   : > { %v3052_v35 = vsel %vm875_vm0, %v3048_v55, 0.0  ;;  %v3069_v43 = vsel %vm875_vm0, %v3065_v21, 0.0  ;;  %v7603_v21 = vld [vmem:[#allocation13] sm:$0xff] }
0x14d5   : > { %v5323_v16 = vpop.eup %5322  ;;  %v3051_v22 = vsel %vm875_vm0, %v3047_v2, 0.0  ;;  %v3068_v45 = vsel %vm875_vm0, %v3064_v38, 0.0 }
0x14d6   : > { %v5325_v19 = vpop.eup %5324  ;;  %v3067_v58 = vmul.f32 %v7359_v9, %v5323_v16  ;;  %v3053_v23 = vadd.f32 %v3052_v35, %v3051_v22  ;;  %v3070_v60 = vadd.f32 %v3069_v43, %v3068_v45  ;;  %v3050_v39 = vmul.f32 %v7368_v49, %v5323_v16  ;;  %v7606_v35 = vld [vmem:[#allocation11 + $0x18] sm:$0xff]  ;;  %v7609_v22 = vld [vmem:[#allocation11 + $0x10] sm:$0xff] }
0x14d7   : > { %v3049_v42 = vmul.f32 %v7362_v33, %v5325_v19  ;;  %v3066_v15 = vmul.f32 %v7365_v26, %v5325_v19  ;;  %v7612_v19 = vld [vmem:[#allocation13 + $0x18] sm:$0xff] }
0x14d8   : > { %v3073_v27 = vsel %vm875_vm0, %v3067_v58, 0.0  ;;  %v3056_v63 = vsel %vm875_vm0, %v3050_v39, 0.0  ;;  %v7618_v39 = vld [vmem:[#allocation14 + $0x8] sm:$0xff] }
0x14d9   : > { %v3054_v18 = vsel %vm875_vm0, %v3049_v42, 0.0  ;;  %v3071_v25 = vsel %vm875_vm0, %v3066_v15, 0.0  ;;  %v7615_v42 = vld [vmem:[#allocation13 + $0x10] sm:$0xff] }
0x14da   : > { %v3055_v41 = vadd.f32 %v3054_v18, %v3053_v23  ;;  %v3072_v50 = vadd.f32 %v3071_v25, %v3070_v60  ;;  %v7621_v25 = vld [vmem:[#allocation16 + $0x8] sm:$0xff] }
0x14dc   : > { %v3074_v3 = vadd.f32 %v3073_v27, %v3072_v50  ;;  %v3057_v9 = vadd.f32 %v3056_v63, %v3055_v41  ;;  %v7624_v50 = vld [vmem:[#allocation14] sm:$0xff] }
0x14de   : > { %v3075_v17 = vrot.slane %v3074_v3, 4  ;;  %v3058_v48 = vrot.slane %v3057_v9, 4 }
0x14e0   : > { %v3076_v33 = vadd.f32 %v3075_v17, %v3074_v3  ;;  %v3059_v36 = vadd.f32 %v3058_v48, %v3057_v9  ;;  %v7627_v3 = vld [vmem:[#allocation16] sm:$0xff] }
0x14e2   : > { %v3077_v26 = vrot.slane %v3076_v33, 2  ;;  %v3060_v52 = vrot.slane %v3059_v36, 2 }
0x14e4   : > { %v3078_v40 = vadd.f32 %v3077_v26, %v3076_v33  ;;  %v3061_v31 = vadd.f32 %v3060_v52, %v3059_v36  ;;  %v7634_v36 = vld [vmem:[#allocation16 + $0x18] sm:$0xff] }
0x14e6   : > { %v3079_v46 = vrot.slane %v3078_v40, 1  ;;  %v3062_v57 = vrot.slane %v3061_v31, 1 }
0x14e8   : > { %v3080_v49 = vadd.f32 %v3079_v46, %v3078_v40  ;;  %v3063_v29 = vadd.f32 %v3062_v57, %v3061_v31 }
0x14ea   : > { %v3084_v10 = vadd.f32 %v3080_v49, %v7495_v13  ;;  %v3082_v56 = vadd.f32 %v3081_v4, %v3063_v29  ;;  %v7637_v49 = vld [vmem:[#allocation14 + $0x10] sm:$0xff]  ;;  %v7643_v4 = vld [vmem:[#allocation14 + $0x18] sm:$0xff] }
0x14ec   : > { %5326 = vrcp.f32 %v3084_v10  ;;  %v3083_v59 = vadd.f32 %v3082_v56, %v7503_v0 }
0x14f9   : > { %v5327_v51 = vpop.eup %5326 }
0x14fa   : > { %v3086_v34 = vmul.f32 %v5327_v51, %v3084_v10  ;;  %v7640_v10 = vld [vmem:[#allocation16 + $0x10] sm:$0xff] }
0x14fc   : > { %v3087_v11 = vsub.f32 2.0, %v3086_v34 }
0x14fe   : > { %v3088_v8 = vmul.f32 %v5327_v51, %v3087_v11 }
0x1500   : > { %v7590_v53 = vmul.f32 %v3088_v8, %v3083_v59 }
0x1502   : > { %v3093_v47 = vrot.slane %v7590_v53, %v6480_v6 }
0x1504   : > { %3099 = vbcast.lane.b32.xlu0 %v3093_v47, 264  ;;  %3095 = vbcast.lane.b32.xlu1 %v3093_v47, 256 }
0x1508   : > { %3107 = vbcast.lane.b32.xlu0 %v3093_v47, 280  ;;  %3103 = vbcast.lane.b32.xlu1 %v3093_v47, 272 }
0x1576   : > { %v3100_v28 = vpop.permute.xlu0 %3099  ;;  %v3096_v14 = vpop.permute.xlu1 %3095 }
0x1577   : > { %v3110_v32 = vmul.f32 %v7594_v20, %v3100_v28  ;;  %v3109_v61 = vmul.f32 %v7597_v44, %v3096_v14 }
0x1579   : > { %v3114_v55 = vsub.f32 %v3110_v32, %v7600_v54  ;;  %v3113_v2 = vsub.f32 %v3109_v61, %v7603_v21 }
0x157a   : > { %v3108_v38 = vpop.permute.xlu0 %3107  ;;  %v3104_v16 = vpop.permute.xlu1 %3103 }
0x157b   : > { %5328 = vtanh.f32 %v3114_v55  ;;  %v3112_v43 = vmul.f32 %v7606_v35, %v3108_v38  ;;  %v3111_v45 = vmul.f32 %v7609_v22, %v3104_v16 }
0x157c   : > { %5330 = vtanh.f32 %v3113_v2 }
0x157d   : > { %v3116_v58 = vsub.f32 %v3112_v43, %v7612_v19  ;;  %v3115_v15 = vsub.f32 %v3111_v45, %v7615_v42 }
0x157f   : > { %5332 = vtanh.f32 %v3116_v58 }
0x1580   : > { %5334 = vtanh.f32 %v3115_v15 }
0x1588   : > { %v5329_v23 = vpop.eup %5328 }
0x1589   : > { %v5331_v60 = vpop.eup %5330  ;;  %v3122_v18 = vmul.f32 %v7618_v39, %v5329_v23  ;;  %v3139_v41 = vmul.f32 %v7621_v25, %v5329_v23 }
0x158a   : > { %v3121_v27 = vmul.f32 %v7624_v50, %v5331_v60  ;;  %v3138_v63 = vmul.f32 %v7627_v3, %v5331_v60 }
0x158b   : > { %v3126_v17 = vsel %vm875_vm0, %v3122_v18, 0.0  ;;  %v3143_v33 = vsel %vm875_vm0, %v3139_v41, 0.0  ;;  %v7651_v41 = vld [vmem:[#allocation20] sm:$0x1] }
0x158c   : > { %v5333_v9 = vpop.eup %5332  ;;  %v3125_v48 = vsel %vm875_vm0, %v3121_v27, 0.0  ;;  %v3142_v26 = vsel %vm875_vm0, %v3138_v63, 0.0  ;;  %v3155_v27 = vmul.f32 %v7651_v41, %v7590_v53 }
0x158d   : > { %v5335_v40 = vpop.eup %5334  ;;  %v3141_v46 = vmul.f32 %v7634_v36, %v5333_v9  ;;  %v3127_v57 = vadd.f32 %v3126_v17, %v3125_v48  ;;  %v3144_v29 = vadd.f32 %v3143_v33, %v3142_v26  ;;  %v3124_v51 = vmul.f32 %v7643_v4, %v5333_v9 }
0x158e   : > { %v3123_v52 = vmul.f32 %v7637_v49, %v5335_v40  ;;  %v3140_v31 = vmul.f32 %v7640_v10, %v5335_v40 }
0x158f   : > { %v3147_v8 = vsel %vm875_vm0, %v3141_v46, 0.0  ;;  %v3130_v28 = vsel %vm875_vm0, %v3124_v51, 0.0 }
0x1590   : > { %v3128_v56 = vsel %vm875_vm0, %v3123_v52, 0.0  ;;  %v3145_v34 = vsel %vm875_vm0, %v3140_v31, 0.0 }
0x1591   : > { %v3129_v11 = vadd.f32 %v3128_v56, %v3127_v57  ;;  %v3146_v59 = vadd.f32 %v3145_v34, %v3144_v29 }
0x1593   : > { %v3148_v47 = vadd.f32 %v3147_v8, %v3146_v59  ;;  %v3131_v14 = vadd.f32 %v3130_v28, %v3129_v11 }
0x1595   : > { %v3149_v32 = vrot.slane %v3148_v47, 4  ;;  %v3132_v55 = vrot.slane %v3131_v14, 4 }
0x1597   : > { %v3150_v61 = vadd.f32 %v3149_v32, %v3148_v47  ;;  %v3133_v16 = vadd.f32 %v3132_v55, %v3131_v14 }
0x1599   : > { %v3151_v2 = vrot.slane %v3150_v61, 2  ;;  %v3134_v58 = vrot.slane %v3133_v16, 2 }
0x159b   : > { %v3152_v38 = vadd.f32 %v3151_v2, %v3150_v61  ;;  %v3135_v23 = vadd.f32 %v3134_v58, %v3133_v16 }
0x159d   : > { %v3153_v43 = vrot.slane %v3152_v38, 1  ;;  %v3136_v60 = vrot.slane %v3135_v23, 1 }
0x159f   : > { %v3154_v45 = vadd.f32 %v3153_v43, %v3152_v38  ;;  %v3137_v18 = vadd.f32 %v3136_v60, %v3135_v23 }
0x15a1   : > { %v3158_v15 = vadd.f32 %v3154_v45, %v7495_v13  ;;  %v3156_v9 = vadd.f32 %v3155_v27, %v3137_v18 }
0x15a3   : > { %5336 = vrcp.f32 %v3158_v15  ;;  %v3157_v48 = vadd.f32 %v3156_v9, %v7503_v0 }
0x15b0   : > { %v5337_v63 = vpop.eup %5336 }
0x15b1   : > { %v3160_v17 = vmul.f32 %v5337_v63, %v3158_v15 }
0x15b3   : > { %v3161_v33 = vsub.f32 2.0, %v3160_v17 }
0x15b5   : > { %v3162_v26 = vmul.f32 %v5337_v63, %v3161_v33 }
0x15b7   : > { %v3163_v40 = vmul.f32 %v3162_v26, %v3157_v48 }
0x15b9   : > { %v3167_v46 = vrot.slane %v3163_v40, %v6480_v6 }
0x15bb   : > { %3173 = vbcast.lane.b32.xlu0 %v3167_v46, 264  ;;  %3169 = vbcast.lane.b32.xlu1 %v3167_v46, 256 }
0x15bf   : > { %3181 = vbcast.lane.b32.xlu0 %v3167_v46, 280  ;;  %3177 = vbcast.lane.b32.xlu1 %v3167_v46, 272 }
0x162d   : > { %v3174_v52 = vpop.permute.xlu0 %3173  ;;  %v3170_v31 = vpop.permute.xlu1 %3169 }
0x162e   : > { %v3184_v57 = vmul.f32 %v7594_v20, %v3174_v52  ;;  %v3183_v53 = vmul.f32 %v7597_v44, %v3170_v31 }
0x1630   : > { %v3188_v29 = vsub.f32 %v3184_v57, %v7600_v54  ;;  %v3187_v51 = vsub.f32 %v3183_v53, %v7603_v21 }
0x1631   : > { %v3182_v56 = vpop.permute.xlu0 %3181  ;;  %v3178_v34 = vpop.permute.xlu1 %3177 }
0x1632   : > { %5338 = vtanh.f32 %v3188_v29  ;;  %v3186_v11 = vmul.f32 %v7606_v35, %v3182_v56  ;;  %v3185_v59 = vmul.f32 %v7609_v22, %v3178_v34 }
0x1633   : > { %5340 = vtanh.f32 %v3187_v51 }
0x1634   : > { %v3190_v8 = vsub.f32 %v3186_v11, %v7612_v19  ;;  %v3189_v47 = vsub.f32 %v3185_v59, %v7615_v42 }
0x1636   : > { %5342 = vtanh.f32 %v3190_v8 }
0x1637   : > { %5344 = vtanh.f32 %v3189_v47 }
0x163f   : > { %v5339_v28 = vpop.eup %5338 }
0x1640   : > { %v5341_v14 = vpop.eup %5340  ;;  %v3196_v32 = vmul.f32 %v7618_v39, %v5339_v28  ;;  %v3213_v61 = vmul.f32 %v7621_v25, %v5339_v28 }
0x1641   : > { %v3195_v55 = vmul.f32 %v7624_v50, %v5341_v14  ;;  %v3212_v2 = vmul.f32 %v7627_v3, %v5341_v14 }
0x1642   : > { %v3200_v16 = vsel %vm875_vm0, %v3196_v32, 0.0  ;;  %v3217_v43 = vsel %vm875_vm0, %v3213_v61, 0.0 }
0x1643   : > { %v5343_v38 = vpop.eup %5342  ;;  %v3199_v45 = vsel %vm875_vm0, %v3195_v55, 0.0  ;;  %v3216_v58 = vsel %vm875_vm0, %v3212_v2, 0.0  ;;  %v3229_v55 = vmul.f32 %v7651_v41, %v3163_v40 }
0x1644   : > { %v5345_v15 = vpop.eup %5344  ;;  %v3215_v23 = vmul.f32 %v7634_v36, %v5343_v38  ;;  %v3201_v27 = vadd.f32 %v3200_v16, %v3199_v45  ;;  %v3218_v63 = vadd.f32 %v3217_v43, %v3216_v58  ;;  %v3198_v9 = vmul.f32 %v7643_v4, %v5343_v38 }
0x1645   : > { %v3197_v60 = vmul.f32 %v7637_v49, %v5345_v15  ;;  %v3214_v18 = vmul.f32 %v7640_v10, %v5345_v15 }
0x1646   : > { %v3221_v46 = vsel %vm875_vm0, %v3215_v23, 0.0  ;;  %v3204_v31 = vsel %vm875_vm0, %v3198_v9, 0.0  ;;  %v824_v23 = vsub.s32 5, %v6477_v1 }
0x1647   : > { %v3202_v17 = vsel %vm875_vm0, %v3197_v60, 0.0  ;;  %v3219_v33 = vsel %vm875_vm0, %v3214_v18, 0.0  ;;  %v7689_v60 = vld [vmem:[#allocation22] sm:$0x1]  ;;  %v7693_v18 = vld [vmem:[#allocation23] sm:$0x1] }
0x1648   : > { %v3203_v48 = vadd.f32 %v3202_v17, %v3201_v27  ;;  %v3220_v26 = vadd.f32 %v3219_v33, %v3218_v63 }
0x164a   : > { %v3222_v52 = vadd.f32 %v3221_v46, %v3220_v26  ;;  %v3205_v57 = vadd.f32 %v3204_v31, %v3203_v48 }
0x164c   : > { %v3223_v53 = vrot.slane %v3222_v52, 4  ;;  %v3206_v51 = vrot.slane %v3205_v57, 4 }
0x164e   : > { %v3224_v29 = vadd.f32 %v3223_v53, %v3222_v52  ;;  %v3207_v11 = vadd.f32 %v3206_v51, %v3205_v57 }
0x1650   : > { %v3225_v56 = vrot.slane %v3224_v29, 2  ;;  %v3208_v47 = vrot.slane %v3207_v11, 2 }
0x1652   : > { %v3226_v34 = vadd.f32 %v3225_v56, %v3224_v29  ;;  %v3209_v14 = vadd.f32 %v3208_v47, %v3207_v11 }
0x1654   : > { %v3227_v59 = vrot.slane %v3226_v34, 1  ;;  %v3210_v32 = vrot.slane %v3209_v14, 1 }
0x1656   : > { %v3228_v8 = vadd.f32 %v3227_v59, %v3226_v34  ;;  %v3211_v61 = vadd.f32 %v3210_v32, %v3209_v14 }
0x1658   : > { %v3232_v28 = vadd.f32 %v3228_v8, %v7495_v13  ;;  %v3230_v38 = vadd.f32 %v3229_v55, %v3211_v61 }
0x165a   : > { %5346 = vrcp.f32 %v3232_v28  ;;  %v3231_v45 = vadd.f32 %v3230_v38, %v7503_v0  ;;  %v825_v0 = vrot.slane %v6482_v7, %v824_v23 }
0x1667   : > { %v5347_v2 = vpop.eup %5346 }
0x1668   : > { %v3234_v16 = vmul.f32 %v5347_v2, %v3232_v28 }
0x166a   : > { %v3235_v43 = vsub.f32 2.0, %v3234_v16 }
0x166c   : > { %v3236_v58 = vmul.f32 %v5347_v2, %v3235_v43 }
0x166e   : > { %v7684_v15 = vmul.f32 %v3236_v58, %v3231_v45 }
0x1670   : > { %v3244_v13 = vrot.slane %v7684_v15, %v6480_v6  ;;  %v3238_v40 = vmul.f32 %v7689_v60, %v7684_v15 }
0x1672   : > { %3250 = vbcast.lane.b32.xlu0 %v3244_v13, 264  ;;  %v3239_v27 = vadd.f32 %v7693_v18, %v3238_v40  ;;  %3246 = vbcast.lane.b32.xlu1 %v3244_v13, 256 }
0x1674   : > { %3240 = vst.msk [vmem:[%s6733_s2 + $0x4] sm:$0x1] %vm1451_vm1, %v3239_v27 }
0x1676   : > { %827 = vbcast.lane.b32.xlu0 %v825_v0, 256  ;;  %3254 = vbcast.lane.b32.xlu1 %v3244_v13, 272 }
0x167a   : > { %3258 = vbcast.lane.b32.xlu1 %v3244_v13, 280 }
0x16e4   : > { %v3251_v63 = vpop.permute.xlu0 %3250  ;;  %v3247_v9 = vpop.permute.xlu1 %3246 }
0x16e5   : > { %v3261_v17 = vmul.f32 %v7594_v20, %v3251_v63  ;;  %v3260_v33 = vmul.f32 %v7597_v44, %v3247_v9 }
0x16e7   : > { %v3265_v48 = vsub.f32 %v3261_v17, %v7600_v54  ;;  %v3264_v26 = vsub.f32 %v3260_v33, %v7603_v21 }
0x16e8   : > { %v828_v46 = vpop.permute.xlu0 %827  ;;  %v3255_v52 = vpop.permute.xlu1 %3254 }
0x16e9   : > { %5348 = vtanh.f32 %v3265_v48  ;;  %v848_v31 = vmul.f32 %v7455_v24, %v828_v46  ;;  %v3262_v57 = vmul.f32 %v7609_v22, %v3255_v52 }
0x16ea   : > { %5350 = vtanh.f32 %v3264_v26 }
0x16eb   : > { %v856_v53 = vsub.f32 %v848_v31, %v7462_v12  ;;  %v3266_v29 = vsub.f32 %v3262_v57, %v7615_v42 }
0x16ec   : > { %v3259_v51 = vpop.permute.xlu1 %3258 }
0x16ed   : > { %5352 = vtanh.f32 %v856_v53  ;;  %v3263_v56 = vmul.f32 %v7606_v35, %v3259_v51 }
0x16ee   : > { %5354 = vtanh.f32 %v3266_v29 }
0x16ef   : > { %v3267_v34 = vsub.f32 %v3263_v56, %v7612_v19 }
0x16f1   : > { %5356 = vtanh.f32 %v3267_v34 }
0x16f6   : > { %v5349_v11 = vpop.eup %5348 }
0x16f7   : > { %v5351_v59 = vpop.eup %5350  ;;  %v3290_v8 = vmul.f32 %v7621_v25, %v5349_v11  ;;  %v3273_v47 = vmul.f32 %v7618_v39, %v5349_v11 }
0x16f8   : > { %v3289_v24 = vmul.f32 %v7627_v3, %v5351_v59  ;;  %v3272_v12 = vmul.f32 %v7624_v50, %v5351_v59 }
0x16f9   : > { %v3294_v32 = vsel %vm875_vm0, %v3290_v8, 0.0  ;;  %v3277_v16 = vsel %vm875_vm0, %v3273_v47, 0.0 }
0x16fa   : > { %v5353_v28 = vpop.eup %5352  ;;  %v3293_v61 = vsel %vm875_vm0, %v3289_v24, 0.0  ;;  %v3276_v43 = vsel %vm875_vm0, %v3272_v12, 0.0 }
0x16fb   : > { %v5355_v14 = vpop.eup %5354  ;;  %v951_v55 = vmul.f32 %v7474_v5, %v5353_v28  ;;  %v3295_v23 = vadd.f32 %v3294_v32, %v3293_v61  ;;  %v3278_v63 = vadd.f32 %v3277_v16, %v3276_v43  ;;  %v872_v31 = vmul.f32 %v7488_v30, %v5353_v28 }
0x16fc   : > { %v3274_v2 = vmul.f32 %v7637_v49, %v5355_v14  ;;  %v3291_v38 = vmul.f32 %v7640_v10, %v5355_v14 }
0x16fd   : > { %v989_v45 = vsel %vm875_vm0, %v951_v55, 0.0  ;;  %v911_v34 = vsel %vm875_vm0, %v872_v31, 0.0 }
0x16fe   : > { %v5357_v58 = vpop.eup %5356  ;;  %v990_v13 = vrot.slane %v989_v45, 4  ;;  %v3296_v40 = vsel %vm875_vm0, %v3291_v38, 0.0  ;;  %v3279_v27 = vsel %vm875_vm0, %v3274_v2, 0.0  ;;  %v912_v8 = vrot.slane %v911_v34, 4 }
0x16ff   : > { %v3275_v0 = vmul.f32 %v7643_v4, %v5357_v58  ;;  %v3292_v5 = vmul.f32 %v7634_v36, %v5357_v58  ;;  %v3297_v17 = vadd.f32 %v3296_v40, %v3295_v23  ;;  %v3280_v46 = vadd.f32 %v3279_v27, %v3278_v63 }
0x1700   : > { %v991_v9 = vadd.f32 %v990_v13, %v989_v45  ;;  %v913_v32 = vadd.f32 %v912_v8, %v911_v34  ;;  %v3306_v13 = vmul.f32 %v7651_v41, %v7684_v15 }
0x1701   : > { %v3281_v33 = vsel %vm875_vm0, %v3275_v0, 0.0  ;;  %v3298_v48 = vsel %vm875_vm0, %v3292_v5, 0.0 }
0x1702   : > { %v992_v26 = vrot.slane %v991_v9, 2  ;;  %v3299_v52 = vadd.f32 %v3298_v48, %v3297_v17  ;;  %v3282_v53 = vadd.f32 %v3281_v33, %v3280_v46  ;;  %v914_v2 = vrot.slane %v913_v32, 2 }
0x1704   : > { %v993_v57 = vadd.f32 %v992_v26, %v991_v9  ;;  %v3300_v29 = vrot.slane %v3299_v52, 4  ;;  %v3283_v11 = vrot.slane %v3282_v53, 4  ;;  %v915_v16 = vadd.f32 %v914_v2, %v913_v32 }
0x1706   : > { %v994_v51 = vrot.slane %v993_v57, 1  ;;  %v3301_v56 = vadd.f32 %v3300_v29, %v3299_v52  ;;  %v3284_v12 = vadd.f32 %v3283_v11, %v3282_v53  ;;  %v916_v45 = vrot.slane %v915_v16, 1 }
0x1708   : > { %v3302_v59 = vrot.slane %v3301_v56, 2  ;;  %v995_v24 = vadd.f32 %v994_v51, %v993_v57  ;;  %v3285_v30 = vrot.slane %v3284_v12, 2  ;;  %v917_v23 = vadd.f32 %v916_v45, %v915_v16 }
0x170a   : > { %v3303_v47 = vadd.f32 %v3302_v59, %v3301_v56  ;;  %v7730_v61 = vadd.f32 %v7492_v62, %v995_v24  ;;  %v3286_v38 = vadd.f32 %v3285_v30, %v3284_v12  ;;  %v7736_v62 = vadd.f32 %v7500_v37, %v917_v23 }
0x170c   : > { %v3304_v14 = vrot.slane %v3303_v47, 1  ;;  %v3287_v43 = vrot.slane %v3286_v38, 1 }
0x170e   : > { %v3305_v55 = vadd.f32 %v3304_v14, %v3303_v47  ;;  %v3288_v58 = vadd.f32 %v3287_v43, %v3286_v38 }
0x1710   : > { %v3309_v28 = vadd.f32 %v3305_v55, %v7730_v61  ;;  %v3307_v27 = vadd.f32 %v3306_v13, %v3288_v58 }
0x1712   : > { %5358 = vrcp.f32 %v3309_v28  ;;  %v3308_v63 = vadd.f32 %v3307_v27, %v7736_v62 }
0x171f   : > { %v5359_v40 = vpop.eup %5358 }
0x1720   : > { %v3311_v0 = vmul.f32 %v5359_v40, %v3309_v28 }
0x1722   : > { %v3312_v5 = vsub.f32 2.0, %v3311_v0 }
0x1724   : > { %v3313_v9 = vmul.f32 %v5359_v40, %v3312_v5 }
0x1726   : > { %v3314_v17 = vmul.f32 %v3313_v9, %v3308_v63 }
0x1728   : > { %v3318_v33 = vrot.slane %v3314_v17, %v6480_v6 }
0x172a   : > { %3324 = vbcast.lane.b32.xlu1 %v3318_v33, 264  ;;  %3320 = vbcast.lane.b32.xlu0 %v3318_v33, 256 }
0x172e   : > { %3332 = vbcast.lane.b32.xlu1 %v3318_v33, 280  ;;  %3328 = vbcast.lane.b32.xlu0 %v3318_v33, 272 }
0x179c   : > { %v3325_v48 = vpop.permute.xlu1 %3324  ;;  %v3321_v26 = vpop.permute.xlu0 %3320 }
0x179d   : > { %v3335_v15 = vmul.f32 %v7594_v20, %v3325_v48  ;;  %v3334_v46 = vmul.f32 %v7597_v44, %v3321_v26 }
0x179f   : > { %v3339_v37 = vsub.f32 %v3335_v15, %v7600_v54  ;;  %v3338_v52 = vsub.f32 %v3334_v46, %v7603_v21 }
0x17a0   : > { %v3333_v31 = vpop.permute.xlu1 %3332  ;;  %v3329_v57 = vpop.permute.xlu0 %3328 }
0x17a1   : > { %5360 = vtanh.f32 %v3339_v37  ;;  %v3337_v53 = vmul.f32 %v7606_v35, %v3333_v31  ;;  %v3336_v29 = vmul.f32 %v7609_v22, %v3329_v57 }
0x17a2   : > { %5362 = vtanh.f32 %v3338_v52 }
0x17a3   : > { %v3341_v51 = vsub.f32 %v3337_v53, %v7612_v19  ;;  %v3340_v56 = vsub.f32 %v3336_v29, %v7615_v42 }
0x17a5   : > { %5364 = vtanh.f32 %v3341_v51 }
0x17a6   : > { %5366 = vtanh.f32 %v3340_v56 }
0x17ae   : > { %v5361_v34 = vpop.eup %5360 }
0x17af   : > { %v5363_v11 = vpop.eup %5362  ;;  %v3347_v59 = vmul.f32 %v7618_v39, %v5361_v34  ;;  %v3364_v8 = vmul.f32 %v7621_v25, %v5361_v34  ;;  %v3380_v34 = vmul.f32 %v7651_v41, %v3314_v17 }
0x17b0   : > { %v3346_v24 = vmul.f32 %v7624_v50, %v5363_v11  ;;  %v3363_v47 = vmul.f32 %v7627_v3, %v5363_v11 }
0x17b1   : > { %v3351_v14 = vsel %vm875_vm0, %v3347_v59, 0.0  ;;  %v3368_v32 = vsel %vm875_vm0, %v3364_v8, 0.0 }
0x17b2   : > { %v5365_v12 = vpop.eup %5364  ;;  %v3350_v55 = vsel %vm875_vm0, %v3346_v24, 0.0  ;;  %v3367_v30 = vsel %vm875_vm0, %v3363_v47, 0.0 }
0x17b3   : > { %v5367_v28 = vpop.eup %5366  ;;  %v3366_v2 = vmul.f32 %v7634_v36, %v5365_v12  ;;  %v3352_v43 = vadd.f32 %v3351_v14, %v3350_v55  ;;  %v3369_v45 = vadd.f32 %v3368_v32, %v3367_v30  ;;  %v3349_v58 = vmul.f32 %v7643_v4, %v5365_v12 }
0x17b4   : > { %v3348_v38 = vmul.f32 %v7637_v49, %v5367_v28  ;;  %v3365_v16 = vmul.f32 %v7640_v10, %v5367_v28 }
0x17b5   : > { %v3372_v0 = vsel %vm875_vm0, %v3366_v2, 0.0  ;;  %v3355_v63 = vsel %vm875_vm0, %v3349_v58, 0.0 }
0x17b6   : > { %v3353_v23 = vsel %vm875_vm0, %v3348_v38, 0.0  ;;  %v3370_v13 = vsel %vm875_vm0, %v3365_v16, 0.0 }
0x17b7   : > { %v3354_v40 = vadd.f32 %v3353_v23, %v3352_v43  ;;  %v3371_v27 = vadd.f32 %v3370_v13, %v3369_v45 }
0x17b9   : > { %v3373_v5 = vadd.f32 %v3372_v0, %v3371_v27  ;;  %v3356_v9 = vadd.f32 %v3355_v63, %v3354_v40 }
0x17bb   : > { %v3374_v33 = vrot.slane %v3373_v5, 4  ;;  %v3357_v26 = vrot.slane %v3356_v9, 4 }
0x17bd   : > { %v3375_v48 = vadd.f32 %v3374_v33, %v3373_v5  ;;  %v3358_v37 = vadd.f32 %v3357_v26, %v3356_v9 }
0x17bf   : > { %v3376_v15 = vrot.slane %v3375_v48, 2  ;;  %v3359_v57 = vrot.slane %v3358_v37, 2 }
0x17c1   : > { %v3377_v46 = vadd.f32 %v3376_v15, %v3375_v48  ;;  %v3360_v29 = vadd.f32 %v3359_v57, %v3358_v37 }
0x17c3   : > { %v3378_v52 = vrot.slane %v3377_v46, 1  ;;  %v3361_v51 = vrot.slane %v3360_v29, 1 }
0x17c5   : > { %v3379_v31 = vadd.f32 %v3378_v52, %v3377_v46  ;;  %v3362_v56 = vadd.f32 %v3361_v51, %v3360_v29 }
0x17c7   : > { %v3383_v53 = vadd.f32 %v3379_v31, %v7730_v61  ;;  %v3381_v59 = vadd.f32 %v3380_v34, %v3362_v56 }
0x17c9   : > { %5368 = vrcp.f32 %v3383_v53  ;;  %v3382_v47 = vadd.f32 %v3381_v59, %v7736_v62 }
0x17d6   : > { %v5369_v11 = vpop.eup %5368 }
0x17d7   : > { %v3385_v8 = vmul.f32 %v5369_v11, %v3383_v53 }
0x17d9   : > { %v3386_v24 = vsub.f32 2.0, %v3385_v8 }
0x17db   : > { %v3387_v12 = vmul.f32 %v5369_v11, %v3386_v24 }
0x17dd   : > { %v3388_v14 = vmul.f32 %v3387_v12, %v3382_v47 }
0x17df   : > { %v3392_v32 = vrot.slane %v3388_v14, %v6480_v6 }
0x17e1   : > { %3398 = vbcast.lane.b32.xlu1 %v3392_v32, 264  ;;  %3394 = vbcast.lane.b32.xlu0 %v3392_v32, 256 }
0x17e5   : > { %3406 = vbcast.lane.b32.xlu1 %v3392_v32, 280  ;;  %3402 = vbcast.lane.b32.xlu0 %v3392_v32, 272 }
0x1853   : > { %v3399_v55 = vpop.permute.xlu1 %3398  ;;  %v3395_v30 = vpop.permute.xlu0 %3394 }
0x1854   : > { %v3409_v28 = vmul.f32 %v7594_v20, %v3399_v55  ;;  %v3408_v17 = vmul.f32 %v7597_v44, %v3395_v30 }
0x1856   : > { %v3413_v2 = vsub.f32 %v3409_v28, %v7600_v54  ;;  %v3412_v38 = vsub.f32 %v3408_v17, %v7603_v21 }
0x1857   : > { %v3407_v16 = vpop.permute.xlu1 %3406  ;;  %v3403_v43 = vpop.permute.xlu0 %3402 }
0x1858   : > { %5370 = vtanh.f32 %v3413_v2  ;;  %v3411_v45 = vmul.f32 %v7606_v35, %v3407_v16  ;;  %v3410_v58 = vmul.f32 %v7609_v22, %v3403_v43 }
0x1859   : > { %5372 = vtanh.f32 %v3412_v38 }
0x185a   : > { %v3415_v23 = vsub.f32 %v3411_v45, %v7612_v19  ;;  %v3414_v13 = vsub.f32 %v3410_v58, %v7615_v42 }
0x185c   : > { %5374 = vtanh.f32 %v3415_v23 }
0x185d   : > { %5376 = vtanh.f32 %v3414_v13 }
0x1865   : > { %v5371_v40 = vpop.eup %5370 }
0x1866   : > { %v5373_v27 = vpop.eup %5372  ;;  %v3421_v0 = vmul.f32 %v7618_v39, %v5371_v40  ;;  %v3438_v5 = vmul.f32 %v7621_v25, %v5371_v40  ;;  %v3454_v40 = vmul.f32 %v7651_v41, %v3388_v14 }
0x1867   : > { %v3420_v63 = vmul.f32 %v7624_v50, %v5373_v27  ;;  %v3437_v9 = vmul.f32 %v7627_v3, %v5373_v27 }
0x1868   : > { %v3425_v48 = vsel %vm875_vm0, %v3421_v0, 0.0  ;;  %v3442_v26 = vsel %vm875_vm0, %v3438_v5, 0.0 }
0x1869   : > { %v5375_v33 = vpop.eup %5374  ;;  %v3424_v15 = vsel %vm875_vm0, %v3420_v63, 0.0  ;;  %v3441_v46 = vsel %vm875_vm0, %v3437_v9, 0.0 }
0x186a   : > { %v5377_v37 = vpop.eup %5376  ;;  %v3440_v52 = vmul.f32 %v7634_v36, %v5375_v33  ;;  %v3426_v53 = vadd.f32 %v3425_v48, %v3424_v15  ;;  %v3443_v29 = vadd.f32 %v3442_v26, %v3441_v46  ;;  %v3423_v51 = vmul.f32 %v7643_v4, %v5375_v33 }
0x186b   : > { %v3422_v31 = vmul.f32 %v7637_v49, %v5377_v37  ;;  %v3439_v57 = vmul.f32 %v7640_v10, %v5377_v37 }
0x186c   : > { %v3446_v8 = vsel %vm875_vm0, %v3440_v52, 0.0  ;;  %v3429_v47 = vsel %vm875_vm0, %v3423_v51, 0.0 }
0x186d   : > { %v3427_v56 = vsel %vm875_vm0, %v3422_v31, 0.0  ;;  %v3444_v34 = vsel %vm875_vm0, %v3439_v57, 0.0 }
0x186e   : > { %v3428_v11 = vadd.f32 %v3427_v56, %v3426_v53  ;;  %v3445_v59 = vadd.f32 %v3444_v34, %v3443_v29 }
0x1870   : > { %v3447_v24 = vadd.f32 %v3446_v8, %v3445_v59  ;;  %v3430_v12 = vadd.f32 %v3429_v47, %v3428_v11 }
0x1872   : > { %v3448_v32 = vrot.slane %v3447_v24, 4  ;;  %v3431_v30 = vrot.slane %v3430_v12, 4 }
0x1874   : > { %v3449_v55 = vadd.f32 %v3448_v32, %v3447_v24  ;;  %v3432_v2 = vadd.f32 %v3431_v30, %v3430_v12 }
0x1876   : > { %v3450_v28 = vrot.slane %v3449_v55, 2  ;;  %v3433_v43 = vrot.slane %v3432_v2, 2 }
0x1878   : > { %v3451_v17 = vadd.f32 %v3450_v28, %v3449_v55  ;;  %v3434_v58 = vadd.f32 %v3433_v43, %v3432_v2 }
0x187a   : > { %v3452_v38 = vrot.slane %v3451_v17, 1  ;;  %v3435_v23 = vrot.slane %v3434_v58, 1 }
0x187c   : > { %v3453_v16 = vadd.f32 %v3452_v38, %v3451_v17  ;;  %v3436_v13 = vadd.f32 %v3435_v23, %v3434_v58 }
0x187e   : > { %v3457_v45 = vadd.f32 %v3453_v16, %v7730_v61  ;;  %v3455_v0 = vadd.f32 %v3454_v40, %v3436_v13 }
0x1880   : > { %5378 = vrcp.f32 %v3457_v45  ;;  %v3456_v9 = vadd.f32 %v3455_v0, %v7736_v62 }
0x188d   : > { %v5379_v27 = vpop.eup %5378 }
0x188e   : > { %v3459_v5 = vmul.f32 %v5379_v27, %v3457_v45 }
0x1890   : > { %v3460_v63 = vsub.f32 2.0, %v3459_v5 }
0x1892   : > { %v3461_v33 = vmul.f32 %v5379_v27, %v3460_v63 }
0x1894   : > { %v3462_v48 = vmul.f32 %v3461_v33, %v3456_v9 }
0x1896   : > { %v3466_v26 = vrot.slane %v3462_v48, %v6480_v6 }
0x1898   : > { %3472 = vbcast.lane.b32.xlu1 %v3466_v26, 264  ;;  %3468 = vbcast.lane.b32.xlu0 %v3466_v26, 256 }
0x189c   : > { %3480 = vbcast.lane.b32.xlu1 %v3466_v26, 280  ;;  %3476 = vbcast.lane.b32.xlu0 %v3466_v26, 272 }
0x190a   : > { %v3473_v15 = vpop.permute.xlu1 %3472  ;;  %v3469_v46 = vpop.permute.xlu0 %3468 }
0x190b   : > { %v3483_v37 = vmul.f32 %v7594_v20, %v3473_v15  ;;  %v3482_v14 = vmul.f32 %v7597_v44, %v3469_v46 }
0x190d   : > { %v3487_v52 = vsub.f32 %v3483_v37, %v7600_v54  ;;  %v3486_v31 = vsub.f32 %v3482_v14, %v7603_v21 }
0x190e   : > { %v3481_v57 = vpop.permute.xlu1 %3480  ;;  %v3477_v53 = vpop.permute.xlu0 %3476 }
0x190f   : > { %5380 = vtanh.f32 %v3487_v52  ;;  %v3485_v29 = vmul.f32 %v7606_v35, %v3481_v57  ;;  %v3484_v51 = vmul.f32 %v7609_v22, %v3477_v53 }
0x1910   : > { %5382 = vtanh.f32 %v3486_v31 }
0x1911   : > { %v3489_v56 = vsub.f32 %v3485_v29, %v7612_v19  ;;  %v3488_v34 = vsub.f32 %v3484_v51, %v7615_v42 }
0x1913   : > { %5384 = vtanh.f32 %v3489_v56 }
0x1914   : > { %5386 = vtanh.f32 %v3488_v34 }
0x191c   : > { %v5381_v11 = vpop.eup %5380 }
0x191d   : > { %v5383_v59 = vpop.eup %5382  ;;  %v3495_v8 = vmul.f32 %v7618_v39, %v5381_v11  ;;  %v3512_v24 = vmul.f32 %v7621_v25, %v5381_v11  ;;  %v3528_v11 = vmul.f32 %v7651_v41, %v3462_v48 }
0x191e   : > { %v3494_v47 = vmul.f32 %v7624_v50, %v5383_v59  ;;  %v3511_v12 = vmul.f32 %v7627_v3, %v5383_v59 }
0x191f   : > { %v3499_v55 = vsel %vm875_vm0, %v3495_v8, 0.0  ;;  %v3516_v30 = vsel %vm875_vm0, %v3512_v24, 0.0 }
0x1920   : > { %v5385_v32 = vpop.eup %5384  ;;  %v3498_v28 = vsel %vm875_vm0, %v3494_v47, 0.0  ;;  %v3515_v17 = vsel %vm875_vm0, %v3511_v12, 0.0 }
0x1921   : > { %v5387_v2 = vpop.eup %5386  ;;  %v3514_v38 = vmul.f32 %v7634_v36, %v5385_v32  ;;  %v3500_v45 = vadd.f32 %v3499_v55, %v3498_v28  ;;  %v3517_v58 = vadd.f32 %v3516_v30, %v3515_v17  ;;  %v3497_v23 = vmul.f32 %v7643_v4, %v5385_v32 }
0x1922   : > { %v3496_v16 = vmul.f32 %v7637_v49, %v5387_v2  ;;  %v3513_v43 = vmul.f32 %v7640_v10, %v5387_v2 }
0x1923   : > { %v3520_v5 = vsel %vm875_vm0, %v3514_v38, 0.0  ;;  %v3503_v9 = vsel %vm875_vm0, %v3497_v23, 0.0 }
0x1924   : > { %v3501_v13 = vsel %vm875_vm0, %v3496_v16, 0.0  ;;  %v3518_v40 = vsel %vm875_vm0, %v3513_v43, 0.0 }
0x1925   : > { %v3502_v27 = vadd.f32 %v3501_v13, %v3500_v45  ;;  %v3519_v0 = vadd.f32 %v3518_v40, %v3517_v58 }
0x1927   : > { %v3521_v63 = vadd.f32 %v3520_v5, %v3519_v0  ;;  %v3504_v33 = vadd.f32 %v3503_v9, %v3502_v27 }
0x1929   : > { %v3522_v26 = vrot.slane %v3521_v63, 4  ;;  %v3505_v46 = vrot.slane %v3504_v33, 4 }
0x192b   : > { %v3523_v15 = vadd.f32 %v3522_v26, %v3521_v63  ;;  %v3506_v52 = vadd.f32 %v3505_v46, %v3504_v33 }
0x192d   : > { %v3524_v37 = vrot.slane %v3523_v15, 2  ;;  %v3507_v53 = vrot.slane %v3506_v52, 2 }
0x192f   : > { %v3525_v14 = vadd.f32 %v3524_v37, %v3523_v15  ;;  %v3508_v51 = vadd.f32 %v3507_v53, %v3506_v52 }
0x1931   : > { %v3526_v31 = vrot.slane %v3525_v14, 1  ;;  %v3509_v56 = vrot.slane %v3508_v51, 1 }
0x1933   : > { %v3527_v57 = vadd.f32 %v3526_v31, %v3525_v14  ;;  %v3510_v34 = vadd.f32 %v3509_v56, %v3508_v51 }
0x1935   : > { %v3531_v29 = vadd.f32 %v3527_v57, %v7730_v61  ;;  %v3529_v8 = vadd.f32 %v3528_v11, %v3510_v34 }
0x1937   : > { %5388 = vrcp.f32 %v3531_v29  ;;  %v3530_v12 = vadd.f32 %v3529_v8, %v7736_v62 }
0x1944   : > { %v5389_v59 = vpop.eup %5388 }
0x1945   : > { %v3533_v24 = vmul.f32 %v5389_v59, %v3531_v29 }
0x1947   : > { %v3534_v47 = vsub.f32 2.0, %v3533_v24 }
0x1949   : > { %v3535_v32 = vmul.f32 %v5389_v59, %v3534_v47 }
0x194b   : > { %v3536_v55 = vmul.f32 %v3535_v32, %v3530_v12 }
0x194d   : > { %v3540_v30 = vrot.slane %v3536_v55, %v6480_v6  ;;  %v3602_v47 = vmul.f32 %v7651_v41, %v3536_v55  ;;  %v7858_v55 = vld [vmem:[#allocation11] sm:$0xff] }
0x194f   : > { %3546 = vbcast.lane.b32.xlu1 %v3540_v30, 264  ;;  %3542 = vbcast.lane.b32.xlu0 %v3540_v30, 256 }
0x1953   : > { %3554 = vbcast.lane.b32.xlu1 %v3540_v30, 280  ;;  %3550 = vbcast.lane.b32.xlu0 %v3540_v30, 272 }
0x19c1   : > { %v3547_v28 = vpop.permute.xlu1 %3546  ;;  %v3543_v17 = vpop.permute.xlu0 %3542 }
0x19c2   : > { %v3557_v2 = vmul.f32 %v7594_v20, %v3547_v28  ;;  %v3556_v48 = vmul.f32 %v7597_v44, %v3543_v17 }
0x19c4   : > { %v3561_v38 = vsub.f32 %v3557_v2, %v7600_v54  ;;  %v3560_v16 = vsub.f32 %v3556_v48, %v7603_v21 }
0x19c5   : > { %v3555_v43 = vpop.permute.xlu1 %3554  ;;  %v3551_v45 = vpop.permute.xlu0 %3550 }
0x19c6   : > { %5390 = vtanh.f32 %v3561_v38  ;;  %v3559_v58 = vmul.f32 %v7606_v35, %v3555_v43  ;;  %v3558_v23 = vmul.f32 %v7609_v22, %v3551_v45  ;;  %v7855_v45 = vld [vmem:[#allocation11 + $0x8] sm:$0xff] }
0x19c7   : > { %5392 = vtanh.f32 %v3560_v16 }
0x19c8   : > { %v3563_v13 = vsub.f32 %v3559_v58, %v7612_v19  ;;  %v3562_v40 = vsub.f32 %v3558_v23, %v7615_v42  ;;  %v7861_v23 = vld [vmem:[#allocation13 + $0x8] sm:$0xff] }
0x19ca   : > { %5394 = vtanh.f32 %v3563_v13 }
0x19cb   : > { %5396 = vtanh.f32 %v3562_v40  ;;  %v7864_v40 = vld [vmem:[#allocation13] sm:$0xff] }
0x19d3   : > { %v5391_v20 = vpop.eup %5390 }
0x19d4   : > { %v5393_v44 = vpop.eup %5392  ;;  %v3569_v54 = vmul.f32 %v7618_v39, %v5391_v20  ;;  %v3586_v21 = vmul.f32 %v7621_v25, %v5391_v20 }
0x19d5   : > { %v3568_v27 = vmul.f32 %v7624_v50, %v5393_v44  ;;  %v3585_v0 = vmul.f32 %v7627_v3, %v5393_v44 }
0x19d6   : > { %v3573_v22 = vsel %vm875_vm0, %v3569_v54, 0.0  ;;  %v3590_v5 = vsel %vm875_vm0, %v3586_v21, 0.0  ;;  %v7867_v21 = vld [vmem:[#allocation11 + $0x18] sm:$0xff] }
0x19d7   : > { %v5395_v35 = vpop.eup %5394  ;;  %v3572_v19 = vsel %vm875_vm0, %v3568_v27, 0.0  ;;  %v3589_v42 = vsel %vm875_vm0, %v3585_v0, 0.0  ;;  %v7870_v0 = vld [vmem:[#allocation11 + $0x10] sm:$0xff] }
0x19d8   : > { %v5397_v63 = vpop.eup %5396  ;;  %v3588_v9 = vmul.f32 %v7634_v36, %v5395_v35  ;;  %v3574_v33 = vadd.f32 %v3573_v22, %v3572_v19  ;;  %v3591_v50 = vadd.f32 %v3590_v5, %v3589_v42  ;;  %v3571_v3 = vmul.f32 %v7643_v4, %v5395_v35  ;;  %v7873_v22 = vld [vmem:[#allocation13 + $0x18] sm:$0xff]  ;;  %v7876_v19 = vld [vmem:[#allocation13 + $0x10] sm:$0xff] }
0x19d9   : > { %v3570_v39 = vmul.f32 %v7637_v49, %v5397_v63  ;;  %v3587_v25 = vmul.f32 %v7640_v10, %v5397_v63 }
0x19da   : > { %v3594_v14 = vsel %vm875_vm0, %v3588_v9, 0.0  ;;  %v3577_v31 = vsel %vm875_vm0, %v3571_v3, 0.0  ;;  %v7885_v3 = vld [vmem:[#allocation14] sm:$0xff] }
0x19db   : > { %v3575_v26 = vsel %vm875_vm0, %v3570_v39, 0.0  ;;  %v3592_v15 = vsel %vm875_vm0, %v3587_v25, 0.0  ;;  %v7879_v39 = vld [vmem:[#allocation14 + $0x8] sm:$0xff] }
0x19dc   : > { %v3576_v46 = vadd.f32 %v3575_v26, %v3574_v33  ;;  %v3593_v37 = vadd.f32 %v3592_v15, %v3591_v50  ;;  %v7882_v33 = vld [vmem:[#allocation16 + $0x8] sm:$0xff]  ;;  %v7888_v15 = vld [vmem:[#allocation16] sm:$0xff] }
0x19de   : > { %v3595_v52 = vadd.f32 %v3594_v14, %v3593_v37  ;;  %v3578_v36 = vadd.f32 %v3577_v31, %v3576_v46 }
0x19e0   : > { %v3596_v57 = vrot.slane %v3595_v52, 4  ;;  %v3579_v53 = vrot.slane %v3578_v36, 4 }
0x19e2   : > { %v3597_v49 = vadd.f32 %v3596_v57, %v3595_v52  ;;  %v3580_v51 = vadd.f32 %v3579_v53, %v3578_v36 }
0x19e4   : > { %v3598_v10 = vrot.slane %v3597_v49, 2  ;;  %v3581_v34 = vrot.slane %v3580_v51, 2 }
0x19e6   : > { %v3599_v29 = vadd.f32 %v3598_v10, %v3597_v49  ;;  %v3582_v59 = vadd.f32 %v3581_v34, %v3580_v51  ;;  %v7895_v49 = vld [vmem:[#allocation16 + $0x18] sm:$0xff]  ;;  %v7898_v10 = vld [vmem:[#allocation14 + $0x10] sm:$0xff] }
0x19e7   : > { %v7901_v51 = vld [vmem:[#allocation16 + $0x10] sm:$0xff] }
0x19e8   : > { %v3600_v56 = vrot.slane %v3599_v29, 1  ;;  %v3583_v8 = vrot.slane %v3582_v59, 1 }
0x19ea   : > { %v3601_v4 = vadd.f32 %v3600_v56, %v3599_v29  ;;  %v3584_v24 = vadd.f32 %v3583_v8, %v3582_v59 }
0x19ec   : > { %v3605_v11 = vadd.f32 %v3601_v4, %v7730_v61  ;;  %v3603_v32 = vadd.f32 %v3602_v47, %v3584_v24 }
0x19ee   : > { %5398 = vrcp.f32 %v3605_v11  ;;  %v3604_v17 = vadd.f32 %v3603_v32, %v7736_v62 }
0x19fb   : > { %v5399_v12 = vpop.eup %5398 }
0x19fc   : > { %v3607_v30 = vmul.f32 %v5399_v12, %v3605_v11  ;;  %v7904_v11 = vld [vmem:[#allocation14 + $0x18] sm:$0xff] }
0x19fe   : > { %v3608_v28 = vsub.f32 2.0, %v3607_v30 }
0x1a00   : > { %v3609_v2 = vmul.f32 %v5399_v12, %v3608_v28 }
0x1a02   : > { %v7851_v48 = vmul.f32 %v3609_v2, %v3604_v17 }
0x1a04   : > { %v3614_v38 = vrot.slane %v7851_v48, %v6480_v6 }
0x1a06   : > { %3620 = vbcast.lane.b32.xlu1 %v3614_v38, 264  ;;  %3616 = vbcast.lane.b32.xlu0 %v3614_v38, 256 }
0x1a0a   : > { %3628 = vbcast.lane.b32.xlu1 %v3614_v38, 280  ;;  %3624 = vbcast.lane.b32.xlu0 %v3614_v38, 272 }
0x1a78   : > { %v3621_v16 = vpop.permute.xlu1 %3620  ;;  %v3617_v43 = vpop.permute.xlu0 %3616 }
0x1a79   : > { %v3631_v41 = vmul.f32 %v7855_v45, %v3621_v16  ;;  %v3630_v58 = vmul.f32 %v7858_v55, %v3617_v43 }
0x1a7b   : > { %v3635_v13 = vsub.f32 %v3631_v41, %v7861_v23  ;;  %v3634_v20 = vsub.f32 %v3630_v58, %v7864_v40 }
0x1a7c   : > { %v3629_v44 = vpop.permute.xlu1 %3628  ;;  %v3625_v54 = vpop.permute.xlu0 %3624 }
0x1a7d   : > { %5400 = vtanh.f32 %v3635_v13  ;;  %v3633_v27 = vmul.f32 %v7867_v21, %v3629_v44  ;;  %v3632_v35 = vmul.f32 %v7870_v0, %v3625_v54 }
0x1a7e   : > { %5402 = vtanh.f32 %v3634_v20 }
0x1a7f   : > { %v3637_v5 = vsub.f32 %v3633_v27, %v7873_v22  ;;  %v3636_v42 = vsub.f32 %v3632_v35, %v7876_v19 }
0x1a81   : > { %5404 = vtanh.f32 %v3637_v5 }
0x1a82   : > { %5406 = vtanh.f32 %v3636_v42  ;;  %v7912_v42 = vld [vmem:[#allocation20] sm:$0x1] }
0x1a8a   : > { %v5401_v63 = vpop.eup %5400 }
0x1a8b   : > { %v5403_v9 = vpop.eup %5402  ;;  %v3643_v25 = vmul.f32 %v7879_v39, %v5401_v63  ;;  %v3660_v50 = vmul.f32 %v7882_v33, %v5401_v63  ;;  %v3676_v63 = vmul.f32 %v7912_v42, %v7851_v48 }
0x1a8c   : > { %v3642_v26 = vmul.f32 %v7885_v3, %v5403_v9  ;;  %v3659_v46 = vmul.f32 %v7888_v15, %v5403_v9 }
0x1a8d   : > { %v3647_v14 = vsel %vm875_vm0, %v3643_v25, 0.0  ;;  %v3664_v52 = vsel %vm875_vm0, %v3660_v50, 0.0 }
0x1a8e   : > { %v5405_v37 = vpop.eup %5404  ;;  %v3646_v31 = vsel %vm875_vm0, %v3642_v26, 0.0  ;;  %v3663_v36 = vsel %vm875_vm0, %v3659_v46, 0.0 }
0x1a8f   : > { %v5407_v57 = vpop.eup %5406  ;;  %v3662_v53 = vmul.f32 %v7895_v49, %v5405_v37  ;;  %v3648_v4 = vadd.f32 %v3647_v14, %v3646_v31  ;;  %v3665_v34 = vadd.f32 %v3664_v52, %v3663_v36  ;;  %v3645_v59 = vmul.f32 %v7904_v11, %v5405_v37 }
0x1a90   : > { %v3644_v29 = vmul.f32 %v7898_v10, %v5407_v57  ;;  %v3661_v56 = vmul.f32 %v7901_v51, %v5407_v57 }
0x1a91   : > { %v3668_v32 = vsel %vm875_vm0, %v3662_v53, 0.0  ;;  %v3651_v28 = vsel %vm875_vm0, %v3645_v59, 0.0 }
0x1a92   : > { %v3649_v8 = vsel %vm875_vm0, %v3644_v29, 0.0  ;;  %v3666_v24 = vsel %vm875_vm0, %v3661_v56, 0.0 }
0x1a93   : > { %v3650_v47 = vadd.f32 %v3649_v8, %v3648_v4  ;;  %v3667_v12 = vadd.f32 %v3666_v24, %v3665_v34  ;;  %v7935_v34 = vld [vmem:[%s8404_s3] sm:$0xff] }
0x1a94   : > { %v7942_v24 = vld [vmem:[%s8405_s4] sm:$0xff] }
0x1a95   : > { %v3669_v30 = vadd.f32 %v3668_v32, %v3667_v12  ;;  %v3652_v17 = vadd.f32 %v3651_v28, %v3650_v47 }
0x1a97   : > { %v3670_v2 = vrot.slane %v3669_v30, 4  ;;  %v3653_v16 = vrot.slane %v3652_v17, 4 }
0x1a99   : > { %v3671_v38 = vadd.f32 %v3670_v2, %v3669_v30  ;;  %v3654_v58 = vadd.f32 %v3653_v16, %v3652_v17 }
0x1a9b   : > { %v3672_v43 = vrot.slane %v3671_v38, 2  ;;  %v3655_v44 = vrot.slane %v3654_v58, 2 }
0x1a9d   : > { %v3673_v41 = vadd.f32 %v3672_v43, %v3671_v38  ;;  %v3656_v27 = vadd.f32 %v3655_v44, %v3654_v58 }
0x1a9f   : > { %v3674_v13 = vrot.slane %v3673_v41, 1  ;;  %v3657_v35 = vrot.slane %v3656_v27, 1 }
0x1aa1   : > { %v3675_v20 = vadd.f32 %v3674_v13, %v3673_v41  ;;  %v3658_v5 = vadd.f32 %v3657_v35, %v3656_v27 }
0x1aa3   : > { %v3679_v54 = vadd.f32 %v3675_v20, %v7730_v61  ;;  %v3677_v25 = vadd.f32 %v3676_v63, %v3658_v5  ;;  %v831_v61 = vsub.s32 6, %v6477_v1 }
0x1aa5   : > { %5408 = vrcp.f32 %v3679_v54  ;;  %v3678_v46 = vadd.f32 %v3677_v25, %v7736_v62  ;;  %v832_v36 = vrot.slane %v6482_v7, %v831_v61 }
0x1ab2   : > { %v5409_v9 = vpop.eup %5408 }
0x1ab3   : > { %v3681_v50 = vmul.f32 %v5409_v9, %v3679_v54  ;;  %v7954_v54 = vld [vmem:[#allocation10] sm:$0xff] }
0x1ab5   : > { %v3682_v26 = vsub.f32 2.0, %v3681_v50 }
0x1ab7   : > { %v3683_v37 = vmul.f32 %v5409_v9, %v3682_v26 }
0x1ab9   : > { %v7917_v14 = vmul.f32 %v3683_v37, %v3678_v46 }
0x1abb   : > { %v3691_v52 = vrot.slane %v7917_v14, %v6480_v6  ;;  %v3685_v31 = vmul.f32 %v7689_v60, %v7917_v14 }
0x1abd   : > { %3697 = vbcast.lane.b32.xlu1 %v3691_v52, 264  ;;  %v3686_v48 = vadd.f32 %v7693_v18, %v3685_v31  ;;  %3693 = vbcast.lane.b32.xlu0 %v3691_v52, 256 }
0x1abf   : > { %3687 = vst.msk [vmem:[%s6733_s2 + $0x5] sm:$0x1] %vm1451_vm1, %v3686_v48 }
0x1ac1   : > { %834 = vbcast.lane.b32.xlu1 %v832_v36, 256  ;;  %3701 = vbcast.lane.b32.xlu0 %v3691_v52, 272 }
0x1ac5   : > { %3705 = vbcast.lane.b32.xlu0 %v3691_v52, 280 }
0x1b2f   : > { %v3698_v62 = vpop.permute.xlu1 %3697  ;;  %v3694_v57 = vpop.permute.xlu0 %3693 }
0x1b30   : > { %v3708_v53 = vmul.f32 %v7855_v45, %v3698_v62  ;;  %v3707_v29 = vmul.f32 %v7858_v55, %v3694_v57 }
0x1b32   : > { %v3712_v56 = vsub.f32 %v3708_v53, %v7861_v23  ;;  %v3711_v60 = vsub.f32 %v3707_v29, %v7864_v40 }
0x1b33   : > { %v835_v4 = vpop.permute.xlu1 %834  ;;  %v3702_v18 = vpop.permute.xlu0 %3701 }
0x1b34   : > { %5410 = vtanh.f32 %v3712_v56  ;;  %v849_v59 = vmul.f32 %v7935_v34, %v835_v4  ;;  %v3709_v8 = vmul.f32 %v7870_v0, %v3702_v18  ;;  %v7968_v4 = vld [vmem:[#allocation8] sm:$0xff] }
0x1b35   : > { %5412 = vtanh.f32 %v3711_v60 }
0x1b36   : > { %v857_v47 = vsub.f32 %v849_v59, %v7942_v24  ;;  %v3713_v12 = vsub.f32 %v3709_v8, %v7876_v19 }
0x1b37   : > { %v3706_v32 = vpop.permute.xlu0 %3705 }
0x1b38   : > { %5414 = vtanh.f32 %v857_v47  ;;  %v3710_v30 = vmul.f32 %v7867_v21, %v3706_v32 }
0x1b39   : > { %5416 = vtanh.f32 %v3713_v12 }
0x1b3a   : > { %v3714_v28 = vsub.f32 %v3710_v30, %v7873_v22 }
0x1b3c   : > { %5418 = vtanh.f32 %v3714_v28 }
0x1b41   : > { %v5411_v17 = vpop.eup %5410 }
0x1b42   : > { %v5413_v2 = vpop.eup %5412  ;;  %v3737_v38 = vmul.f32 %v7882_v33, %v5411_v17  ;;  %v3720_v43 = vmul.f32 %v7879_v39, %v5411_v17 }
0x1b43   : > { %v3736_v16 = vmul.f32 %v7888_v15, %v5413_v2  ;;  %v3719_v41 = vmul.f32 %v7885_v3, %v5413_v2 }
0x1b44   : > { %v3741_v20 = vsel %vm875_vm0, %v3737_v38, 0.0  ;;  %v3724_v63 = vsel %vm875_vm0, %v3720_v43, 0.0 }
0x1b45   : > { %v5415_v58 = vpop.eup %5414  ;;  %v3740_v44 = vsel %vm875_vm0, %v3736_v16, 0.0  ;;  %v3723_v9 = vsel %vm875_vm0, %v3719_v41, 0.0 }
0x1b46   : > { %v5417_v13 = vpop.eup %5416  ;;  %v952_v27 = vmul.f32 %v7954_v54, %v5415_v58  ;;  %v3742_v26 = vadd.f32 %v3741_v20, %v3740_v44  ;;  %v3725_v48 = vadd.f32 %v3724_v63, %v3723_v9  ;;  %v873_v18 = vmul.f32 %v7968_v4, %v5415_v58  ;;  %v7972_v20 = vld [vmem:[#allocation19] ss:$0 sm:$0xff] }
0x1b47   : > { %v3721_v35 = vmul.f32 %v7898_v10, %v5417_v13  ;;  %v3738_v5 = vmul.f32 %v7901_v51, %v5417_v13 }
0x1b48   : > { %v996_v25 = vsel %vm875_vm0, %v952_v27, 0.0  ;;  %v918_v30 = vsel %vm875_vm0, %v873_v18, 0.0 }
0x1b49   : > { %v5419_v50 = vpop.eup %5418  ;;  %v997_v46 = vrot.slane %v996_v25, 4  ;;  %v3743_v37 = vsel %vm875_vm0, %v3738_v5, 0.0  ;;  %v3726_v61 = vsel %vm875_vm0, %v3721_v35, 0.0  ;;  %v919_v2 = vrot.slane %v918_v30, 4 }
0x1b4a   : > { %v3722_v52 = vmul.f32 %v7904_v11, %v5419_v50  ;;  %v3739_v31 = vmul.f32 %v7895_v49, %v5419_v50  ;;  %v3744_v62 = vadd.f32 %v3743_v37, %v3742_v26  ;;  %v3727_v56 = vadd.f32 %v3726_v61, %v3725_v48  ;;  %v7980_v48 = vld [vmem:[#allocation17] ss:$0 sm:$0xff] }
0x1b4b   : > { %v998_v36 = vadd.f32 %v997_v46, %v996_v25  ;;  %v920_v13 = vadd.f32 %v919_v2, %v918_v30  ;;  %v3753_v37 = vmul.f32 %v7912_v42, %v7917_v14 }
0x1b4c   : > { %v3728_v57 = vsel %vm875_vm0, %v3722_v52, 0.0  ;;  %v3745_v53 = vsel %vm875_vm0, %v3739_v31, 0.0 }
0x1b4d   : > { %v999_v29 = vrot.slane %v998_v36, 2  ;;  %v3746_v60 = vadd.f32 %v3745_v53, %v3744_v62  ;;  %v3729_v8 = vadd.f32 %v3728_v57, %v3727_v56  ;;  %v921_v5 = vrot.slane %v920_v13, 2 }
0x1b4f   : > { %v1000_v59 = vadd.f32 %v999_v29, %v998_v36  ;;  %v3747_v47 = vrot.slane %v3746_v60, 4  ;;  %v3730_v28 = vrot.slane %v3729_v8, 4  ;;  %v922_v9 = vadd.f32 %v921_v5, %v920_v13 }
0x1b51   : > { %v1001_v12 = vrot.slane %v1000_v59, 1  ;;  %v3748_v32 = vadd.f32 %v3747_v47, %v3746_v60  ;;  %v3731_v43 = vadd.f32 %v3730_v28, %v3729_v8  ;;  %v923_v50 = vrot.slane %v922_v9, 1 }
0x1b53   : > { %v3749_v17 = vrot.slane %v3748_v32, 2  ;;  %v1002_v38 = vadd.f32 %v1001_v12, %v1000_v59  ;;  %v3732_v27 = vrot.slane %v3731_v43, 2  ;;  %v924_v46 = vadd.f32 %v923_v50, %v922_v9 }
0x1b55   : > { %v3750_v16 = vadd.f32 %v3749_v17, %v3748_v32  ;;  %v7975_v44 = vadd.f32 %v7972_v20, %v1002_v38  ;;  %v3733_v63 = vadd.f32 %v3732_v27, %v3731_v43  ;;  %v7983_v36 = vadd.f32 %v7980_v48, %v924_v46 }
0x1b57   : > { %v3751_v41 = vrot.slane %v3750_v16, 1  ;;  %v3734_v25 = vrot.slane %v3733_v63, 1 }
0x1b59   : > { %v3752_v58 = vadd.f32 %v3751_v41, %v3750_v16  ;;  %v3735_v26 = vadd.f32 %v3734_v25, %v3733_v63 }
0x1b5b   : > { %v3756_v35 = vadd.f32 %v3752_v58, %v7975_v44  ;;  %v3754_v52 = vadd.f32 %v3753_v37, %v3735_v26 }
0x1b5d   : > { %5420 = vrcp.f32 %v3756_v35  ;;  %v3755_v57 = vadd.f32 %v3754_v52, %v7983_v36 }
0x1b6a   : > { %v5421_v61 = vpop.eup %5420 }
0x1b6b   : > { %v3758_v31 = vmul.f32 %v5421_v61, %v3756_v35 }
0x1b6d   : > { %v3759_v62 = vsub.f32 2.0, %v3758_v31 }
0x1b6f   : > { %v3760_v53 = vmul.f32 %v5421_v61, %v3759_v62 }
0x1b71   : > { %v3761_v29 = vmul.f32 %v3760_v53, %v3755_v57 }
0x1b73   : > { %v3765_v56 = vrot.slane %v3761_v29, %v6480_v6 }
0x1b75   : > { %3771 = vbcast.lane.b32.xlu0 %v3765_v56, 264  ;;  %3767 = vbcast.lane.b32.xlu1 %v3765_v56, 256 }
0x1b79   : > { %3779 = vbcast.lane.b32.xlu0 %v3765_v56, 280  ;;  %3775 = vbcast.lane.b32.xlu1 %v3765_v56, 272 }
0x1be7   : > { %v3772_v14 = vpop.permute.xlu0 %3771  ;;  %v3768_v60 = vpop.permute.xlu1 %3767 }
0x1be8   : > { %v3782_v18 = vmul.f32 %v7855_v45, %v3772_v14  ;;  %v3781_v59 = vmul.f32 %v7858_v55, %v3768_v60 }
0x1bea   : > { %v3786_v8 = vsub.f32 %v3782_v18, %v7861_v23  ;;  %v3785_v47 = vsub.f32 %v3781_v59, %v7864_v40 }
0x1beb   : > { %v3780_v12 = vpop.permute.xlu0 %3779  ;;  %v3776_v32 = vpop.permute.xlu1 %3775 }
0x1bec   : > { %5422 = vtanh.f32 %v3786_v8  ;;  %v3784_v30 = vmul.f32 %v7867_v21, %v3780_v12  ;;  %v3783_v28 = vmul.f32 %v7870_v0, %v3776_v32 }
0x1bed   : > { %5424 = vtanh.f32 %v3785_v47 }
0x1bee   : > { %v3788_v17 = vsub.f32 %v3784_v30, %v7873_v22  ;;  %v3787_v2 = vsub.f32 %v3783_v28, %v7876_v19 }
0x1bf0   : > { %5426 = vtanh.f32 %v3788_v17 }
0x1bf1   : > { %5428 = vtanh.f32 %v3787_v2 }
0x1bf9   : > { %v5423_v38 = vpop.eup %5422 }
0x1bfa   : > { %v5425_v16 = vpop.eup %5424  ;;  %v3794_v43 = vmul.f32 %v7879_v39, %v5423_v38  ;;  %v3811_v41 = vmul.f32 %v7882_v33, %v5423_v38 }
0x1bfb   : > { %v3793_v13 = vmul.f32 %v7885_v3, %v5425_v16  ;;  %v3810_v58 = vmul.f32 %v7888_v15, %v5425_v16 }
0x1bfc   : > { %v3798_v35 = vsel %vm875_vm0, %v3794_v43, 0.0  ;;  %v3815_v5 = vsel %vm875_vm0, %v3811_v41, 0.0 }
0x1bfd   : > { %v5427_v27 = vpop.eup %5426  ;;  %v3797_v63 = vsel %vm875_vm0, %v3793_v13, 0.0  ;;  %v3814_v9 = vsel %vm875_vm0, %v3810_v58, 0.0  ;;  %v3827_v13 = vmul.f32 %v7912_v42, %v3761_v29 }
0x1bfe   : > { %v5429_v25 = vpop.eup %5428  ;;  %v3813_v50 = vmul.f32 %v7895_v49, %v5427_v27  ;;  %v3799_v37 = vadd.f32 %v3798_v35, %v3797_v63  ;;  %v3816_v61 = vadd.f32 %v3815_v5, %v3814_v9  ;;  %v3796_v52 = vmul.f32 %v7904_v11, %v5427_v27 }
0x1bff   : > { %v3795_v26 = vmul.f32 %v7898_v10, %v5429_v25  ;;  %v3812_v46 = vmul.f32 %v7901_v51, %v5429_v25 }
0x1c00   : > { %v3819_v56 = vsel %vm875_vm0, %v3813_v50, 0.0  ;;  %v3802_v60 = vsel %vm875_vm0, %v3796_v52, 0.0 }
0x1c01   : > { %v3800_v31 = vsel %vm875_vm0, %v3795_v26, 0.0  ;;  %v3817_v62 = vsel %vm875_vm0, %v3812_v46, 0.0 }
0x1c02   : > { %v3801_v57 = vadd.f32 %v3800_v31, %v3799_v37  ;;  %v3818_v53 = vadd.f32 %v3817_v62, %v3816_v61 }
0x1c04   : > { %v3820_v14 = vadd.f32 %v3819_v56, %v3818_v53  ;;  %v3803_v18 = vadd.f32 %v3802_v60, %v3801_v57 }
0x1c06   : > { %v3821_v59 = vrot.slane %v3820_v14, 4  ;;  %v3804_v47 = vrot.slane %v3803_v18, 4 }
0x1c08   : > { %v3822_v8 = vadd.f32 %v3821_v59, %v3820_v14  ;;  %v3805_v30 = vadd.f32 %v3804_v47, %v3803_v18 }
0x1c0a   : > { %v3823_v12 = vrot.slane %v3822_v8, 2  ;;  %v3806_v2 = vrot.slane %v3805_v30, 2 }
0x1c0c   : > { %v3824_v32 = vadd.f32 %v3823_v12, %v3822_v8  ;;  %v3807_v16 = vadd.f32 %v3806_v2, %v3805_v30 }
0x1c0e   : > { %v3825_v28 = vrot.slane %v3824_v32, 1  ;;  %v3808_v43 = vrot.slane %v3807_v16, 1 }
0x1c10   : > { %v3826_v17 = vadd.f32 %v3825_v28, %v3824_v32  ;;  %v3809_v41 = vadd.f32 %v3808_v43, %v3807_v16 }
0x1c12   : > { %v3830_v38 = vadd.f32 %v3826_v17, %v7975_v44  ;;  %v3828_v27 = vadd.f32 %v3827_v13, %v3809_v41 }
0x1c14   : > { %5430 = vrcp.f32 %v3830_v38  ;;  %v3829_v63 = vadd.f32 %v3828_v27, %v7983_v36 }
0x1c21   : > { %v5431_v58 = vpop.eup %5430 }
0x1c22   : > { %v3832_v35 = vmul.f32 %v5431_v58, %v3830_v38 }
0x1c24   : > { %v3833_v5 = vsub.f32 2.0, %v3832_v35 }
0x1c26   : > { %v3834_v9 = vmul.f32 %v5431_v58, %v3833_v5 }
0x1c28   : > { %v3835_v25 = vmul.f32 %v3834_v9, %v3829_v63 }
0x1c2a   : > { %v3839_v50 = vrot.slane %v3835_v25, %v6480_v6 }
0x1c2c   : > { %3845 = vbcast.lane.b32.xlu0 %v3839_v50, 264  ;;  %3841 = vbcast.lane.b32.xlu1 %v3839_v50, 256 }
0x1c30   : > { %3853 = vbcast.lane.b32.xlu0 %v3839_v50, 280  ;;  %3849 = vbcast.lane.b32.xlu1 %v3839_v50, 272 }
0x1c9e   : > { %v3846_v26 = vpop.permute.xlu0 %3845  ;;  %v3842_v46 = vpop.permute.xlu1 %3841 }
0x1c9f   : > { %v3856_v37 = vmul.f32 %v7855_v45, %v3846_v26  ;;  %v3855_v29 = vmul.f32 %v7858_v55, %v3842_v46 }
0x1ca1   : > { %v3860_v61 = vsub.f32 %v3856_v37, %v7861_v23  ;;  %v3859_v52 = vsub.f32 %v3855_v29, %v7864_v40 }
0x1ca2   : > { %v3854_v31 = vpop.permute.xlu0 %3853  ;;  %v3850_v62 = vpop.permute.xlu1 %3849 }
0x1ca3   : > { %5432 = vtanh.f32 %v3860_v61  ;;  %v3858_v57 = vmul.f32 %v7867_v21, %v3854_v31  ;;  %v3857_v53 = vmul.f32 %v7870_v0, %v3850_v62 }
0x1ca4   : > { %5434 = vtanh.f32 %v3859_v52 }
0x1ca5   : > { %v3862_v56 = vsub.f32 %v3858_v57, %v7873_v22  ;;  %v3861_v14 = vsub.f32 %v3857_v53, %v7876_v19 }
0x1ca7   : > { %5436 = vtanh.f32 %v3862_v56 }
0x1ca8   : > { %5438 = vtanh.f32 %v3861_v14 }
0x1cb0   : > { %v5433_v60 = vpop.eup %5432 }
0x1cb1   : > { %v5435_v18 = vpop.eup %5434  ;;  %v3868_v59 = vmul.f32 %v7879_v39, %v5433_v60  ;;  %v3885_v8 = vmul.f32 %v7882_v33, %v5433_v60 }
0x1cb2   : > { %v3867_v47 = vmul.f32 %v7885_v3, %v5435_v18  ;;  %v3884_v12 = vmul.f32 %v7888_v15, %v5435_v18 }
0x1cb3   : > { %v3872_v30 = vsel %vm875_vm0, %v3868_v59, 0.0  ;;  %v3889_v28 = vsel %vm875_vm0, %v3885_v8, 0.0 }
0x1cb4   : > { %v5437_v32 = vpop.eup %5436  ;;  %v3871_v17 = vsel %vm875_vm0, %v3867_v47, 0.0  ;;  %v3888_v2 = vsel %vm875_vm0, %v3884_v12, 0.0  ;;  %v3901_v47 = vmul.f32 %v7912_v42, %v3835_v25 }
0x1cb5   : > { %v5439_v38 = vpop.eup %5438  ;;  %v3887_v16 = vmul.f32 %v7895_v49, %v5437_v32  ;;  %v3873_v13 = vadd.f32 %v3872_v30, %v3871_v17  ;;  %v3890_v58 = vadd.f32 %v3889_v28, %v3888_v2  ;;  %v3870_v27 = vmul.f32 %v7904_v11, %v5437_v32 }
0x1cb6   : > { %v3869_v43 = vmul.f32 %v7898_v10, %v5439_v38  ;;  %v3886_v41 = vmul.f32 %v7901_v51, %v5439_v38 }
0x1cb7   : > { %v3893_v50 = vsel %vm875_vm0, %v3887_v16, 0.0  ;;  %v3876_v46 = vsel %vm875_vm0, %v3870_v27, 0.0 }
0x1cb8   : > { %v3874_v35 = vsel %vm875_vm0, %v3869_v43, 0.0  ;;  %v3891_v5 = vsel %vm875_vm0, %v3886_v41, 0.0 }
0x1cb9   : > { %v3875_v63 = vadd.f32 %v3874_v35, %v3873_v13  ;;  %v3892_v9 = vadd.f32 %v3891_v5, %v3890_v58 }
0x1cbb   : > { %v3894_v26 = vadd.f32 %v3893_v50, %v3892_v9  ;;  %v3877_v37 = vadd.f32 %v3876_v46, %v3875_v63 }
0x1cbd   : > { %v3895_v29 = vrot.slane %v3894_v26, 4  ;;  %v3878_v52 = vrot.slane %v3877_v37, 4 }
0x1cbf   : > { %v3896_v61 = vadd.f32 %v3895_v29, %v3894_v26  ;;  %v3879_v57 = vadd.f32 %v3878_v52, %v3877_v37 }
0x1cc1   : > { %v3897_v31 = vrot.slane %v3896_v61, 2  ;;  %v3880_v14 = vrot.slane %v3879_v57, 2 }
0x1cc3   : > { %v3898_v62 = vadd.f32 %v3897_v31, %v3896_v61  ;;  %v3881_v18 = vadd.f32 %v3880_v14, %v3879_v57 }
0x1cc5   : > { %v3899_v53 = vrot.slane %v3898_v62, 1  ;;  %v3882_v59 = vrot.slane %v3881_v18, 1 }
0x1cc7   : > { %v3900_v56 = vadd.f32 %v3899_v53, %v3898_v62  ;;  %v3883_v8 = vadd.f32 %v3882_v59, %v3881_v18 }
0x1cc9   : > { %v3904_v60 = vadd.f32 %v3900_v56, %v7975_v44  ;;  %v3902_v32 = vadd.f32 %v3901_v47, %v3883_v8 }
0x1ccb   : > { %5440 = vrcp.f32 %v3904_v60  ;;  %v3903_v17 = vadd.f32 %v3902_v32, %v7983_v36 }
0x1cd8   : > { %v5441_v12 = vpop.eup %5440 }
0x1cd9   : > { %v3906_v30 = vmul.f32 %v5441_v12, %v3904_v60 }
0x1cdb   : > { %v3907_v28 = vsub.f32 2.0, %v3906_v30 }
0x1cdd   : > { %v3908_v2 = vmul.f32 %v5441_v12, %v3907_v28 }
0x1cdf   : > { %v3909_v38 = vmul.f32 %v3908_v2, %v3903_v17 }
0x1ce1   : > { %v3913_v16 = vrot.slane %v3909_v38, %v6480_v6 }
0x1ce3   : > { %3919 = vbcast.lane.b32.xlu0 %v3913_v16, 264  ;;  %3915 = vbcast.lane.b32.xlu1 %v3913_v16, 256 }
0x1ce7   : > { %3927 = vbcast.lane.b32.xlu0 %v3913_v16, 280  ;;  %3923 = vbcast.lane.b32.xlu1 %v3913_v16, 272 }
0x1d55   : > { %v3920_v43 = vpop.permute.xlu0 %3919  ;;  %v3916_v41 = vpop.permute.xlu1 %3915 }
0x1d56   : > { %v3930_v13 = vmul.f32 %v7855_v45, %v3920_v43  ;;  %v3929_v25 = vmul.f32 %v7858_v55, %v3916_v41 }
0x1d58   : > { %v3934_v58 = vsub.f32 %v3930_v13, %v7861_v23  ;;  %v3933_v27 = vsub.f32 %v3929_v25, %v7864_v40 }
0x1d59   : > { %v3928_v35 = vpop.permute.xlu0 %3927  ;;  %v3924_v5 = vpop.permute.xlu1 %3923 }
0x1d5a   : > { %5442 = vtanh.f32 %v3934_v58  ;;  %v3932_v63 = vmul.f32 %v7867_v21, %v3928_v35  ;;  %v3931_v9 = vmul.f32 %v7870_v0, %v3924_v5 }
0x1d5b   : > { %5444 = vtanh.f32 %v3933_v27 }
0x1d5c   : > { %v3936_v50 = vsub.f32 %v3932_v63, %v7873_v22  ;;  %v3935_v26 = vsub.f32 %v3931_v9, %v7876_v19 }
0x1d5e   : > { %5446 = vtanh.f32 %v3936_v50 }
0x1d5f   : > { %5448 = vtanh.f32 %v3935_v26 }
0x1d67   : > { %v5443_v46 = vpop.eup %5442 }
0x1d68   : > { %v5445_v37 = vpop.eup %5444  ;;  %v3942_v29 = vmul.f32 %v7879_v39, %v5443_v46  ;;  %v3959_v61 = vmul.f32 %v7882_v33, %v5443_v46 }
0x1d69   : > { %v3941_v52 = vmul.f32 %v7885_v3, %v5445_v37  ;;  %v3958_v31 = vmul.f32 %v7888_v15, %v5445_v37 }
0x1d6a   : > { %v3946_v57 = vsel %vm875_vm0, %v3942_v29, 0.0  ;;  %v3963_v53 = vsel %vm875_vm0, %v3959_v61, 0.0 }
0x1d6b   : > { %v5447_v62 = vpop.eup %5446  ;;  %v3945_v56 = vsel %vm875_vm0, %v3941_v52, 0.0  ;;  %v3962_v14 = vsel %vm875_vm0, %v3958_v31, 0.0  ;;  %v3975_v52 = vmul.f32 %v7912_v42, %v3909_v38 }
0x1d6c   : > { %v5449_v60 = vpop.eup %5448  ;;  %v3961_v18 = vmul.f32 %v7895_v49, %v5447_v62  ;;  %v3947_v47 = vadd.f32 %v3946_v57, %v3945_v56  ;;  %v3964_v12 = vadd.f32 %v3963_v53, %v3962_v14  ;;  %v3944_v32 = vmul.f32 %v7904_v11, %v5447_v62 }
0x1d6d   : > { %v3943_v59 = vmul.f32 %v7898_v10, %v5449_v60  ;;  %v3960_v8 = vmul.f32 %v7901_v51, %v5449_v60 }
0x1d6e   : > { %v3967_v16 = vsel %vm875_vm0, %v3961_v18, 0.0  ;;  %v3950_v41 = vsel %vm875_vm0, %v3944_v32, 0.0 }
0x1d6f   : > { %v3948_v30 = vsel %vm875_vm0, %v3943_v59, 0.0  ;;  %v3965_v28 = vsel %vm875_vm0, %v3960_v8, 0.0 }
0x1d70   : > { %v3949_v17 = vadd.f32 %v3948_v30, %v3947_v47  ;;  %v3966_v2 = vadd.f32 %v3965_v28, %v3964_v12 }
0x1d72   : > { %v3968_v43 = vadd.f32 %v3967_v16, %v3966_v2  ;;  %v3951_v13 = vadd.f32 %v3950_v41, %v3949_v17 }
0x1d74   : > { %v3969_v25 = vrot.slane %v3968_v43, 4  ;;  %v3952_v27 = vrot.slane %v3951_v13, 4 }
0x1d76   : > { %v3970_v58 = vadd.f32 %v3969_v25, %v3968_v43  ;;  %v3953_v63 = vadd.f32 %v3952_v27, %v3951_v13 }
0x1d78   : > { %v3971_v35 = vrot.slane %v3970_v58, 2  ;;  %v3954_v26 = vrot.slane %v3953_v63, 2 }
0x1d7a   : > { %v3972_v5 = vadd.f32 %v3971_v35, %v3970_v58  ;;  %v3955_v37 = vadd.f32 %v3954_v26, %v3953_v63 }
0x1d7c   : > { %v3973_v9 = vrot.slane %v3972_v5, 1  ;;  %v3956_v29 = vrot.slane %v3955_v37, 1 }
0x1d7e   : > { %v3974_v50 = vadd.f32 %v3973_v9, %v3972_v5  ;;  %v3957_v61 = vadd.f32 %v3956_v29, %v3955_v37 }
0x1d80   : > { %v3978_v46 = vadd.f32 %v3974_v50, %v7975_v44  ;;  %v3976_v62 = vadd.f32 %v3975_v52, %v3957_v61 }
0x1d82   : > { %5450 = vrcp.f32 %v3978_v46  ;;  %v3977_v56 = vadd.f32 %v3976_v62, %v7983_v36 }
0x1d8f   : > { %v5451_v31 = vpop.eup %5450 }
0x1d90   : > { %v3980_v57 = vmul.f32 %v5451_v31, %v3978_v46 }
0x1d92   : > { %v3981_v53 = vsub.f32 2.0, %v3980_v57 }
0x1d94   : > { %v3982_v14 = vmul.f32 %v5451_v31, %v3981_v53 }
0x1d96   : > { %v3983_v60 = vmul.f32 %v3982_v14, %v3977_v56 }
0x1d98   : > { %v3987_v18 = vrot.slane %v3983_v60, %v6480_v6 }
0x1d9a   : > { %3993 = vbcast.lane.b32.xlu0 %v3987_v18, 264  ;;  %3989 = vbcast.lane.b32.xlu1 %v3987_v18, 256 }
0x1d9e   : > { %4001 = vbcast.lane.b32.xlu0 %v3987_v18, 280  ;;  %3997 = vbcast.lane.b32.xlu1 %v3987_v18, 272 }
0x1e0c   : > { %v3994_v59 = vpop.permute.xlu0 %3993  ;;  %v3990_v8 = vpop.permute.xlu1 %3989 }
0x1e0d   : > { %v4004_v47 = vmul.f32 %v7855_v45, %v3994_v59  ;;  %v4003_v38 = vmul.f32 %v7858_v55, %v3990_v8 }
0x1e0f   : > { %v4008_v12 = vsub.f32 %v4004_v47, %v7861_v23  ;;  %v4007_v32 = vsub.f32 %v4003_v38, %v7864_v40 }
0x1e10   : > { %v4002_v30 = vpop.permute.xlu0 %4001  ;;  %v3998_v28 = vpop.permute.xlu1 %3997 }
0x1e11   : > { %5452 = vtanh.f32 %v4008_v12  ;;  %v4006_v17 = vmul.f32 %v7867_v21, %v4002_v30  ;;  %v4005_v2 = vmul.f32 %v7870_v0, %v3998_v28 }
0x1e12   : > { %5454 = vtanh.f32 %v4007_v32 }
0x1e13   : > { %v4010_v16 = vsub.f32 %v4006_v17, %v7873_v22  ;;  %v4009_v43 = vsub.f32 %v4005_v2, %v7876_v19 }
0x1e15   : > { %5456 = vtanh.f32 %v4010_v16 }
0x1e16   : > { %5458 = vtanh.f32 %v4009_v43 }
0x1e1e   : > { %v5453_v41 = vpop.eup %5452 }
0x1e1f   : > { %v5455_v13 = vpop.eup %5454  ;;  %v4016_v25 = vmul.f32 %v7879_v39, %v5453_v41  ;;  %v4033_v58 = vmul.f32 %v7882_v33, %v5453_v41 }
0x1e20   : > { %v4015_v27 = vmul.f32 %v7885_v3, %v5455_v13  ;;  %v4032_v35 = vmul.f32 %v7888_v15, %v5455_v13 }
0x1e21   : > { %v4020_v63 = vsel %vm875_vm0, %v4016_v25, 0.0  ;;  %v4037_v9 = vsel %vm875_vm0, %v4033_v58, 0.0 }
0x1e22   : > { %v5457_v5 = vpop.eup %5456  ;;  %v4019_v50 = vsel %vm875_vm0, %v4015_v27, 0.0  ;;  %v4036_v26 = vsel %vm875_vm0, %v4032_v35, 0.0  ;;  %v4049_v27 = vmul.f32 %v7912_v42, %v3983_v60 }
0x1e23   : > { %v5459_v46 = vpop.eup %5458  ;;  %v4035_v37 = vmul.f32 %v7895_v49, %v5457_v5  ;;  %v4021_v52 = vadd.f32 %v4020_v63, %v4019_v50  ;;  %v4038_v31 = vadd.f32 %v4037_v9, %v4036_v26  ;;  %v4018_v62 = vmul.f32 %v7904_v11, %v5457_v5 }
0x1e24   : > { %v4017_v29 = vmul.f32 %v7898_v10, %v5459_v46  ;;  %v4034_v61 = vmul.f32 %v7901_v51, %v5459_v46 }
0x1e25   : > { %v4041_v18 = vsel %vm875_vm0, %v4035_v37, 0.0  ;;  %v4024_v8 = vsel %vm875_vm0, %v4018_v62, 0.0 }
0x1e26   : > { %v4022_v57 = vsel %vm875_vm0, %v4017_v29, 0.0  ;;  %v4039_v53 = vsel %vm875_vm0, %v4034_v61, 0.0 }
0x1e27   : > { %v4023_v56 = vadd.f32 %v4022_v57, %v4021_v52  ;;  %v4040_v14 = vadd.f32 %v4039_v53, %v4038_v31 }
0x1e29   : > { %v4042_v59 = vadd.f32 %v4041_v18, %v4040_v14  ;;  %v4025_v47 = vadd.f32 %v4024_v8, %v4023_v56 }
0x1e2b   : > { %v4043_v38 = vrot.slane %v4042_v59, 4  ;;  %v4026_v32 = vrot.slane %v4025_v47, 4 }
0x1e2d   : > { %v4044_v12 = vadd.f32 %v4043_v38, %v4042_v59  ;;  %v4027_v17 = vadd.f32 %v4026_v32, %v4025_v47 }
0x1e2f   : > { %v4045_v30 = vrot.slane %v4044_v12, 2  ;;  %v4028_v43 = vrot.slane %v4027_v17, 2 }
0x1e31   : > { %v4046_v28 = vadd.f32 %v4045_v30, %v4044_v12  ;;  %v4029_v13 = vadd.f32 %v4028_v43, %v4027_v17 }
0x1e33   : > { %v4047_v2 = vrot.slane %v4046_v28, 1  ;;  %v4030_v25 = vrot.slane %v4029_v13, 1 }
0x1e35   : > { %v4048_v16 = vadd.f32 %v4047_v2, %v4046_v28  ;;  %v4031_v58 = vadd.f32 %v4030_v25, %v4029_v13 }
0x1e37   : > { %v4052_v41 = vadd.f32 %v4048_v16, %v7975_v44  ;;  %v4050_v5 = vadd.f32 %v4049_v27, %v4031_v58 }
0x1e39   : > { %5460 = vrcp.f32 %v4052_v41  ;;  %v4051_v50 = vadd.f32 %v4050_v5, %v7983_v36 }
0x1e46   : > { %v5461_v35 = vpop.eup %5460 }
0x1e47   : > { %v4054_v63 = vmul.f32 %v5461_v35, %v4052_v41 }
0x1e49   : > { %v4055_v9 = vsub.f32 2.0, %v4054_v63 }
0x1e4b   : > { %v4056_v26 = vmul.f32 %v5461_v35, %v4055_v9 }
0x1e4d   : > { %v4057_v46 = vmul.f32 %v4056_v26, %v4051_v50 }
0x1e4f   : > { %v4061_v37 = vrot.slane %v4057_v46, %v6480_v6 }
0x1e51   : > { %4067 = vbcast.lane.b32.xlu0 %v4061_v37, 264  ;;  %4063 = vbcast.lane.b32.xlu1 %v4061_v37, 256 }
0x1e55   : > { %4075 = vbcast.lane.b32.xlu0 %v4061_v37, 280  ;;  %4071 = vbcast.lane.b32.xlu1 %v4061_v37, 272 }
0x1ec3   : > { %v4068_v29 = vpop.permute.xlu0 %4067  ;;  %v4064_v61 = vpop.permute.xlu1 %4063 }
0x1ec4   : > { %v4078_v52 = vmul.f32 %v7855_v45, %v4068_v29  ;;  %v4077_v60 = vmul.f32 %v7858_v55, %v4064_v61  ;;  %v4123_v29 = vmul.f32 %v7912_v42, %v4057_v46  ;;  %v8135_v46 = vld [vmem:[#allocation23] sm:$0x1] }
0x1ec6   : > { %v4082_v31 = vsub.f32 %v4078_v52, %v7861_v23  ;;  %v4081_v62 = vsub.f32 %v4077_v60, %v7864_v40 }
0x1ec7   : > { %v4076_v57 = vpop.permute.xlu0 %4075  ;;  %v4072_v53 = vpop.permute.xlu1 %4071 }
0x1ec8   : > { %5462 = vtanh.f32 %v4082_v31  ;;  %v4080_v56 = vmul.f32 %v7867_v21, %v4076_v57  ;;  %v4079_v14 = vmul.f32 %v7870_v0, %v4072_v53 }
0x1ec9   : > { %5464 = vtanh.f32 %v4081_v62 }
0x1eca   : > { %v4084_v18 = vsub.f32 %v4080_v56, %v7873_v22  ;;  %v4083_v59 = vsub.f32 %v4079_v14, %v7876_v19  ;;  %v838_v56 = vsub.s32 7, %v6477_v1  ;;  %v8131_v14 = vld [vmem:[#allocation22] sm:$0x1] }
0x1ecc   : > { %5466 = vtanh.f32 %v4084_v18 }
0x1ecd   : > { %5468 = vtanh.f32 %v4083_v59 }
0x1ed5   : > { %v5463_v45 = vpop.eup %5462 }
0x1ed6   : > { %v5465_v55 = vpop.eup %5464  ;;  %v4090_v23 = vmul.f32 %v7879_v39, %v5463_v45  ;;  %v4107_v40 = vmul.f32 %v7882_v33, %v5463_v45  ;;  %v8141_v45 = vld [vmem:[#allocation11 + $0x8] sm:$0xff] }
0x1ed7   : > { %v4089_v8 = vmul.f32 %v7885_v3, %v5465_v55  ;;  %v4106_v47 = vmul.f32 %v7888_v15, %v5465_v55 }
0x1ed8   : > { %v4094_v0 = vsel %vm875_vm0, %v4090_v23, 0.0  ;;  %v4111_v38 = vsel %vm875_vm0, %v4107_v40, 0.0  ;;  %v8144_v23 = vld [vmem:[#allocation11] sm:$0xff] }
0x1ed9   : > { %v5467_v21 = vpop.eup %5466  ;;  %v4093_v22 = vsel %vm875_vm0, %v4089_v8, 0.0  ;;  %v4110_v19 = vsel %vm875_vm0, %v4106_v47, 0.0  ;;  %v8147_v8 = vld [vmem:[#allocation13 + $0x8] sm:$0xff] }
0x1eda   : > { %v5469_v12 = vpop.eup %5468  ;;  %v4109_v32 = vmul.f32 %v7895_v49, %v5467_v21  ;;  %v4095_v30 = vadd.f32 %v4094_v0, %v4093_v22  ;;  %v4112_v3 = vadd.f32 %v4111_v38, %v4110_v19  ;;  %v4092_v15 = vmul.f32 %v7904_v11, %v5467_v21  ;;  %v8154_v19 = vld [vmem:[#allocation11 + $0x10] sm:$0xff] }
0x1edb   : > { %v4091_v39 = vmul.f32 %v7898_v10, %v5469_v12  ;;  %v4108_v33 = vmul.f32 %v7901_v51, %v5469_v12 }
0x1edc   : > { %v4115_v43 = vsel %vm875_vm0, %v4109_v32, 0.0  ;;  %v4098_v13 = vsel %vm875_vm0, %v4092_v15, 0.0 }
0x1edd   : > { %v4096_v28 = vsel %vm875_vm0, %v4091_v39, 0.0  ;;  %v4113_v17 = vsel %vm875_vm0, %v4108_v33, 0.0  ;;  %v8158_v39 = vld [vmem:[#allocation13 + $0x10] sm:$0xff] }
0x1ede   : > { %v4097_v2 = vadd.f32 %v4096_v28, %v4095_v30  ;;  %v4114_v16 = vadd.f32 %v4113_v17, %v4112_v3  ;;  %v8161_v3 = vld [vmem:[#allocation11 + $0x18] sm:$0xff] }
0x1edf   : > { %v8164_v28 = vld [vmem:[#allocation13 + $0x18] sm:$0xff] }
0x1ee0   : > { %v4116_v41 = vadd.f32 %v4115_v43, %v4114_v16  ;;  %v4099_v49 = vadd.f32 %v4098_v13, %v4097_v2  ;;  %v8167_v16 = vld [vmem:[#allocation16 + $0x8] sm:$0xff]  ;;  %v8170_v43 = vld [vmem:[#allocation16] sm:$0xff] }
0x1ee1   : > { %v8173_v13 = vld [vmem:[#allocation14 + $0x8] sm:$0xff] }
0x1ee2   : > { %v4117_v25 = vrot.slane %v4116_v41, 4  ;;  %v4100_v58 = vrot.slane %v4099_v49, 4 }
0x1ee4   : > { %v4118_v10 = vadd.f32 %v4117_v25, %v4116_v41  ;;  %v4101_v35 = vadd.f32 %v4100_v58, %v4099_v49  ;;  %v8176_v25 = vld [vmem:[#allocation14] sm:$0xff] }
0x1ee6   : > { %v4119_v51 = vrot.slane %v4118_v10, 2  ;;  %v4102_v63 = vrot.slane %v4101_v35, 2 }
0x1ee8   : > { %v4120_v27 = vadd.f32 %v4119_v51, %v4118_v10  ;;  %v4103_v50 = vadd.f32 %v4102_v63, %v4101_v35 }
0x1eea   : > { %v4121_v5 = vrot.slane %v4120_v27, 1  ;;  %v4104_v26 = vrot.slane %v4103_v50, 1 }
0x1eec   : > { %v4122_v11 = vadd.f32 %v4121_v5, %v4120_v27  ;;  %v4105_v37 = vadd.f32 %v4104_v26, %v4103_v50 }
0x1eee   : > { %v4126_v9 = vadd.f32 %v4122_v11, %v7975_v44  ;;  %v4124_v52 = vadd.f32 %v4123_v29, %v4105_v37  ;;  %v8182_v11 = vld [vmem:[#allocation14 + $0x10] sm:$0xff] }
0x1ef0   : > { %5470 = vrcp.f32 %v4126_v9  ;;  %v4125_v62 = vadd.f32 %v4124_v52, %v7983_v36  ;;  %v839_v36 = vrot.slane %v6482_v7, %v838_v56  ;;  %v8150_v7 = vld [vmem:[#allocation13] sm:$0xff]  ;;  %v8196_v56 = vld [vmem:[#allocation16 + $0x18] sm:$0xff] }
0x1efd   : > { %v5471_v61 = vpop.eup %5470 }
0x1efe   : > { %v4128_v60 = vmul.f32 %v5471_v61, %v4126_v9  ;;  %v8185_v9 = vld [vmem:[#allocation16 + $0x10] sm:$0xff] }
0x1f00   : > { %v4129_v31 = vsub.f32 2.0, %v4128_v60 }
0x1f02   : > { %v4130_v57 = vmul.f32 %v5471_v61, %v4129_v31 }
0x1f04   : > { %v8126_v53 = vmul.f32 %v4130_v57, %v4125_v62  ;;  %v8193_v62 = vld [vmem:[#allocation14 + $0x18] sm:$0xff] }
0x1f06   : > { %v4138_v44 = vrot.slane %v8126_v53, %v6480_v6  ;;  %v4132_v42 = vmul.f32 %v8131_v14, %v8126_v53 }
0x1f08   : > { %4144 = vbcast.lane.b32.xlu0 %v4138_v44, 264  ;;  %v4133_v18 = vadd.f32 %v8135_v46, %v4132_v42  ;;  %4140 = vbcast.lane.b32.xlu1 %v4138_v44, 256 }
0x1f0a   : > { %4134 = vst.msk [vmem:[%s6733_s2 + $0x6] sm:$0x1] %vm1451_vm1, %v4133_v18 }
0x1f0c   : > { %841 = vbcast.lane.b32.xlu0 %v839_v36, 256  ;;  %4148 = vbcast.lane.b32.xlu1 %v4138_v44, 272 }
0x1f10   : > { %4152 = vbcast.lane.b32.xlu1 %v4138_v44, 280 }
0x1f7a   : > { %v4145_v1 = vpop.permute.xlu0 %4144  ;;  %v4141_v59 = vpop.permute.xlu1 %4140 }
0x1f7b   : > { %v4155_v55 = vmul.f32 %v8141_v45, %v4145_v1  ;;  %v4154_v40 = vmul.f32 %v8144_v23, %v4141_v59 }
0x1f7d   : > { %v4159_v47 = vsub.f32 %v4155_v55, %v8147_v8  ;;  %v4158_v21 = vsub.f32 %v4154_v40, %v8150_v7 }
0x1f7e   : > { %v842_v0 = vpop.permute.xlu0 %841  ;;  %v4149_v38 = vpop.permute.xlu1 %4148 }
0x1f7f   : > { %5472 = vtanh.f32 %v4159_v47  ;;  %v850_v22 = vmul.f32 %v7935_v34, %v842_v0  ;;  %v4156_v12 = vmul.f32 %v8154_v19, %v4149_v38 }
0x1f80   : > { %5474 = vtanh.f32 %v4158_v21 }
0x1f81   : > { %v858_v32 = vsub.f32 %v850_v22, %v7942_v24  ;;  %v4160_v33 = vsub.f32 %v4156_v12, %v8158_v39 }
0x1f82   : > { %v4153_v30 = vpop.permute.xlu1 %4152 }
0x1f83   : > { %5476 = vtanh.f32 %v858_v32  ;;  %v4157_v15 = vmul.f32 %v8161_v3, %v4153_v30 }
0x1f84   : > { %5478 = vtanh.f32 %v4160_v33 }
0x1f85   : > { %v4161_v34 = vsub.f32 %v4157_v15, %v8164_v28 }
0x1f87   : > { %5480 = vtanh.f32 %v4161_v34 }
0x1f8c   : > { %v5473_v17 = vpop.eup %5472 }
0x1f8d   : > { %v5475_v2 = vpop.eup %5474  ;;  %v4184_v24 = vmul.f32 %v8167_v16, %v5473_v17  ;;  %v4167_v49 = vmul.f32 %v8173_v13, %v5473_v17 }
0x1f8e   : > { %v4183_v41 = vmul.f32 %v8170_v43, %v5475_v2  ;;  %v4166_v10 = vmul.f32 %v8176_v25, %v5475_v2 }
0x1f8f   : > { %v4188_v27 = vsel %vm875_vm0, %v4184_v24, 0.0  ;;  %v4171_v26 = vsel %vm875_vm0, %v4167_v49, 0.0 }
0x1f90   : > { %v5477_v58 = vpop.eup %5476  ;;  %v4187_v35 = vsel %vm875_vm0, %v4183_v41, 0.0  ;;  %v4170_v37 = vsel %vm875_vm0, %v4166_v10, 0.0 }
0x1f91   : > { %v5479_v51 = vpop.eup %5478  ;;  %v953_v5 = vmul.f32 %v7954_v54, %v5477_v58  ;;  %v4189_v52 = vadd.f32 %v4188_v27, %v4187_v35  ;;  %v4172_v42 = vadd.f32 %v4171_v26, %v4170_v37  ;;  %v874_v21 = vmul.f32 %v7968_v4, %v5477_v58 }
0x1f92   : > { %v4168_v63 = vmul.f32 %v8182_v11, %v5479_v51  ;;  %v4185_v50 = vmul.f32 %v8185_v9, %v5479_v51 }
0x1f93   : > { %v1003_v29 = vsel %vm875_vm0, %v953_v5, 0.0  ;;  %v925_v33 = vsel %vm875_vm0, %v874_v21, 0.0 }
0x1f94   : > { %v5481_v61 = vpop.eup %5480  ;;  %v1004_v60 = vrot.slane %v1003_v29, 4  ;;  %v4190_v31 = vsel %vm875_vm0, %v4185_v50, 0.0  ;;  %v4173_v54 = vsel %vm875_vm0, %v4168_v63, 0.0  ;;  %v926_v34 = vrot.slane %v925_v33, 4 }
0x1f95   : > { %v4169_v57 = vmul.f32 %v8193_v62, %v5481_v61  ;;  %v4186_v44 = vmul.f32 %v8196_v56, %v5481_v61  ;;  %v4191_v36 = vadd.f32 %v4190_v31, %v4189_v52  ;;  %v4174_v40 = vadd.f32 %v4173_v54, %v4172_v42 }
0x1f96   : > { %v1005_v18 = vadd.f32 %v1004_v60, %v1003_v29  ;;  %v927_v49 = vadd.f32 %v926_v34, %v925_v33  ;;  %v8207_v29 = vld [vmem:[#allocation20] sm:$0x1] }
0x1f97   : > { %v4175_v1 = vsel %vm875_vm0, %v4169_v57, 0.0  ;;  %v4192_v59 = vsel %vm875_vm0, %v4186_v44, 0.0  ;;  %v4200_v61 = vmul.f32 %v8207_v29, %v8126_v53 }
0x1f98   : > { %v1006_v55 = vrot.slane %v1005_v18, 2  ;;  %v4193_v47 = vadd.f32 %v4192_v59, %v4191_v36  ;;  %v4176_v38 = vadd.f32 %v4175_v1, %v4174_v40  ;;  %v928_v27 = vrot.slane %v927_v49, 2 }
0x1f9a   : > { %v1007_v0 = vadd.f32 %v1006_v55, %v1005_v18  ;;  %v4194_v22 = vrot.slane %v4193_v47, 4  ;;  %v4177_v30 = vrot.slane %v4176_v38, 4  ;;  %v929_v5 = vadd.f32 %v928_v27, %v927_v49 }
0x1f9c   : > { %v1008_v12 = vrot.slane %v1007_v0, 1  ;;  %v4195_v32 = vadd.f32 %v4194_v22, %v4193_v47  ;;  %v4178_v24 = vadd.f32 %v4177_v30, %v4176_v38  ;;  %v930_v50 = vrot.slane %v929_v5, 1 }
0x1f9e   : > { %v4196_v15 = vrot.slane %v4195_v32, 2  ;;  %v1009_v17 = vadd.f32 %v1008_v12, %v1007_v0  ;;  %v4179_v4 = vrot.slane %v4178_v24, 2  ;;  %v931_v37 = vadd.f32 %v930_v50, %v929_v5 }
0x1fa0   : > { %v4197_v2 = vadd.f32 %v4196_v15, %v4195_v32  ;;  %v8204_v10 = vadd.f32 %v7972_v20, %v1009_v17  ;;  %v4180_v35 = vadd.f32 %v4179_v4, %v4178_v24  ;;  %v8212_v31 = vadd.f32 %v7980_v48, %v931_v37 }
0x1fa2   : > { %v4198_v41 = vrot.slane %v4197_v2, 1  ;;  %v4181_v63 = vrot.slane %v4180_v35, 1 }
0x1fa4   : > { %v4199_v51 = vadd.f32 %v4198_v41, %v4197_v2  ;;  %v4182_v26 = vadd.f32 %v4181_v63, %v4180_v35 }
0x1fa6   : > { %v4203_v58 = vadd.f32 %v4199_v51, %v8204_v10  ;;  %v4201_v20 = vadd.f32 %v4200_v61, %v4182_v26 }
0x1fa8   : > { %5482 = vrcp.f32 %v4203_v58  ;;  %v4202_v57 = vadd.f32 %v4201_v20, %v8212_v31 }
0x1fb5   : > { %v5483_v52 = vpop.eup %5482 }
0x1fb6   : > { %v4205_v60 = vmul.f32 %v5483_v52, %v4203_v58 }
0x1fb8   : > { %v4206_v54 = vsub.f32 2.0, %v4205_v60 }
0x1fba   : > { %v4207_v44 = vmul.f32 %v5483_v52, %v4206_v54 }
0x1fbc   : > { %v4208_v42 = vmul.f32 %v4207_v44, %v4202_v57 }
0x1fbe   : > { %v4212_v18 = vrot.slane %v4208_v42, %v6480_v6 }
0x1fc0   : > { %4218 = vbcast.lane.b32.xlu1 %v4212_v18, 264  ;;  %4214 = vbcast.lane.b32.xlu0 %v4212_v18, 256 }
0x1fc4   : > { %4226 = vbcast.lane.b32.xlu1 %v4212_v18, 280  ;;  %4222 = vbcast.lane.b32.xlu0 %v4212_v18, 272 }
0x2032   : > { %v4219_v36 = vpop.permute.xlu1 %4218  ;;  %v4215_v1 = vpop.permute.xlu0 %4214 }
0x2033   : > { %v4229_v53 = vmul.f32 %v8141_v45, %v4219_v36  ;;  %v4228_v59 = vmul.f32 %v8144_v23, %v4215_v1 }
0x2035   : > { %v4233_v48 = vsub.f32 %v4229_v53, %v8147_v8  ;;  %v4232_v55 = vsub.f32 %v4228_v59, %v8150_v7 }
0x2036   : > { %v4227_v40 = vpop.permute.xlu1 %4226  ;;  %v4223_v47 = vpop.permute.xlu0 %4222 }
0x2037   : > { %5484 = vtanh.f32 %v4233_v48  ;;  %v4231_v21 = vmul.f32 %v8161_v3, %v4227_v40  ;;  %v4230_v0 = vmul.f32 %v8154_v19, %v4223_v47 }
0x2038   : > { %5486 = vtanh.f32 %v4232_v55 }
0x2039   : > { %v4235_v38 = vsub.f32 %v4231_v21, %v8164_v28  ;;  %v4234_v22 = vsub.f32 %v4230_v0, %v8158_v39 }
0x203b   : > { %5488 = vtanh.f32 %v4235_v38  ;;  %v4274_v38 = vmul.f32 %v8207_v29, %v4208_v42 }
0x203c   : > { %5490 = vtanh.f32 %v4234_v22 }
0x2044   : > { %v5485_v12 = vpop.eup %5484 }
0x2045   : > { %v5487_v32 = vpop.eup %5486  ;;  %v4241_v33 = vmul.f32 %v8173_v13, %v5485_v12  ;;  %v4258_v30 = vmul.f32 %v8167_v16, %v5485_v12 }
0x2046   : > { %v4240_v15 = vmul.f32 %v8176_v25, %v5487_v32  ;;  %v4257_v34 = vmul.f32 %v8170_v43, %v5487_v32 }
0x2047   : > { %v4245_v2 = vsel %vm875_vm0, %v4241_v33, 0.0  ;;  %v4262_v24 = vsel %vm875_vm0, %v4258_v30, 0.0 }
0x2048   : > { %v5489_v17 = vpop.eup %5488  ;;  %v4244_v41 = vsel %vm875_vm0, %v4240_v15, 0.0  ;;  %v4261_v49 = vsel %vm875_vm0, %v4257_v34, 0.0 }
0x2049   : > { %v5491_v51 = vpop.eup %5490  ;;  %v4260_v4 = vmul.f32 %v8196_v56, %v5489_v17  ;;  %v4246_v35 = vadd.f32 %v4245_v2, %v4244_v41  ;;  %v4263_v5 = vadd.f32 %v4262_v24, %v4261_v49  ;;  %v4243_v63 = vmul.f32 %v8193_v62, %v5489_v17 }
0x204a   : > { %v4242_v58 = vmul.f32 %v8182_v11, %v5491_v51  ;;  %v4259_v27 = vmul.f32 %v8185_v9, %v5491_v51 }
0x204b   : > { %v4266_v52 = vsel %vm875_vm0, %v4260_v4, 0.0  ;;  %v4249_v60 = vsel %vm875_vm0, %v4243_v63, 0.0 }
0x204c   : > { %v4247_v50 = vsel %vm875_vm0, %v4242_v58, 0.0  ;;  %v4264_v26 = vsel %vm875_vm0, %v4259_v27, 0.0 }
0x204d   : > { %v4248_v37 = vadd.f32 %v4247_v50, %v4246_v35  ;;  %v4265_v61 = vadd.f32 %v4264_v26, %v4263_v5 }
0x204f   : > { %v4267_v20 = vadd.f32 %v4266_v52, %v4265_v61  ;;  %v4250_v54 = vadd.f32 %v4249_v60, %v4248_v37 }
0x2051   : > { %v4268_v57 = vrot.slane %v4267_v20, 4  ;;  %v4251_v18 = vrot.slane %v4250_v54, 4 }
0x2053   : > { %v4269_v44 = vadd.f32 %v4268_v57, %v4267_v20  ;;  %v4252_v53 = vadd.f32 %v4251_v18, %v4250_v54 }
0x2055   : > { %v4270_v36 = vrot.slane %v4269_v44, 2  ;;  %v4253_v55 = vrot.slane %v4252_v53, 2 }
0x2057   : > { %v4271_v1 = vadd.f32 %v4270_v36, %v4269_v44  ;;  %v4254_v47 = vadd.f32 %v4253_v55, %v4252_v53 }
0x2059   : > { %v4272_v59 = vrot.slane %v4271_v1, 1  ;;  %v4255_v21 = vrot.slane %v4254_v47, 1 }
0x205b   : > { %v4273_v48 = vadd.f32 %v4272_v59, %v4271_v1  ;;  %v4256_v0 = vadd.f32 %v4255_v21, %v4254_v47 }
0x205d   : > { %v4277_v40 = vadd.f32 %v4273_v48, %v8204_v10  ;;  %v4275_v12 = vadd.f32 %v4274_v38, %v4256_v0 }
0x205f   : > { %5492 = vrcp.f32 %v4277_v40  ;;  %v4276_v30 = vadd.f32 %v4275_v12, %v8212_v31 }
0x206c   : > { %v5493_v22 = vpop.eup %5492 }
0x206d   : > { %v4279_v32 = vmul.f32 %v5493_v22, %v4277_v40 }
0x206f   : > { %v4280_v33 = vsub.f32 2.0, %v4279_v32 }
0x2071   : > { %v4281_v15 = vmul.f32 %v5493_v22, %v4280_v33 }
0x2073   : > { %v4282_v34 = vmul.f32 %v4281_v15, %v4276_v30 }
0x2075   : > { %v4286_v17 = vrot.slane %v4282_v34, %v6480_v6 }
0x2077   : > { %4292 = vbcast.lane.b32.xlu1 %v4286_v17, 264  ;;  %4288 = vbcast.lane.b32.xlu0 %v4286_v17, 256 }
0x207b   : > { %4300 = vbcast.lane.b32.xlu1 %v4286_v17, 280  ;;  %4296 = vbcast.lane.b32.xlu0 %v4286_v17, 272 }
0x20e9   : > { %v4293_v2 = vpop.permute.xlu1 %4292  ;;  %v4289_v24 = vpop.permute.xlu0 %4288 }
0x20ea   : > { %v4303_v41 = vmul.f32 %v8141_v45, %v4293_v2  ;;  %v4302_v42 = vmul.f32 %v8144_v23, %v4289_v24 }
0x20ec   : > { %v4307_v49 = vsub.f32 %v4303_v41, %v8147_v8  ;;  %v4306_v51 = vsub.f32 %v4302_v42, %v8150_v7 }
0x20ed   : > { %v4301_v4 = vpop.permute.xlu1 %4300  ;;  %v4297_v58 = vpop.permute.xlu0 %4296 }
0x20ee   : > { %5494 = vtanh.f32 %v4307_v49  ;;  %v4305_v27 = vmul.f32 %v8161_v3, %v4301_v4  ;;  %v4304_v35 = vmul.f32 %v8154_v19, %v4297_v58 }
0x20ef   : > { %5496 = vtanh.f32 %v4306_v51 }
0x20f0   : > { %v4309_v5 = vsub.f32 %v4305_v27, %v8164_v28  ;;  %v4308_v63 = vsub.f32 %v4304_v35, %v8158_v39 }
0x20f2   : > { %5498 = vtanh.f32 %v4309_v5  ;;  %v4348_v5 = vmul.f32 %v8207_v29, %v4282_v34 }
0x20f3   : > { %5500 = vtanh.f32 %v4308_v63 }
0x20fb   : > { %v5495_v50 = vpop.eup %5494 }
0x20fc   : > { %v5497_v26 = vpop.eup %5496  ;;  %v4315_v37 = vmul.f32 %v8173_v13, %v5495_v50  ;;  %v4332_v61 = vmul.f32 %v8167_v16, %v5495_v50 }
0x20fd   : > { %v4314_v52 = vmul.f32 %v8176_v25, %v5497_v26  ;;  %v4331_v20 = vmul.f32 %v8170_v43, %v5497_v26 }
0x20fe   : > { %v4319_v54 = vsel %vm875_vm0, %v4315_v37, 0.0  ;;  %v4336_v57 = vsel %vm875_vm0, %v4332_v61, 0.0 }
0x20ff   : > { %v5499_v60 = vpop.eup %5498  ;;  %v4318_v44 = vsel %vm875_vm0, %v4314_v52, 0.0  ;;  %v4335_v18 = vsel %vm875_vm0, %v4331_v20, 0.0 }
0x2100   : > { %v5501_v36 = vpop.eup %5500  ;;  %v4334_v1 = vmul.f32 %v8196_v56, %v5499_v60  ;;  %v4320_v48 = vadd.f32 %v4319_v54, %v4318_v44  ;;  %v4337_v55 = vadd.f32 %v4336_v57, %v4335_v18  ;;  %v4317_v40 = vmul.f32 %v8193_v62, %v5499_v60 }
0x2101   : > { %v4316_v53 = vmul.f32 %v8182_v11, %v5501_v36  ;;  %v4333_v59 = vmul.f32 %v8185_v9, %v5501_v36 }
0x2102   : > { %v4340_v22 = vsel %vm875_vm0, %v4334_v1, 0.0  ;;  %v4323_v32 = vsel %vm875_vm0, %v4317_v40, 0.0 }
0x2103   : > { %v4321_v47 = vsel %vm875_vm0, %v4316_v53, 0.0  ;;  %v4338_v21 = vsel %vm875_vm0, %v4333_v59, 0.0 }
0x2104   : > { %v4322_v0 = vadd.f32 %v4321_v47, %v4320_v48  ;;  %v4339_v38 = vadd.f32 %v4338_v21, %v4337_v55 }
0x2106   : > { %v4341_v12 = vadd.f32 %v4340_v22, %v4339_v38  ;;  %v4324_v33 = vadd.f32 %v4323_v32, %v4322_v0 }
0x2108   : > { %v4342_v30 = vrot.slane %v4341_v12, 4  ;;  %v4325_v17 = vrot.slane %v4324_v33, 4 }
0x210a   : > { %v4343_v15 = vadd.f32 %v4342_v30, %v4341_v12  ;;  %v4326_v41 = vadd.f32 %v4325_v17, %v4324_v33 }
0x210c   : > { %v4344_v2 = vrot.slane %v4343_v15, 2  ;;  %v4327_v51 = vrot.slane %v4326_v41, 2 }
0x210e   : > { %v4345_v24 = vadd.f32 %v4344_v2, %v4343_v15  ;;  %v4328_v58 = vadd.f32 %v4327_v51, %v4326_v41 }
0x2110   : > { %v4346_v42 = vrot.slane %v4345_v24, 1  ;;  %v4329_v27 = vrot.slane %v4328_v58, 1 }
0x2112   : > { %v4347_v49 = vadd.f32 %v4346_v42, %v4345_v24  ;;  %v4330_v35 = vadd.f32 %v4329_v27, %v4328_v58 }
0x2114   : > { %v4351_v4 = vadd.f32 %v4347_v49, %v8204_v10  ;;  %v4349_v50 = vadd.f32 %v4348_v5, %v4330_v35 }
0x2116   : > { %5502 = vrcp.f32 %v4351_v4  ;;  %v4350_v61 = vadd.f32 %v4349_v50, %v8212_v31 }
0x2123   : > { %v5503_v63 = vpop.eup %5502 }
0x2124   : > { %v4353_v26 = vmul.f32 %v5503_v63, %v4351_v4 }
0x2126   : > { %v4354_v37 = vsub.f32 2.0, %v4353_v26 }
0x2128   : > { %v4355_v52 = vmul.f32 %v5503_v63, %v4354_v37 }
0x212a   : > { %v4356_v20 = vmul.f32 %v4355_v52, %v4350_v61 }
0x212c   : > { %v4360_v60 = vrot.slane %v4356_v20, %v6480_v6 }
0x212e   : > { %4366 = vbcast.lane.b32.xlu1 %v4360_v60, 264  ;;  %4362 = vbcast.lane.b32.xlu0 %v4360_v60, 256 }
0x2132   : > { %4374 = vbcast.lane.b32.xlu1 %v4360_v60, 280  ;;  %4370 = vbcast.lane.b32.xlu0 %v4360_v60, 272 }
0x21a0   : > { %v4367_v54 = vpop.permute.xlu1 %4366  ;;  %v4363_v57 = vpop.permute.xlu0 %4362 }
0x21a1   : > { %v4377_v44 = vmul.f32 %v8141_v45, %v4367_v54  ;;  %v4376_v34 = vmul.f32 %v8144_v23, %v4363_v57 }
0x21a3   : > { %v4381_v18 = vsub.f32 %v4377_v44, %v8147_v8  ;;  %v4380_v36 = vsub.f32 %v4376_v34, %v8150_v7 }
0x21a4   : > { %v4375_v1 = vpop.permute.xlu1 %4374  ;;  %v4371_v53 = vpop.permute.xlu0 %4370 }
0x21a5   : > { %5504 = vtanh.f32 %v4381_v18  ;;  %v4379_v59 = vmul.f32 %v8161_v3, %v4375_v1  ;;  %v4378_v48 = vmul.f32 %v8154_v19, %v4371_v53 }
0x21a6   : > { %5506 = vtanh.f32 %v4380_v36 }
0x21a7   : > { %v4383_v55 = vsub.f32 %v4379_v59, %v8164_v28  ;;  %v4382_v40 = vsub.f32 %v4378_v48, %v8158_v39 }
0x21a9   : > { %5508 = vtanh.f32 %v4383_v55  ;;  %v4422_v55 = vmul.f32 %v8207_v29, %v4356_v20 }
0x21aa   : > { %5510 = vtanh.f32 %v4382_v40 }
0x21b2   : > { %v5505_v47 = vpop.eup %5504 }
0x21b3   : > { %v5507_v21 = vpop.eup %5506  ;;  %v4389_v0 = vmul.f32 %v8173_v13, %v5505_v47  ;;  %v4406_v38 = vmul.f32 %v8167_v16, %v5505_v47 }
0x21b4   : > { %v4388_v22 = vmul.f32 %v8176_v25, %v5507_v21  ;;  %v4405_v12 = vmul.f32 %v8170_v43, %v5507_v21 }
0x21b5   : > { %v4393_v33 = vsel %vm875_vm0, %v4389_v0, 0.0  ;;  %v4410_v30 = vsel %vm875_vm0, %v4406_v38, 0.0 }
0x21b6   : > { %v5509_v32 = vpop.eup %5508  ;;  %v4392_v15 = vsel %vm875_vm0, %v4388_v22, 0.0  ;;  %v4409_v17 = vsel %vm875_vm0, %v4405_v12, 0.0 }
0x21b7   : > { %v5511_v2 = vpop.eup %5510  ;;  %v4408_v24 = vmul.f32 %v8196_v56, %v5509_v32  ;;  %v4394_v49 = vadd.f32 %v4393_v33, %v4392_v15  ;;  %v4411_v51 = vadd.f32 %v4410_v30, %v4409_v17  ;;  %v4391_v4 = vmul.f32 %v8193_v62, %v5509_v32 }
0x21b8   : > { %v4390_v41 = vmul.f32 %v8182_v11, %v5511_v2  ;;  %v4407_v42 = vmul.f32 %v8185_v9, %v5511_v2 }
0x21b9   : > { %v4414_v63 = vsel %vm875_vm0, %v4408_v24, 0.0  ;;  %v4397_v26 = vsel %vm875_vm0, %v4391_v4, 0.0 }
0x21ba   : > { %v4395_v58 = vsel %vm875_vm0, %v4390_v41, 0.0  ;;  %v4412_v27 = vsel %vm875_vm0, %v4407_v42, 0.0 }
0x21bb   : > { %v4396_v35 = vadd.f32 %v4395_v58, %v4394_v49  ;;  %v4413_v5 = vadd.f32 %v4412_v27, %v4411_v51 }
0x21bd   : > { %v4415_v50 = vadd.f32 %v4414_v63, %v4413_v5  ;;  %v4398_v37 = vadd.f32 %v4397_v26, %v4396_v35 }
0x21bf   : > { %v4416_v61 = vrot.slane %v4415_v50, 4  ;;  %v4399_v60 = vrot.slane %v4398_v37, 4 }
0x21c1   : > { %v4417_v52 = vadd.f32 %v4416_v61, %v4415_v50  ;;  %v4400_v44 = vadd.f32 %v4399_v60, %v4398_v37 }
0x21c3   : > { %v4418_v54 = vrot.slane %v4417_v52, 2  ;;  %v4401_v36 = vrot.slane %v4400_v44, 2 }
0x21c5   : > { %v4419_v57 = vadd.f32 %v4418_v54, %v4417_v52  ;;  %v4402_v53 = vadd.f32 %v4401_v36, %v4400_v44 }
0x21c7   : > { %v4420_v34 = vrot.slane %v4419_v57, 1  ;;  %v4403_v59 = vrot.slane %v4402_v53, 1 }
0x21c9   : > { %v4421_v18 = vadd.f32 %v4420_v34, %v4419_v57  ;;  %v4404_v48 = vadd.f32 %v4403_v59, %v4402_v53 }
0x21cb   : > { %v4425_v1 = vadd.f32 %v4421_v18, %v8204_v10  ;;  %v4423_v47 = vadd.f32 %v4422_v55, %v4404_v48 }
0x21cd   : > { %5512 = vrcp.f32 %v4425_v1  ;;  %v4424_v38 = vadd.f32 %v4423_v47, %v8212_v31 }
0x21da   : > { %v5513_v40 = vpop.eup %5512 }
0x21db   : > { %v4427_v21 = vmul.f32 %v5513_v40, %v4425_v1 }
0x21dd   : > { %v4428_v0 = vsub.f32 2.0, %v4427_v21 }
0x21df   : > { %v4429_v22 = vmul.f32 %v5513_v40, %v4428_v0 }
0x21e1   : > { %v4430_v12 = vmul.f32 %v4429_v22, %v4424_v38 }
0x21e3   : > { %v4434_v32 = vrot.slane %v4430_v12, %v6480_v6 }
0x21e5   : > { %4440 = vbcast.lane.b32.xlu1 %v4434_v32, 264  ;;  %4436 = vbcast.lane.b32.xlu0 %v4434_v32, 256 }
0x21e9   : > { %4448 = vbcast.lane.b32.xlu1 %v4434_v32, 280  ;;  %4444 = vbcast.lane.b32.xlu0 %v4434_v32, 272 }
0x2257   : > { %v4441_v33 = vpop.permute.xlu1 %4440  ;;  %v4437_v30 = vpop.permute.xlu0 %4436 }
0x2258   : > { %v4451_v15 = vmul.f32 %v8141_v45, %v4441_v33  ;;  %v4450_v20 = vmul.f32 %v8144_v23, %v4437_v30 }
0x225a   : > { %v4455_v17 = vsub.f32 %v4451_v15, %v8147_v8  ;;  %v4454_v2 = vsub.f32 %v4450_v20, %v8150_v7 }
0x225b   : > { %v4449_v24 = vpop.permute.xlu1 %4448  ;;  %v4445_v41 = vpop.permute.xlu0 %4444 }
0x225c   : > { %5514 = vtanh.f32 %v4455_v17  ;;  %v4453_v42 = vmul.f32 %v8161_v3, %v4449_v24  ;;  %v4452_v49 = vmul.f32 %v8154_v19, %v4445_v41 }
0x225d   : > { %5516 = vtanh.f32 %v4454_v2 }
0x225e   : > { %v4457_v51 = vsub.f32 %v4453_v42, %v8164_v28  ;;  %v4456_v4 = vsub.f32 %v4452_v49, %v8158_v39 }
0x2260   : > { %5518 = vtanh.f32 %v4457_v51  ;;  %v4496_v51 = vmul.f32 %v8207_v29, %v4430_v12 }
0x2261   : > { %5520 = vtanh.f32 %v4456_v4 }
0x2269   : > { %v5515_v58 = vpop.eup %5514 }
0x226a   : > { %v5517_v27 = vpop.eup %5516  ;;  %v4463_v35 = vmul.f32 %v8173_v13, %v5515_v58  ;;  %v4480_v5 = vmul.f32 %v8167_v16, %v5515_v58 }
0x226b   : > { %v4462_v63 = vmul.f32 %v8176_v25, %v5517_v27  ;;  %v4479_v50 = vmul.f32 %v8170_v43, %v5517_v27 }
0x226c   : > { %v4467_v37 = vsel %vm875_vm0, %v4463_v35, 0.0  ;;  %v4484_v61 = vsel %vm875_vm0, %v4480_v5, 0.0 }
0x226d   : > { %v5519_v26 = vpop.eup %5518  ;;  %v4466_v52 = vsel %vm875_vm0, %v4462_v63, 0.0  ;;  %v4483_v60 = vsel %vm875_vm0, %v4479_v50, 0.0 }
0x226e   : > { %v5521_v54 = vpop.eup %5520  ;;  %v4482_v57 = vmul.f32 %v8196_v56, %v5519_v26  ;;  %v4468_v18 = vadd.f32 %v4467_v37, %v4466_v52  ;;  %v4485_v36 = vadd.f32 %v4484_v61, %v4483_v60  ;;  %v4465_v1 = vmul.f32 %v8193_v62, %v5519_v26 }
0x226f   : > { %v4464_v44 = vmul.f32 %v8182_v11, %v5521_v54  ;;  %v4481_v34 = vmul.f32 %v8185_v9, %v5521_v54 }
0x2270   : > { %v4488_v40 = vsel %vm875_vm0, %v4482_v57, 0.0  ;;  %v4471_v21 = vsel %vm875_vm0, %v4465_v1, 0.0 }
0x2271   : > { %v4469_v53 = vsel %vm875_vm0, %v4464_v44, 0.0  ;;  %v4486_v59 = vsel %vm875_vm0, %v4481_v34, 0.0 }
0x2272   : > { %v4470_v48 = vadd.f32 %v4469_v53, %v4468_v18  ;;  %v4487_v55 = vadd.f32 %v4486_v59, %v4485_v36 }
0x2274   : > { %v4489_v47 = vadd.f32 %v4488_v40, %v4487_v55  ;;  %v4472_v0 = vadd.f32 %v4471_v21, %v4470_v48 }
0x2276   : > { %v4490_v38 = vrot.slane %v4489_v47, 4  ;;  %v4473_v32 = vrot.slane %v4472_v0, 4 }
0x2278   : > { %v4491_v22 = vadd.f32 %v4490_v38, %v4489_v47  ;;  %v4474_v15 = vadd.f32 %v4473_v32, %v4472_v0 }
0x227a   : > { %v4492_v33 = vrot.slane %v4491_v22, 2  ;;  %v4475_v2 = vrot.slane %v4474_v15, 2 }
0x227c   : > { %v4493_v30 = vadd.f32 %v4492_v33, %v4491_v22  ;;  %v4476_v41 = vadd.f32 %v4475_v2, %v4474_v15 }
0x227e   : > { %v4494_v20 = vrot.slane %v4493_v30, 1  ;;  %v4477_v42 = vrot.slane %v4476_v41, 1 }
0x2280   : > { %v4495_v17 = vadd.f32 %v4494_v20, %v4493_v30  ;;  %v4478_v49 = vadd.f32 %v4477_v42, %v4476_v41 }
0x2282   : > { %v4499_v24 = vadd.f32 %v4495_v17, %v8204_v10  ;;  %v4497_v58 = vadd.f32 %v4496_v51, %v4478_v49 }
0x2284   : > { %5522 = vrcp.f32 %v4499_v24  ;;  %v4498_v5 = vadd.f32 %v4497_v58, %v8212_v31 }
0x2291   : > { %v5523_v4 = vpop.eup %5522 }
0x2292   : > { %v4501_v27 = vmul.f32 %v5523_v4, %v4499_v24 }
0x2294   : > { %v4502_v35 = vsub.f32 2.0, %v4501_v27 }
0x2296   : > { %v4503_v63 = vmul.f32 %v5523_v4, %v4502_v35 }
0x2298   : > { %v4504_v50 = vmul.f32 %v4503_v63, %v4498_v5 }
0x229a   : > { %v4508_v26 = vrot.slane %v4504_v50, %v6480_v6  ;;  %v4570_v4 = vmul.f32 %v8207_v29, %v4504_v50 }
0x229c   : > { %4514 = vbcast.lane.b32.xlu1 %v4508_v26, 264  ;;  %4510 = vbcast.lane.b32.xlu0 %v4508_v26, 256 }
0x22a0   : > { %4522 = vbcast.lane.b32.xlu1 %v4508_v26, 280  ;;  %4518 = vbcast.lane.b32.xlu0 %v4508_v26, 272 }
0x230e   : > { %v4515_v37 = vpop.permute.xlu1 %4514  ;;  %v4511_v61 = vpop.permute.xlu0 %4510 }
0x230f   : > { %v4525_v52 = vmul.f32 %v8141_v45, %v4515_v37  ;;  %v4524_v12 = vmul.f32 %v8144_v23, %v4511_v61 }
0x2311   : > { %v4529_v60 = vsub.f32 %v4525_v52, %v8147_v8  ;;  %v4528_v54 = vsub.f32 %v4524_v12, %v8150_v7 }
0x2312   : > { %v4523_v57 = vpop.permute.xlu1 %4522  ;;  %v4519_v44 = vpop.permute.xlu0 %4518 }
0x2313   : > { %5524 = vtanh.f32 %v4529_v60  ;;  %v4527_v34 = vmul.f32 %v8161_v3, %v4523_v57  ;;  %v4526_v6 = vmul.f32 %v8154_v19, %v4519_v44 }
0x2314   : > { %5526 = vtanh.f32 %v4528_v54 }
0x2315   : > { %v4531_v18 = vsub.f32 %v4527_v34, %v8164_v28  ;;  %v4530_v36 = vsub.f32 %v4526_v6, %v8158_v39 }
0x2317   : > { %5528 = vtanh.f32 %v4531_v18 }
0x2318   : > { %5530 = vtanh.f32 %v4530_v36 }
0x2320   : > { %v5525_v45 = vpop.eup %5524 }
0x2321   : > { %v5527_v23 = vpop.eup %5526  ;;  %v4537_v8 = vmul.f32 %v8173_v13, %v5525_v45  ;;  %v4554_v7 = vmul.f32 %v8167_v16, %v5525_v45 }
0x2322   : > { %v4536_v1 = vmul.f32 %v8176_v25, %v5527_v23  ;;  %v4553_v53 = vmul.f32 %v8170_v43, %v5527_v23 }
0x2323   : > { %v4541_v19 = vsel %vm875_vm0, %v4537_v8, 0.0  ;;  %v4558_v59 = vsel %vm875_vm0, %v4554_v7, 0.0 }
0x2324   : > { %v5529_v3 = vpop.eup %5528  ;;  %v4540_v28 = vsel %vm875_vm0, %v4536_v1, 0.0  ;;  %v4557_v39 = vsel %vm875_vm0, %v4553_v53, 0.0 }
0x2325   : > { %v5531_v48 = vpop.eup %5530  ;;  %v4556_v55 = vmul.f32 %v8196_v56, %v5529_v3  ;;  %v4542_v40 = vadd.f32 %v4541_v19, %v4540_v28  ;;  %v4559_v25 = vadd.f32 %v4558_v59, %v4557_v39  ;;  %v4539_v43 = vmul.f32 %v8193_v62, %v5529_v3 }
0x2326   : > { %v4538_v13 = vmul.f32 %v8182_v11, %v5531_v48  ;;  %v4555_v16 = vmul.f32 %v8185_v9, %v5531_v48 }
0x2327   : > { %v4562_v22 = vsel %vm875_vm0, %v4556_v55, 0.0  ;;  %v4545_v33 = vsel %vm875_vm0, %v4539_v43, 0.0 }
0x2328   : > { %v4543_v47 = vsel %vm875_vm0, %v4538_v13, 0.0  ;;  %v4560_v21 = vsel %vm875_vm0, %v4555_v16, 0.0 }
0x2329   : > { %v4544_v0 = vadd.f32 %v4543_v47, %v4542_v40  ;;  %v4561_v38 = vadd.f32 %v4560_v21, %v4559_v25 }
0x232b   : > { %v4563_v32 = vadd.f32 %v4562_v22, %v4561_v38  ;;  %v4546_v56 = vadd.f32 %v4545_v33, %v4544_v0 }
0x232d   : > { %v4564_v30 = vrot.slane %v4563_v32, 4  ;;  %v4547_v15 = vrot.slane %v4546_v56, 4 }
0x232f   : > { %v4565_v11 = vadd.f32 %v4564_v30, %v4563_v32  ;;  %v4548_v62 = vadd.f32 %v4547_v15, %v4546_v56 }
0x2331   : > { %v4566_v9 = vrot.slane %v4565_v11, 2  ;;  %v4549_v24 = vrot.slane %v4548_v62, 2 }
0x2333   : > { %v4567_v20 = vadd.f32 %v4566_v9, %v4565_v11  ;;  %v4550_v42 = vadd.f32 %v4549_v24, %v4548_v62 }
0x2335   : > { %v4568_v17 = vrot.slane %v4567_v20, 1  ;;  %v4551_v49 = vrot.slane %v4550_v42, 1 }
0x2337   : > { %v4569_v2 = vadd.f32 %v4568_v17, %v4567_v20  ;;  %v4552_v51 = vadd.f32 %v4551_v49, %v4550_v42 }
0x2339   : > { %v4573_v41 = vadd.f32 %v4569_v2, %v8204_v10  ;;  %v4571_v27 = vadd.f32 %v4570_v4, %v4552_v51 }
0x233b   : > { %5532 = vrcp.f32 %v4573_v41  ;;  %v4572_v63 = vadd.f32 %v4571_v27, %v8212_v31 }
0x2348   : > { %v5533_v58 = vpop.eup %5532 }
0x2349   : > { %v4575_v35 = vmul.f32 %v5533_v58, %v4573_v41 }
0x234b   : > { %v4576_v5 = vsub.f32 2.0, %v4575_v35 }
0x234d   : > { %v4577_v26 = vmul.f32 %v5533_v58, %v4576_v5 }
0x234f   : > { %v4578_v10 = vmul.f32 %v4577_v26, %v4572_v63 }
0x2351   : > { %v4579_v29 = vmul.f32 %v8131_v14, %v4578_v10  ;;  %4583 = vst.msk [vmem:[%s740_s29] sm:$0x1] %vm4582_vm2, %v4578_v10 }
0x2352   : > { %6039 = shalt.err (!%p6036_p10)
}
0x2353   : > { %s6040_s16 = scalar_lea.hbm %s8360_s11, 16  ;;  %s6044_s22 = scalar_lea.hbm %s8480_s18, 32 }
0x2354   : > { %p6041_p11 = scmp.ne.s32.totalorder %s8360_s11, %s6040_s16  ;;  %p6045_p3 = scmp.lt.s32.totalorder %s8360_s11, %s8480_s18 }
0x2355   : > { %p6046_p7 = scmp.lt.s32.totalorder %s6044_s22, %s6040_s16 }
0x2356   : > { %p6042_p0 = pnand %p6041_p11, %p8481_p12 }
0x2357   : > { %p6047_p9 = por %p6046_p7, %p6045_p3 }
0x2358   : > { %p6043_p1 = pneg %p6042_p0 }
0x235a   : > { %p6048_p6 = pnand %p6047_p9, %p6043_p1 }
0x235c   : > { %6051 = shalt.err (!%p6048_p6)
}
0x235d   : > { %4913 = dma.vmem_to_hbm [thread:$0]  (%p8481_p12), %s4605_s6, 16, %s8360_s11, %s4589_s7   ;;  %v4580_v14 = vadd.f32 %v8135_v46, %v4579_v29 }
0x235f   : > { %4581 = vst.msk [vmem:[%s6733_s2 + $0x7] sm:$0x1] %vm1451_vm1, %v4580_v14 }
0x2360 PF: > { %s4623_s20 = sand.u32 1, %s6106_s24   ;;  %p8482_p13 = scmp.ne.s32.totalorder %s8460_s28, 0 }
0x2361   : > { %p8483_p4 = scmp.ge.s32.totalorder %s6118_s27, 2  ;;  %s4624_s10 = scalar_lea.sflag [#allocation4], %s4623_s20 }
0x2363   : > { %p4960_p2 = pnand %p8483_p4, %p8482_p13 }
0x2365   : > { %p4961_p5 = pneg %p4960_p2 }
0x2367   : > { %6101 = dma.done.wait (%p4961_p5), %s4624_s10, 16  }
0x2368   : > { %6103 = vsyncadd (%p4961_p5), %s4624_s10, 4294967280  ;;  %p38_p12 = scmp.ge.s32.totalorder %s6384_s21, 4   ;;  %s8484_s24 = smov %s6110_s25 }
0x2369   : > { %s8485_s25 = smov %s6114_s26  ;;  %s8486_s26 = smov %s6396_s5 }
0x236a   : > { %s8487_s27 = smov %s6384_s21  ;;  %40 = sbr.rel (!%p38_p12) target bundleno = 26 (0x1a), region = 193 }
0x236f   :  { %4628 = vsyncpa [#allocation3], 1 }
0x2370   :  { %4630 = vsyncpa [#allocation3 + $0x1], 1 }
0x2371   :  { %4631 = vsyncpa [#allocation6], 1 }
0x2372   :  { %4632 = vsyncpa [#allocation9], 1 }
0x2373   :  { %4633 = vsyncpa [#allocation12], 1 }
0x2374   :  { %4634 = vsyncpa [#allocation15], 1 }
0x2375   :  { %4635 = vsyncpa [#allocation18], 1 }
0x2376   :  { %4636 = vsyncpa [#allocation21], 1 }
0x2377   :  { %4637 = vsyncpa [#allocation24], 1 }
0x2378   :  { %4638 = vsyncpa [#allocation4], 1 }
0x2379   :  { %4640 = vsyncpa [#allocation4 + $0x1], 1 }

</bundles_post_ra>
